<compile_context>
chip_gen: v6e
topology: v6e:2x2x1
jax: 0.10.0
libtpu: 0.0.40
codegen_flags: <defaults>
</compile_context>

<pallas_src>
import functools

import jax
import jax.numpy as jnp
from jax.experimental import pallas as pl
from jax.experimental.pallas import tpu as pltpu

_PAD_OFF = 16        # bf16-sublane-aligned column offset of the activation
                     # inside the zero-padded VMEM scratch
_PARALLEL = pltpu.CompilerParams(dimension_semantics=("parallel",))


def _pad_width(W):
    return _PAD_OFF + W + 8


def _pick_img(B):
    # Batch images per grid step, but keep >= 2 steps (v7x megacore balance).
    for img in (4, 2, 1):
        if B % img == 0 and B // img >= 2:
            return img
    return 1


# ----------------------------- Pallas kernels ------------------------------

def _stem_kernel(pe_ref, po_ref, w_ref, o_ref, sum_ref, sq_ref, *,
                 IMG, OH, OW, K, Cout):
    # resnet18 conv1 (7x7 / s2 / p3).  pe/po hold width-only "row patches"
    # (K = kw*Cin = 21) split into even/odd padded-row phases so every kh tap
    # is a unit-stride row window.  7 tap matmuls, value-chained accumulation
    # (no VMEM accumulator RMW); BN batch stats from the f32 accumulator.
    s_acc = jnp.zeros((1, Cout), jnp.float32)
    q_acc = jnp.zeros((1, Cout), jnp.float32)
    for img in range(IMG):
        acc = jnp.zeros((OH * OW, Cout), jnp.float32)
        for di in range(7):
            src = pe_ref if di % 2 == 0 else po_ref
            off = di // 2
            xs = src[img, off:off + OH, :, :].reshape(OH * OW, K)
            acc = acc + jnp.dot(xs, w_ref[di],
                                preferred_element_type=jnp.float32)
        o_ref[img] = acc.reshape(OH, OW, Cout).astype(o_ref.dtype)
        s_acc = s_acc + jnp.sum(acc, axis=0, keepdims=True)
        q_acc = q_acc + jnp.sum(acc * acc, axis=0, keepdims=True)
    sum_ref[...] = s_acc.reshape(1, 1, Cout)
    sq_ref[...] = q_acc.reshape(1, 1, Cout)


def _conv3x3_kernel(*refs, IMG, H, W, Cin, Cout, mode):
    # 3x3 / s1 / p1 conv for IMG images.  mode 0: plain; mode 1: fused
    # BN+ReLU prologue; mode 2: fused BN+residual+ReLU prologue that also
    # emits the prologue result (block residual) as an extra output.
    # Builds a bf16 im2col patch in VMEM and does ONE wide-K MXU matmul.
    if mode == 0:
        x_ref, w_ref, o_ref, sum_ref, sq_ref, pad_ref, patch_ref = refs
    elif mode == 1:
        (x_ref, s_ref, b_ref, w_ref, o_ref, sum_ref, sq_ref,
         pad_ref, patch_ref) = refs
    else:
        (x_ref, r_ref, s_ref, b_ref, w_ref, o_ref, y_ref, sum_ref, sq_ref,
         pad_ref, patch_ref) = refs

    Wp = _pad_width(W)
    HW = H * W
    # Zero once per step; the interior is overwritten per image, the border
    # ring (only thing the taps read outside the interior) stays zero.
    pad_ref[...] = jnp.zeros((H + 2, Wp, Cin), jnp.bfloat16)

    for img in range(IMG):
        if mode == 0:
            xb = x_ref[img].astype(jnp.bfloat16)
        else:
            x = x_ref[img].astype(jnp.float32) * s_ref[...] + b_ref[...]
            if mode == 2:
                x = x + r_ref[img].astype(jnp.float32)
            xb = jnp.maximum(x, 0.0).astype(jnp.bfloat16)
            if mode == 2:
                y_ref[img] = xb                      # block residual output
        pad_ref[1:H + 1, _PAD_OFF:_PAD_OFF + W, :] = xb
        for di in range(3):
            for dj in range(3):
                tap = di * 3 + dj
                c0 = _PAD_OFF - 1 + dj
                patch_ref[img * HW:(img + 1) * HW,
                          tap * Cin:(tap + 1) * Cin] = (
                    pad_ref[di:di + H, c0:c0 + W, :].reshape(HW, Cin))

    acc = jnp.dot(patch_ref[...], w_ref[...],
                  preferred_element_type=jnp.float32)     # (IMG*H*W, Cout)
    o_ref[...] = acc.reshape(IMG, H, W, Cout).astype(o_ref.dtype)
    sum_ref[...] = jnp.sum(acc, axis=0, keepdims=True).reshape(1, 1, Cout)
    sq_ref[...] = jnp.sum(acc * acc, axis=0, keepdims=True).reshape(1, 1, Cout)


def _pool_kernel(x_ref, s_ref, b_ref, o_ref, pad_ref, *, IMG, H, W, C):
    # Fused BN+ReLU prologue + MaxPool2d(3, stride=2, padding=1), with the
    # stride-2 subsample done in-kernel via strided reads (so only the
    # quarter-size activation is written to HBM).  Zero padding == PyTorch's
    # -inf padding because the prologue ends in ReLU (values >= 0).
    OH, OW = H // 2, W // 2
    Wp = _pad_width(W)
    # Only the top border row and the left border column are ever read.
    pad_ref[0:1, :, :] = jnp.zeros((1, Wp, C), jnp.float32)
    pad_ref[:, _PAD_OFF - 1:_PAD_OFF, :] = jnp.zeros((H + 2, 1, C),
                                                     jnp.float32)
    for img in range(IMG):
        y = jnp.maximum(
            x_ref[img].astype(jnp.float32) * s_ref[...] + b_ref[...], 0.0)
        pad_ref[1:H + 1, _PAD_OFF:_PAD_OFF + W, :] = y
        m = None
        for di in range(3):
            for dj in range(3):
                t = pad_ref[pl.ds(di, OH, stride=2),
                            pl.ds(_PAD_OFF - 1 + dj, OW, stride=2), :]
                m = t if m is None else jnp.maximum(m, t)
        o_ref[img] = m.astype(o_ref.dtype)


def _final_kernel(x_ref, r_ref, s_ref, b_ref, w_ref, o_ref):
    # block-2 tail fused with conv2 (1x1, 64 -> 1, no bias): relu(bn(x)+res)
    # followed by a VPU multiply with the broadcast weight row + lane sum.
    t = jnp.maximum(
        x_ref[...].astype(jnp.float32) * s_ref[...] + b_ref[...]
        + r_ref[...].astype(jnp.float32), 0.0)
    o_ref[...] = jnp.sum(t * w_ref[...], axis=-1)


# ----------------------------- Pallas wrappers -----------------------------

def stem_conv(pe, po, w_stem, OH, OW, img):
    B, He, _, K = pe.shape
    Ho = po.shape[1]
    Cout = w_stem.shape[-1]
    steps = B // img
    kernel = functools.partial(_stem_kernel, IMG=img, OH=OH, OW=OW, K=K,
                               Cout=Cout)
    return pl.pallas_call(
        kernel,
        out_shape=(jax.ShapeDtypeStruct((B, OH, OW, Cout), jnp.bfloat16),
                   jax.ShapeDtypeStruct((steps, 1, Cout), jnp.float32),
                   jax.ShapeDtypeStruct((steps, 1, Cout), jnp.float32)),
        grid_spec=pltpu.PrefetchScalarGridSpec(
            num_scalar_prefetch=0, grid=(steps,),
            in_specs=[pl.BlockSpec((img, He, OW, K), lambda b: (b, 0, 0, 0)),
                      pl.BlockSpec((img, Ho, OW, K), lambda b: (b, 0, 0, 0)),
                      pl.BlockSpec((7, K, Cout), lambda b: (0, 0, 0))],
            out_specs=(pl.BlockSpec((img, OH, OW, Cout),
                                    lambda b: (b, 0, 0, 0)),
                       pl.BlockSpec((1, 1, Cout), lambda b: (b, 0, 0)),
                       pl.BlockSpec((1, 1, Cout), lambda b: (b, 0, 0)))),
        compiler_params=_PARALLEL,
    )(pe, po, w_stem)


def conv3x3_bn_stats(x, w9, img, scale=None, bias=None, residual=None):
    B, H, W, Cin = x.shape
    Cout = w9.shape[-1]
    steps = B // img
    mode = 0 if scale is None else (2 if residual is not None else 1)
    kernel = functools.partial(_conv3x3_kernel, IMG=img, H=H, W=W,
                               Cin=Cin, Cout=Cout, mode=mode)

    args = [x]
    in_specs = [pl.BlockSpec((img, H, W, Cin), lambda b: (b, 0, 0, 0))]
    if mode == 2:
        args.append(residual)
        in_specs.append(pl.BlockSpec((img, H, W, Cin), lambda b: (b, 0, 0, 0)))
    if mode >= 1:
        args += [scale.reshape(1, Cin).astype(jnp.float32),
                 bias.reshape(1, Cin).astype(jnp.float32)]
        in_specs += [pl.BlockSpec((1, Cin), lambda b: (0, 0)),
                     pl.BlockSpec((1, Cin), lambda b: (0, 0))]
    args.append(w9)
    in_specs.append(pl.BlockSpec((9 * Cin, Cout), lambda b: (0, 0)))

    out_shape = [jax.ShapeDtypeStruct((B, H, W, Cout), jnp.bfloat16)]
    out_specs = [pl.BlockSpec((img, H, W, Cout), lambda b: (b, 0, 0, 0))]
    if mode == 2:
        out_shape.append(jax.ShapeDtypeStruct((B, H, W, Cin), jnp.bfloat16))
        out_specs.append(pl.BlockSpec((img, H, W, Cin),
                                      lambda b: (b, 0, 0, 0)))
    out_shape += [jax.ShapeDtypeStruct((steps, 1, Cout), jnp.float32)] * 2
    out_specs += [pl.BlockSpec((1, 1, Cout), lambda b: (b, 0, 0))] * 2

    return pl.pallas_call(
        kernel,
        out_shape=tuple(out_shape),
        grid_spec=pltpu.PrefetchScalarGridSpec(
            num_scalar_prefetch=0, grid=(steps,),
            in_specs=in_specs,
            out_specs=tuple(out_specs),
            scratch_shapes=[
                pltpu.VMEM((H + 2, _pad_width(W), Cin), jnp.bfloat16),
                pltpu.VMEM((img * H * W, 9 * Cin), jnp.bfloat16)]),
        compiler_params=_PARALLEL,
    )(*args)


def maxpool_bn_relu(x, scale, bias, img):
    B, H, W, C = x.shape
    OH, OW = H // 2, W // 2
    steps = B // img
    kernel = functools.partial(_pool_kernel, IMG=img, H=H, W=W, C=C)
    return pl.pallas_call(
        kernel,
        out_shape=jax.ShapeDtypeStruct((B, OH, OW, C), jnp.bfloat16),
        grid_spec=pltpu.PrefetchScalarGridSpec(
            num_scalar_prefetch=0, grid=(steps,),
            in_specs=[pl.BlockSpec((img, H, W, C), lambda b: (b, 0, 0, 0)),
                      pl.BlockSpec((1, C), lambda b: (0, 0)),
                      pl.BlockSpec((1, C), lambda b: (0, 0))],
            out_specs=pl.BlockSpec((img, OH, OW, C), lambda b: (b, 0, 0, 0)),
            scratch_shapes=[
                pltpu.VMEM((H + 2, _pad_width(W), C), jnp.float32)]),
        compiler_params=_PARALLEL,
    )(x, scale.reshape(1, C), bias.reshape(1, C))


def block_tail_conv1x1(x, res, scale, bias, w1x1, img):
    B, H, W, C = x.shape
    steps = B // img
    return pl.pallas_call(
        _final_kernel,
        out_shape=jax.ShapeDtypeStruct((B, H, W), jnp.float32),
        grid_spec=pltpu.PrefetchScalarGridSpec(
            num_scalar_prefetch=0, grid=(steps,),
            in_specs=[pl.BlockSpec((img, H, W, C), lambda b: (b, 0, 0, 0)),
                      pl.BlockSpec((img, H, W, C), lambda b: (b, 0, 0, 0)),
                      pl.BlockSpec((1, C), lambda b: (0, 0)),
                      pl.BlockSpec((1, C), lambda b: (0, 0)),
                      pl.BlockSpec((1, C), lambda b: (0, 0))],
            out_specs=pl.BlockSpec((img, H, W), lambda b: (b, 0, 0))),
        compiler_params=_PARALLEL,
    )(x, res, scale.reshape(1, C), bias.reshape(1, C),
      w1x1.astype(jnp.float32))


# ------------------------------- glue (JAX) --------------------------------

def bn_scale_bias(psum, psq, count, gamma, beta, eps=1e-5):
    # Training-mode BatchNorm2d: batch mean / biased variance folded into a
    # per-channel scale + bias, applied inside the fused Pallas prologues.
    s = jnp.sum(psum, axis=(0, 1))
    q = jnp.sum(psq, axis=(0, 1))
    mean = s / count
    var = jnp.maximum(q / count - mean * mean, 0.0)
    scale = gamma / jnp.sqrt(var + eps)
    bias = beta - mean * scale
    return scale.astype(jnp.float32), bias.astype(jnp.float32)


def taps9(w_oihw):
    # PyTorch (O, I, 3, 3) -> (9*I, O), row index = (di*3 + dj)*I + ci,
    # matching the in-kernel im2col patch layout.  bf16 for the MXU.
    o, i = w_oihw.shape[0], w_oihw.shape[1]
    return (jnp.transpose(w_oihw, (2, 3, 1, 0))
            .reshape(9 * i, o).astype(jnp.bfloat16))


def adaptive_max_pool_2d(x, g):
    # AdaptiveMaxPool2d((g, g)) on a tiny (B, H, W) 1-channel map: plain JAX.
    B, Hc, Wc = x.shape
    rows = []
    for i in range(g):
        hs, he = (i * Hc) // g, -(-((i + 1) * Hc) // g)
        cols = []
        for j in range(g):
            ws, we = (j * Wc) // g, -(-((j + 1) * Wc) // g)
            cols.append(jnp.max(x[:, hs:he, ws:we], axis=(1, 2)))
        rows.append(jnp.stack(cols, axis=-1))
    return jnp.stack(rows, axis=1)          # (B, g, g)


# ------------------------------ model pieces -------------------------------

def init_params(key):
    ks = jax.random.split(key, 11)

    def conv_w(k, o, i, kh, kw):
        fan_in = i * kh * kw
        return (jax.random.normal(k, (o, i, kh, kw), jnp.float32)
                * (2.0 / fan_in) ** 0.5)

    def bn_p(k, c):
        k1, k2 = jax.random.split(k)
        gamma = 1.0 + 0.1 * jax.random.normal(k1, (c,), jnp.float32)
        beta = 0.1 * jax.random.normal(k2, (c,), jnp.float32)
        return gamma, beta

    return {
        "conv1_w": conv_w(ks[0], 64, 3, 7, 7),      # resnet18.conv1
        "bn1": bn_p(ks[1], 64),                     # resnet18.bn1
        "b1_conv1_w": conv_w(ks[2], 64, 64, 3, 3),  # layer1.0
        "b1_bn1": bn_p(ks[3], 64),
        "b1_conv2_w": conv_w(ks[4], 64, 64, 3, 3),
        "b1_bn2": bn_p(ks[5], 64),
        "b2_conv1_w": conv_w(ks[6], 64, 64, 3, 3),  # layer1.1
        "b2_bn1": bn_p(ks[7], 64),
        "b2_conv2_w": conv_w(ks[8], 64, 64, 3, 3),
        "b2_bn2": bn_p(ks[9], 64),
        "conv2_w": conv_w(ks[10], 1, 64, 1, 1),     # Conv2d(64,1,1x1,pad=1)
    }


def forward(params, d_nchw, grid_size):
    # d_nchw: (B, 3, H, W) float32, PyTorch NCHW convention.
    x = jnp.transpose(d_nchw, (0, 2, 3, 1)).astype(jnp.float32)   # NHWC
    B, H, W, _ = x.shape
    assert H % 4 == 0 and W % 4 == 0, "spatial dims must be multiples of 4"
    img = _pick_img(B)
    OH1, OW1 = H // 2, W // 2

    # --- conv1 (7x7 / s2 / p3): width-only row patches (K = kw*Cin = 21),
    #     split into even/odd padded-row phases (no full HBM im2col) ----------
    xp = jnp.pad(x, ((0, 0), (3, 3), (3, 3), (0, 0)))
    pw = jnp.concatenate(
        [xp[:, :, dj:dj + 2 * OW1:2, :] for dj in range(7)], axis=-1)
    pe = pw[:, 0::2].astype(jnp.bfloat16)
    po = pw[:, 1::2].astype(jnp.bfloat16)
    w_stem = (jnp.transpose(params["conv1_w"], (2, 3, 1, 0))
              .reshape(7, 21, 64).astype(jnp.bfloat16))
    h1, s1, q1 = stem_conv(pe, po, w_stem, OH1, OW1, img)
    sc1, bi1 = bn_scale_bias(s1, q1, B * OH1 * OW1, *params["bn1"])

    # --- bn1 + relu + maxpool(3,2,1), subsample in-kernel --------------------
    p1 = maxpool_bn_relu(h1, sc1, bi1, img)
    H2, W2 = OH1 // 2, OW1 // 2
    n2 = B * H2 * W2

    # --- layer1.0 (BasicBlock) ------------------------------------------------
    hA, sA, qA = conv3x3_bn_stats(p1, taps9(params["b1_conv1_w"]), img)
    scA, biA = bn_scale_bias(sA, qA, n2, *params["b1_bn1"])
    hB, sB, qB = conv3x3_bn_stats(hA, taps9(params["b1_conv2_w"]), img,
                                  scale=scA, bias=biA)
    scB, biB = bn_scale_bias(sB, qB, n2, *params["b1_bn2"])

    # --- layer1.1 (BasicBlock); block-1 tail fused into its first conv -------
    hA2, o1, sA2, qA2 = conv3x3_bn_stats(hB, taps9(params["b2_conv1_w"]), img,
                                         scale=scB, bias=biB, residual=p1)
    scA2, biA2 = bn_scale_bias(sA2, qA2, n2, *params["b2_bn1"])
    hB2, sB2, qB2 = conv3x3_bn_stats(hA2, taps9(params["b2_conv2_w"]), img,
                                     scale=scA2, bias=biA2)
    scB2, biB2 = bn_scale_bias(sB2, qB2, n2, *params["b2_bn2"])

    # --- block-2 tail + conv2 (1x1, 64->1, bias-free), fused ------------------
    ymap = block_tail_conv1x1(hB2, o1, scB2, biB2,
                              params["conv2_w"].reshape(1, 64), img)
    # conv2 has padding=1: with no bias its output is ymap with a zero ring.
    ymap = jnp.pad(ymap, ((0, 0), (1, 1), (1, 1)))
    pooled = adaptive_max_pool_2d(ymap, grid_size)                # (B, g, g)
    return pooled.reshape(B, grid_size * grid_size)
    # TODO(synk): shortest_path_solver (Gurobi MILP) is constructed in
    # __init__ but never invoked in forward(); intentionally not implemented.


if __name__ == "__main__":
    key = jax.random.PRNGKey(0)
    pkey, dkey = jax.random.split(key)
    params = init_params(pkey)
    grid_size = 5
    d = jax.random.normal(dkey, (2, 3, 32, 32), jnp.float32)  # NCHW input
    fwd = jax.jit(functools.partial(forward, grid_size=grid_size))
    out = fwd(params, d)
    jax.block_until_ready(out)
    assert out.shape == (2, grid_size * grid_size)
    assert bool(jnp.all(jnp.isfinite(out)))
    print("KERNEL_OK")
</pallas_src>

<mosaic_0001>
module attributes {stable_mosaic.version = 11 : i64} {
  func.func @_stem_kernel(%arg0: i32, %arg1: memref<1x19x16x21xbf16, #tpu.memory_space<vmem>>, %arg2: memref<1x19x16x21xbf16, #tpu.memory_space<vmem>>, %arg3: memref<7x21x64xbf16, #tpu.memory_space<vmem>>, %arg4: memref<1x16x16x64xbf16, #tpu.memory_space<vmem>>, %arg5: memref<1x1x64xf32, #tpu.memory_space<vmem>>, %arg6: memref<1x1x64xf32, #tpu.memory_space<vmem>>) attributes {dimension_semantics = [#tpu.dimension_semantics<parallel>], iteration_bounds = array<i64: 2>, scalar_prefetch = 0 : i64, scratch_operands = 0 : i64, tpu.core_type = #tpu.core_type<tc>, window_params = [{transform_indices = @transform_0, window_bounds = array<i64: 1, 19, 16, 21>}, {transform_indices = @transform_1, window_bounds = array<i64: 1, 19, 16, 21>}, {pipeline_mode = #tpu.pipeline_mode<synchronous>, transform_indices = @transform_2, window_bounds = array<i64: 7, 21, 64>}, {transform_indices = @transform_3, window_bounds = array<i64: 1, 16, 16, 64>}, {transform_indices = @transform_4, window_bounds = array<i64: 1, 1, 64>}, {transform_indices = @transform_5, window_bounds = array<i64: 1, 1, 64>}]} {
    %cst = arith.constant 0.000000e+00 : f32
    %0 = vector.broadcast %cst : f32 to vector<1x64xf32>
    %cst_0 = arith.constant 0.000000e+00 : f32
    %1 = vector.broadcast %cst_0 : f32 to vector<1x64xf32>
    %cst_1 = arith.constant 0.000000e+00 : f32
    %2 = vector.broadcast %cst_1 : f32 to vector<256x64xf32>
    %c0 = arith.constant 0 : index
    %c0_2 = arith.constant 0 : index
    %c0_3 = arith.constant 0 : index
    %c0_4 = arith.constant 0 : index
    %3 = vector.load %arg1[%c0, %c0_2, %c0_3, %c0_4] : memref<1x19x16x21xbf16, #tpu.memory_space<vmem>>, vector<1x16x16x21xbf16>
    %4 = vector.shape_cast %3 : vector<1x16x16x21xbf16> to vector<16x16x21xbf16>
    %5 = vector.shape_cast %4 : vector<16x16x21xbf16> to vector<256x21xbf16>
    %c0_5 = arith.constant 0 : index
    %c0_6 = arith.constant 0 : index
    %c0_7 = arith.constant 0 : index
    %6 = vector.load %arg3[%c0_5, %c0_6, %c0_7] : memref<7x21x64xbf16, #tpu.memory_space<vmem>>, vector<1x21x64xbf16>
    %7 = vector.shape_cast %6 : vector<1x21x64xbf16> to vector<21x64xbf16>
    %cst_8 = arith.constant dense<0.000000e+00> : vector<256x64xf32>
    %8 = tpu.matmul %5, %7, %cst_8 {dimension_numbers = #tpu.dot_dimension_numbers<[1], [0], [0], [1], [0, 0, 1, 1], [], []>} : vector<256x21xbf16>, vector<21x64xbf16>, vector<256x64xf32> -> vector<256x64xf32>
    %9 = arith.addf %2, %8 : vector<256x64xf32>
    %c0_9 = arith.constant 0 : index
    %c0_10 = arith.constant 0 : index
    %c0_11 = arith.constant 0 : index
    %c0_12 = arith.constant 0 : index
    %10 = vector.load %arg2[%c0_9, %c0_10, %c0_11, %c0_12] : memref<1x19x16x21xbf16, #tpu.memory_space<vmem>>, vector<1x16x16x21xbf16>
    %11 = vector.shape_cast %10 : vector<1x16x16x21xbf16> to vector<16x16x21xbf16>
    %12 = vector.shape_cast %11 : vector<16x16x21xbf16> to vector<256x21xbf16>
    %c1 = arith.constant 1 : index
    %c0_13 = arith.constant 0 : index
    %c0_14 = arith.constant 0 : index
    %13 = vector.load %arg3[%c1, %c0_13, %c0_14] : memref<7x21x64xbf16, #tpu.memory_space<vmem>>, vector<1x21x64xbf16>
    %14 = vector.shape_cast %13 : vector<1x21x64xbf16> to vector<21x64xbf16>
    %cst_15 = arith.constant dense<0.000000e+00> : vector<256x64xf32>
    %15 = tpu.matmul %12, %14, %cst_15 {dimension_numbers = #tpu.dot_dimension_numbers<[1], [0], [0], [1], [0, 0, 1, 1], [], []>} : vector<256x21xbf16>, vector<21x64xbf16>, vector<256x64xf32> -> vector<256x64xf32>
    %16 = arith.addf %9, %15 : vector<256x64xf32>
    %c0_16 = arith.constant 0 : index
    %c1_17 = arith.constant 1 : index
    %c0_18 = arith.constant 0 : index
    %c0_19 = arith.constant 0 : index
    %17 = vector.load %arg1[%c0_16, %c1_17, %c0_18, %c0_19] : memref<1x19x16x21xbf16, #tpu.memory_space<vmem>>, vector<1x16x16x21xbf16>
    %18 = vector.shape_cast %17 : vector<1x16x16x21xbf16> to vector<16x16x21xbf16>
    %19 = vector.shape_cast %18 : vector<16x16x21xbf16> to vector<256x21xbf16>
    %c2 = arith.constant 2 : index
    %c0_20 = arith.constant 0 : index
    %c0_21 = arith.constant 0 : index
    %20 = vector.load %arg3[%c2, %c0_20, %c0_21] : memref<7x21x64xbf16, #tpu.memory_space<vmem>>, vector<1x21x64xbf16>
    %21 = vector.shape_cast %20 : vector<1x21x64xbf16> to vector<21x64xbf16>
    %cst_22 = arith.constant dense<0.000000e+00> : vector<256x64xf32>
    %22 = tpu.matmul %19, %21, %cst_22 {dimension_numbers = #tpu.dot_dimension_numbers<[1], [0], [0], [1], [0, 0, 1, 1], [], []>} : vector<256x21xbf16>, vector<21x64xbf16>, vector<256x64xf32> -> vector<256x64xf32>
    %23 = arith.addf %16, %22 : vector<256x64xf32>
    %c0_23 = arith.constant 0 : index
    %c1_24 = arith.constant 1 : index
    %c0_25 = arith.constant 0 : index
    %c0_26 = arith.constant 0 : index
    %24 = vector.load %arg2[%c0_23, %c1_24, %c0_25, %c0_26] : memref<1x19x16x21xbf16, #tpu.memory_space<vmem>>, vector<1x16x16x21xbf16>
    %25 = vector.shape_cast %24 : vector<1x16x16x21xbf16> to vector<16x16x21xbf16>
    %26 = vector.shape_cast %25 : vector<16x16x21xbf16> to vector<256x21xbf16>
    %c3 = arith.constant 3 : index
    %c0_27 = arith.constant 0 : index
    %c0_28 = arith.constant 0 : index
    %27 = vector.load %arg3[%c3, %c0_27, %c0_28] : memref<7x21x64xbf16, #tpu.memory_space<vmem>>, vector<1x21x64xbf16>
    %28 = vector.shape_cast %27 : vector<1x21x64xbf16> to vector<21x64xbf16>
    %cst_29 = arith.constant dense<0.000000e+00> : vector<256x64xf32>
    %29 = tpu.matmul %26, %28, %cst_29 {dimension_numbers = #tpu.dot_dimension_numbers<[1], [0], [0], [1], [0, 0, 1, 1], [], []>} : vector<256x21xbf16>, vector<21x64xbf16>, vector<256x64xf32> -> vector<256x64xf32>
    %30 = arith.addf %23, %29 : vector<256x64xf32>
    %c0_30 = arith.constant 0 : index
    %c2_31 = arith.constant 2 : index
    %c0_32 = arith.constant 0 : index
    %c0_33 = arith.constant 0 : index
    %31 = vector.load %arg1[%c0_30, %c2_31, %c0_32, %c0_33] : memref<1x19x16x21xbf16, #tpu.memory_space<vmem>>, vector<1x16x16x21xbf16>
    %32 = vector.shape_cast %31 : vector<1x16x16x21xbf16> to vector<16x16x21xbf16>
    %33 = vector.shape_cast %32 : vector<16x16x21xbf16> to vector<256x21xbf16>
    %c4 = arith.constant 4 : index
    %c0_34 = arith.constant 0 : index
    %c0_35 = arith.constant 0 : index
    %34 = vector.load %arg3[%c4, %c0_34, %c0_35] : memref<7x21x64xbf16, #tpu.memory_space<vmem>>, vector<1x21x64xbf16>
    %35 = vector.shape_cast %34 : vector<1x21x64xbf16> to vector<21x64xbf16>
    %cst_36 = arith.constant dense<0.000000e+00> : vector<256x64xf32>
    %36 = tpu.matmul %33, %35, %cst_36 {dimension_numbers = #tpu.dot_dimension_numbers<[1], [0], [0], [1], [0, 0, 1, 1], [], []>} : vector<256x21xbf16>, vector<21x64xbf16>, vector<256x64xf32> -> vector<256x64xf32>
    %37 = arith.addf %30, %36 : vector<256x64xf32>
    %c0_37 = arith.constant 0 : index
    %c2_38 = arith.constant 2 : index
    %c0_39 = arith.constant 0 : index
    %c0_40 = arith.constant 0 : index
    %38 = vector.load %arg2[%c0_37, %c2_38, %c0_39, %c0_40] : memref<1x19x16x21xbf16, #tpu.memory_space<vmem>>, vector<1x16x16x21xbf16>
    %39 = vector.shape_cast %38 : vector<1x16x16x21xbf16> to vector<16x16x21xbf16>
    %40 = vector.shape_cast %39 : vector<16x16x21xbf16> to vector<256x21xbf16>
    %c5 = arith.constant 5 : index
    %c0_41 = arith.constant 0 : index
    %c0_42 = arith.constant 0 : index
    %41 = vector.load %arg3[%c5, %c0_41, %c0_42] : memref<7x21x64xbf16, #tpu.memory_space<vmem>>, vector<1x21x64xbf16>
    %42 = vector.shape_cast %41 : vector<1x21x64xbf16> to vector<21x64xbf16>
    %cst_43 = arith.constant dense<0.000000e+00> : vector<256x64xf32>
    %43 = tpu.matmul %40, %42, %cst_43 {dimension_numbers = #tpu.dot_dimension_numbers<[1], [0], [0], [1], [0, 0, 1, 1], [], []>} : vector<256x21xbf16>, vector<21x64xbf16>, vector<256x64xf32> -> vector<256x64xf32>
    %44 = arith.addf %37, %43 : vector<256x64xf32>
    %c0_44 = arith.constant 0 : index
    %c3_45 = arith.constant 3 : index
    %c0_46 = arith.constant 0 : index
    %c0_47 = arith.constant 0 : index
    %45 = vector.load %arg1[%c0_44, %c3_45, %c0_46, %c0_47] : memref<1x19x16x21xbf16, #tpu.memory_space<vmem>>, vector<1x16x16x21xbf16>
    %46 = vector.shape_cast %45 : vector<1x16x16x21xbf16> to vector<16x16x21xbf16>
    %47 = vector.shape_cast %46 : vector<16x16x21xbf16> to vector<256x21xbf16>
    %c6 = arith.constant 6 : index
    %c0_48 = arith.constant 0 : index
    %c0_49 = arith.constant 0 : index
    %48 = vector.load %arg3[%c6, %c0_48, %c0_49] : memref<7x21x64xbf16, #tpu.memory_space<vmem>>, vector<1x21x64xbf16>
    %49 = vector.shape_cast %48 : vector<1x21x64xbf16> to vector<21x64xbf16>
    %cst_50 = arith.constant dense<0.000000e+00> : vector<256x64xf32>
    %50 = tpu.matmul %47, %49, %cst_50 {dimension_numbers = #tpu.dot_dimension_numbers<[1], [0], [0], [1], [0, 0, 1, 1], [], []>} : vector<256x21xbf16>, vector<21x64xbf16>, vector<256x64xf32> -> vector<256x64xf32>
    %51 = arith.addf %44, %50 : vector<256x64xf32>
    %52 = vector.shape_cast %51 : vector<256x64xf32> to vector<16x16x64xf32>
    %53 = arith.truncf %52 : vector<16x16x64xf32> to vector<16x16x64xbf16>
    %c0_51 = arith.constant 0 : index
    %c0_52 = arith.constant 0 : index
    %c0_53 = arith.constant 0 : index
    %c0_54 = arith.constant 0 : index
    %54 = vector.load %arg4[%c0_51, %c0_52, %c0_53, %c0_54] : memref<1x16x16x64xbf16, #tpu.memory_space<vmem>>, vector<1x16x16x64xbf16>
    %55 = vector.shape_cast %54 : vector<1x16x16x64xbf16> to vector<16x16x64xbf16>
    %56 = vector.shape_cast %53 : vector<16x16x64xbf16> to vector<1x16x16x64xbf16>
    tpu.vector_store %arg4[%c0_51, %c0_52, %c0_53, %c0_54], %56 {strides = array<i32>} : memref<1x16x16x64xbf16, #tpu.memory_space<vmem>>, vector<1x16x16x64xbf16>,
    %cst_55 = arith.constant dense<0.000000e+00> : vector<64xf32>
    %57 = vector.multi_reduction <add>, %51, %cst_55 [0] : vector<256x64xf32> to vector<64xf32>
    %58 = vector.shape_cast %57 : vector<64xf32> to vector<1x64xf32>
    %59 = arith.addf %0, %58 : vector<1x64xf32>
    %60 = arith.mulf %51, %51 : vector<256x64xf32>
    %cst_56 = arith.constant dense<0.000000e+00> : vector<64xf32>
    %61 = vector.multi_reduction <add>, %60, %cst_56 [0] : vector<256x64xf32> to vector<64xf32>
    %62 = vector.shape_cast %61 : vector<64xf32> to vector<1x64xf32>
    %63 = arith.addf %1, %62 : vector<1x64xf32>
    %64 = vector.shape_cast %59 : vector<1x64xf32> to vector<1x1x64xf32>
    %c0_57 = arith.constant 0 : index
    %c0_58 = arith.constant 0 : index
    %c0_59 = arith.constant 0 : index
    %65 = vector.load %arg5[%c0_57, %c0_58, %c0_59] : memref<1x1x64xf32, #tpu.memory_space<vmem>>, vector<1x1x64xf32>
    tpu.vector_store %arg5[%c0_57, %c0_58, %c0_59], %64 {strides = array<i32>} : memref<1x1x64xf32, #tpu.memory_space<vmem>>, vector<1x1x64xf32>,
    %66 = vector.shape_cast %63 : vector<1x64xf32> to vector<1x1x64xf32>
    %c0_60 = arith.constant 0 : index
    %c0_61 = arith.constant 0 : index
    %c0_62 = arith.constant 0 : index
    %67 = vector.load %arg6[%c0_60, %c0_61, %c0_62] : memref<1x1x64xf32, #tpu.memory_space<vmem>>, vector<1x1x64xf32>
    tpu.vector_store %arg6[%c0_60, %c0_61, %c0_62], %66 {strides = array<i32>} : memref<1x1x64xf32, #tpu.memory_space<vmem>>, vector<1x1x64xf32>,
    return
  }
  func.func @transform_0(%arg0: i32) -> (i32, i32, i32, i32) {
    %c0_i32 = arith.constant 0 : i32
    %c0_i32_0 = arith.constant 0 : i32
    %c0_i32_1 = arith.constant 0 : i32
    %c0_i32_2 = arith.constant 0 : i32
    return %arg0, %c0_i32, %c0_i32_0, %c0_i32_1 : i32, i32, i32, i32
  }
  func.func @transform_1(%arg0: i32) -> (i32, i32, i32, i32) {
    %c0_i32 = arith.constant 0 : i32
    %c0_i32_0 = arith.constant 0 : i32
    %c0_i32_1 = arith.constant 0 : i32
    %c0_i32_2 = arith.constant 0 : i32
    return %arg0, %c0_i32, %c0_i32_0, %c0_i32_1 : i32, i32, i32, i32
  }
  func.func @transform_2(%arg0: i32) -> (i32, i32, i32) {
    %c0_i32 = arith.constant 0 : i32
    %c0_i32_0 = arith.constant 0 : i32
    %c0_i32_1 = arith.constant 0 : i32
    %c0_i32_2 = arith.constant 0 : i32
    return %c0_i32, %c0_i32_0, %c0_i32_1 : i32, i32, i32
  }
  func.func @transform_3(%arg0: i32) -> (i32, i32, i32, i32) {
    %c0_i32 = arith.constant 0 : i32
    %c0_i32_0 = arith.constant 0 : i32
    %c0_i32_1 = arith.constant 0 : i32
    %c0_i32_2 = arith.constant 0 : i32
    return %arg0, %c0_i32, %c0_i32_0, %c0_i32_1 : i32, i32, i32, i32
  }
  func.func @transform_4(%arg0: i32) -> (i32, i32, i32) {
    %c0_i32 = arith.constant 0 : i32
    %c0_i32_0 = arith.constant 0 : i32
    %c0_i32_1 = arith.constant 0 : i32
    return %arg0, %c0_i32, %c0_i32_0 : i32, i32, i32
  }
  func.func @transform_5(%arg0: i32) -> (i32, i32, i32) {
    %c0_i32 = arith.constant 0 : i32
    %c0_i32_0 = arith.constant 0 : i32
    %c0_i32_1 = arith.constant 0 : i32
    return %arg0, %c0_i32, %c0_i32_0 : i32, i32, i32
  }
}

module attributes {stable_mosaic.version = 11 : i64} {
  func.func @_pool_kernel(%arg0: i32, %arg1: memref<1x16x16x64xbf16, #tpu.memory_space<vmem>>, %arg2: memref<1x64xf32, #tpu.memory_space<vmem>>, %arg3: memref<1x64xf32, #tpu.memory_space<vmem>>, %arg4: memref<1x8x8x64xbf16, #tpu.memory_space<vmem>>, %arg5: memref<18x40x64xf32, #tpu.memory_space<vmem>>) attributes {dimension_semantics = [#tpu.dimension_semantics<parallel>], iteration_bounds = array<i64: 2>, scalar_prefetch = 0 : i64, scratch_operands = 1 : i64, tpu.core_type = #tpu.core_type<tc>, window_params = [{transform_indices = @transform_0, window_bounds = array<i64: 1, 16, 16, 64>}, {pipeline_mode = #tpu.pipeline_mode<synchronous>, transform_indices = @transform_1, window_bounds = array<i64: 1, 64>}, {pipeline_mode = #tpu.pipeline_mode<synchronous>, transform_indices = @transform_2, window_bounds = array<i64: 1, 64>}, {transform_indices = @transform_3, window_bounds = array<i64: 1, 8, 8, 64>}]} {
    %cst = arith.constant 0.000000e+00 : f32
    %0 = vector.broadcast %cst : f32 to vector<1x40x64xf32>
    %c0 = arith.constant 0 : index
    %c0_0 = arith.constant 0 : index
    %c0_1 = arith.constant 0 : index
    %1 = vector.load %arg5[%c0, %c0_0, %c0_1] : memref<18x40x64xf32, #tpu.memory_space<vmem>>, vector<1x40x64xf32>
    tpu.vector_store %arg5[%c0, %c0_0, %c0_1], %0 {strides = array<i32>} : memref<18x40x64xf32, #tpu.memory_space<vmem>>, vector<1x40x64xf32>,
    %cst_2 = arith.constant 0.000000e+00 : f32
    %2 = vector.broadcast %cst_2 : f32 to vector<18x1x64xf32>
    %c0_3 = arith.constant 0 : index
    %c15 = arith.constant 15 : index
    %c0_4 = arith.constant 0 : index
    %3 = vector.load %arg5[%c0_3, %c15, %c0_4] : memref<18x40x64xf32, #tpu.memory_space<vmem>>, vector<18x1x64xf32>
    tpu.vector_store %arg5[%c0_3, %c15, %c0_4], %2 {strides = array<i32>} : memref<18x40x64xf32, #tpu.memory_space<vmem>>, vector<18x1x64xf32>,
    %c0_5 = arith.constant 0 : index
    %c0_6 = arith.constant 0 : index
    %c0_7 = arith.constant 0 : index
    %c0_8 = arith.constant 0 : index
    %4 = vector.load %arg1[%c0_5, %c0_6, %c0_7, %c0_8] : memref<1x16x16x64xbf16, #tpu.memory_space<vmem>>, vector<1x16x16x64xbf16>
    %5 = vector.shape_cast %4 : vector<1x16x16x64xbf16> to vector<16x16x64xbf16>
    %6 = arith.extf %5 : vector<16x16x64xbf16> to vector<16x16x64xf32>
    %c0_9 = arith.constant 0 : index
    %c0_10 = arith.constant 0 : index
    %7 = vector.load %arg2[%c0_9, %c0_10] : memref<1x64xf32, #tpu.memory_space<vmem>>, vector<1x64xf32>
    %8 = vector.shape_cast %7 : vector<1x64xf32> to vector<1x1x64xf32>
    %9 = vector.broadcast %8 : vector<1x1x64xf32> to vector<16x16x64xf32>
    %10 = arith.mulf %6, %9 : vector<16x16x64xf32>
    %c0_11 = arith.constant 0 : index
    %c0_12 = arith.constant 0 : index
    %11 = vector.load %arg3[%c0_11, %c0_12] : memref<1x64xf32, #tpu.memory_space<vmem>>, vector<1x64xf32>
    %12 = vector.shape_cast %11 : vector<1x64xf32> to vector<1x1x64xf32>
    %13 = vector.broadcast %12 : vector<1x1x64xf32> to vector<16x16x64xf32>
    %14 = arith.addf %10, %13 : vector<16x16x64xf32>
    %cst_13 = arith.constant 0.000000e+00 : f32
    %15 = vector.broadcast %cst_13 : f32 to vector<16x16x64xf32>
    %16 = arith.maximumf %14, %15 : vector<16x16x64xf32>
    %c1 = arith.constant 1 : index
    %c16 = arith.constant 16 : index
    %c0_14 = arith.constant 0 : index
    %17 = vector.load %arg5[%c1, %c16, %c0_14] : memref<18x40x64xf32, #tpu.memory_space<vmem>>, vector<16x16x64xf32>
    tpu.vector_store %arg5[%c1, %c16, %c0_14], %16 {strides = array<i32>} : memref<18x40x64xf32, #tpu.memory_space<vmem>>, vector<16x16x64xf32>,
    %c0_15 = arith.constant 0 : index
    %c15_16 = arith.constant 15 : index
    %c0_17 = arith.constant 0 : index
    %18 = tpu.strided_load %arg5[%c0_15, %c15_16, %c0_17] {strides = array<i32: 2, 2, 1>} : memref<18x40x64xf32, #tpu.memory_space<vmem>>, vector<8x8x64xf32>
    %c0_18 = arith.constant 0 : index
    %c16_19 = arith.constant 16 : index
    %c0_20 = arith.constant 0 : index
    %19 = tpu.strided_load %arg5[%c0_18, %c16_19, %c0_20] {strides = array<i32: 2, 2, 1>} : memref<18x40x64xf32, #tpu.memory_space<vmem>>, vector<8x8x64xf32>
    %20 = arith.maximumf %18, %19 : vector<8x8x64xf32>
    %c0_21 = arith.constant 0 : index
    %c17 = arith.constant 17 : index
    %c0_22 = arith.constant 0 : index
    %21 = tpu.strided_load %arg5[%c0_21, %c17, %c0_22] {strides = array<i32: 2, 2, 1>} : memref<18x40x64xf32, #tpu.memory_space<vmem>>, vector<8x8x64xf32>
    %22 = arith.maximumf %20, %21 : vector<8x8x64xf32>
    %c1_23 = arith.constant 1 : index
    %c15_24 = arith.constant 15 : index
    %c0_25 = arith.constant 0 : index
    %23 = tpu.strided_load %arg5[%c1_23, %c15_24, %c0_25] {strides = array<i32: 2, 2, 1>} : memref<18x40x64xf32, #tpu.memory_space<vmem>>, vector<8x8x64xf32>
    %24 = arith.maximumf %22, %23 : vector<8x8x64xf32>
    %c1_26 = arith.constant 1 : index
    %c16_27 = arith.constant 16 : index
    %c0_28 = arith.constant 0 : index
    %25 = tpu.strided_load %arg5[%c1_26, %c16_27, %c0_28] {strides = array<i32: 2, 2, 1>} : memref<18x40x64xf32, #tpu.memory_space<vmem>>, vector<8x8x64xf32>
    %26 = arith.maximumf %24, %25 : vector<8x8x64xf32>
    %c1_29 = arith.constant 1 : index
    %c17_30 = arith.constant 17 : index
    %c0_31 = arith.constant 0 : index
    %27 = tpu.strided_load %arg5[%c1_29, %c17_30, %c0_31] {strides = array<i32: 2, 2, 1>} : memref<18x40x64xf32, #tpu.memory_space<vmem>>, vector<8x8x64xf32>
    %28 = arith.maximumf %26, %27 : vector<8x8x64xf32>
    %c2 = arith.constant 2 : index
    %c15_32 = arith.constant 15 : index
    %c0_33 = arith.constant 0 : index
    %29 = tpu.strided_load %arg5[%c2, %c15_32, %c0_33] {strides = array<i32: 2, 2, 1>} : memref<18x40x64xf32, #tpu.memory_space<vmem>>, vector<8x8x64xf32>
    %30 = arith.maximumf %28, %29 : vector<8x8x64xf32>
    %c2_34 = arith.constant 2 : index
    %c16_35 = arith.constant 16 : index
    %c0_36 = arith.constant 0 : index
    %31 = tpu.strided_load %arg5[%c2_34, %c16_35, %c0_36] {strides = array<i32: 2, 2, 1>} : memref<18x40x64xf32, #tpu.memory_space<vmem>>, vector<8x8x64xf32>
    %32 = arith.maximumf %30, %31 : vector<8x8x64xf32>
    %c2_37 = arith.constant 2 : index
    %c17_38 = arith.constant 17 : index
    %c0_39 = arith.constant 0 : index
    %33 = tpu.strided_load %arg5[%c2_37, %c17_38, %c0_39] {strides = array<i32: 2, 2, 1>} : memref<18x40x64xf32, #tpu.memory_space<vmem>>, vector<8x8x64xf32>
    %34 = arith.maximumf %32, %33 : vector<8x8x64xf32>
    %35 = arith.truncf %34 : vector<8x8x64xf32> to vector<8x8x64xbf16>
    %c0_40 = arith.constant 0 : index
    %c0_41 = arith.constant 0 : index
    %c0_42 = arith.constant 0 : index
    %c0_43 = arith.constant 0 : index
    %36 = vector.load %arg4[%c0_40, %c0_41, %c0_42, %c0_43] : memref<1x8x8x64xbf16, #tpu.memory_space<vmem>>, vector<1x8x8x64xbf16>
    %37 = vector.shape_cast %36 : vector<1x8x8x64xbf16> to vector<8x8x64xbf16>
    %38 = vector.shape_cast %35 : vector<8x8x64xbf16> to vector<1x8x8x64xbf16>
    tpu.vector_store %arg4[%c0_40, %c0_41, %c0_42, %c0_43], %38 {strides = array<i32>} : memref<1x8x8x64xbf16, #tpu.memory_space<vmem>>, vector<1x8x8x64xbf16>,
    return
  }
  func.func @transform_0(%arg0: i32) -> (i32, i32, i32, i32) {
    %c0_i32 = arith.constant 0 : i32
    %c0_i32_0 = arith.constant 0 : i32
    %c0_i32_1 = arith.constant 0 : i32
    %c0_i32_2 = arith.constant 0 : i32
    return %arg0, %c0_i32, %c0_i32_0, %c0_i32_1 : i32, i32, i32, i32
  }
  func.func @transform_1(%arg0: i32) -> (i32, i32) {
    %c0_i32 = arith.constant 0 : i32
    %c0_i32_0 = arith.constant 0 : i32
    %c0_i32_1 = arith.constant 0 : i32
    return %c0_i32, %c0_i32_0 : i32, i32
  }
  func.func @transform_2(%arg0: i32) -> (i32, i32) {
    %c0_i32 = arith.constant 0 : i32
    %c0_i32_0 = arith.constant 0 : i32
    %c0_i32_1 = arith.constant 0 : i32
    return %c0_i32, %c0_i32_0 : i32, i32
  }
  func.func @transform_3(%arg0: i32) -> (i32, i32, i32, i32) {
    %c0_i32 = arith.constant 0 : i32
    %c0_i32_0 = arith.constant 0 : i32
    %c0_i32_1 = arith.constant 0 : i32
    %c0_i32_2 = arith.constant 0 : i32
    return %arg0, %c0_i32, %c0_i32_0, %c0_i32_1 : i32, i32, i32, i32
  }
}

module attributes {stable_mosaic.version = 11 : i64} {
  func.func @_conv3x3_kernel(%arg0: i32, %arg1: memref<1x8x8x64xbf16, #tpu.memory_space<vmem>>, %arg2: memref<576x64xbf16, #tpu.memory_space<vmem>>, %arg3: memref<1x8x8x64xbf16, #tpu.memory_space<vmem>>, %arg4: memref<1x1x64xf32, #tpu.memory_space<vmem>>, %arg5: memref<1x1x64xf32, #tpu.memory_space<vmem>>, %arg6: memref<10x32x64xbf16, #tpu.memory_space<vmem>>, %arg7: memref<64x576xbf16, #tpu.memory_space<vmem>>) attributes {dimension_semantics = [#tpu.dimension_semantics<parallel>], iteration_bounds = array<i64: 2>, scalar_prefetch = 0 : i64, scratch_operands = 2 : i64, tpu.core_type = #tpu.core_type<tc>, window_params = [{transform_indices = @transform_0, window_bounds = array<i64: 1, 8, 8, 64>}, {pipeline_mode = #tpu.pipeline_mode<synchronous>, transform_indices = @transform_1, window_bounds = array<i64: 576, 64>}, {transform_indices = @transform_2, window_bounds = array<i64: 1, 8, 8, 64>}, {transform_indices = @transform_3, window_bounds = array<i64: 1, 1, 64>}, {transform_indices = @transform_4, window_bounds = array<i64: 1, 1, 64>}]} {
    %cst = arith.constant 0.000000e+00 : bf16
    %0 = vector.broadcast %cst : bf16 to vector<10x32x64xbf16>
    %c0 = arith.constant 0 : index
    %c0_0 = arith.constant 0 : index
    %c0_1 = arith.constant 0 : index
    %1 = vector.load %arg6[%c0, %c0_0, %c0_1] : memref<10x32x64xbf16, #tpu.memory_space<vmem>>, vector<10x32x64xbf16>
    tpu.vector_store %arg6[%c0, %c0_0, %c0_1], %0 {strides = array<i32>} : memref<10x32x64xbf16, #tpu.memory_space<vmem>>, vector<10x32x64xbf16>,
    %c0_2 = arith.constant 0 : index
    %c0_3 = arith.constant 0 : index
    %c0_4 = arith.constant 0 : index
    %c0_5 = arith.constant 0 : index
    %2 = vector.load %arg1[%c0_2, %c0_3, %c0_4, %c0_5] : memref<1x8x8x64xbf16, #tpu.memory_space<vmem>>, vector<1x8x8x64xbf16>
    %3 = vector.shape_cast %2 : vector<1x8x8x64xbf16> to vector<8x8x64xbf16>
    %c1 = arith.constant 1 : index
    %c16 = arith.constant 16 : index
    %c0_6 = arith.constant 0 : index
    %4 = vector.load %arg6[%c1, %c16, %c0_6] : memref<10x32x64xbf16, #tpu.memory_space<vmem>>, vector<8x8x64xbf16>
    tpu.vector_store %arg6[%c1, %c16, %c0_6], %3 {strides = array<i32>} : memref<10x32x64xbf16, #tpu.memory_space<vmem>>, vector<8x8x64xbf16>,
    %c0_7 = arith.constant 0 : index
    %c15 = arith.constant 15 : index
    %c0_8 = arith.constant 0 : index
    %5 = vector.load %arg6[%c0_7, %c15, %c0_8] : memref<10x32x64xbf16, #tpu.memory_space<vmem>>, vector<8x8x64xbf16>
    %6 = vector.shape_cast %5 : vector<8x8x64xbf16> to vector<64x64xbf16>
    %c0_9 = arith.constant 0 : index
    %c0_10 = arith.constant 0 : index
    %7 = vector.load %arg7[%c0_9, %c0_10] : memref<64x576xbf16, #tpu.memory_space<vmem>>, vector<64x64xbf16>
    tpu.vector_store %arg7[%c0_9, %c0_10], %6 {strides = array<i32>} : memref<64x576xbf16, #tpu.memory_space<vmem>>, vector<64x64xbf16>,
    %c0_11 = arith.constant 0 : index
    %c16_12 = arith.constant 16 : index
    %c0_13 = arith.constant 0 : index
    %8 = vector.load %arg6[%c0_11, %c16_12, %c0_13] : memref<10x32x64xbf16, #tpu.memory_space<vmem>>, vector<8x8x64xbf16>
    %9 = vector.shape_cast %8 : vector<8x8x64xbf16> to vector<64x64xbf16>
    %c0_14 = arith.constant 0 : index
    %c64 = arith.constant 64 : index
    %10 = vector.load %arg7[%c0_14, %c64] : memref<64x576xbf16, #tpu.memory_space<vmem>>, vector<64x64xbf16>
    tpu.vector_store %arg7[%c0_14, %c64], %9 {strides = array<i32>} : memref<64x576xbf16, #tpu.memory_space<vmem>>, vector<64x64xbf16>,
    %c0_15 = arith.constant 0 : index
    %c17 = arith.constant 17 : index
    %c0_16 = arith.constant 0 : index
    %11 = vector.load %arg6[%c0_15, %c17, %c0_16] : memref<10x32x64xbf16, #tpu.memory_space<vmem>>, vector<8x8x64xbf16>
    %12 = vector.shape_cast %11 : vector<8x8x64xbf16> to vector<64x64xbf16>
    %c0_17 = arith.constant 0 : index
    %c128 = arith.constant 128 : index
    %13 = vector.load %arg7[%c0_17, %c128] : memref<64x576xbf16, #tpu.memory_space<vmem>>, vector<64x64xbf16>
    tpu.vector_store %arg7[%c0_17, %c128], %12 {strides = array<i32>} : memref<64x576xbf16, #tpu.memory_space<vmem>>, vector<64x64xbf16>,
    %c1_18 = arith.constant 1 : index
    %c15_19 = arith.constant 15 : index
    %c0_20 = arith.constant 0 : index
    %14 = vector.load %arg6[%c1_18, %c15_19, %c0_20] : memref<10x32x64xbf16, #tpu.memory_space<vmem>>, vector<8x8x64xbf16>
    %15 = vector.shape_cast %14 : vector<8x8x64xbf16> to vector<64x64xbf16>
    %c0_21 = arith.constant 0 : index
    %c192 = arith.constant 192 : index
    %16 = vector.load %arg7[%c0_21, %c192] : memref<64x576xbf16, #tpu.memory_space<vmem>>, vector<64x64xbf16>
    tpu.vector_store %arg7[%c0_21, %c192], %15 {strides = array<i32>} : memref<64x576xbf16, #tpu.memory_space<vmem>>, vector<64x64xbf16>,
    %c1_22 = arith.constant 1 : index
    %c16_23 = arith.constant 16 : index
    %c0_24 = arith.constant 0 : index
    %17 = vector.load %arg6[%c1_22, %c16_23, %c0_24] : memref<10x32x64xbf16, #tpu.memory_space<vmem>>, vector<8x8x64xbf16>
    %18 = vector.shape_cast %17 : vector<8x8x64xbf16> to vector<64x64xbf16>
    %c0_25 = arith.constant 0 : index
    %c256 = arith.constant 256 : index
    %19 = vector.load %arg7[%c0_25, %c256] : memref<64x576xbf16, #tpu.memory_space<vmem>>, vector<64x64xbf16>
    tpu.vector_store %arg7[%c0_25, %c256], %18 {strides = array<i32>} : memref<64x576xbf16, #tpu.memory_space<vmem>>, vector<64x64xbf16>,
    %c1_26 = arith.constant 1 : index
    %c17_27 = arith.constant 17 : index
    %c0_28 = arith.constant 0 : index
    %20 = vector.load %arg6[%c1_26, %c17_27, %c0_28] : memref<10x32x64xbf16, #tpu.memory_space<vmem>>, vector<8x8x64xbf16>
    %21 = vector.shape_cast %20 : vector<8x8x64xbf16> to vector<64x64xbf16>
    %c0_29 = arith.constant 0 : index
    %c320 = arith.constant 320 : index
    %22 = vector.load %arg7[%c0_29, %c320] : memref<64x576xbf16, #tpu.memory_space<vmem>>, vector<64x64xbf16>
    tpu.vector_store %arg7[%c0_29, %c320], %21 {strides = array<i32>} : memref<64x576xbf16, #tpu.memory_space<vmem>>, vector<64x64xbf16>,
    %c2 = arith.constant 2 : index
    %c15_30 = arith.constant 15 : index
    %c0_31 = arith.constant 0 : index
    %23 = vector.load %arg6[%c2, %c15_30, %c0_31] : memref<10x32x64xbf16, #tpu.memory_space<vmem>>, vector<8x8x64xbf16>
    %24 = vector.shape_cast %23 : vector<8x8x64xbf16> to vector<64x64xbf16>
    %c0_32 = arith.constant 0 : index
    %c384 = arith.constant 384 : index
    %25 = vector.load %arg7[%c0_32, %c384] : memref<64x576xbf16, #tpu.memory_space<vmem>>, vector<64x64xbf16>
    tpu.vector_store %arg7[%c0_32, %c384], %24 {strides = array<i32>} : memref<64x576xbf16, #tpu.memory_space<vmem>>, vector<64x64xbf16>,
    %c2_33 = arith.constant 2 : index
    %c16_34 = arith.constant 16 : index
    %c0_35 = arith.constant 0 : index
    %26 = vector.load %arg6[%c2_33, %c16_34, %c0_35] : memref<10x32x64xbf16, #tpu.memory_space<vmem>>, vector<8x8x64xbf16>
    %27 = vector.shape_cast %26 : vector<8x8x64xbf16> to vector<64x64xbf16>
    %c0_36 = arith.constant 0 : index
    %c448 = arith.constant 448 : index
    %28 = vector.load %arg7[%c0_36, %c448] : memref<64x576xbf16, #tpu.memory_space<vmem>>, vector<64x64xbf16>
    tpu.vector_store %arg7[%c0_36, %c448], %27 {strides = array<i32>} : memref<64x576xbf16, #tpu.memory_space<vmem>>, vector<64x64xbf16>,
    %c2_37 = arith.constant 2 : index
    %c17_38 = arith.constant 17 : index
    %c0_39 = arith.constant 0 : index
    %29 = vector.load %arg6[%c2_37, %c17_38, %c0_39] : memref<10x32x64xbf16, #tpu.memory_space<vmem>>, vector<8x8x64xbf16>
    %30 = vector.shape_cast %29 : vector<8x8x64xbf16> to vector<64x64xbf16>
    %c0_40 = arith.constant 0 : index
    %c512 = arith.constant 512 : index
    %31 = vector.load %arg7[%c0_40, %c512] : memref<64x576xbf16, #tpu.memory_space<vmem>>, vector<64x64xbf16>
    tpu.vector_store %arg7[%c0_40, %c512], %30 {strides = array<i32>} : memref<64x576xbf16, #tpu.memory_space<vmem>>, vector<64x64xbf16>,
    %c0_41 = arith.constant 0 : index
    %c0_42 = arith.constant 0 : index
    %32 = vector.load %arg7[%c0_41, %c0_42] : memref<64x576xbf16, #tpu.memory_space<vmem>>, vector<64x576xbf16>
    %c0_43 = arith.constant 0 : index
    %c0_44 = arith.constant 0 : index
    %33 = vector.load %arg2[%c0_43, %c0_44] : memref<576x64xbf16, #tpu.memory_space<vmem>>, vector<576x64xbf16>
    %cst_45 = arith.constant dense<0.000000e+00> : vector<64x64xf32>
    %34 = tpu.matmul %32, %33, %cst_45 {dimension_numbers = #tpu.dot_dimension_numbers<[1], [0], [0], [1], [0, 0, 1, 1], [], []>} : vector<64x576xbf16>, vector<576x64xbf16>, vector<64x64xf32> -> vector<64x64xf32>
    %35 = vector.shape_cast %34 : vector<64x64xf32> to vector<1x8x8x64xf32>
    %36 = arith.truncf %35 : vector<1x8x8x64xf32> to vector<1x8x8x64xbf16>
    %c0_46 = arith.constant 0 : index
    %c0_47 = arith.constant 0 : index
    %c0_48 = arith.constant 0 : index
    %c0_49 = arith.constant 0 : index
    %37 = vector.load %arg3[%c0_46, %c0_47, %c0_48, %c0_49] : memref<1x8x8x64xbf16, #tpu.memory_space<vmem>>, vector<1x8x8x64xbf16>
    tpu.vector_store %arg3[%c0_46, %c0_47, %c0_48, %c0_49], %36 {strides = array<i32>} : memref<1x8x8x64xbf16, #tpu.memory_space<vmem>>, vector<1x8x8x64xbf16>,
    %cst_50 = arith.constant dense<0.000000e+00> : vector<64xf32>
    %38 = vector.multi_reduction <add>, %34, %cst_50 [0] : vector<64x64xf32> to vector<64xf32>
    %39 = vector.shape_cast %38 : vector<64xf32> to vector<1x64xf32>
    %40 = vector.shape_cast %39 : vector<1x64xf32> to vector<1x1x64xf32>
    %c0_51 = arith.constant 0 : index
    %c0_52 = arith.constant 0 : index
    %c0_53 = arith.constant 0 : index
    %41 = vector.load %arg4[%c0_51, %c0_52, %c0_53] : memref<1x1x64xf32, #tpu.memory_space<vmem>>, vector<1x1x64xf32>
    tpu.vector_store %arg4[%c0_51, %c0_52, %c0_53], %40 {strides = array<i32>} : memref<1x1x64xf32, #tpu.memory_space<vmem>>, vector<1x1x64xf32>,
    %42 = arith.mulf %34, %34 : vector<64x64xf32>
    %cst_54 = arith.constant dense<0.000000e+00> : vector<64xf32>
    %43 = vector.multi_reduction <add>, %42, %cst_54 [0] : vector<64x64xf32> to vector<64xf32>
    %44 = vector.shape_cast %43 : vector<64xf32> to vector<1x64xf32>
    %45 = vector.shape_cast %44 : vector<1x64xf32> to vector<1x1x64xf32>
    %c0_55 = arith.constant 0 : index
    %c0_56 = arith.constant 0 : index
    %c0_57 = arith.constant 0 : index
    %46 = vector.load %arg5[%c0_55, %c0_56, %c0_57] : memref<1x1x64xf32, #tpu.memory_space<vmem>>, vector<1x1x64xf32>
    tpu.vector_store %arg5[%c0_55, %c0_56, %c0_57], %45 {strides = array<i32>} : memref<1x1x64xf32, #tpu.memory_space<vmem>>, vector<1x1x64xf32>,
    return
  }
  func.func @transform_0(%arg0: i32) -> (i32, i32, i32, i32) {
    %c0_i32 = arith.constant 0 : i32
    %c0_i32_0 = arith.constant 0 : i32
    %c0_i32_1 = arith.constant 0 : i32
    %c0_i32_2 = arith.constant 0 : i32
    return %arg0, %c0_i32, %c0_i32_0, %c0_i32_1 : i32, i32, i32, i32
  }
  func.func @transform_1(%arg0: i32) -> (i32, i32) {
    %c0_i32 = arith.constant 0 : i32
    %c0_i32_0 = arith.constant 0 : i32
    %c0_i32_1 = arith.constant 0 : i32
    return %c0_i32, %c0_i32_0 : i32, i32
  }
  func.func @transform_2(%arg0: i32) -> (i32, i32, i32, i32) {
    %c0_i32 = arith.constant 0 : i32
    %c0_i32_0 = arith.constant 0 : i32
    %c0_i32_1 = arith.constant 0 : i32
    %c0_i32_2 = arith.constant 0 : i32
    return %arg0, %c0_i32, %c0_i32_0, %c0_i32_1 : i32, i32, i32, i32
  }
  func.func @transform_3(%arg0: i32) -> (i32, i32, i32) {
    %c0_i32 = arith.constant 0 : i32
    %c0_i32_0 = arith.constant 0 : i32
    %c0_i32_1 = arith.constant 0 : i32
    return %arg0, %c0_i32, %c0_i32_0 : i32, i32, i32
  }
  func.func @transform_4(%arg0: i32) -> (i32, i32, i32) {
    %c0_i32 = arith.constant 0 : i32
    %c0_i32_0 = arith.constant 0 : i32
    %c0_i32_1 = arith.constant 0 : i32
    return %arg0, %c0_i32, %c0_i32_0 : i32, i32, i32
  }
}

module attributes {stable_mosaic.version = 11 : i64} {
  func.func @_conv3x3_kernel(%arg0: i32, %arg1: memref<1x8x8x64xbf16, #tpu.memory_space<vmem>>, %arg2: memref<1x64xf32, #tpu.memory_space<vmem>>, %arg3: memref<1x64xf32, #tpu.memory_space<vmem>>, %arg4: memref<576x64xbf16, #tpu.memory_space<vmem>>, %arg5: memref<1x8x8x64xbf16, #tpu.memory_space<vmem>>, %arg6: memref<1x1x64xf32, #tpu.memory_space<vmem>>, %arg7: memref<1x1x64xf32, #tpu.memory_space<vmem>>, %arg8: memref<10x32x64xbf16, #tpu.memory_space<vmem>>, %arg9: memref<64x576xbf16, #tpu.memory_space<vmem>>) attributes {dimension_semantics = [#tpu.dimension_semantics<parallel>], iteration_bounds = array<i64: 2>, scalar_prefetch = 0 : i64, scratch_operands = 2 : i64, tpu.core_type = #tpu.core_type<tc>, window_params = [{transform_indices = @transform_0, window_bounds = array<i64: 1, 8, 8, 64>}, {pipeline_mode = #tpu.pipeline_mode<synchronous>, transform_indices = @transform_1, window_bounds = array<i64: 1, 64>}, {pipeline_mode = #tpu.pipeline_mode<synchronous>, transform_indices = @transform_2, window_bounds = array<i64: 1, 64>}, {pipeline_mode = #tpu.pipeline_mode<synchronous>, transform_indices = @transform_3, window_bounds = array<i64: 576, 64>}, {transform_indices = @transform_4, window_bounds = array<i64: 1, 8, 8, 64>}, {transform_indices = @transform_5, window_bounds = array<i64: 1, 1, 64>}, {transform_indices = @transform_6, window_bounds = array<i64: 1, 1, 64>}]} {
    %cst = arith.constant 0.000000e+00 : bf16
    %0 = vector.broadcast %cst : bf16 to vector<10x32x64xbf16>
    %c0 = arith.constant 0 : index
    %c0_0 = arith.constant 0 : index
    %c0_1 = arith.constant 0 : index
    %1 = vector.load %arg8[%c0, %c0_0, %c0_1] : memref<10x32x64xbf16, #tpu.memory_space<vmem>>, vector<10x32x64xbf16>
    tpu.vector_store %arg8[%c0, %c0_0, %c0_1], %0 {strides = array<i32>} : memref<10x32x64xbf16, #tpu.memory_space<vmem>>, vector<10x32x64xbf16>,
    %c0_2 = arith.constant 0 : index
    %c0_3 = arith.constant 0 : index
    %c0_4 = arith.constant 0 : index
    %c0_5 = arith.constant 0 : index
    %2 = vector.load %arg1[%c0_2, %c0_3, %c0_4, %c0_5] : memref<1x8x8x64xbf16, #tpu.memory_space<vmem>>, vector<1x8x8x64xbf16>
    %3 = vector.shape_cast %2 : vector<1x8x8x64xbf16> to vector<8x8x64xbf16>
    %4 = arith.extf %3 : vector<8x8x64xbf16> to vector<8x8x64xf32>
    %c0_6 = arith.constant 0 : index
    %c0_7 = arith.constant 0 : index
    %5 = vector.load %arg2[%c0_6, %c0_7] : memref<1x64xf32, #tpu.memory_space<vmem>>, vector<1x64xf32>
    %6 = vector.shape_cast %5 : vector<1x64xf32> to vector<1x1x64xf32>
    %7 = vector.broadcast %6 : vector<1x1x64xf32> to vector<8x8x64xf32>
    %8 = arith.mulf %4, %7 : vector<8x8x64xf32>
    %c0_8 = arith.constant 0 : index
    %c0_9 = arith.constant 0 : index
    %9 = vector.load %arg3[%c0_8, %c0_9] : memref<1x64xf32, #tpu.memory_space<vmem>>, vector<1x64xf32>
    %10 = vector.shape_cast %9 : vector<1x64xf32> to vector<1x1x64xf32>
    %11 = vector.broadcast %10 : vector<1x1x64xf32> to vector<8x8x64xf32>
    %12 = arith.addf %8, %11 : vector<8x8x64xf32>
    %cst_10 = arith.constant 0.000000e+00 : f32
    %13 = vector.broadcast %cst_10 : f32 to vector<8x8x64xf32>
    %14 = arith.maximumf %12, %13 : vector<8x8x64xf32>
    %15 = arith.truncf %14 : vector<8x8x64xf32> to vector<8x8x64xbf16>
    %c1 = arith.constant 1 : index
    %c16 = arith.constant 16 : index
    %c0_11 = arith.constant 0 : index
    %16 = vector.load %arg8[%c1, %c16, %c0_11] : memref<10x32x64xbf16, #tpu.memory_space<vmem>>, vector<8x8x64xbf16>
    tpu.vector_store %arg8[%c1, %c16, %c0_11], %15 {strides = array<i32>} : memref<10x32x64xbf16, #tpu.memory_space<vmem>>, vector<8x8x64xbf16>,
    %c0_12 = arith.constant 0 : index
    %c15 = arith.constant 15 : index
    %c0_13 = arith.constant 0 : index
    %17 = vector.load %arg8[%c0_12, %c15, %c0_13] : memref<10x32x64xbf16, #tpu.memory_space<vmem>>, vector<8x8x64xbf16>
    %18 = vector.shape_cast %17 : vector<8x8x64xbf16> to vector<64x64xbf16>
    %c0_14 = arith.constant 0 : index
    %c0_15 = arith.constant 0 : index
    %19 = vector.load %arg9[%c0_14, %c0_15] : memref<64x576xbf16, #tpu.memory_space<vmem>>, vector<64x64xbf16>
    tpu.vector_store %arg9[%c0_14, %c0_15], %18 {strides = array<i32>} : memref<64x576xbf16, #tpu.memory_space<vmem>>, vector<64x64xbf16>,
    %c0_16 = arith.constant 0 : index
    %c16_17 = arith.constant 16 : index
    %c0_18 = arith.constant 0 : index
    %20 = vector.load %arg8[%c0_16, %c16_17, %c0_18] : memref<10x32x64xbf16, #tpu.memory_space<vmem>>, vector<8x8x64xbf16>
    %21 = vector.shape_cast %20 : vector<8x8x64xbf16> to vector<64x64xbf16>
    %c0_19 = arith.constant 0 : index
    %c64 = arith.constant 64 : index
    %22 = vector.load %arg9[%c0_19, %c64] : memref<64x576xbf16, #tpu.memory_space<vmem>>, vector<64x64xbf16>
    tpu.vector_store %arg9[%c0_19, %c64], %21 {strides = array<i32>} : memref<64x576xbf16, #tpu.memory_space<vmem>>, vector<64x64xbf16>,
    %c0_20 = arith.constant 0 : index
    %c17 = arith.constant 17 : index
    %c0_21 = arith.constant 0 : index
    %23 = vector.load %arg8[%c0_20, %c17, %c0_21] : memref<10x32x64xbf16, #tpu.memory_space<vmem>>, vector<8x8x64xbf16>
    %24 = vector.shape_cast %23 : vector<8x8x64xbf16> to vector<64x64xbf16>
    %c0_22 = arith.constant 0 : index
    %c128 = arith.constant 128 : index
    %25 = vector.load %arg9[%c0_22, %c128] : memref<64x576xbf16, #tpu.memory_space<vmem>>, vector<64x64xbf16>
    tpu.vector_store %arg9[%c0_22, %c128], %24 {strides = array<i32>} : memref<64x576xbf16, #tpu.memory_space<vmem>>, vector<64x64xbf16>,
    %c1_23 = arith.constant 1 : index
    %c15_24 = arith.constant 15 : index
    %c0_25 = arith.constant 0 : index
    %26 = vector.load %arg8[%c1_23, %c15_24, %c0_25] : memref<10x32x64xbf16, #tpu.memory_space<vmem>>, vector<8x8x64xbf16>
    %27 = vector.shape_cast %26 : vector<8x8x64xbf16> to vector<64x64xbf16>
    %c0_26 = arith.constant 0 : index
    %c192 = arith.constant 192 : index
    %28 = vector.load %arg9[%c0_26, %c192] : memref<64x576xbf16, #tpu.memory_space<vmem>>, vector<64x64xbf16>
    tpu.vector_store %arg9[%c0_26, %c192], %27 {strides = array<i32>} : memref<64x576xbf16, #tpu.memory_space<vmem>>, vector<64x64xbf16>,
    %c1_27 = arith.constant 1 : index
    %c16_28 = arith.constant 16 : index
    %c0_29 = arith.constant 0 : index
    %29 = vector.load %arg8[%c1_27, %c16_28, %c0_29] : memref<10x32x64xbf16, #tpu.memory_space<vmem>>, vector<8x8x64xbf16>
    %30 = vector.shape_cast %29 : vector<8x8x64xbf16> to vector<64x64xbf16>
    %c0_30 = arith.constant 0 : index
    %c256 = arith.constant 256 : index
    %31 = vector.load %arg9[%c0_30, %c256] : memref<64x576xbf16, #tpu.memory_space<vmem>>, vector<64x64xbf16>
    tpu.vector_store %arg9[%c0_30, %c256], %30 {strides = array<i32>} : memref<64x576xbf16, #tpu.memory_space<vmem>>, vector<64x64xbf16>,
    %c1_31 = arith.constant 1 : index
    %c17_32 = arith.constant 17 : index
    %c0_33 = arith.constant 0 : index
    %32 = vector.load %arg8[%c1_31, %c17_32, %c0_33] : memref<10x32x64xbf16, #tpu.memory_space<vmem>>, vector<8x8x64xbf16>
    %33 = vector.shape_cast %32 : vector<8x8x64xbf16> to vector<64x64xbf16>
    %c0_34 = arith.constant 0 : index
    %c320 = arith.constant 320 : index
    %34 = vector.load %arg9[%c0_34, %c320] : memref<64x576xbf16, #tpu.memory_space<vmem>>, vector<64x64xbf16>
    tpu.vector_store %arg9[%c0_34, %c320], %33 {strides = array<i32>} : memref<64x576xbf16, #tpu.memory_space<vmem>>, vector<64x64xbf16>,
    %c2 = arith.constant 2 : index
    %c15_35 = arith.constant 15 : index
    %c0_36 = arith.constant 0 : index
    %35 = vector.load %arg8[%c2, %c15_35, %c0_36] : memref<10x32x64xbf16, #tpu.memory_space<vmem>>, vector<8x8x64xbf16>
    %36 = vector.shape_cast %35 : vector<8x8x64xbf16> to vector<64x64xbf16>
    %c0_37 = arith.constant 0 : index
    %c384 = arith.constant 384 : index
    %37 = vector.load %arg9[%c0_37, %c384] : memref<64x576xbf16, #tpu.memory_space<vmem>>, vector<64x64xbf16>
    tpu.vector_store %arg9[%c0_37, %c384], %36 {strides = array<i32>} : memref<64x576xbf16, #tpu.memory_space<vmem>>, vector<64x64xbf16>,
    %c2_38 = arith.constant 2 : index
    %c16_39 = arith.constant 16 : index
    %c0_40 = arith.constant 0 : index
    %38 = vector.load %arg8[%c2_38, %c16_39, %c0_40] : memref<10x32x64xbf16, #tpu.memory_space<vmem>>, vector<8x8x64xbf16>
    %39 = vector.shape_cast %38 : vector<8x8x64xbf16> to vector<64x64xbf16>
    %c0_41 = arith.constant 0 : index
    %c448 = arith.constant 448 : index
    %40 = vector.load %arg9[%c0_41, %c448] : memref<64x576xbf16, #tpu.memory_space<vmem>>, vector<64x64xbf16>
    tpu.vector_store %arg9[%c0_41, %c448], %39 {strides = array<i32>} : memref<64x576xbf16, #tpu.memory_space<vmem>>, vector<64x64xbf16>,
    %c2_42 = arith.constant 2 : index
    %c17_43 = arith.constant 17 : index
    %c0_44 = arith.constant 0 : index
    %41 = vector.load %arg8[%c2_42, %c17_43, %c0_44] : memref<10x32x64xbf16, #tpu.memory_space<vmem>>, vector<8x8x64xbf16>
    %42 = vector.shape_cast %41 : vector<8x8x64xbf16> to vector<64x64xbf16>
    %c0_45 = arith.constant 0 : index
    %c512 = arith.constant 512 : index
    %43 = vector.load %arg9[%c0_45, %c512] : memref<64x576xbf16, #tpu.memory_space<vmem>>, vector<64x64xbf16>
    tpu.vector_store %arg9[%c0_45, %c512], %42 {strides = array<i32>} : memref<64x576xbf16, #tpu.memory_space<vmem>>, vector<64x64xbf16>,
    %c0_46 = arith.constant 0 : index
    %c0_47 = arith.constant 0 : index
    %44 = vector.load %arg9[%c0_46, %c0_47] : memref<64x576xbf16, #tpu.memory_space<vmem>>, vector<64x576xbf16>
    %c0_48 = arith.constant 0 : index
    %c0_49 = arith.constant 0 : index
    %45 = vector.load %arg4[%c0_48, %c0_49] : memref<576x64xbf16, #tpu.memory_space<vmem>>, vector<576x64xbf16>
    %cst_50 = arith.constant dense<0.000000e+00> : vector<64x64xf32>
    %46 = tpu.matmul %44, %45, %cst_50 {dimension_numbers = #tpu.dot_dimension_numbers<[1], [0], [0], [1], [0, 0, 1, 1], [], []>} : vector<64x576xbf16>, vector<576x64xbf16>, vector<64x64xf32> -> vector<64x64xf32>
    %47 = vector.shape_cast %46 : vector<64x64xf32> to vector<1x8x8x64xf32>
    %48 = arith.truncf %47 : vector<1x8x8x64xf32> to vector<1x8x8x64xbf16>
    %c0_51 = arith.constant 0 : index
    %c0_52 = arith.constant 0 : index
    %c0_53 = arith.constant 0 : index
    %c0_54 = arith.constant 0 : index
    %49 = vector.load %arg5[%c0_51, %c0_52, %c0_53, %c0_54] : memref<1x8x8x64xbf16, #tpu.memory_space<vmem>>, vector<1x8x8x64xbf16>
    tpu.vector_store %arg5[%c0_51, %c0_52, %c0_53, %c0_54], %48 {strides = array<i32>} : memref<1x8x8x64xbf16, #tpu.memory_space<vmem>>, vector<1x8x8x64xbf16>,
    %cst_55 = arith.constant dense<0.000000e+00> : vector<64xf32>
    %50 = vector.multi_reduction <add>, %46, %cst_55 [0] : vector<64x64xf32> to vector<64xf32>
    %51 = vector.shape_cast %50 : vector<64xf32> to vector<1x64xf32>
    %52 = vector.shape_cast %51 : vector<1x64xf32> to vector<1x1x64xf32>
    %c0_56 = arith.constant 0 : index
    %c0_57 = arith.constant 0 : index
    %c0_58 = arith.constant 0 : index
    %53 = vector.load %arg6[%c0_56, %c0_57, %c0_58] : memref<1x1x64xf32, #tpu.memory_space<vmem>>, vector<1x1x64xf32>
    tpu.vector_store %arg6[%c0_56, %c0_57, %c0_58], %52 {strides = array<i32>} : memref<1x1x64xf32, #tpu.memory_space<vmem>>, vector<1x1x64xf32>,
    %54 = arith.mulf %46, %46 : vector<64x64xf32>
    %cst_59 = arith.constant dense<0.000000e+00> : vector<64xf32>
    %55 = vector.multi_reduction <add>, %54, %cst_59 [0] : vector<64x64xf32> to vector<64xf32>
    %56 = vector.shape_cast %55 : vector<64xf32> to vector<1x64xf32>
    %57 = vector.shape_cast %56 : vector<1x64xf32> to vector<1x1x64xf32>
    %c0_60 = arith.constant 0 : index
    %c0_61 = arith.constant 0 : index
    %c0_62 = arith.constant 0 : index
    %58 = vector.load %arg7[%c0_60, %c0_61, %c0_62] : memref<1x1x64xf32, #tpu.memory_space<vmem>>, vector<1x1x64xf32>
    tpu.vector_store %arg7[%c0_60, %c0_61, %c0_62], %57 {strides = array<i32>} : memref<1x1x64xf32, #tpu.memory_space<vmem>>, vector<1x1x64xf32>,
    return
  }
  func.func @transform_0(%arg0: i32) -> (i32, i32, i32, i32) {
    %c0_i32 = arith.constant 0 : i32
    %c0_i32_0 = arith.constant 0 : i32
    %c0_i32_1 = arith.constant 0 : i32
    %c0_i32_2 = arith.constant 0 : i32
    return %arg0, %c0_i32, %c0_i32_0, %c0_i32_1 : i32, i32, i32, i32
  }
  func.func @transform_1(%arg0: i32) -> (i32, i32) {
    %c0_i32 = arith.constant 0 : i32
    %c0_i32_0 = arith.constant 0 : i32
    %c0_i32_1 = arith.constant 0 : i32
    return %c0_i32, %c0_i32_0 : i32, i32
  }
  func.func @transform_2(%arg0: i32) -> (i32, i32) {
    %c0_i32 = arith.constant 0 : i32
    %c0_i32_0 = arith.constant 0 : i32
    %c0_i32_1 = arith.constant 0 : i32
    return %c0_i32, %c0_i32_0 : i32, i32
  }
  func.func @transform_3(%arg0: i32) -> (i32, i32) {
    %c0_i32 = arith.constant 0 : i32
    %c0_i32_0 = arith.constant 0 : i32
    %c0_i32_1 = arith.constant 0 : i32
    return %c0_i32, %c0_i32_0 : i32, i32
  }
  func.func @transform_4(%arg0: i32) -> (i32, i32, i32, i32) {
    %c0_i32 = arith.constant 0 : i32
    %c0_i32_0 = arith.constant 0 : i32
    %c0_i32_1 = arith.constant 0 : i32
    %c0_i32_2 = arith.constant 0 : i32
    return %arg0, %c0_i32, %c0_i32_0, %c0_i32_1 : i32, i32, i32, i32
  }
  func.func @transform_5(%arg0: i32) -> (i32, i32, i32) {
    %c0_i32 = arith.constant 0 : i32
    %c0_i32_0 = arith.constant 0 : i32
    %c0_i32_1 = arith.constant 0 : i32
    return %arg0, %c0_i32, %c0_i32_0 : i32, i32, i32
  }
  func.func @transform_6(%arg0: i32) -> (i32, i32, i32) {
    %c0_i32 = arith.constant 0 : i32
    %c0_i32_0 = arith.constant 0 : i32
    %c0_i32_1 = arith.constant 0 : i32
    return %arg0, %c0_i32, %c0_i32_0 : i32, i32, i32
  }
}

module attributes {stable_mosaic.version = 11 : i64} {
  func.func @_conv3x3_kernel(%arg0: i32, %arg1: memref<1x8x8x64xbf16, #tpu.memory_space<vmem>>, %arg2: memref<1x8x8x64xbf16, #tpu.memory_space<vmem>>, %arg3: memref<1x64xf32, #tpu.memory_space<vmem>>, %arg4: memref<1x64xf32, #tpu.memory_space<vmem>>, %arg5: memref<576x64xbf16, #tpu.memory_space<vmem>>, %arg6: memref<1x8x8x64xbf16, #tpu.memory_space<vmem>>, %arg7: memref<1x8x8x64xbf16, #tpu.memory_space<vmem>>, %arg8: memref<1x1x64xf32, #tpu.memory_space<vmem>>, %arg9: memref<1x1x64xf32, #tpu.memory_space<vmem>>, %arg10: memref<10x32x64xbf16, #tpu.memory_space<vmem>>, %arg11: memref<64x576xbf16, #tpu.memory_space<vmem>>) attributes {dimension_semantics = [#tpu.dimension_semantics<parallel>], iteration_bounds = array<i64: 2>, scalar_prefetch = 0 : i64, scratch_operands = 2 : i64, tpu.core_type = #tpu.core_type<tc>, window_params = [{transform_indices = @transform_0, window_bounds = array<i64: 1, 8, 8, 64>}, {transform_indices = @transform_1, window_bounds = array<i64: 1, 8, 8, 64>}, {pipeline_mode = #tpu.pipeline_mode<synchronous>, transform_indices = @transform_2, window_bounds = array<i64: 1, 64>}, {pipeline_mode = #tpu.pipeline_mode<synchronous>, transform_indices = @transform_3, window_bounds = array<i64: 1, 64>}, {pipeline_mode = #tpu.pipeline_mode<synchronous>, transform_indices = @transform_4, window_bounds = array<i64: 576, 64>}, {transform_indices = @transform_5, window_bounds = array<i64: 1, 8, 8, 64>}, {transform_indices = @transform_6, window_bounds = array<i64: 1, 8, 8, 64>}, {transform_indices = @transform_7, window_bounds = array<i64: 1, 1, 64>}, {transform_indices = @transform_8, window_bounds = array<i64: 1, 1, 64>}]} {
    %cst = arith.constant 0.000000e+00 : bf16
    %0 = vector.broadcast %cst : bf16 to vector<10x32x64xbf16>
    %c0 = arith.constant 0 : index
    %c0_0 = arith.constant 0 : index
    %c0_1 = arith.constant 0 : index
    %1 = vector.load %arg10[%c0, %c0_0, %c0_1] : memref<10x32x64xbf16, #tpu.memory_space<vmem>>, vector<10x32x64xbf16>
    tpu.vector_store %arg10[%c0, %c0_0, %c0_1], %0 {strides = array<i32>} : memref<10x32x64xbf16, #tpu.memory_space<vmem>>, vector<10x32x64xbf16>,
    %c0_2 = arith.constant 0 : index
    %c0_3 = arith.constant 0 : index
    %c0_4 = arith.constant 0 : index
    %c0_5 = arith.constant 0 : index
    %2 = vector.load %arg1[%c0_2, %c0_3, %c0_4, %c0_5] : memref<1x8x8x64xbf16, #tpu.memory_space<vmem>>, vector<1x8x8x64xbf16>
    %3 = vector.shape_cast %2 : vector<1x8x8x64xbf16> to vector<8x8x64xbf16>
    %4 = arith.extf %3 : vector<8x8x64xbf16> to vector<8x8x64xf32>
    %c0_6 = arith.constant 0 : index
    %c0_7 = arith.constant 0 : index
    %5 = vector.load %arg3[%c0_6, %c0_7] : memref<1x64xf32, #tpu.memory_space<vmem>>, vector<1x64xf32>
    %6 = vector.shape_cast %5 : vector<1x64xf32> to vector<1x1x64xf32>
    %7 = vector.broadcast %6 : vector<1x1x64xf32> to vector<8x8x64xf32>
    %8 = arith.mulf %4, %7 : vector<8x8x64xf32>
    %c0_8 = arith.constant 0 : index
    %c0_9 = arith.constant 0 : index
    %9 = vector.load %arg4[%c0_8, %c0_9] : memref<1x64xf32, #tpu.memory_space<vmem>>, vector<1x64xf32>
    %10 = vector.shape_cast %9 : vector<1x64xf32> to vector<1x1x64xf32>
    %11 = vector.broadcast %10 : vector<1x1x64xf32> to vector<8x8x64xf32>
    %12 = arith.addf %8, %11 : vector<8x8x64xf32>
    %c0_10 = arith.constant 0 : index
    %c0_11 = arith.constant 0 : index
    %c0_12 = arith.constant 0 : index
    %c0_13 = arith.constant 0 : index
    %13 = vector.load %arg2[%c0_10, %c0_11, %c0_12, %c0_13] : memref<1x8x8x64xbf16, #tpu.memory_space<vmem>>, vector<1x8x8x64xbf16>
    %14 = vector.shape_cast %13 : vector<1x8x8x64xbf16> to vector<8x8x64xbf16>
    %15 = arith.extf %14 : vector<8x8x64xbf16> to vector<8x8x64xf32>
    %16 = arith.addf %12, %15 : vector<8x8x64xf32>
    %cst_14 = arith.constant 0.000000e+00 : f32
    %17 = vector.broadcast %cst_14 : f32 to vector<8x8x64xf32>
    %18 = arith.maximumf %16, %17 : vector<8x8x64xf32>
    %19 = arith.truncf %18 : vector<8x8x64xf32> to vector<8x8x64xbf16>
    %c0_15 = arith.constant 0 : index
    %c0_16 = arith.constant 0 : index
    %c0_17 = arith.constant 0 : index
    %c0_18 = arith.constant 0 : index
    %20 = vector.load %arg7[%c0_15, %c0_16, %c0_17, %c0_18] : memref<1x8x8x64xbf16, #tpu.memory_space<vmem>>, vector<1x8x8x64xbf16>
    %21 = vector.shape_cast %20 : vector<1x8x8x64xbf16> to vector<8x8x64xbf16>
    %22 = vector.shape_cast %19 : vector<8x8x64xbf16> to vector<1x8x8x64xbf16>
    tpu.vector_store %arg7[%c0_15, %c0_16, %c0_17, %c0_18], %22 {strides = array<i32>} : memref<1x8x8x64xbf16, #tpu.memory_space<vmem>>, vector<1x8x8x64xbf16>,
    %c1 = arith.constant 1 : index
    %c16 = arith.constant 16 : index
    %c0_19 = arith.constant 0 : index
    %23 = vector.load %arg10[%c1, %c16, %c0_19] : memref<10x32x64xbf16, #tpu.memory_space<vmem>>, vector<8x8x64xbf16>
    tpu.vector_store %arg10[%c1, %c16, %c0_19], %19 {strides = array<i32>} : memref<10x32x64xbf16, #tpu.memory_space<vmem>>, vector<8x8x64xbf16>,
    %c0_20 = arith.constant 0 : index
    %c15 = arith.constant 15 : index
    %c0_21 = arith.constant 0 : index
    %24 = vector.load %arg10[%c0_20, %c15, %c0_21] : memref<10x32x64xbf16, #tpu.memory_space<vmem>>, vector<8x8x64xbf16>
    %25 = vector.shape_cast %24 : vector<8x8x64xbf16> to vector<64x64xbf16>
    %c0_22 = arith.constant 0 : index
    %c0_23 = arith.constant 0 : index
    %26 = vector.load %arg11[%c0_22, %c0_23] : memref<64x576xbf16, #tpu.memory_space<vmem>>, vector<64x64xbf16>
    tpu.vector_store %arg11[%c0_22, %c0_23], %25 {strides = array<i32>} : memref<64x576xbf16, #tpu.memory_space<vmem>>, vector<64x64xbf16>,
    %c0_24 = arith.constant 0 : index
    %c16_25 = arith.constant 16 : index
    %c0_26 = arith.constant 0 : index
    %27 = vector.load %arg10[%c0_24, %c16_25, %c0_26] : memref<10x32x64xbf16, #tpu.memory_space<vmem>>, vector<8x8x64xbf16>
    %28 = vector.shape_cast %27 : vector<8x8x64xbf16> to vector<64x64xbf16>
    %c0_27 = arith.constant 0 : index
    %c64 = arith.constant 64 : index
    %29 = vector.load %arg11[%c0_27, %c64] : memref<64x576xbf16, #tpu.memory_space<vmem>>, vector<64x64xbf16>
    tpu.vector_store %arg11[%c0_27, %c64], %28 {strides = array<i32>} : memref<64x576xbf16, #tpu.memory_space<vmem>>, vector<64x64xbf16>,
    %c0_28 = arith.constant 0 : index
    %c17 = arith.constant 17 : index
    %c0_29 = arith.constant 0 : index
    %30 = vector.load %arg10[%c0_28, %c17, %c0_29] : memref<10x32x64xbf16, #tpu.memory_space<vmem>>, vector<8x8x64xbf16>
    %31 = vector.shape_cast %30 : vector<8x8x64xbf16> to vector<64x64xbf16>
    %c0_30 = arith.constant 0 : index
    %c128 = arith.constant 128 : index
    %32 = vector.load %arg11[%c0_30, %c128] : memref<64x576xbf16, #tpu.memory_space<vmem>>, vector<64x64xbf16>
    tpu.vector_store %arg11[%c0_30, %c128], %31 {strides = array<i32>} : memref<64x576xbf16, #tpu.memory_space<vmem>>, vector<64x64xbf16>,
    %c1_31 = arith.constant 1 : index
    %c15_32 = arith.constant 15 : index
    %c0_33 = arith.constant 0 : index
    %33 = vector.load %arg10[%c1_31, %c15_32, %c0_33] : memref<10x32x64xbf16, #tpu.memory_space<vmem>>, vector<8x8x64xbf16>
    %34 = vector.shape_cast %33 : vector<8x8x64xbf16> to vector<64x64xbf16>
    %c0_34 = arith.constant 0 : index
    %c192 = arith.constant 192 : index
    %35 = vector.load %arg11[%c0_34, %c192] : memref<64x576xbf16, #tpu.memory_space<vmem>>, vector<64x64xbf16>
    tpu.vector_store %arg11[%c0_34, %c192], %34 {strides = array<i32>} : memref<64x576xbf16, #tpu.memory_space<vmem>>, vector<64x64xbf16>,
    %c1_35 = arith.constant 1 : index
    %c16_36 = arith.constant 16 : index
    %c0_37 = arith.constant 0 : index
    %36 = vector.load %arg10[%c1_35, %c16_36, %c0_37] : memref<10x32x64xbf16, #tpu.memory_space<vmem>>, vector<8x8x64xbf16>
    %37 = vector.shape_cast %36 : vector<8x8x64xbf16> to vector<64x64xbf16>
    %c0_38 = arith.constant 0 : index
    %c256 = arith.constant 256 : index
    %38 = vector.load %arg11[%c0_38, %c256] : memref<64x576xbf16, #tpu.memory_space<vmem>>, vector<64x64xbf16>
    tpu.vector_store %arg11[%c0_38, %c256], %37 {strides = array<i32>} : memref<64x576xbf16, #tpu.memory_space<vmem>>, vector<64x64xbf16>,
    %c1_39 = arith.constant 1 : index
    %c17_40 = arith.constant 17 : index
    %c0_41 = arith.constant 0 : index
    %39 = vector.load %arg10[%c1_39, %c17_40, %c0_41] : memref<10x32x64xbf16, #tpu.memory_space<vmem>>, vector<8x8x64xbf16>
    %40 = vector.shape_cast %39 : vector<8x8x64xbf16> to vector<64x64xbf16>
    %c0_42 = arith.constant 0 : index
    %c320 = arith.constant 320 : index
    %41 = vector.load %arg11[%c0_42, %c320] : memref<64x576xbf16, #tpu.memory_space<vmem>>, vector<64x64xbf16>
    tpu.vector_store %arg11[%c0_42, %c320], %40 {strides = array<i32>} : memref<64x576xbf16, #tpu.memory_space<vmem>>, vector<64x64xbf16>,
    %c2 = arith.constant 2 : index
    %c15_43 = arith.constant 15 : index
    %c0_44 = arith.constant 0 : index
    %42 = vector.load %arg10[%c2, %c15_43, %c0_44] : memref<10x32x64xbf16, #tpu.memory_space<vmem>>, vector<8x8x64xbf16>
    %43 = vector.shape_cast %42 : vector<8x8x64xbf16> to vector<64x64xbf16>
    %c0_45 = arith.constant 0 : index
    %c384 = arith.constant 384 : index
    %44 = vector.load %arg11[%c0_45, %c384] : memref<64x576xbf16, #tpu.memory_space<vmem>>, vector<64x64xbf16>
    tpu.vector_store %arg11[%c0_45, %c384], %43 {strides = array<i32>} : memref<64x576xbf16, #tpu.memory_space<vmem>>, vector<64x64xbf16>,
    %c2_46 = arith.constant 2 : index
    %c16_47 = arith.constant 16 : index
    %c0_48 = arith.constant 0 : index
    %45 = vector.load %arg10[%c2_46, %c16_47, %c0_48] : memref<10x32x64xbf16, #tpu.memory_space<vmem>>, vector<8x8x64xbf16>
    %46 = vector.shape_cast %45 : vector<8x8x64xbf16> to vector<64x64xbf16>
    %c0_49 = arith.constant 0 : index
    %c448 = arith.constant 448 : index
    %47 = vector.load %arg11[%c0_49, %c448] : memref<64x576xbf16, #tpu.memory_space<vmem>>, vector<64x64xbf16>
    tpu.vector_store %arg11[%c0_49, %c448], %46 {strides = array<i32>} : memref<64x576xbf16, #tpu.memory_space<vmem>>, vector<64x64xbf16>,
    %c2_50 = arith.constant 2 : index
    %c17_51 = arith.constant 17 : index
    %c0_52 = arith.constant 0 : index
    %48 = vector.load %arg10[%c2_50, %c17_51, %c0_52] : memref<10x32x64xbf16, #tpu.memory_space<vmem>>, vector<8x8x64xbf16>
    %49 = vector.shape_cast %48 : vector<8x8x64xbf16> to vector<64x64xbf16>
    %c0_53 = arith.constant 0 : index
    %c512 = arith.constant 512 : index
    %50 = vector.load %arg11[%c0_53, %c512] : memref<64x576xbf16, #tpu.memory_space<vmem>>, vector<64x64xbf16>
    tpu.vector_store %arg11[%c0_53, %c512], %49 {strides = array<i32>} : memref<64x576xbf16, #tpu.memory_space<vmem>>, vector<64x64xbf16>,
    %c0_54 = arith.constant 0 : index
    %c0_55 = arith.constant 0 : index
    %51 = vector.load %arg11[%c0_54, %c0_55] : memref<64x576xbf16, #tpu.memory_space<vmem>>, vector<64x576xbf16>
    %c0_56 = arith.constant 0 : index
    %c0_57 = arith.constant 0 : index
    %52 = vector.load %arg5[%c0_56, %c0_57] : memref<576x64xbf16, #tpu.memory_space<vmem>>, vector<576x64xbf16>
    %cst_58 = arith.constant dense<0.000000e+00> : vector<64x64xf32>
    %53 = tpu.matmul %51, %52, %cst_58 {dimension_numbers = #tpu.dot_dimension_numbers<[1], [0], [0], [1], [0, 0, 1, 1], [], []>} : vector<64x576xbf16>, vector<576x64xbf16>, vector<64x64xf32> -> vector<64x64xf32>
    %54 = vector.shape_cast %53 : vector<64x64xf32> to vector<1x8x8x64xf32>
    %55 = arith.truncf %54 : vector<1x8x8x64xf32> to vector<1x8x8x64xbf16>
    %c0_59 = arith.constant 0 : index
    %c0_60 = arith.constant 0 : index
    %c0_61 = arith.constant 0 : index
    %c0_62 = arith.constant 0 : index
    %56 = vector.load %arg6[%c0_59, %c0_60, %c0_61, %c0_62] : memref<1x8x8x64xbf16, #tpu.memory_space<vmem>>, vector<1x8x8x64xbf16>
    tpu.vector_store %arg6[%c0_59, %c0_60, %c0_61, %c0_62], %55 {strides = array<i32>} : memref<1x8x8x64xbf16, #tpu.memory_space<vmem>>, vector<1x8x8x64xbf16>,
    %cst_63 = arith.constant dense<0.000000e+00> : vector<64xf32>
    %57 = vector.multi_reduction <add>, %53, %cst_63 [0] : vector<64x64xf32> to vector<64xf32>
    %58 = vector.shape_cast %57 : vector<64xf32> to vector<1x64xf32>
    %59 = vector.shape_cast %58 : vector<1x64xf32> to vector<1x1x64xf32>
    %c0_64 = arith.constant 0 : index
    %c0_65 = arith.constant 0 : index
    %c0_66 = arith.constant 0 : index
    %60 = vector.load %arg8[%c0_64, %c0_65, %c0_66] : memref<1x1x64xf32, #tpu.memory_space<vmem>>, vector<1x1x64xf32>
    tpu.vector_store %arg8[%c0_64, %c0_65, %c0_66], %59 {strides = array<i32>} : memref<1x1x64xf32, #tpu.memory_space<vmem>>, vector<1x1x64xf32>,
    %61 = arith.mulf %53, %53 : vector<64x64xf32>
    %cst_67 = arith.constant dense<0.000000e+00> : vector<64xf32>
    %62 = vector.multi_reduction <add>, %61, %cst_67 [0] : vector<64x64xf32> to vector<64xf32>
    %63 = vector.shape_cast %62 : vector<64xf32> to vector<1x64xf32>
    %64 = vector.shape_cast %63 : vector<1x64xf32> to vector<1x1x64xf32>
    %c0_68 = arith.constant 0 : index
    %c0_69 = arith.constant 0 : index
    %c0_70 = arith.constant 0 : index
    %65 = vector.load %arg9[%c0_68, %c0_69, %c0_70] : memref<1x1x64xf32, #tpu.memory_space<vmem>>, vector<1x1x64xf32>
    tpu.vector_store %arg9[%c0_68, %c0_69, %c0_70], %64 {strides = array<i32>} : memref<1x1x64xf32, #tpu.memory_space<vmem>>, vector<1x1x64xf32>,
    return
  }
  func.func @transform_0(%arg0: i32) -> (i32, i32, i32, i32) {
    %c0_i32 = arith.constant 0 : i32
    %c0_i32_0 = arith.constant 0 : i32
    %c0_i32_1 = arith.constant 0 : i32
    %c0_i32_2 = arith.constant 0 : i32
    return %arg0, %c0_i32, %c0_i32_0, %c0_i32_1 : i32, i32, i32, i32
  }
  func.func @transform_1(%arg0: i32) -> (i32, i32, i32, i32) {
    %c0_i32 = arith.constant 0 : i32
    %c0_i32_0 = arith.constant 0 : i32
    %c0_i32_1 = arith.constant 0 : i32
    %c0_i32_2 = arith.constant 0 : i32
    return %arg0, %c0_i32, %c0_i32_0, %c0_i32_1 : i32, i32, i32, i32
  }
  func.func @transform_2(%arg0: i32) -> (i32, i32) {
    %c0_i32 = arith.constant 0 : i32
    %c0_i32_0 = arith.constant 0 : i32
    %c0_i32_1 = arith.constant 0 : i32
    return %c0_i32, %c0_i32_0 : i32, i32
  }
  func.func @transform_3(%arg0: i32) -> (i32, i32) {
    %c0_i32 = arith.constant 0 : i32
    %c0_i32_0 = arith.constant 0 : i32
    %c0_i32_1 = arith.constant 0 : i32
    return %c0_i32, %c0_i32_0 : i32, i32
  }
  func.func @transform_4(%arg0: i32) -> (i32, i32) {
    %c0_i32 = arith.constant 0 : i32
    %c0_i32_0 = arith.constant 0 : i32
    %c0_i32_1 = arith.constant 0 : i32
    return %c0_i32, %c0_i32_0 : i32, i32
  }
  func.func @transform_5(%arg0: i32) -> (i32, i32, i32, i32) {
    %c0_i32 = arith.constant 0 : i32
    %c0_i32_0 = arith.constant 0 : i32
    %c0_i32_1 = arith.constant 0 : i32
    %c0_i32_2 = arith.constant 0 : i32
    return %arg0, %c0_i32, %c0_i32_0, %c0_i32_1 : i32, i32, i32, i32
  }
  func.func @transform_6(%arg0: i32) -> (i32, i32, i32, i32) {
    %c0_i32 = arith.constant 0 : i32
    %c0_i32_0 = arith.constant 0 : i32
    %c0_i32_1 = arith.constant 0 : i32
    %c0_i32_2 = arith.constant 0 : i32
    return %arg0, %c0_i32, %c0_i32_0, %c0_i32_1 : i32, i32, i32, i32
  }
  func.func @transform_7(%arg0: i32) -> (i32, i32, i32) {
    %c0_i32 = arith.constant 0 : i32
    %c0_i32_0 = arith.constant 0 : i32
    %c0_i32_1 = arith.constant 0 : i32
    return %arg0, %c0_i32, %c0_i32_0 : i32, i32, i32
  }
  func.func @transform_8(%arg0: i32) -> (i32, i32, i32) {
    %c0_i32 = arith.constant 0 : i32
    %c0_i32_0 = arith.constant 0 : i32
    %c0_i32_1 = arith.constant 0 : i32
    return %arg0, %c0_i32, %c0_i32_0 : i32, i32, i32
  }
}

module attributes {stable_mosaic.version = 11 : i64} {
  func.func @_final_kernel(%arg0: i32, %arg1: memref<1x8x8x64xbf16, #tpu.memory_space<vmem>>, %arg2: memref<1x8x8x64xbf16, #tpu.memory_space<vmem>>, %arg3: memref<1x64xf32, #tpu.memory_space<vmem>>, %arg4: memref<1x64xf32, #tpu.memory_space<vmem>>, %arg5: memref<1x64xf32, #tpu.memory_space<vmem>>, %arg6: memref<1x8x8xf32, #tpu.memory_space<vmem>>) attributes {dimension_semantics = [#tpu.dimension_semantics<parallel>], iteration_bounds = array<i64: 2>, scalar_prefetch = 0 : i64, scratch_operands = 0 : i64, tpu.core_type = #tpu.core_type<tc>, window_params = [{transform_indices = @transform_0, window_bounds = array<i64: 1, 8, 8, 64>}, {transform_indices = @transform_1, window_bounds = array<i64: 1, 8, 8, 64>}, {pipeline_mode = #tpu.pipeline_mode<synchronous>, transform_indices = @transform_2, window_bounds = array<i64: 1, 64>}, {pipeline_mode = #tpu.pipeline_mode<synchronous>, transform_indices = @transform_3, window_bounds = array<i64: 1, 64>}, {pipeline_mode = #tpu.pipeline_mode<synchronous>, transform_indices = @transform_4, window_bounds = array<i64: 1, 64>}, {transform_indices = @transform_5, window_bounds = array<i64: 1, 8, 8>}]} {
    %c0 = arith.constant 0 : index
    %c0_0 = arith.constant 0 : index
    %c0_1 = arith.constant 0 : index
    %c0_2 = arith.constant 0 : index
    %0 = vector.load %arg1[%c0, %c0_0, %c0_1, %c0_2] : memref<1x8x8x64xbf16, #tpu.memory_space<vmem>>, vector<1x8x8x64xbf16>
    %1 = arith.extf %0 : vector<1x8x8x64xbf16> to vector<1x8x8x64xf32>
    %c0_3 = arith.constant 0 : index
    %c0_4 = arith.constant 0 : index
    %2 = vector.load %arg3[%c0_3, %c0_4] : memref<1x64xf32, #tpu.memory_space<vmem>>, vector<1x64xf32>
    %3 = vector.shape_cast %2 : vector<1x64xf32> to vector<1x1x1x64xf32>
    %4 = vector.broadcast %3 : vector<1x1x1x64xf32> to vector<1x8x8x64xf32>
    %5 = arith.mulf %1, %4 : vector<1x8x8x64xf32>
    %c0_5 = arith.constant 0 : index
    %c0_6 = arith.constant 0 : index
    %6 = vector.load %arg4[%c0_5, %c0_6] : memref<1x64xf32, #tpu.memory_space<vmem>>, vector<1x64xf32>
    %7 = vector.shape_cast %6 : vector<1x64xf32> to vector<1x1x1x64xf32>
    %8 = vector.broadcast %7 : vector<1x1x1x64xf32> to vector<1x8x8x64xf32>
    %9 = arith.addf %5, %8 : vector<1x8x8x64xf32>
    %c0_7 = arith.constant 0 : index
    %c0_8 = arith.constant 0 : index
    %c0_9 = arith.constant 0 : index
    %c0_10 = arith.constant 0 : index
    %10 = vector.load %arg2[%c0_7, %c0_8, %c0_9, %c0_10] : memref<1x8x8x64xbf16, #tpu.memory_space<vmem>>, vector<1x8x8x64xbf16>
    %11 = arith.extf %10 : vector<1x8x8x64xbf16> to vector<1x8x8x64xf32>
    %12 = arith.addf %9, %11 : vector<1x8x8x64xf32>
    %cst = arith.constant 0.000000e+00 : f32
    %13 = vector.broadcast %cst : f32 to vector<1x8x8x64xf32>
    %14 = arith.maximumf %12, %13 : vector<1x8x8x64xf32>
    %c0_11 = arith.constant 0 : index
    %c0_12 = arith.constant 0 : index
    %15 = vector.load %arg5[%c0_11, %c0_12] : memref<1x64xf32, #tpu.memory_space<vmem>>, vector<1x64xf32>
    %16 = vector.shape_cast %15 : vector<1x64xf32> to vector<1x1x1x64xf32>
    %17 = vector.broadcast %16 : vector<1x1x1x64xf32> to vector<1x8x8x64xf32>
    %18 = arith.mulf %14, %17 : vector<1x8x8x64xf32>
    %cst_13 = arith.constant dense<0.000000e+00> : vector<1x8x8xf32>
    %19 = vector.multi_reduction <add>, %18, %cst_13 [3] : vector<1x8x8x64xf32> to vector<1x8x8xf32>
    %c0_14 = arith.constant 0 : index
    %c0_15 = arith.constant 0 : index
    %c0_16 = arith.constant 0 : index
    %20 = vector.load %arg6[%c0_14, %c0_15, %c0_16] : memref<1x8x8xf32, #tpu.memory_space<vmem>>, vector<1x8x8xf32>
    tpu.vector_store %arg6[%c0_14, %c0_15, %c0_16], %19 {strides = array<i32>} : memref<1x8x8xf32, #tpu.memory_space<vmem>>, vector<1x8x8xf32>,
    return
  }
  func.func @transform_0(%arg0: i32) -> (i32, i32, i32, i32) {
    %c0_i32 = arith.constant 0 : i32
    %c0_i32_0 = arith.constant 0 : i32
    %c0_i32_1 = arith.constant 0 : i32
    %c0_i32_2 = arith.constant 0 : i32
    return %arg0, %c0_i32, %c0_i32_0, %c0_i32_1 : i32, i32, i32, i32
  }
  func.func @transform_1(%arg0: i32) -> (i32, i32, i32, i32) {
    %c0_i32 = arith.constant 0 : i32
    %c0_i32_0 = arith.constant 0 : i32
    %c0_i32_1 = arith.constant 0 : i32
    %c0_i32_2 = arith.constant 0 : i32
    return %arg0, %c0_i32, %c0_i32_0, %c0_i32_1 : i32, i32, i32, i32
  }
  func.func @transform_2(%arg0: i32) -> (i32, i32) {
    %c0_i32 = arith.constant 0 : i32
    %c0_i32_0 = arith.constant 0 : i32
    %c0_i32_1 = arith.constant 0 : i32
    return %c0_i32, %c0_i32_0 : i32, i32
  }
  func.func @transform_3(%arg0: i32) -> (i32, i32) {
    %c0_i32 = arith.constant 0 : i32
    %c0_i32_0 = arith.constant 0 : i32
    %c0_i32_1 = arith.constant 0 : i32
    return %c0_i32, %c0_i32_0 : i32, i32
  }
  func.func @transform_4(%arg0: i32) -> (i32, i32) {
    %c0_i32 = arith.constant 0 : i32
    %c0_i32_0 = arith.constant 0 : i32
    %c0_i32_1 = arith.constant 0 : i32
    return %c0_i32, %c0_i32_0 : i32, i32
  }
  func.func @transform_5(%arg0: i32) -> (i32, i32, i32) {
    %c0_i32 = arith.constant 0 : i32
    %c0_i32_0 = arith.constant 0 : i32
    %c0_i32_1 = arith.constant 0 : i32
    return %arg0, %c0_i32, %c0_i32_0 : i32, i32, i32
  }
}

</mosaic_0001>

<bundles_post_ra>
// kernel: forward.8
= control target key start
LH: loop header
LB: loop body
LE: loop exit
PB: predicated region body
PF: predicated region fallthrough
CT: control target
= control target key end

     0   :  { %s864_s12 = smov 0   ;;  %s1055_s0 = inlined_call_operand.vmem [shape: bf16[2,16,16,64], index: 0, kind: input, shape index: {}]   ;;  %s1056_s1 = inlined_call_operand.vmem [shape: f32[1,64], index: 1, kind: input, shape index: {}]   ;;  %s1057_s2 = inlined_call_operand.vmem [shape: f32[1,64], index: 2, kind: input, shape index: {}]   ;;  %s1058_s3 = inlined_call_operand.vmem [shape: bf16[2,8,8,64], index: 3, kind: output, shape index: {}]  }
   0x1 LB: > { %s732_s13 = sadd.s32 4294967295, %s841_s12   ;;  %p736_p0 = scmp.ge.s32.totalorder %s841_s12, 1  ;;  %s841_s12 = sphi %s864_s12, %s13_s12  }
   0x2   : > { %p137_p1 = scmp.lt.s32.totalorder %s841_s12, 3 }
   0x4   : > { %p138_p2 = pnand %p736_p0, %p137_p1 }
   0x5   : > { %p872_p3 = scmp.lt.s32.totalorder (!%p138_p2), %s732_s13, 1 }
   0x6   : > { %141 = sbr.rel (%p138_p2) target bundleno = 77 (0x4d), region = 32 }
   0xb   : > { %vm171_vm0 = vcmask 523264   ;;  %vm177_vm1 = vcmask 516096   ;;  %v843_v0 = vmov 0.0   ;;  %s1061_s13 = smov (!%p872_p3, %s732_s13), 1  ;;  %v909_v1 = vld [vmem:[%s1056_s1] ss:$0 sm:$0xff] }
   0xc   : > { %173 = vst.msk [vmem:[#allocation2 + $0x8] sm:$0xff] %vm171_vm0, %v843_v0  ;;  %174 = vst.msk [vmem:[#allocation2 + $0x10] sm:$0xff] %vm171_vm0, %v843_v0  ;;  %s745_s15 = sshll.u32 %s1061_s13, 7  ;;  %v918_v10 = vld [vmem:[%s1057_s2] ss:$0 sm:$0xff]  ;;  %s746_s23 = sshll.u32 %s1061_s13, 5 }
   0xd   : > { %175 = vst.msk [vmem:[#allocation2 + $0x18] sm:$0xff] %vm171_vm0, %v843_v0  ;;  %s904_s18 = scalar_lea.vmem %s1055_s0, %s745_s15  ;;  %vm620_vm2 = vcmask 519168   ;;  %s1034_s26 = scalar_lea.vmem %s1058_s3, %s746_s23 }
   0xe   : > { %179 = vst.msk [vmem:[#allocation2 + $0x37] sm:$0x1] %vm177_vm1, %v843_v0  ;;  %180 = vst.msk [vmem:[#allocation2 + $0x5f] sm:$0x1] %vm177_vm1, %v843_v0  ;;  %v748_v2 = vld [vmem:[%s904_s18] sm:$0xff]   ;;  %v811_v3 = vld [vmem:[%s904_s18 + $0x8] sm:$0xff]  }
   0xf   : > { %181 = vst.msk [vmem:[#allocation2 + $0x87] sm:$0x1] %vm177_vm1, %v843_v0  ;;  %182 = vst.msk [vmem:[#allocation2 + $0xaf] sm:$0x1] %vm177_vm1, %v843_v0  ;;  %v813_v4 = vld [vmem:[%s904_s18 + $0x18] sm:$0xff]   ;;  %v749_v5 = vunpack.c.l.bf16 %v748_v2  ;;  %v750_v6 = vunpack.c.h.bf16 %v748_v2  ;;  %v753_v7 = vunpack.c.l.bf16 %v811_v3  ;;  %v754_v8 = vunpack.c.h.bf16 %v811_v3  ;;  %v815_v9 = vld [vmem:[%s904_s18 + $0x28] sm:$0xff]  }
  0x10   : > { %183 = vst.msk [vmem:[#allocation2 + $0xd7] sm:$0x1] %vm177_vm1, %v843_v0  ;;  %184 = vst.msk [vmem:[#allocation2 + $0xff] sm:$0x1] %vm177_vm1, %v843_v0  ;;  %v761_v11 = vunpack.c.l.bf16 %v813_v4  ;;  %v762_v12 = vunpack.c.h.bf16 %v813_v4  ;;  %v769_v13 = vunpack.c.l.bf16 %v815_v9  ;;  %v770_v14 = vunpack.c.h.bf16 %v815_v9  ;;  %v817_v31 = vld [vmem:[%s904_s18 + $0x38] sm:$0xff]   ;;  %v819_v32 = vld [vmem:[%s904_s18 + $0x48] sm:$0xff]  }
  0x11   : > { %185 = vst.msk [vmem:[#allocation2 + $0x127] sm:$0x1] %vm177_vm1, %v843_v0  ;;  %186 = vst.msk [vmem:[#allocation2 + $0x14f] sm:$0x1] %vm177_vm1, %v843_v0  ;;  %v267_v15 = vmul.f32 %v749_v5, %v909_v1  ;;  %v268_v16 = vmul.f32 %v750_v6, %v909_v1  ;;  %v269_v17 = vmul.f32 %v753_v7, %v909_v1  ;;  %v821_v37 = vld [vmem:[%s904_s18 + $0x58] sm:$0xff]   ;;  %v823_v38 = vld [vmem:[%s904_s18 + $0x68] sm:$0xff]   ;;  %v777_v43 = vunpack.c.l.bf16 %v817_v31 }
  0x12   : > { %187 = vst.msk [vmem:[#allocation2 + $0x177] sm:$0x1] %vm177_vm1, %v843_v0  ;;  %188 = vst.msk [vmem:[#allocation2 + $0x19f] sm:$0x1] %vm177_vm1, %v843_v0  ;;  %v270_v18 = vmul.f32 %v754_v8, %v909_v1  ;;  %v273_v19 = vmul.f32 %v761_v11, %v909_v1  ;;  %v274_v20 = vmul.f32 %v762_v12, %v909_v1  ;;  %v778_v44 = vunpack.c.h.bf16 %v817_v31  ;;  %v812_v4 = vld [vmem:[%s904_s18 + $0x10] sm:$0xff]   ;;  %v814_v5 = vld [vmem:[%s904_s18 + $0x20] sm:$0xff]  }
  0x13   : > { %189 = vst.msk [vmem:[#allocation2 + $0x1c7] sm:$0x1] %vm177_vm1, %v843_v0  ;;  %190 = vst.msk [vmem:[#allocation2 + $0x1ef] sm:$0x1] %vm177_vm1, %v843_v0  ;;  %v277_v21 = vmul.f32 %v769_v13, %v909_v1  ;;  %v278_v22 = vmul.f32 %v770_v14, %v909_v1  ;;  %v306_v23 = vadd.f32 %v918_v10, %v267_v15  ;;  %v785_v45 = vunpack.c.l.bf16 %v819_v32  ;;  %v816_v11 = vld [vmem:[%s904_s18 + $0x30] sm:$0xff]   ;;  %v818_v12 = vld [vmem:[%s904_s18 + $0x40] sm:$0xff]  }
  0x14   : > { %191 = vst.msk [vmem:[#allocation2 + $0x217] sm:$0x1] %vm177_vm1, %v843_v0  ;;  %192 = vst.msk [vmem:[#allocation2 + $0x23f] sm:$0x1] %vm177_vm1, %v843_v0  ;;  %v307_v24 = vadd.f32 %v918_v10, %v268_v16  ;;  %v308_v25 = vadd.f32 %v918_v10, %v269_v17  ;;  %v309_v26 = vadd.f32 %v918_v10, %v270_v18  ;;  %v786_v46 = vunpack.c.h.bf16 %v819_v32 }
  0x15   : > { %193 = vst.msk [vmem:[#allocation2 + $0x267] sm:$0x1] %vm177_vm1, %v843_v0  ;;  %194 = vst.msk [vmem:[#allocation2 + $0x28f] sm:$0x1] %vm177_vm1, %v843_v0  ;;  %v312_v27 = vadd.f32 %v918_v10, %v273_v19  ;;  %v313_v28 = vadd.f32 %v918_v10, %v274_v20  ;;  %v316_v29 = vadd.f32 %v918_v10, %v277_v21  ;;  %v338_v33 = vmax.f32 %v306_v23, 0.0 }
  0x16   : > { %178 = vst.msk [vmem:[#allocation2 + $0xf] sm:$0x1] %vm177_vm1, %v843_v0  ;;  %v317_v30 = vadd.f32 %v918_v10, %v278_v22  ;;  %v339_v34 = vmax.f32 %v307_v24, 0.0  ;;  %v340_v35 = vmax.f32 %v308_v25, 0.0  ;;  %v341_v36 = vmax.f32 %v309_v26, 0.0 }
  0x17   : > { %v344_v39 = vmax.f32 %v312_v27, 0.0  ;;  %v345_v40 = vmax.f32 %v313_v28, 0.0  ;;  %v348_v41 = vmax.f32 %v316_v29, 0.0  ;;  %371 = vst.msk [vmem:[#allocation2 + $0x38] sm:$0xff] %vm171_vm0, %v338_v33  ;;  %v793_v47 = vunpack.c.l.bf16 %v821_v37 }
  0x18   : > { %v349_v42 = vmax.f32 %v317_v30, 0.0  ;;  %372 = vst.msk [vmem:[#allocation2 + $0x40] sm:$0xff] %vm171_vm0, %v339_v34  ;;  %373 = vst.msk [vmem:[#allocation2 + $0x60] sm:$0xff] %vm171_vm0, %v340_v35  ;;  %v794_v48 = vunpack.c.h.bf16 %v821_v37  ;;  %v801_v49 = vunpack.c.l.bf16 %v823_v38  ;;  %v802_v50 = vunpack.c.h.bf16 %v823_v38 }
  0x19   : > { %374 = vst.msk [vmem:[#allocation2 + $0x68] sm:$0xff] %vm171_vm0, %v341_v36  ;;  %377 = vst.msk [vmem:[#allocation2 + $0xb0] sm:$0xff] %vm171_vm0, %v344_v39  ;;  %v281_v51 = vmul.f32 %v777_v43, %v909_v1  ;;  %v282_v52 = vmul.f32 %v778_v44, %v909_v1  ;;  %v285_v53 = vmul.f32 %v785_v45, %v909_v1  ;;  %v757_v17 = vunpack.c.l.bf16 %v812_v4 }
  0x1a   : > { %378 = vst.msk [vmem:[#allocation2 + $0xb8] sm:$0xff] %vm171_vm0, %v345_v40  ;;  %381 = vst.msk [vmem:[#allocation2 + $0x100] sm:$0xff] %vm171_vm0, %v348_v41  ;;  %v286_v54 = vmul.f32 %v786_v46, %v909_v1  ;;  %v289_v55 = vmul.f32 %v793_v47, %v909_v1  ;;  %v290_v56 = vmul.f32 %v794_v48, %v909_v1  ;;  %v758_v18 = vunpack.c.h.bf16 %v812_v4  ;;  %v820_v41 = vld [vmem:[%s904_s18 + $0x50] sm:$0xff]   ;;  %v825_v48 = vld [vmem:[%s904_s18 + $0x78] sm:$0xff]  }
  0x1b   : > { %382 = vst.msk [vmem:[#allocation2 + $0x108] sm:$0xff] %vm171_vm0, %v349_v42  ;;  %v293_v57 = vmul.f32 %v801_v49, %v909_v1  ;;  %v294_v58 = vmul.f32 %v802_v50, %v909_v1  ;;  %v320_v59 = vadd.f32 %v918_v10, %v281_v51  ;;  %v321_v60 = vadd.f32 %v918_v10, %v282_v52  ;;  %v822_v42 = vld [vmem:[%s904_s18 + $0x60] sm:$0xff]   ;;  %v824_v47 = vld [vmem:[%s904_s18 + $0x70] sm:$0xff]  }
  0x1c   : > { %v324_v61 = vadd.f32 %v918_v10, %v285_v53  ;;  %v325_v62 = vadd.f32 %v918_v10, %v286_v54  ;;  %v328_v63 = vadd.f32 %v918_v10, %v289_v55  ;;  %v329_v0 = vadd.f32 %v918_v10, %v290_v56 }
  0x1d   : > { %v332_v2 = vadd.f32 %v918_v10, %v293_v57  ;;  %v333_v3 = vadd.f32 %v918_v10, %v294_v58  ;;  %v352_v6 = vmax.f32 %v320_v59, 0.0  ;;  %v353_v7 = vmax.f32 %v321_v60, 0.0 }
  0x1e   : > { %v356_v8 = vmax.f32 %v324_v61, 0.0  ;;  %v357_v9 = vmax.f32 %v325_v62, 0.0  ;;  %v360_v13 = vmax.f32 %v328_v63, 0.0  ;;  %v361_v14 = vmax.f32 %v329_v0, 0.0 }
  0x1f   : > { %v364_v15 = vmax.f32 %v332_v2, 0.0  ;;  %v365_v16 = vmax.f32 %v333_v3, 0.0  ;;  %385 = vst.msk [vmem:[#allocation2 + $0x150] sm:$0xff] %vm171_vm0, %v352_v6  ;;  %386 = vst.msk [vmem:[#allocation2 + $0x158] sm:$0xff] %vm171_vm0, %v353_v7  ;;  %v765_v19 = vunpack.c.l.bf16 %v814_v5  ;;  %v766_v20 = vunpack.c.h.bf16 %v814_v5  ;;  %v404_v6 = vld [vmem:[#allocation2 + $0xf] ss:$2 sm:$0xff] }
  0x20   : > { %389 = vst.msk [vmem:[#allocation2 + $0x1a0] sm:$0xff] %vm171_vm0, %v356_v8  ;;  %390 = vst.msk [vmem:[#allocation2 + $0x1a8] sm:$0xff] %vm171_vm0, %v357_v9  ;;  %v773_v21 = vunpack.c.l.bf16 %v816_v11  ;;  %v774_v22 = vunpack.c.h.bf16 %v816_v11  ;;  %v781_v23 = vunpack.c.l.bf16 %v818_v12  ;;  %v782_v24 = vunpack.c.h.bf16 %v818_v12  ;;  %v420_v7 = vld [vmem:[#allocation2 + $0x10] ss:$2 sm:$0xff]  ;;  %v406_v8 = vld [vmem:[#allocation2 + $0x5f] ss:$2 sm:$0xff] }
  0x21   : > { %393 = vst.msk [vmem:[#allocation2 + $0x1f0] sm:$0xff] %vm171_vm0, %v360_v13  ;;  %394 = vst.msk [vmem:[#allocation2 + $0x1f8] sm:$0xff] %vm171_vm0, %v361_v14  ;;  %v271_v25 = vmul.f32 %v757_v17, %v909_v1  ;;  %v272_v26 = vmul.f32 %v758_v18, %v909_v1  ;;  %v275_v27 = vmul.f32 %v765_v19, %v909_v1  ;;  %v789_v53 = vunpack.c.l.bf16 %v820_v41  ;;  %v422_v9 = vld [vmem:[#allocation2 + $0x60] ss:$2 sm:$0xff]  ;;  %v408_v11 = vld [vmem:[#allocation2 + $0xaf] ss:$2 sm:$0xff] }
  0x22   : > { %397 = vst.msk [vmem:[#allocation2 + $0x240] sm:$0xff] %vm171_vm0, %v364_v15  ;;  %398 = vst.msk [vmem:[#allocation2 + $0x248] sm:$0xff] %vm171_vm0, %v365_v16  ;;  %v276_v28 = vmul.f32 %v766_v20, %v909_v1  ;;  %v279_v29 = vmul.f32 %v773_v21, %v909_v1  ;;  %v280_v30 = vmul.f32 %v774_v22, %v909_v1  ;;  %v790_v54 = vunpack.c.h.bf16 %v820_v41  ;;  %v424_v12 = vld [vmem:[#allocation2 + $0xb0] ss:$2 sm:$0xff]  ;;  %v410_v13 = vld [vmem:[#allocation2 + $0xff] ss:$2 sm:$0xff] }
  0x23   : > { %v283_v31 = vmul.f32 %v781_v23, %v909_v1  ;;  %v284_v32 = vmul.f32 %v782_v24, %v909_v1  ;;  %v310_v33 = vadd.f32 %v918_v10, %v271_v25  ;;  %v311_v34 = vadd.f32 %v918_v10, %v272_v26  ;;  %v426_v18 = vld [vmem:[#allocation2 + $0x100] ss:$2 sm:$0xff]  ;;  %v444_v24 = vld [vmem:[#allocation2 + $0x11] ss:$2 sm:$0xff] }
  0x24   : > { %v314_v35 = vadd.f32 %v918_v10, %v275_v27  ;;  %v315_v36 = vadd.f32 %v918_v10, %v276_v28  ;;  %v318_v37 = vadd.f32 %v918_v10, %v279_v29  ;;  %v319_v38 = vadd.f32 %v918_v10, %v280_v30  ;;  %v448_v41 = vld [vmem:[#allocation2 + $0xb1] ss:$2 sm:$0xff] }
  0x25   : > { %v322_v39 = vadd.f32 %v918_v10, %v283_v31  ;;  %v323_v40 = vadd.f32 %v918_v10, %v284_v32  ;;  %v342_v43 = vmax.f32 %v310_v33, 0.0  ;;  %v343_v44 = vmax.f32 %v311_v34, 0.0 }
  0x26   : > { %v346_v45 = vmax.f32 %v314_v35, 0.0  ;;  %v347_v46 = vmax.f32 %v315_v36, 0.0  ;;  %v350_v49 = vmax.f32 %v318_v37, 0.0  ;;  %v351_v50 = vmax.f32 %v319_v38, 0.0  ;;  %v412_v19 = vld [vmem:[#allocation2 + $0x14f] ss:$2 sm:$0xff] }
  0x27   : > { %v354_v51 = vmax.f32 %v322_v39, 0.0  ;;  %v355_v52 = vmax.f32 %v323_v40, 0.0  ;;  %375 = vst.msk [vmem:[#allocation2 + $0x88] sm:$0xff] %vm171_vm0, %v342_v43  ;;  %376 = vst.msk [vmem:[#allocation2 + $0x90] sm:$0xff] %vm171_vm0, %v343_v44  ;;  %v797_v55 = vunpack.c.l.bf16 %v822_v42  ;;  %v798_v56 = vunpack.c.h.bf16 %v822_v42  ;;  %v428_v20 = vld [vmem:[#allocation2 + $0x150] ss:$2 sm:$0xff] }
  0x28   : > { %379 = vst.msk [vmem:[#allocation2 + $0xd8] sm:$0xff] %vm171_vm0, %v346_v45  ;;  %380 = vst.msk [vmem:[#allocation2 + $0xe0] sm:$0xff] %vm171_vm0, %v347_v46  ;;  %v805_v57 = vunpack.c.l.bf16 %v824_v47  ;;  %v806_v58 = vunpack.c.h.bf16 %v824_v47  ;;  %v809_v59 = vunpack.c.l.bf16 %v825_v48  ;;  %v810_v60 = vunpack.c.h.bf16 %v825_v48  ;;  %v414_v25 = vld [vmem:[#allocation2 + $0x19f] ss:$2 sm:$0xff]  ;;  %v430_v26 = vld [vmem:[#allocation2 + $0x1a0] ss:$2 sm:$0xff] }
  0x29   : > { %383 = vst.msk [vmem:[#allocation2 + $0x128] sm:$0xff] %vm171_vm0, %v350_v49  ;;  %384 = vst.msk [vmem:[#allocation2 + $0x130] sm:$0xff] %vm171_vm0, %v351_v50  ;;  %v287_v61 = vmul.f32 %v789_v53, %v909_v1  ;;  %v288_v62 = vmul.f32 %v790_v54, %v909_v1  ;;  %v291_v63 = vmul.f32 %v797_v55, %v909_v1  ;;  %v416_v27 = vld [vmem:[#allocation2 + $0x1ef] ss:$2 sm:$0xff]  ;;  %v432_v32 = vld [vmem:[#allocation2 + $0x1f0] ss:$2 sm:$0xff] }
  0x2a   : > { %387 = vst.msk [vmem:[#allocation2 + $0x178] sm:$0xff] %vm171_vm0, %v354_v51  ;;  %388 = vst.msk [vmem:[#allocation2 + $0x180] sm:$0xff] %vm171_vm0, %v355_v52  ;;  %v292_v0 = vmul.f32 %v798_v56, %v909_v1  ;;  %v295_v2 = vmul.f32 %v805_v57, %v909_v1  ;;  %v296_v3 = vmul.f32 %v806_v58, %v909_v1  ;;  %v468_v37 = vld [vmem:[#allocation2 + $0x37] ss:$2 sm:$0xff]  ;;  %v492_v56 = vld [vmem:[#allocation2 + $0x38] ss:$2 sm:$0xff] }
  0x2b   : > { %v297_v4 = vmul.f32 %v809_v59, %v909_v1  ;;  %v298_v5 = vmul.f32 %v810_v60, %v909_v1  ;;  %v326_v14 = vadd.f32 %v918_v10, %v287_v61  ;;  %v327_v15 = vadd.f32 %v918_v10, %v288_v62  ;;  %v446_v39 = vld [vmem:[#allocation2 + $0x61] ss:$2 sm:$0xff]  ;;  %v452_v54 = vld [vmem:[#allocation2 + $0x151] ss:$2 sm:$0xff] }
  0x2c   : > { %v330_v16 = vadd.f32 %v918_v10, %v291_v63  ;;  %v331_v17 = vadd.f32 %v918_v10, %v292_v0  ;;  %v334_v1 = vadd.f32 %v918_v10, %v295_v2  ;;  %v335_v21 = vadd.f32 %v918_v10, %v296_v3  ;;  %v450_v43 = vld [vmem:[#allocation2 + $0x101] ss:$2 sm:$0xff]  ;;  %v456_v0 = vld [vmem:[#allocation2 + $0x1f1] ss:$2 sm:$0xff]  ;;  %v434_v3 = vld [vmem:[#allocation2 + $0x240] ss:$2 sm:$0xff] }
  0x2d   : > { %v336_v22 = vadd.f32 %v918_v10, %v297_v4  ;;  %v337_v23 = vadd.f32 %v918_v10, %v298_v5  ;;  %v358_v28 = vmax.f32 %v326_v14, 0.0  ;;  %v359_v29 = vmax.f32 %v327_v15, 0.0  ;;  %v516_v57 = vld [vmem:[#allocation2 + $0x39] ss:$2 sm:$0xff] }
  0x2e   : > { %v362_v30 = vmax.f32 %v330_v16, 0.0  ;;  %v363_v31 = vmax.f32 %v331_v17, 0.0  ;;  %v366_v33 = vmax.f32 %v334_v1, 0.0  ;;  %v367_v34 = vmax.f32 %v335_v21, 0.0  ;;  %v470_v44 = vld [vmem:[#allocation2 + $0x87] ss:$2 sm:$0xff] }
  0x2f   : > { %v368_v35 = vmax.f32 %v336_v22, 0.0  ;;  %v369_v36 = vmax.f32 %v337_v23, 0.0  ;;  %391 = vst.msk [vmem:[#allocation2 + $0x1c8] sm:$0xff] %vm171_vm0, %v358_v28  ;;  %392 = vst.msk [vmem:[#allocation2 + $0x1d0] sm:$0xff] %vm171_vm0, %v359_v29  ;;  %v435_v10 = vmax.f32 %v404_v6, %v420_v7  ;;  %v436_v38 = vmax.f32 %v406_v8, %v422_v9  ;;  %v472_v45 = vld [vmem:[#allocation2 + $0xd7] ss:$2 sm:$0xff] }
  0x30   : > { %395 = vst.msk [vmem:[#allocation2 + $0x218] sm:$0xff] %vm171_vm0, %v362_v30  ;;  %396 = vst.msk [vmem:[#allocation2 + $0x220] sm:$0xff] %vm171_vm0, %v363_v31  ;;  %v437_v40 = vmax.f32 %v408_v11, %v424_v12  ;;  %v438_v42 = vmax.f32 %v410_v13, %v426_v18  ;;  %v474_v46 = vld [vmem:[#allocation2 + $0x127] ss:$2 sm:$0xff]  ;;  %v439_v47 = vmax.f32 %v412_v19, %v428_v20  ;;  %v494_v4 = vld [vmem:[#allocation2 + $0x88] ss:$2 sm:$0xff] }
  0x31   : > { %399 = vst.msk [vmem:[#allocation2 + $0x268] sm:$0xff] %vm171_vm0, %v366_v33  ;;  %400 = vst.msk [vmem:[#allocation2 + $0x270] sm:$0xff] %vm171_vm0, %v367_v34  ;;  %v440_v48 = vmax.f32 %v414_v25, %v430_v26  ;;  %v441_v49 = vmax.f32 %v416_v27, %v432_v32  ;;  %v459_v50 = vmax.f32 %v435_v10, %v444_v24  ;;  %v476_v55 = vld [vmem:[#allocation2 + $0x177] ss:$2 sm:$0xff]  ;;  %v496_v5 = vld [vmem:[#allocation2 + $0xd8] ss:$2 sm:$0xff] }
  0x32   : > { %401 = vst.msk [vmem:[#allocation2 + $0x290] sm:$0xff] %vm171_vm0, %v368_v35  ;;  %402 = vst.msk [vmem:[#allocation2 + $0x298] sm:$0xff] %vm171_vm0, %v369_v36  ;;  %v460_v51 = vmax.f32 %v436_v38, %v446_v39  ;;  %v461_v52 = vmax.f32 %v437_v40, %v448_v41  ;;  %v462_v53 = vmax.f32 %v438_v42, %v450_v43  ;;  %v454_v59 = vld [vmem:[#allocation2 + $0x1a1] ss:$2 sm:$0xff]  ;;  %v498_v6 = vld [vmem:[#allocation2 + $0x128] ss:$2 sm:$0xff] }
  0x33   : > { %v463_v58 = vmax.f32 %v439_v47, %v452_v54  ;;  %v483_v60 = vmax.f32 %v459_v50, %v468_v37  ;;  %v418_v2 = vld [vmem:[#allocation2 + $0x23f] ss:$2 sm:$0xff]  ;;  %v464_v8 = vmax.f32 %v440_v48, %v454_v59  ;;  %v465_v9 = vmax.f32 %v441_v49, %v456_v0  ;;  %v500_v17 = vld [vmem:[#allocation2 + $0x178] ss:$2 sm:$0xff]  ;;  %v543_v20 = vld [vmem:[#allocation2 + $0xaf] ss:$2 sm:$0xff] }
  0x34   : > { %v484_v61 = vmax.f32 %v460_v51, %v470_v44  ;;  %v485_v62 = vmax.f32 %v461_v52, %v472_v45  ;;  %v486_v63 = vmax.f32 %v462_v53, %v474_v46  ;;  %v442_v11 = vmax.f32 %v418_v2, %v434_v3  ;;  %v518_v14 = vld [vmem:[#allocation2 + $0x89] ss:$2 sm:$0xff]  ;;  %v520_v1 = vld [vmem:[#allocation2 + $0xd9] ss:$2 sm:$0xff]  ;;  %v565_v32 = vld [vmem:[#allocation2 + $0x60] ss:$2 sm:$0xff] }
  0x35   : > { %v487_v7 = vmax.f32 %v463_v58, %v476_v55  ;;  %v507_v12 = vmax.f32 %v483_v60, %v492_v56  ;;  %v458_v18 = vld [vmem:[#allocation2 + $0x241] ss:$2 sm:$0xff]  ;;  %v567_v33 = vld [vmem:[#allocation2 + $0xb0] ss:$2 sm:$0xff]  ;;  %v569_v34 = vld [vmem:[#allocation2 + $0x100] ss:$2 sm:$0xff] }
  0x36   : > { %v508_v13 = vmax.f32 %v484_v61, %v494_v4  ;;  %v509_v15 = vmax.f32 %v485_v62, %v496_v5  ;;  %v510_v16 = vmax.f32 %v486_v63, %v498_v6  ;;  %v541_v19 = vld [vmem:[#allocation2 + $0x5f] ss:$2 sm:$0xff]  ;;  %v466_v24 = vmax.f32 %v442_v11, %v458_v18  ;;  %v547_v35 = vld [vmem:[#allocation2 + $0x14f] ss:$2 sm:$0xff]  ;;  %v502_v44 = vld [vmem:[#allocation2 + $0x1c8] ss:$2 sm:$0xff] }
  0x37   : > { %v522_v21 = vld [vmem:[#allocation2 + $0x129] ss:$2 sm:$0xff]  ;;  %v511_v22 = vmax.f32 %v487_v7, %v500_v17  ;;  %v531_v25 = vmax.f32 %v507_v12, %v516_v57  ;;  %v524_v30 = vld [vmem:[#allocation2 + $0x179] ss:$2 sm:$0xff]  ;;  %v504_v45 = vld [vmem:[#allocation2 + $0x218] ss:$2 sm:$0xff] }
  0x38   : > { %v478_v23 = vld [vmem:[#allocation2 + $0x1c7] ss:$2 sm:$0xff]  ;;  %v532_v26 = vmax.f32 %v508_v13, %v518_v14  ;;  %v533_v27 = vmax.f32 %v509_v15, %v520_v1  ;;  %v534_v29 = vmax.f32 %v510_v16, %v522_v21  ;;  %v480_v31 = vld [vmem:[#allocation2 + $0x217] ss:$2 sm:$0xff]  ;;  %v571_v49 = vld [vmem:[#allocation2 + $0x150] ss:$2 sm:$0xff] }
  0x39   : > { %v545_v28 = vld [vmem:[#allocation2 + $0xff] ss:$2 sm:$0xff]  ;;  %v535_v36 = vmax.f32 %v511_v22, %v524_v30  ;;  %v488_v37 = vmax.f32 %v464_v8, %v478_v23  ;;  %v489_v10 = vmax.f32 %v465_v9, %v480_v31  ;;  %v556_v39 = vmax.f32 %v531_v25, %v541_v19  ;;  %v573_v51 = vld [vmem:[#allocation2 + $0x1a0] ss:$2 sm:$0xff]  ;;  %v551_v3 = vld [vmem:[#allocation2 + $0x1ef] ss:$2 sm:$0xff] }
  0x3a   : > { %v482_v38 = vld [vmem:[#allocation2 + $0x267] ss:$2 sm:$0xff]  ;;  %v557_v40 = vmax.f32 %v532_v26, %v543_v20  ;;  %v558_v41 = vmax.f32 %v533_v27, %v545_v28  ;;  %v559_v42 = vmax.f32 %v534_v29, %v547_v35  ;;  %v506_v61 = vld [vmem:[#allocation2 + $0x268] ss:$2 sm:$0xff] }
  0x3b   : > { %v549_v43 = vld [vmem:[#allocation2 + $0x19f] ss:$2 sm:$0xff]  ;;  %v512_v52 = vmax.f32 %v488_v37, %v502_v44  ;;  %v513_v53 = vmax.f32 %v489_v10, %v504_v45  ;;  %v490_v54 = vmax.f32 %v466_v24, %v482_v38  ;;  %v580_v55 = vmax.f32 %v556_v39, %v565_v32  ;;  %v555_v13 = vld [vmem:[#allocation2 + $0x28f] ss:$2 sm:$0xff]  ;;  %v575_v21 = vld [vmem:[#allocation2 + $0x1f0] ss:$2 sm:$0xff] }
  0x3c   : > { %v589_v46 = vld [vmem:[#allocation2 + $0x61] ss:$2 sm:$0xff]  ;;  %v591_v47 = vld [vmem:[#allocation2 + $0xb1] ss:$2 sm:$0xff]  ;;  %v560_v50 = vmax.f32 %v535_v36, %v549_v43  ;;  %v581_v56 = vmax.f32 %v557_v40, %v567_v33  ;;  %v582_v57 = vmax.f32 %v558_v41, %v569_v34  ;;  %v583_v58 = vmax.f32 %v559_v42, %v571_v49  ;;  %v577_v22 = vld [vmem:[#allocation2 + $0x240] ss:$2 sm:$0xff] }
  0x3d   : > { %v593_v48 = vld [vmem:[#allocation2 + $0x101] ss:$2 sm:$0xff]  ;;  %v595_v62 = vld [vmem:[#allocation2 + $0x151] ss:$2 sm:$0xff]  ;;  %v514_v5 = vmax.f32 %v490_v54, %v506_v61  ;;  %v604_v6 = vmax.f32 %v580_v55, %v589_v46  ;;  %v579_v29 = vld [vmem:[#allocation2 + $0x290] ss:$2 sm:$0xff] }
  0x3e   : > { %v526_v59 = vld [vmem:[#allocation2 + $0x1c9] ss:$2 sm:$0xff]  ;;  %v528_v60 = vld [vmem:[#allocation2 + $0x219] ss:$2 sm:$0xff]  ;;  %v584_v63 = vmax.f32 %v560_v50, %v573_v51  ;;  %v605_v7 = vmax.f32 %v581_v56, %v591_v47  ;;  %v606_v8 = vmax.f32 %v582_v57, %v593_v48  ;;  %v607_v9 = vmax.f32 %v583_v58, %v595_v62 }
  0x3f   : > { %v597_v0 = vld [vmem:[#allocation2 + $0x1a1] ss:$2 sm:$0xff]  ;;  %v536_v2 = vmax.f32 %v512_v52, %v526_v59  ;;  %v537_v4 = vmax.f32 %v513_v53, %v528_v60  ;;  %v612_v18 = vpack.c.bf16 %v604_v6, %v604_v6  ;;  %v599_v27 = vld [vmem:[#allocation2 + $0x1f1] ss:$2 sm:$0xff] }
  0x40   : > { %v553_v11 = vld [vmem:[#allocation2 + $0x23f] ss:$2 sm:$0xff]  ;;  %v608_v14 = vmax.f32 %v584_v63, %v597_v0  ;;  %v613_v19 = vpack.c.bf16 %v605_v7, %v605_v7  ;;  %v614_v20 = vpack.c.bf16 %v606_v8, %v606_v8  ;;  %v615_v1 = vpack.c.bf16 %v607_v9, %v607_v9 }
  0x41   : > { %v530_v12 = vld [vmem:[#allocation2 + $0x269] ss:$2 sm:$0xff]  ;;  %v561_v15 = vmax.f32 %v536_v2, %v551_v3  ;;  %v562_v16 = vmax.f32 %v537_v4, %v553_v11  ;;  %621 = vst.msk [vmem:[%s1034_s26] sm:$0xf] %vm620_vm2, %v612_v18 }
  0x42   : > { %v538_v17 = vmax.f32 %v514_v5, %v530_v12  ;;  %v616_v23 = vpack.c.bf16 %v608_v14, %v608_v14  ;;  %622 = vst.msk [vmem:[%s1034_s26 + $0x4] sm:$0xf] %vm620_vm2, %v613_v19  ;;  %623 = vst.msk [vmem:[%s1034_s26 + $0x8] sm:$0xf] %vm620_vm2, %v614_v20  ;;  %v601_v28 = vld [vmem:[#allocation2 + $0x241] ss:$2 sm:$0xff] }
  0x43   : > { %v585_v24 = vmax.f32 %v561_v15, %v575_v21  ;;  %v586_v25 = vmax.f32 %v562_v16, %v577_v22  ;;  %624 = vst.msk [vmem:[%s1034_s26 + $0xc] sm:$0xf] %vm620_vm2, %v615_v1  ;;  %v603_v33 = vld [vmem:[#allocation2 + $0x291] ss:$2 sm:$0xff] }
  0x44   : > { %v563_v26 = vmax.f32 %v538_v17, %v555_v13  ;;  %625 = vst.msk [vmem:[%s1034_s26 + $0x10] sm:$0xf] %vm620_vm2, %v616_v23 }
  0x45   : > { %v609_v30 = vmax.f32 %v585_v24, %v599_v27  ;;  %v610_v31 = vmax.f32 %v586_v25, %v601_v28 }
  0x46   : > { %v587_v32 = vmax.f32 %v563_v26, %v579_v29 }
  0x47   : > { %v617_v34 = vpack.c.bf16 %v609_v30, %v609_v30  ;;  %v618_v35 = vpack.c.bf16 %v610_v31, %v610_v31 }
  0x48   : > { %v611_v36 = vmax.f32 %v587_v32, %v603_v33 }
  0x49   : > { %626 = vst.msk [vmem:[%s1034_s26 + $0x14] sm:$0xf] %vm620_vm2, %v617_v34  ;;  %627 = vst.msk [vmem:[%s1034_s26 + $0x18] sm:$0xf] %vm620_vm2, %v618_v35 }
  0x4a   : > { %v619_v37 = vpack.c.bf16 %v611_v36, %v611_v36 }
  0x4c   : > { %628 = vst.msk [vmem:[%s1034_s26 + $0x1c] sm:$0xf] %vm620_vm2, %v619_v37 }
  0x4d PF: > { %s13_s12 = sadd.s32 1, %s841_s12  }
  0x4e   : > { %p10_p4 = scmp.ge.s32.totalorder %s13_s12, 4  }
  0x50   :  { %12 = sbr.rel (!%p10_p4) target bundleno = 1 (0x1), region = 136 }

// kernel: forward.7
= control target key start
LH: loop header
LB: loop body
LE: loop exit
PB: predicated region body
PF: predicated region fallthrough
CT: control target
= control target key end

     0   :  { %s4294_s18 = smov 0   ;;  %s5105_s0 = inlined_call_operand.vmem [shape: bf16[2,19,16,21], index: 0, kind: input, shape index: {}]   ;;  %s5106_s1 = inlined_call_operand.vmem [shape: bf16[2,19,16,21], index: 1, kind: input, shape index: {}]   ;;  %s5107_s2 = inlined_call_operand.vmem [shape: bf16[7,21,64], index: 2, kind: input, shape index: {}]   ;;  %s5108_s3 = inlined_call_operand.vmem [shape: bf16[2,16,16,64], index: 3, kind: output, shape index: {0}]   ;;  %s5109_s4 = inlined_call_operand.vmem [shape: f32[2,1,64], index: 4, kind: output, shape index: {1}]   ;;  %s5110_s5 = inlined_call_operand.vmem [shape: f32[2,1,64], index: 5, kind: output, shape index: {2}]  }
   0x1 LB: > { %s3245_s19 = sadd.s32 4294967295, %s4261_s18   ;;  %p3249_p0 = scmp.ge.s32.totalorder %s4261_s18, 1  ;;  %s4261_s18 = sphi %s4294_s18, %s16_s18  }
   0x2   : > { %p202_p1 = scmp.lt.s32.totalorder %s4261_s18, 3 }
   0x4   : > { %p203_p2 = pnand %p3249_p0, %p202_p1 }
   0x6   : > { %206 = sbr.rel (%p203_p2) target bundleno = 466 (0x1d2), region = 32 }
   0xb   : > { %v4129_v0 = vld [vmem:[%s5107_s2 + $0x14] ss:$0 sps:$4 sm:$0x77]   ;;  %vm472_vm0 = vcmask 1041408   ;;  %vm473_vm1 = vcmask 1042432   ;;  %v4263_v1 = vmov 65535  }
   0xc   : > { %v474_v2 = vsel %vm472_vm0, 4294967295, %v4263_v1  ;;  %v4130_v3 = vld [vmem:[%s5107_s2 + $0xc] sm:$0xff]   ;;  %p241_p3 = scmp.lt.s32.totalorder %s3245_s19, 1  ;;  %v4135_v5 = vld [vmem:[%s5107_s2 + $0x8] ss:$0 sps:$4 sm:$0x77]  }
   0xd   : > { %v4308_v4 = vsel %vm473_vm1, %v474_v2, 0  ;;  %v4136_v7 = vld [vmem:[%s5107_s2 + $0x20] ss:$0 sps:$4 sm:$0x77]   ;;  %vm423_vm2 = vcmask 171008   ;;  %v4146_v16 = vld [vmem:[%s5107_s2 + $0x18] sm:$0xff]  }
   0xe   : > { %v477_v6 = vand.u32 %v4129_v0, %v4308_v4  ;;  %s5180_s19 = smov (!%p241_p3, %s3245_s19), 1  ;;  %v778_v9 = vand.u32 %v4135_v5, %v4308_v4  ;;  %v1116_v10 = vand.u32 %v4136_v7, %v4308_v4  ;;  %v4155_v12 = vld [vmem:[%s5107_s2 + $0x2c] ss:$0 sps:$4 sm:$0x77]   ;;  %v4145_v15 = vld [vmem:[%s5107_s2] sm:$0xff]   ;;  %v4174_v38 = vld [vmem:[%s5107_s2 + $0x30] sm:$0xff]  }
   0xf   : > { %s4119_s28 = smul.u32 152, %s5180_s19  ;;  %v4156_v13 = vld [vmem:[%s5107_s2 + $0x38] ss:$0 sps:$4 sm:$0x77]   ;;  %v1486_v21 = vand.u32 %v4155_v12, %v4308_v4  ;;  %v4173_v37 = vld [vmem:[%s5107_s2 + $0x24] sm:$0xff]   ;;  %v4209_v12 = vld [vmem:[%s5107_s2 + $0x3c] sm:$0xff]   ;;  %s258_s13 = scalar_lea.vmem %s5109_s4, %s5180_s19 }
  0x10   : > { %3863 = vmatprep.subr.bf16.mxu0 %v477_v6  ;;  %4115 = vmatprep.subr.bf16.mxu1 %v477_v6  ;;  %v1856_v22 = vand.u32 %v4156_v13, %v4308_v4  ;;  %v4191_v48 = vld [vmem:[%s5107_s2 + $0x44] ss:$0 sps:$4 sm:$0x77]   ;;  %v4192_v49 = vld [vmem:[%s5107_s2 + $0x50] ss:$0 sps:$4 sm:$0x77]   ;;  %s261_s16 = scalar_lea.vmem %s5110_s5, %s5180_s19 }
  0x11   : > { %3864 = vmatpush3.bf16.msra.mxu0 %v477_v6  ;;  %4117 = vmatpush3.bf16.msra.mxu1 %v477_v6  ;;  %s4325_s6 = scalar_lea.vmem %s5106_s1, %s4119_s28  ;;  %s4368_s17 = scalar_lea.vmem %s5105_s0, %s4119_s28  ;;  %v2226_v52 = vand.u32 %v4191_v48, %v4308_v4  ;;  %v2596_v53 = vand.u32 %v4192_v49, %v4308_v4  ;;  %v4210_v13 = vld [vmem:[%s5107_s2 + $0x48] sm:$0xff]   ;;  %vm2919_vm3 = vcmask 519168   ;;  %vm2952_vm4 = vcmask 523264  }
  0x12   : > { %3865 = vmatprep.subr.bf16.mxu0 %v4130_v3  ;;  %4116 = vmatprep.subr.bf16.mxu1 %v4130_v3  ;;  %v4131_v8 = vld [vmem:[%s4325_s6] sm:$0xff]   ;;  %v4133_v14 = vld [vmem:[%s4325_s6 + $0x8] sm:$0xff]   ;;  %v4137_v18 = vld [vmem:[%s4325_s6 + $0x10] sm:$0xff]   ;;  %vm3125_vm5 = vcmask 516096  }
  0x13   : > { %v4132_v11 = vld [vmem:[%s4325_s6 + $0x40] sm:$0xff]   ;;  %3867 = vmatprep.mubr.msk.bf16.mxu0 %vm423_vm2, %v4131_v8  ;;  %v4134_v17 = vld [vmem:[%s4325_s6 + $0x48] sm:$0xff]   ;;  %v4138_v19 = vld [vmem:[%s4325_s6 + $0x50] sm:$0xff]  }
  0x14   : > { %3883 = vmatprep.mubr.msk.bf16.mxu1 %vm423_vm2, %v4132_v11  ;;  %v4139_v20 = vld [vmem:[%s4325_s6 + $0x18] sm:$0xff]   ;;  %v4141_v24 = vld [vmem:[%s4325_s6 + $0x20] sm:$0xff]   ;;  %v4143_v26 = vld [vmem:[%s4325_s6 + $0x28] sm:$0xff]  }
  0x15   : > { %3866 = vmatpush3.bf16.msra.mxu0 %v4130_v3  ;;  %4118 = vmatpush3.bf16.msra.mxu1 %v4130_v3  ;;  %v4140_v23 = vld [vmem:[%s4325_s6 + $0x58] sm:$0xff]   ;;  %v4142_v25 = vld [vmem:[%s4325_s6 + $0x60] sm:$0xff]   ;;  %v4144_v27 = vld [vmem:[%s4325_s6 + $0x68] sm:$0xff]  }
  0x16   : > { %3899 = vmatprep.subr.bf16.mxu1 %v778_v9  ;;  %3935 = vmatprep.subr.bf16.mxu0 %v1116_v10  ;;  %v4147_v28 = vld [vmem:[%s4325_s6 + $0x30] sm:$0xff]   ;;  %v4149_v30 = vld [vmem:[%s4325_s6 + $0x38] sm:$0xff]   ;;  %v4151_v32 = vld [vmem:[%s4368_s17] sm:$0xff]  }
  0x17   : > { %v4148_v29 = vld [vmem:[%s4325_s6 + $0x70] sm:$0xff]   ;;  %v4150_v31 = vld [vmem:[%s4325_s6 + $0x78] sm:$0xff]   ;;  %v4152_v33 = vld [vmem:[%s4368_s17 + $0x8] sm:$0xff]  }
  0x18   : > { %3868 = vmatmul.mubr.msk.bf16.vlgmr.msra.gmra.mxu0 %vm423_vm2, %v4133_v14  ;;  %3884 = vmatmul.mubr.msk.bf16.vlgmr.msra.gmra.mxu1 %vm423_vm2, %v4134_v17  ;;  %v4153_v34 = vld [vmem:[%s4368_s17 + $0x8] sm:$0xff]   ;;  %v4154_v35 = vld [vmem:[%s4368_s17 + $0x10] sm:$0xff]   ;;  %v4158_v39 = vld [vmem:[%s4368_s17 + $0x18] sm:$0xff]  }
  0x19   : > { %3900 = vmatpush3.bf16.msra.mxu1 %v778_v9  ;;  %3936 = vmatpush3.bf16.msra.mxu0 %v1116_v10  ;;  %v4157_v36 = vld [vmem:[%s4368_s17 + $0x10] sm:$0xff]   ;;  %v4159_v40 = vld [vmem:[%s4368_s17 + $0x18] sm:$0xff]   ;;  %v4160_v41 = vld [vmem:[%s4368_s17 + $0x20] sm:$0xff]  }
  0x1a   : > { %3871 = vmatprep.mubr.msk.bf16.mxu0 %vm423_vm2, %v4137_v18  ;;  %3887 = vmatprep.mubr.msk.bf16.mxu1 %vm423_vm2, %v4138_v19  ;;  %v4161_v42 = vld [vmem:[%s4368_s17 + $0x20] sm:$0xff]   ;;  %v4162_v43 = vld [vmem:[%s4368_s17 + $0x28] sm:$0xff]   ;;  %v4164_v45 = vld [vmem:[%s4368_s17 + $0x30] sm:$0xff]  }
  0x1b   : > { %3901 = vmatprep.subr.bf16.mxu1 %v4145_v15  ;;  %3937 = vmatprep.subr.bf16.mxu0 %v4146_v16  ;;  %v4163_v44 = vld [vmem:[%s4368_s17 + $0x28] sm:$0xff]   ;;  %v4165_v46 = vld [vmem:[%s4368_s17 + $0x30] sm:$0xff]   ;;  %v4166_v47 = vld [vmem:[%s4368_s17 + $0x38] sm:$0xff]  }
  0x1c   : > { %v4167_v50 = vld [vmem:[%s4368_s17 + $0x38] sm:$0xff]   ;;  %v4168_v51 = vld [vmem:[%s4368_s17 + $0x40] sm:$0xff]   ;;  %v4170_v55 = vld [vmem:[%s4368_s17 + $0x48] sm:$0xff]  }
  0x1d   : > { %3902 = vmatpush3.bf16.msra.mxu1 %v4145_v15  ;;  %3938 = vmatpush3.bf16.msra.mxu0 %v4146_v16  ;;  %v4169_v54 = vld [vmem:[%s4368_s17 + $0x40] sm:$0xff]   ;;  %v4171_v56 = vld [vmem:[%s4368_s17 + $0x48] sm:$0xff]   ;;  %v4172_v57 = vld [vmem:[%s4368_s17 + $0x50] sm:$0xff]  }
  0x1e   : > { %3971 = vmatprep.subr.bf16.mxu1 %v1486_v21  ;;  %4007 = vmatprep.subr.bf16.mxu0 %v1856_v22  ;;  %v4175_v58 = vld [vmem:[%s4368_s17 + $0x50] sm:$0xff]   ;;  %v4176_v59 = vld [vmem:[%s4368_s17 + $0x58] sm:$0xff]   ;;  %v4178_v61 = vld [vmem:[%s4368_s17 + $0x60] sm:$0xff]  }
  0x1f   : > { %v4177_v60 = vld [vmem:[%s4368_s17 + $0x58] sm:$0xff]   ;;  %v4179_v62 = vld [vmem:[%s4368_s17 + $0x60] sm:$0xff]   ;;  %v4180_v63 = vld [vmem:[%s4368_s17 + $0x68] sm:$0xff]  }
  0x20   : > { %3872 = vmatmul.mubr.msk.bf16.gmra.mxu0 %vm423_vm2, %v4139_v20  ;;  %3888 = vmatmul.mubr.msk.bf16.gmra.mxu1 %vm423_vm2, %v4140_v23  ;;  %v4181_v0 = vld [vmem:[%s4368_s17 + $0x68] sm:$0xff]   ;;  %v4182_v1 = vld [vmem:[%s4368_s17 + $0x70] sm:$0xff]   ;;  %v4184_v3 = vld [vmem:[%s4368_s17 + $0x78] sm:$0xff]  }
  0x21   : > { %3875 = vmatprep.mubr.msk.bf16.mxu0 %vm423_vm2, %v4141_v24  ;;  %3891 = vmatprep.mubr.msk.bf16.mxu1 %vm423_vm2, %v4142_v25  ;;  %v4183_v2 = vld [vmem:[%s4368_s17 + $0x70] sm:$0xff]   ;;  %v4185_v4 = vld [vmem:[%s4368_s17 + $0x78] sm:$0xff]   ;;  %v4186_v5 = vld [vmem:[%s4368_s17 + $0x80] sm:$0xff]  }
  0x22   : > { %v4187_v6 = vld [vmem:[%s4325_s6 + $0x8] sm:$0xff]   ;;  %v4188_v7 = vld [vmem:[%s4368_s17 + $0x10] sm:$0xff]   ;;  %v4190_v9 = vld [vmem:[%s4368_s17 + $0x18] sm:$0xff]  }
  0x23   : > { %v4189_v8 = vld [vmem:[%s4325_s6 + $0x10] sm:$0xff]   ;;  %v4193_v10 = vld [vmem:[%s4325_s6 + $0x18] sm:$0xff]   ;;  %v4194_v11 = vld [vmem:[%s4368_s17 + $0x20] sm:$0xff]  }
  0x24   : > { %v4195_v14 = vld [vmem:[%s4325_s6 + $0x20] sm:$0xff]   ;;  %v4196_v15 = vld [vmem:[%s4368_s17 + $0x28] sm:$0xff]   ;;  %v4198_v17 = vld [vmem:[%s4368_s17 + $0x30] sm:$0xff]  }
  0x25   : > { %v4197_v16 = vld [vmem:[%s4325_s6 + $0x28] sm:$0xff]   ;;  %v4199_v18 = vld [vmem:[%s4325_s6 + $0x30] sm:$0xff]   ;;  %v4200_v19 = vld [vmem:[%s4368_s17 + $0x38] sm:$0xff]  }
  0x26   : > { %v4201_v20 = vld [vmem:[%s4325_s6 + $0x38] sm:$0xff]   ;;  %v4204_v23 = vld [vmem:[%s4368_s17 + $0x48] sm:$0xff]   ;;  %v4206_v25 = vld [vmem:[%s4368_s17 + $0x50] sm:$0xff]  }
  0x27   : > { %v4205_v24 = vld [vmem:[%s4325_s6 + $0x48] sm:$0xff]   ;;  %v4231_v48 = vld [vmem:[%s4325_s6 + $0x30] sm:$0xff]   ;;  %v4232_v49 = vld [vmem:[%s4368_s17 + $0x38] sm:$0xff]  }
  0x28   : > { %3876 = vmatmul.mubr.msk.bf16.gmra.mxu0 %vm423_vm2, %v4143_v26  ;;  %3892 = vmatmul.mubr.msk.bf16.gmra.mxu1 %vm423_vm2, %v4144_v27  ;;  %v4207_v26 = vld [vmem:[%s4325_s6 + $0x50] sm:$0xff]   ;;  %v4208_v27 = vld [vmem:[%s4368_s17 + $0x58] sm:$0xff]  }
  0x29   : > { %3879 = vmatprep.mubr.msk.bf16.mxu0 %vm423_vm2, %v4147_v28  ;;  %3895 = vmatprep.mubr.msk.bf16.mxu1 %vm423_vm2, %v4148_v29  ;;  %v4211_v28 = vld [vmem:[%s4325_s6 + $0x58] sm:$0xff]   ;;  %v4212_v29 = vld [vmem:[%s4368_s17 + $0x60] sm:$0xff]  }
  0x30   : > { %3880 = vmatmul.mubr.msk.bf16.gmra.mxu0 %vm423_vm2, %v4149_v30  ;;  %3896 = vmatmul.mubr.msk.bf16.gmra.mxu1 %vm423_vm2, %v4150_v31  ;;  %v4213_v30 = vld [vmem:[%s4325_s6 + $0x60] sm:$0xff]   ;;  %v4214_v31 = vld [vmem:[%s4368_s17 + $0x68] sm:$0xff]  }
  0x31   : > { %3903 = vmatprep.mubr.msk.bf16.mxu1 %vm423_vm2, %v4151_v32  ;;  %3939 = vmatprep.mubr.msk.bf16.mxu0 %vm423_vm2, %v4152_v33  ;;  %v4215_v32 = vld [vmem:[%s4325_s6 + $0x68] sm:$0xff]   ;;  %v4216_v33 = vld [vmem:[%s4368_s17 + $0x70] sm:$0xff]  }
  0x38   : > { %3904 = vmatmul.mubr.msk.bf16.vlgmr.msra.gmra.mxu1 %vm423_vm2, %v4153_v34  ;;  %3940 = vmatmul.mubr.msk.bf16.vlgmr.msra.gmra.mxu0 %vm423_vm2, %v4154_v35  ;;  %v4217_v34 = vld [vmem:[%s4325_s6 + $0x70] sm:$0xff]   ;;  %v4218_v35 = vld [vmem:[%s4368_s17 + $0x78] sm:$0xff]  }
  0x39   : > { %3972 = vmatpush3.bf16.msra.mxu1 %v1486_v21  ;;  %4008 = vmatpush3.bf16.msra.mxu0 %v1856_v22  ;;  %v4202_v21 = vld [vmem:[%s4368_s17 + $0x40] sm:$0xff]  }
  0x3a   : > { %3907 = vmatprep.mubr.msk.bf16.mxu1 %vm423_vm2, %v4157_v36  ;;  %3943 = vmatprep.mubr.msk.bf16.mxu0 %vm423_vm2, %v4158_v39  ;;  %v4203_v22 = vld [vmem:[%s4325_s6 + $0x40] sm:$0xff]   ;;  %v4219_v36 = vld [vmem:[%s4325_s6 + $0x78] sm:$0xff]   ;;  %v4222_v39 = vld [vmem:[%s4368_s17 + $0x88] sm:$0xff]  }
  0x3b   : > { %3973 = vmatprep.subr.bf16.mxu1 %v4173_v37  ;;  %4009 = vmatprep.subr.bf16.mxu0 %v4174_v38 }
  0x3d   : > { %3974 = vmatpush3.bf16.msra.mxu1 %v4173_v37  ;;  %4010 = vmatpush3.bf16.msra.mxu0 %v4174_v38  ;;  %v4220_v37 = vld [vmem:[%s4368_s17 + $0x80] sm:$0xff]  }
  0x3e   : > { %4043 = vmatprep.subr.bf16.mxu1 %v2226_v52  ;;  %4079 = vmatprep.subr.bf16.mxu0 %v2596_v53  ;;  %v4221_v38 = vld [vmem:[%s4325_s6 + $0x80] sm:$0xff]  }
  0x40   : > { %3908 = vmatmul.mubr.msk.bf16.gmra.mxu1 %vm423_vm2, %v4159_v40  ;;  %3944 = vmatmul.mubr.msk.bf16.gmra.mxu0 %vm423_vm2, %v4160_v41  ;;  %v4223_v40 = vld [vmem:[%s4325_s6 + $0x10] sm:$0xff]   ;;  %v4224_v41 = vld [vmem:[%s4368_s17 + $0x18] sm:$0xff]  }
  0x41   : > { %3911 = vmatprep.mubr.msk.bf16.mxu1 %vm423_vm2, %v4161_v42  ;;  %3947 = vmatprep.mubr.msk.bf16.mxu0 %vm423_vm2, %v4162_v43  ;;  %v4225_v42 = vld [vmem:[%s4325_s6 + $0x18] sm:$0xff]   ;;  %v4226_v43 = vld [vmem:[%s4368_s17 + $0x20] sm:$0xff]  }
  0x48   : > { %3912 = vmatmul.mubr.msk.bf16.gmra.mxu1 %vm423_vm2, %v4163_v44  ;;  %3948 = vmatmul.mubr.msk.bf16.gmra.mxu0 %vm423_vm2, %v4164_v45  ;;  %v4227_v44 = vld [vmem:[%s4325_s6 + $0x20] sm:$0xff]   ;;  %v4228_v45 = vld [vmem:[%s4368_s17 + $0x28] sm:$0xff]  }
  0x49   : > { %3915 = vmatprep.mubr.msk.bf16.mxu1 %vm423_vm2, %v4165_v46  ;;  %3951 = vmatprep.mubr.msk.bf16.mxu0 %vm423_vm2, %v4166_v47  ;;  %v4229_v46 = vld [vmem:[%s4325_s6 + $0x28] sm:$0xff]   ;;  %v4230_v47 = vld [vmem:[%s4368_s17 + $0x30] sm:$0xff]  }
  0x50   : > { %3916 = vmatmul.mubr.msk.bf16.gmra.mxu1 %vm423_vm2, %v4167_v50  ;;  %3952 = vmatmul.mubr.msk.bf16.gmra.mxu0 %vm423_vm2, %v4168_v51  ;;  %v4233_v50 = vld [vmem:[%s4325_s6 + $0x38] sm:$0xff]   ;;  %v4234_v51 = vld [vmem:[%s4368_s17 + $0x40] sm:$0xff]  }
  0x51   : > { %3919 = vmatprep.mubr.msk.bf16.mxu1 %vm423_vm2, %v4169_v54  ;;  %3955 = vmatprep.mubr.msk.bf16.mxu0 %vm423_vm2, %v4170_v55  ;;  %v4237_v54 = vld [vmem:[%s4325_s6 + $0x48] sm:$0xff]   ;;  %v4238_v55 = vld [vmem:[%s4368_s17 + $0x50] sm:$0xff]  }
  0x58   : > { %3920 = vmatmul.mubr.msk.bf16.gmra.mxu1 %vm423_vm2, %v4171_v56  ;;  %3956 = vmatmul.mubr.msk.bf16.gmra.mxu0 %vm423_vm2, %v4172_v57  ;;  %v4239_v56 = vld [vmem:[%s4325_s6 + $0x50] sm:$0xff]   ;;  %v4240_v57 = vld [vmem:[%s4368_s17 + $0x58] sm:$0xff]  }
  0x59   : > { %3923 = vmatprep.mubr.msk.bf16.mxu1 %vm423_vm2, %v4175_v58  ;;  %3959 = vmatprep.mubr.msk.bf16.mxu0 %vm423_vm2, %v4176_v59  ;;  %v4241_v58 = vld [vmem:[%s4325_s6 + $0x58] sm:$0xff]   ;;  %v4242_v59 = vld [vmem:[%s4368_s17 + $0x60] sm:$0xff]  }
  0x60   : > { %3924 = vmatmul.mubr.msk.bf16.gmra.mxu1 %vm423_vm2, %v4177_v60  ;;  %3960 = vmatmul.mubr.msk.bf16.gmra.mxu0 %vm423_vm2, %v4178_v61  ;;  %v4243_v60 = vld [vmem:[%s4325_s6 + $0x60] sm:$0xff]   ;;  %v4244_v61 = vld [vmem:[%s4368_s17 + $0x68] sm:$0xff]  }
  0x61   : > { %3927 = vmatprep.mubr.msk.bf16.mxu1 %vm423_vm2, %v4179_v62  ;;  %3963 = vmatprep.mubr.msk.bf16.mxu0 %vm423_vm2, %v4180_v63 }
  0x68   : > { %3928 = vmatmul.mubr.msk.bf16.gmra.mxu1 %vm423_vm2, %v4181_v0  ;;  %3964 = vmatmul.mubr.msk.bf16.gmra.mxu0 %vm423_vm2, %v4182_v1 }
  0x69   : > { %3931 = vmatprep.mubr.msk.bf16.mxu1 %vm423_vm2, %v4183_v2  ;;  %3967 = vmatprep.mubr.msk.bf16.mxu0 %vm423_vm2, %v4184_v3 }
  0x70   : > { %3932 = vmatmul.mubr.msk.bf16.gmra.mxu1 %vm423_vm2, %v4185_v4  ;;  %3968 = vmatmul.mubr.msk.bf16.gmra.mxu0 %vm423_vm2, %v4186_v5  ;;  %v4245_v4 = vld [vmem:[%s4325_s6 + $0x68] sm:$0xff]   ;;  %v4246_v5 = vld [vmem:[%s4368_s17 + $0x70] sm:$0xff]  }
  0x71   : > { %3975 = vmatprep.mubr.msk.bf16.mxu1 %vm423_vm2, %v4187_v6  ;;  %4011 = vmatprep.mubr.msk.bf16.mxu0 %vm423_vm2, %v4188_v7  ;;  %v4247_v6 = vld [vmem:[%s4325_s6 + $0x70] sm:$0xff]   ;;  %v4248_v7 = vld [vmem:[%s4368_s17 + $0x78] sm:$0xff]  }
  0x78   : > { %3976 = vmatmul.mubr.msk.bf16.vlgmr.msra.gmra.mxu1 %vm423_vm2, %v4189_v8  ;;  %4012 = vmatmul.mubr.msk.bf16.vlgmr.msra.gmra.mxu0 %vm423_vm2, %v4190_v9 }
  0x79   : > { %4044 = vmatpush3.bf16.msra.mxu1 %v2226_v52  ;;  %4080 = vmatpush3.bf16.msra.mxu0 %v2596_v53  ;;  %v4235_v52 = vld [vmem:[%s4325_s6 + $0x40] sm:$0xff]   ;;  %v4236_v53 = vld [vmem:[%s4368_s17 + $0x48] sm:$0xff]  }
  0x7a   : > { %3979 = vmatprep.mubr.msk.bf16.mxu1 %vm423_vm2, %v4193_v10  ;;  %4015 = vmatprep.mubr.msk.bf16.mxu0 %vm423_vm2, %v4194_v11 }
  0x7b   : > { %4045 = vmatprep.subr.bf16.mxu1 %v4209_v12  ;;  %4081 = vmatprep.subr.bf16.mxu0 %v4210_v13 }
  0x7d   : > { %4046 = vmatpush3.bf16.msra.mxu1 %v4209_v12  ;;  %4082 = vmatpush3.bf16.msra.mxu0 %v4210_v13 }
  0x80   : > { %3980 = vmatmul.mubr.msk.bf16.gmra.mxu1 %vm423_vm2, %v4195_v14  ;;  %4016 = vmatmul.mubr.msk.bf16.gmra.mxu0 %vm423_vm2, %v4196_v15 }
  0x81   : > { %3983 = vmatprep.mubr.msk.bf16.mxu1 %vm423_vm2, %v4197_v16  ;;  %4019 = vmatprep.mubr.msk.bf16.mxu0 %vm423_vm2, %v4198_v17  ;;  %v4249_v16 = vld [vmem:[%s4325_s6 + $0x78] sm:$0xff]   ;;  %v4250_v17 = vld [vmem:[%s4368_s17 + $0x80] sm:$0xff]  }
  0x88   : > { %3984 = vmatmul.mubr.msk.bf16.gmra.mxu1 %vm423_vm2, %v4199_v18  ;;  %4020 = vmatmul.mubr.msk.bf16.gmra.mxu0 %vm423_vm2, %v4200_v19  ;;  %v4251_v18 = vld [vmem:[%s4325_s6 + $0x80] sm:$0xff]   ;;  %v4252_v19 = vld [vmem:[%s4368_s17 + $0x88] sm:$0xff]  }
  0x89   : > { %3987 = vmatprep.mubr.msk.bf16.mxu1 %vm423_vm2, %v4201_v20  ;;  %4023 = vmatprep.mubr.msk.bf16.mxu0 %vm423_vm2, %v4202_v21 }
  0x90   : > { %3988 = vmatmul.mubr.msk.bf16.gmra.mxu1 %vm423_vm2, %v4203_v22  ;;  %4024 = vmatmul.mubr.msk.bf16.gmra.mxu0 %vm423_vm2, %v4204_v23 }
  0x91   : > { %3991 = vmatprep.mubr.msk.bf16.mxu1 %vm423_vm2, %v4205_v24  ;;  %4027 = vmatprep.mubr.msk.bf16.mxu0 %vm423_vm2, %v4206_v25 }
  0x98   : > { %3992 = vmatmul.mubr.msk.bf16.gmra.mxu1 %vm423_vm2, %v4207_v26  ;;  %4028 = vmatmul.mubr.msk.bf16.gmra.mxu0 %vm423_vm2, %v4208_v27 }
  0x99   : > { %3995 = vmatprep.mubr.msk.bf16.mxu1 %vm423_vm2, %v4211_v28  ;;  %4031 = vmatprep.mubr.msk.bf16.mxu0 %vm423_vm2, %v4212_v29  ;;  %v4253_v28 = vld [vmem:[%s4325_s6 + $0x88] sm:$0xff]   ;;  %v4254_v29 = vld [vmem:[%s4368_s17 + $0x90] sm:$0xff]   ;;  %s3704_s6 = sshll.u32 %s5180_s19, 7 }
  0x9a   : > { %s4882_s10 = scalar_lea.vmem %s5108_s3, %s3704_s6 }
  0xa0   : > { %3996 = vmatmul.mubr.msk.bf16.gmra.mxu1 %vm423_vm2, %v4213_v30  ;;  %4032 = vmatmul.mubr.msk.bf16.gmra.mxu0 %vm423_vm2, %v4214_v31 }
  0xa1   : > { %3999 = vmatprep.mubr.msk.bf16.mxu1 %vm423_vm2, %v4215_v32  ;;  %4035 = vmatprep.mubr.msk.bf16.mxu0 %vm423_vm2, %v4216_v33 }
  0xa8   : > { %4000 = vmatmul.mubr.msk.bf16.gmra.mxu1 %vm423_vm2, %v4217_v34  ;;  %4036 = vmatmul.mubr.msk.bf16.gmra.mxu0 %vm423_vm2, %v4218_v35 }
  0xa9   : > { %4003 = vmatprep.mubr.msk.bf16.mxu1 %vm423_vm2, %v4219_v36  ;;  %4039 = vmatprep.mubr.msk.bf16.mxu0 %vm423_vm2, %v4220_v37 }
  0xb0   : > { %4004 = vmatmul.mubr.msk.bf16.gmra.mxu1 %vm423_vm2, %v4221_v38  ;;  %4040 = vmatmul.mubr.msk.bf16.gmra.mxu0 %vm423_vm2, %v4222_v39 }
  0xb1   : > { %4047 = vmatprep.mubr.msk.bf16.mxu1 %vm423_vm2, %v4223_v40  ;;  %4083 = vmatprep.mubr.msk.bf16.mxu0 %vm423_vm2, %v4224_v41 }
  0xb8   : > { %4048 = vmatmul.mubr.msk.bf16.vlgmr.msra.gmra.mxu1 %vm423_vm2, %v4225_v42  ;;  %4084 = vmatmul.mubr.msk.bf16.vlgmr.msra.gmra.mxu0 %vm423_vm2, %v4226_v43 }
  0xb9   : > { %4051 = vmatprep.mubr.msk.bf16.mxu1 %vm423_vm2, %v4227_v44  ;;  %4087 = vmatprep.mubr.msk.bf16.mxu0 %vm423_vm2, %v4228_v45 }
  0xc0   : > { %4052 = vmatmul.mubr.msk.bf16.gmra.mxu1 %vm423_vm2, %v4229_v46  ;;  %4088 = vmatmul.mubr.msk.bf16.gmra.mxu0 %vm423_vm2, %v4230_v47 }
  0xc1   : > { %4055 = vmatprep.mubr.msk.bf16.mxu1 %vm423_vm2, %v4231_v48  ;;  %4091 = vmatprep.mubr.msk.bf16.mxu0 %vm423_vm2, %v4232_v49 }
  0xc8   : > { %4056 = vmatmul.mubr.msk.bf16.gmra.mxu1 %vm423_vm2, %v4233_v50  ;;  %4092 = vmatmul.mubr.msk.bf16.gmra.mxu0 %vm423_vm2, %v4234_v51 }
  0xc9   : > { %4059 = vmatprep.mubr.msk.bf16.mxu1 %vm423_vm2, %v4235_v52  ;;  %4095 = vmatprep.mubr.msk.bf16.mxu0 %vm423_vm2, %v4236_v53 }
  0xd0   : > { %4060 = vmatmul.mubr.msk.bf16.gmra.mxu1 %vm423_vm2, %v4237_v54  ;;  %4096 = vmatmul.mubr.msk.bf16.gmra.mxu0 %vm423_vm2, %v4238_v55 }
  0xd1   : > { %4063 = vmatprep.mubr.msk.bf16.mxu1 %vm423_vm2, %v4239_v56  ;;  %4099 = vmatprep.mubr.msk.bf16.mxu0 %vm423_vm2, %v4240_v57 }
  0xd8   : > { %v3869_v62 = vpop.f32.mrf.mxu0  ;;  %v4570_v63 = vpop.f32.mrf.mxu1  ;;  %4064 = vmatmul.mubr.msk.bf16.gmra.mxu1 %vm423_vm2, %v4241_v58  ;;  %4100 = vmatmul.mubr.msk.bf16.gmra.mxu0 %vm423_vm2, %v4242_v59 }
  0xd9   : > { %4067 = vmatprep.mubr.msk.bf16.mxu1 %vm423_vm2, %v4243_v60  ;;  %4103 = vmatprep.mubr.msk.bf16.mxu0 %vm423_vm2, %v4244_v61 }
  0xda   : > { %v513_v0 = vpop.f32.mrf.mxu0  ;;  %v4576_v1 = vpop.f32.mrf.mxu1 }
  0xdc   : > { %v3870_v2 = vpop.f32.mrf.mxu0  ;;  %v4578_v3 = vpop.f32.mrf.mxu1 }
  0xde   : > { %v516_v8 = vpop.f32.mrf.mxu0  ;;  %v4584_v9 = vpop.f32.mrf.mxu1 }
  0xe0   : > { %v3873_v10 = vpop.f32.mrf.mxu0  ;;  %v4586_v11 = vpop.f32.mrf.mxu1  ;;  %4068 = vmatmul.mubr.msk.bf16.gmra.mxu1 %vm423_vm2, %v4245_v4  ;;  %4104 = vmatmul.mubr.msk.bf16.gmra.mxu0 %vm423_vm2, %v4246_v5 }
  0xe1   : > { %4071 = vmatprep.mubr.msk.bf16.mxu1 %vm423_vm2, %v4247_v6  ;;  %4107 = vmatprep.mubr.msk.bf16.mxu0 %vm423_vm2, %v4248_v7 }
  0xe2   : > { %v529_v12 = vpop.f32.mrf.mxu0  ;;  %v4592_v13 = vpop.f32.mrf.mxu1 }
  0xe4   : > { %v3874_v14 = vpop.f32.mrf.mxu0  ;;  %v4594_v15 = vpop.f32.mrf.mxu1 }
  0xe6   : > { %v532_v20 = vpop.f32.mrf.mxu0  ;;  %v4600_v21 = vpop.f32.mrf.mxu1 }
  0xe8   : > { %v3877_v22 = vpop.f32.mrf.mxu0  ;;  %v4602_v23 = vpop.f32.mrf.mxu1  ;;  %4072 = vmatmul.mubr.msk.bf16.gmra.mxu1 %vm423_vm2, %v4249_v16  ;;  %4108 = vmatmul.mubr.msk.bf16.gmra.mxu0 %vm423_vm2, %v4250_v17 }
  0xe9   : > { %4075 = vmatprep.mubr.msk.bf16.mxu1 %vm423_vm2, %v4251_v18  ;;  %4111 = vmatprep.mubr.msk.bf16.mxu0 %vm423_vm2, %v4252_v19 }
  0xea   : > { %v545_v24 = vpop.f32.mrf.mxu0  ;;  %v4608_v25 = vpop.f32.mrf.mxu1 }
  0xec   : > { %v3878_v26 = vpop.f32.mrf.mxu0  ;;  %v4610_v27 = vpop.f32.mrf.mxu1 }
  0xee   : > { %v548_v30 = vpop.f32.mrf.mxu0  ;;  %v4614_v31 = vpop.f32.mrf.mxu1 }
  0xf0   : > { %v3881_v32 = vpop.f32.mrf.mxu0  ;;  %v4616_v33 = vpop.f32.mrf.mxu1  ;;  %4076 = vmatmul.mubr.msk.bf16.gmra.mxu1 %vm423_vm2, %v4253_v28  ;;  %4112 = vmatmul.mubr.msk.bf16.gmra.mxu0 %vm423_vm2, %v4254_v29 }
  0xf2   : > { %v561_v34 = vpop.f32.mrf.mxu0  ;;  %v4620_v35 = vpop.f32.mrf.mxu1 }
  0xf4   : > { %v3882_v36 = vpop.f32.mrf.mxu0  ;;  %v4622_v37 = vpop.f32.mrf.mxu1 }
  0xf6   : > { %v4624_v38 = vpop.f32.mrf.mxu0  ;;  %v4626_v39 = vpop.f32.mrf.mxu1 }
  0xf8   : > { %v3905_v40 = vpop.f32.mrf.mxu1  ;;  %v3941_v41 = vpop.f32.mrf.mxu0 }
  0xf9   : > { %v823_v42 = vadd.f32 %v3905_v40, %v3869_v62 }
  0xfa   : > { %v814_v43 = vpop.f32.mrf.mxu1  ;;  %v1152_v44 = vpop.f32.mrf.mxu0 }
  0xfb   : > { %v4628_v45 = vadd.f32 %v3941_v41, %v823_v42  ;;  %v815_v46 = vadd.f32 %v814_v43, %v513_v0 }
  0xfc   : > { %v3906_v47 = vpop.f32.mrf.mxu1  ;;  %v3942_v48 = vpop.f32.mrf.mxu0 }
  0xfd   : > { %v4630_v49 = vadd.f32 %v1152_v44, %v815_v46  ;;  %v826_v50 = vadd.f32 %v3906_v47, %v3870_v2 }
  0xfe   : > { %v817_v51 = vpop.f32.mrf.mxu1  ;;  %v1155_v52 = vpop.f32.mrf.mxu0 }
  0xff   : > { %v4632_v53 = vadd.f32 %v3942_v48, %v826_v50  ;;  %v818_v54 = vadd.f32 %v817_v51, %v516_v8 }
 0x100   : > { %v3909_v55 = vpop.f32.mrf.mxu1  ;;  %v3945_v56 = vpop.f32.mrf.mxu0 }
 0x101   : > { %v4634_v57 = vadd.f32 %v1155_v52, %v818_v54  ;;  %v839_v58 = vadd.f32 %v3909_v55, %v3873_v10 }
 0x102   : > { %v830_v59 = vpop.f32.mrf.mxu1  ;;  %v1168_v60 = vpop.f32.mrf.mxu0 }
 0x103   : > { %v4636_v61 = vadd.f32 %v3945_v56, %v839_v58  ;;  %v831_v62 = vadd.f32 %v830_v59, %v529_v12 }
 0x104   : > { %v3910_v0 = vpop.f32.mrf.mxu1  ;;  %v3946_v4 = vpop.f32.mrf.mxu0 }
 0x105   : > { %v4638_v5 = vadd.f32 %v1168_v60, %v831_v62  ;;  %v842_v2 = vadd.f32 %v3910_v0, %v3874_v14 }
 0x106   : > { %v833_v6 = vpop.f32.mrf.mxu1  ;;  %v1171_v7 = vpop.f32.mrf.mxu0 }
 0x107   : > { %v4640_v16 = vadd.f32 %v3946_v4, %v842_v2  ;;  %v834_v8 = vadd.f32 %v833_v6, %v532_v20 }
 0x108   : > { %v3913_v17 = vpop.f32.mrf.mxu1  ;;  %v3949_v18 = vpop.f32.mrf.mxu0 }
 0x109   : > { %v4642_v19 = vadd.f32 %v1171_v7, %v834_v8  ;;  %v855_v10 = vadd.f32 %v3913_v17, %v3877_v22 }
 0x10a   : > { %v846_v28 = vpop.f32.mrf.mxu1  ;;  %v1184_v29 = vpop.f32.mrf.mxu0 }
 0x10b   : > { %v4644_v40 = vadd.f32 %v3949_v18, %v855_v10  ;;  %v847_v12 = vadd.f32 %v846_v28, %v545_v24 }
 0x10c   : > { %v3914_v41 = vpop.f32.mrf.mxu1  ;;  %v3950_v42 = vpop.f32.mrf.mxu0 }
 0x10d   : > { %v4646_v43 = vadd.f32 %v1184_v29, %v847_v12  ;;  %v858_v14 = vadd.f32 %v3914_v41, %v3878_v26 }
 0x10e   : > { %v849_v44 = vpop.f32.mrf.mxu1  ;;  %v1187_v46 = vpop.f32.mrf.mxu0 }
 0x10f   : > { %v4648_v47 = vadd.f32 %v3950_v42, %v858_v14  ;;  %v850_v20 = vadd.f32 %v849_v44, %v548_v30 }
 0x110   : > { %v3917_v48 = vpop.f32.mrf.mxu1  ;;  %v3953_v50 = vpop.f32.mrf.mxu0 }
 0x111   : > { %v4650_v51 = vadd.f32 %v1187_v46, %v850_v20  ;;  %v871_v22 = vadd.f32 %v3917_v48, %v3881_v32 }
 0x112   : > { %v862_v52 = vpop.f32.mrf.mxu1  ;;  %v1200_v54 = vpop.f32.mrf.mxu0 }
 0x113   : > { %v4652_v55 = vadd.f32 %v3953_v50, %v871_v22  ;;  %v863_v24 = vadd.f32 %v862_v52, %v561_v34 }
 0x114   : > { %v3918_v56 = vpop.f32.mrf.mxu1  ;;  %v3954_v58 = vpop.f32.mrf.mxu0 }
 0x115   : > { %v4654_v59 = vadd.f32 %v1200_v54, %v863_v24  ;;  %v874_v26 = vadd.f32 %v3918_v56, %v3882_v36 }
 0x116   : > { %v865_v60 = vpop.f32.mrf.mxu1  ;;  %v1203_v62 = vpop.f32.mrf.mxu0 }
 0x117   : > { %v4656_v0 = vadd.f32 %v3954_v58, %v874_v26  ;;  %v866_v30 = vadd.f32 %v865_v60, %v4624_v38 }
 0x118   : > { %v3921_v4 = vpop.f32.mrf.mxu1  ;;  %v3957_v2 = vpop.f32.mrf.mxu0 }
 0x119   : > { %v4659_v6 = vadd.f32 %v1203_v62, %v866_v30  ;;  %v887_v32 = vadd.f32 %v3921_v4, %v4570_v63 }
 0x11a   : > { %v878_v7 = vpop.f32.mrf.mxu1  ;;  %v1216_v8 = vpop.f32.mrf.mxu0 }
 0x11b   : > { %v4662_v34 = vadd.f32 %v3957_v2, %v887_v32  ;;  %v879_v17 = vadd.f32 %v878_v7, %v4576_v1 }
 0x11c   : > { %v3922_v18 = vpop.f32.mrf.mxu1  ;;  %v3958_v36 = vpop.f32.mrf.mxu0 }
 0x11d   : > { %v4665_v10 = vadd.f32 %v1216_v8, %v879_v17  ;;  %v890_v28 = vadd.f32 %v3922_v18, %v4578_v3 }
 0x11e   : > { %v881_v29 = vpop.f32.mrf.mxu1  ;;  %v1219_v38 = vpop.f32.mrf.mxu0 }
 0x11f   : > { %v4668_v12 = vadd.f32 %v3958_v36, %v890_v28  ;;  %v882_v41 = vadd.f32 %v881_v29, %v4584_v9 }
 0x120   : > { %v3925_v42 = vpop.f32.mrf.mxu1  ;;  %v3961_v63 = vpop.f32.mrf.mxu0 }
 0x121   : > { %v4671_v14 = vadd.f32 %v1219_v38, %v882_v41  ;;  %v903_v44 = vadd.f32 %v3925_v42, %v4586_v11 }
 0x122   : > { %v894_v46 = vpop.f32.mrf.mxu1  ;;  %v1232_v1 = vpop.f32.mrf.mxu0 }
 0x123   : > { %5111 = vst [vmem:[#allocation2_spill] sm:$0xff] %v4671_v14  ;;  %v4674_v20 = vadd.f32 %v3961_v63, %v903_v44  ;;  %v895_v48 = vadd.f32 %v894_v46, %v4592_v13 }
 0x124   : > { %v3926_v50 = vpop.f32.mrf.mxu1  ;;  %v3962_v3 = vpop.f32.mrf.mxu0 }
 0x125   : > { %5112 = vst [vmem:[#allocation3_spill] sm:$0xff] %v4674_v20  ;;  %v4677_v22 = vadd.f32 %v1232_v1, %v895_v48  ;;  %v906_v52 = vadd.f32 %v3926_v50, %v4594_v15 }
 0x126   : > { %v897_v54 = vpop.f32.mrf.mxu1  ;;  %v1235_v9 = vpop.f32.mrf.mxu0 }
 0x127   : > { %5113 = vst [vmem:[#allocation4_spill] sm:$0xff] %v4677_v22  ;;  %v4680_v24 = vadd.f32 %v3962_v3, %v906_v52  ;;  %v898_v56 = vadd.f32 %v897_v54, %v4600_v21 }
 0x128   : > { %v3929_v58 = vpop.f32.mrf.mxu1  ;;  %v3965_v11 = vpop.f32.mrf.mxu0 }
 0x129   : > { %5114 = vst [vmem:[#allocation5_spill] sm:$0xff] %v4680_v24  ;;  %v4683_v26 = vadd.f32 %v1235_v9, %v898_v56  ;;  %v919_v60 = vadd.f32 %v3929_v58, %v4602_v23 }
 0x12a   : > { %v910_v62 = vpop.f32.mrf.mxu1  ;;  %v1248_v13 = vpop.f32.mrf.mxu0 }
 0x12b   : > { %5115 = vst [vmem:[#allocation6_spill] sm:$0xff] %v4683_v26  ;;  %v4686_v30 = vadd.f32 %v3965_v11, %v919_v60  ;;  %v911_v4 = vadd.f32 %v910_v62, %v4608_v25 }
 0x12c   : > { %v3930_v2 = vpop.f32.mrf.mxu1  ;;  %v3966_v15 = vpop.f32.mrf.mxu0 }
 0x12d   : > { %5116 = vst [vmem:[#allocation7_spill] sm:$0xff] %v4686_v30  ;;  %v4689_v32 = vadd.f32 %v1248_v13, %v911_v4  ;;  %v922_v7 = vadd.f32 %v3930_v2, %v4610_v27 }
 0x12e   : > { %v913_v8 = vpop.f32.mrf.mxu1  ;;  %v1251_v21 = vpop.f32.mrf.mxu0 }
 0x12f   : > { %5117 = vst [vmem:[#allocation8_spill] sm:$0xff] %v4689_v32  ;;  %v4692_v17 = vadd.f32 %v3966_v15, %v922_v7  ;;  %v914_v18 = vadd.f32 %v913_v8, %v4614_v31 }
 0x130   : > { %v3933_v36 = vpop.f32.mrf.mxu1  ;;  %v3969_v23 = vpop.f32.mrf.mxu0 }
 0x131   : > { %5118 = vst [vmem:[#allocation9_spill] sm:$0xff] %v4692_v17  ;;  %v4695_v28 = vadd.f32 %v1251_v21, %v914_v18  ;;  %v935_v29 = vadd.f32 %v3933_v36, %v4616_v33 }
 0x132   : > { %v926_v38 = vpop.f32.mrf.mxu1  ;;  %v1264_v25 = vpop.f32.mrf.mxu0 }
 0x133   : > { %5119 = vst [vmem:[#allocation10_spill] sm:$0xff] %v4695_v28  ;;  %v4698_v41 = vadd.f32 %v3969_v23, %v935_v29  ;;  %v927_v42 = vadd.f32 %v926_v38, %v4620_v35 }
 0x134   : > { %v3934_v63 = vpop.f32.mrf.mxu1  ;;  %v3970_v27 = vpop.f32.mrf.mxu0 }
 0x135   : > { %5120 = vst [vmem:[#allocation11_spill] sm:$0xff] %v4698_v41  ;;  %v4701_v44 = vadd.f32 %v1264_v25, %v927_v42  ;;  %v938_v46 = vadd.f32 %v3934_v63, %v4622_v37 }
 0x136   : > { %v929_v1 = vpop.f32.mrf.mxu1  ;;  %v1267_v31 = vpop.f32.mrf.mxu0 }
 0x137   : > { %5121 = vst [vmem:[#allocation12_spill] sm:$0xff] %v4701_v44  ;;  %v4704_v48 = vadd.f32 %v3970_v27, %v938_v46  ;;  %v930_v50 = vadd.f32 %v929_v1, %v4626_v39 }
 0x138   : > { %v3977_v3 = vpop.f32.mrf.mxu1  ;;  %v4013_v33 = vpop.f32.mrf.mxu0 }
 0x139   : > { %5122 = vst [vmem:[#allocation13_spill] sm:$0xff] %v4704_v48  ;;  %v4707_v52 = vadd.f32 %v1267_v31, %v930_v50 }
 0x13a   : > { %v1522_v54 = vpop.f32.mrf.mxu1  ;;  %v4709_v9 = vpop.f32.mrf.mxu0 }
 0x13b   : > { %5123 = vst [vmem:[#allocation14_spill] sm:$0xff] %v4707_v52 }
 0x13c   : > { %v3978_v35 = vpop.f32.mrf.mxu1  ;;  %v4711_v56 = vpop.f32.mrf.mxu0 }
 0x13e   : > { %v1525_v58 = vpop.f32.mrf.mxu1  ;;  %v4713_v11 = vpop.f32.mrf.mxu0 }
 0x140   : > { %v3981_v37 = vpop.f32.mrf.mxu1  ;;  %v4715_v60 = vpop.f32.mrf.mxu0 }
 0x142   : > { %v1538_v62 = vpop.f32.mrf.mxu1  ;;  %v4717_v13 = vpop.f32.mrf.mxu0 }
 0x144   : > { %v3982_v39 = vpop.f32.mrf.mxu1  ;;  %v4719_v4 = vpop.f32.mrf.mxu0 }
 0x146   : > { %v1541_v2 = vpop.f32.mrf.mxu1  ;;  %v4721_v15 = vpop.f32.mrf.mxu0 }
 0x148   : > { %v3985_v7 = vpop.f32.mrf.mxu1  ;;  %v4723_v8 = vpop.f32.mrf.mxu0 }
 0x14a   : > { %v1554_v21 = vpop.f32.mrf.mxu1  ;;  %v4725_v18 = vpop.f32.mrf.mxu0 }
 0x14c   : > { %v3986_v36 = vpop.f32.mrf.mxu1  ;;  %v4727_v23 = vpop.f32.mrf.mxu0 }
 0x14e   : > { %v1557_v29 = vpop.f32.mrf.mxu1  ;;  %v4729_v38 = vpop.f32.mrf.mxu0 }
 0x150   : > { %v3989_v25 = vpop.f32.mrf.mxu1  ;;  %v4731_v42 = vpop.f32.mrf.mxu0 }
 0x152   : > { %v1570_v63 = vpop.f32.mrf.mxu1  ;;  %v4733_v27 = vpop.f32.mrf.mxu0 }
 0x154   : > { %v3990_v46 = vpop.f32.mrf.mxu1  ;;  %v4735_v1 = vpop.f32.mrf.mxu0 }
 0x156   : > { %v1573_v31 = vpop.f32.mrf.mxu1  ;;  %v4737_v50 = vpop.f32.mrf.mxu0 }
 0x157   : > { %5124 = vst [vmem:[#allocation15_spill] sm:$0xff] %v4737_v50 }
 0x158   : > { %v3993_v52 = vpop.f32.mrf.mxu1  ;;  %v4739_v48 = vpop.f32.mrf.mxu0 }
 0x159   : > { %5125 = vst [vmem:[#allocation16_spill] sm:$0xff] %v4739_v48 }
 0x15a   : > { %v1586_v44 = vpop.f32.mrf.mxu1  ;;  %v4741_v41 = vpop.f32.mrf.mxu0 }
 0x15b   : > { %5126 = vst [vmem:[#allocation17_spill] sm:$0xff] %v4741_v41 }
 0x15c   : > { %v3994_v28 = vpop.f32.mrf.mxu1  ;;  %v4743_v17 = vpop.f32.mrf.mxu0 }
 0x15d   : > { %5127 = vst [vmem:[#allocation18_spill] sm:$0xff] %v4743_v17 }
 0x15e   : > { %v4745_v32 = vpop.f32.mrf.mxu1  ;;  %v4747_v30 = vpop.f32.mrf.mxu0 }
 0x15f   : > { %5128 = vst [vmem:[#allocation19_spill] sm:$0xff] %v4745_v32  ;;  %5129 = vst [vmem:[#allocation20_spill] sm:$0xff] %v4747_v30 }
 0x160   : > { %v4749_v26 = vpop.f32.mrf.mxu1  ;;  %v4751_v24 = vpop.f32.mrf.mxu0 }
 0x161   : > { %5130 = vst [vmem:[#allocation21_spill] sm:$0xff] %v4749_v26  ;;  %5131 = vst [vmem:[#allocation22_spill] sm:$0xff] %v4751_v24 }
 0x162   : > { %v4753_v22 = vpop.f32.mrf.mxu1  ;;  %v4755_v20 = vpop.f32.mrf.mxu0 }
 0x163   : > { %5132 = vst [vmem:[#allocation23_spill] sm:$0xff] %v4753_v22  ;;  %5133 = vst [vmem:[#allocation24_spill] sm:$0xff] %v4755_v20  ;;  %v1651_v20 = vadd.f32 %v3977_v3, %v4628_v45  ;;  %v1656_v45 = vadd.f32 %v3982_v39, %v4640_v16  ;;  %v1663_v16 = vadd.f32 %v3989_v25, %v4652_v55 }
 0x164   : > { %v4757_v14 = vpop.f32.mrf.mxu1  ;;  %v4759_v48 = vpop.f32.mrf.mxu0 }
 0x165   : > { %5134 = vst [vmem:[#allocation25_spill] sm:$0xff] %v4757_v14  ;;  %5135 = vst [vmem:[#allocation26_spill] sm:$0xff] %v4759_v48  ;;  %v4819_v55 = vadd.f32 %v4719_v4, %v1656_v45  ;;  %v5158_v45 = vld [vmem:[#allocation18_spill] sm:$0xff] }
 0x166   : > { %v4761_v41 = vpop.f32.mrf.mxu1  ;;  %v4763_v50 = vpop.f32.mrf.mxu0 }
 0x167   : > { %5136 = vst [vmem:[#allocation27_spill] sm:$0xff] %v4761_v41  ;;  %5137 = vst [vmem:[#allocation28_spill] sm:$0xff] %v4763_v50  ;;  %v1649_v50 = vadd.f32 %v1522_v54, %v4630_v49  ;;  %v1654_v49 = vadd.f32 %v1541_v2, %v4642_v19  ;;  %v1657_v54 = vadd.f32 %v1554_v21, %v4646_v43  ;;  %v5146_v2 = vld [vmem:[#allocation16_spill] sm:$0xff] }
 0x168   : > { %v4765_v17 = vpop.f32.mrf.mxu1  ;;  %v4767_v32 = vpop.f32.mrf.mxu0  ;;  %v1664_v43 = vadd.f32 %v3990_v46, %v4656_v0  ;;  %v5151_v21 = vld [vmem:[#allocation4_spill] sm:$0xff] }
 0x169   : > { %5138 = vst [vmem:[#allocation29_spill] sm:$0xff] %v4765_v17  ;;  %5139 = vst [vmem:[#allocation30_spill] sm:$0xff] %v4767_v32  ;;  %v1652_v17 = vadd.f32 %v3978_v35, %v4632_v53  ;;  %v1659_v53 = vadd.f32 %v3985_v7, %v4644_v40  ;;  %v1660_v35 = vadd.f32 %v3986_v36, %v4648_v47  ;;  %v5147_v7 = vld [vmem:[#allocation2_spill] sm:$0xff] }
 0x16a   : > { %v4769_v30 = vpop.f32.mrf.mxu1  ;;  %v4771_v26 = vpop.f32.mrf.mxu0  ;;  %v1661_v40 = vadd.f32 %v1570_v63, %v4654_v59  ;;  %v1662_v47 = vadd.f32 %v1573_v31, %v4659_v6  ;;  %v4827_v59 = vadd.f32 %v4721_v15, %v1654_v49  ;;  %v4833_v6 = vadd.f32 %v4725_v18, %v1657_v54  ;;  %v5152_v18 = vld [vmem:[#allocation23_spill] sm:$0xff]  ;;  %v5157_v31 = vld [vmem:[#allocation17_spill] sm:$0xff] }
 0x16b   : > { %5140 = vst [vmem:[#allocation31_spill] sm:$0xff] %v4769_v30  ;;  %5141 = vst [vmem:[#allocation32_spill] sm:$0xff] %v4771_v26  ;;  %v1650_v26 = vadd.f32 %v1525_v58, %v4634_v57  ;;  %v2021_v30 = vadd.f32 %v4013_v33, %v1651_v20  ;;  %v2019_v57 = vadd.f32 %v4709_v9, %v1649_v50 }
 0x16c   : > { %v4773_v24 = vpop.f32.mrf.mxu1  ;;  %v4775_v22 = vpop.f32.mrf.mxu0  ;;  %v4830_v0 = vadd.f32 %v4723_v8, %v1659_v53  ;;  %v1668_v58 = vadd.f32 %v3994_v28, %v4668_v12  ;;  %v5149_v12 = vld [vmem:[#allocation3_spill] sm:$0xff]  ;;  %v5150_v28 = vld [vmem:[#allocation21_spill] sm:$0xff]  ;;  %v1669_v36 = vadd.f32 %v5152_v18, %v5151_v21 }
 0x16d   : > { %5142 = vst [vmem:[#allocation33_spill] sm:$0xff] %v4773_v24  ;;  %5143 = vst [vmem:[#allocation34_spill] sm:$0xff] %v4775_v22  ;;  %v1655_v24 = vadd.f32 %v3981_v37, %v4636_v61  ;;  %v1653_v22 = vadd.f32 %v1538_v62, %v4638_v5  ;;  %v2022_v61 = vadd.f32 %v4711_v56, %v1652_v17  ;;  %v5154_v25 = vld [vmem:[#allocation25_spill] sm:$0xff]  ;;  %v5159_v53 = vld [vmem:[#allocation7_spill] sm:$0xff] }
 0x16e   : > { %v4778_v14 = vpop.f32.mrf.mxu1  ;;  %v4780_v48 = vpop.f32.mrf.mxu0  ;;  %v1658_v5 = vadd.f32 %v1557_v29, %v4650_v51  ;;  %v2020_v19 = vadd.f32 %v4713_v11, %v1650_v26  ;;  %v1667_v17 = vadd.f32 %v3993_v52, %v4662_v34  ;;  %v4842_v34 = vadd.f32 %v4731_v42, %v1663_v16  ;;  %v5156_v63 = vld [vmem:[#allocation27_spill] sm:$0xff] }
 0x16f   : > { %5144 = vst [vmem:[#allocation35_spill] sm:$0xff] %v4780_v48  ;;  %v4813_v9 = vadd.f32 %v4715_v60, %v1655_v24  ;;  %v4816_v51 = vadd.f32 %v4717_v13, %v1653_v22  ;;  %v4836_v22 = vadd.f32 %v4727_v23, %v1660_v35  ;;  %v1665_v52 = vadd.f32 %v1586_v44, %v4665_v10  ;;  %v5145_v13 = vld [vmem:[#allocation15_spill] sm:$0xff] }
 0x170   : > { %v4784_v41 = vpop.f32.mrf.mxu1  ;;  %v4786_v32 = vpop.f32.mrf.mxu0  ;;  %v4839_v24 = vadd.f32 %v4729_v38, %v1658_v5  ;;  %v4847_v60 = vadd.f32 %v4733_v27, %v1661_v40  ;;  %v4850_v62 = vadd.f32 %v4735_v1, %v1664_v43  ;;  %v4853_v39 = vadd.f32 %v5145_v13, %v1662_v47  ;;  %v5148_v10 = vld [vmem:[#allocation19_spill] sm:$0xff]  ;;  %v5153_v38 = vld [vmem:[#allocation5_spill] sm:$0xff]  ;;  %v5161_v5 = vld [vmem:[#allocation8_spill] sm:$0xff] }
 0x171   : > { %v4857_v15 = vadd.f32 %v5146_v2, %v1667_v17  ;;  %v1666_v44 = vadd.f32 %v5148_v10, %v5147_v7  ;;  %v1671_v8 = vadd.f32 %v5150_v28, %v5149_v12  ;;  %v1672_v42 = vadd.f32 %v5154_v25, %v5153_v38  ;;  %v5160_v54 = vld [vmem:[#allocation29_spill] sm:$0xff]  ;;  %v5167_v7 = vld [vmem:[#allocation22_spill] sm:$0xff]  ;;  %v5168_v12 = vld [vmem:[#allocation11_spill] sm:$0xff] }
 0x172   : > { %v4792_v3 = vpop.f32.mrf.mxu1  ;;  %v4794_v48 = vpop.f32.mrf.mxu0  ;;  %v4870_v50 = vadd.f32 %v5157_v31, %v1665_v52  ;;  %v4873_v49 = vadd.f32 %v5158_v45, %v1668_v58  ;;  %v1675_v35 = vadd.f32 %v5160_v54, %v5159_v53  ;;  %v5162_v16 = vld [vmem:[#allocation31_spill] sm:$0xff]  ;;  %v5163_v47 = vld [vmem:[#allocation9_spill] sm:$0xff]  ;;  %v1679_v28 = vadd.f32 %v4784_v41, %v5168_v12  ;;  %v5169_v38 = vld [vmem:[#allocation24_spill] sm:$0xff] }
 0x173   : > { %v1673_v40 = vadd.f32 %v5162_v16, %v5161_v5  ;;  %v4892_v10 = vadd.f32 %v5167_v7, %v1671_v8  ;;  %v4897_v25 = vadd.f32 %v5169_v38, %v1669_v36  ;;  %v5172_v8 = vld [vmem:[#allocation30_spill] sm:$0xff]  ;;  %v5173_v41 = vld [vmem:[#allocation32_spill] sm:$0xff] }
 0x174   : > { %v4804_v20 = vpop.f32.mrf.mxu1  ;;  %v4806_v33 = vpop.f32.mrf.mxu0  ;;  %v5164_v17 = vld [vmem:[#allocation33_spill] sm:$0xff]  ;;  %v5174_v54 = vld [vmem:[#allocation34_spill] sm:$0xff] }
 0x175   : > { %v1676_v52 = vadd.f32 %v5164_v17, %v5163_v47 }
 0x176   : > { %v4822_v56 = vpop.f32.mrf.mxu1  ;;  %v4824_v26 = vpop.f32.mrf.mxu0 }
 0x177   : > { %v4914_v5 = vadd.f32 %v5174_v54, %v1676_v52 }
 0x178   : > { %v4049_v11 = vpop.f32.mrf.mxu1  ;;  %v4085_v37 = vpop.f32.mrf.mxu0 }
 0x179   : > { %v2391_v4 = vadd.f32 %v4049_v11, %v2021_v30  ;;  %v5155_v30 = vld [vmem:[#allocation6_spill] sm:$0xff] }
 0x17a   : > { %v2262_v23 = vpop.f32.mrf.mxu1  ;;  %v2632_v29 = vpop.f32.mrf.mxu0  ;;  %v1670_v27 = vadd.f32 %v5156_v63, %v5155_v30  ;;  %v5165_v11 = vld [vmem:[#allocation10_spill] sm:$0xff] }
 0x17b   : > { %v2761_v46 = vadd.f32 %v4085_v37, %v2391_v4  ;;  %v2389_v1 = vadd.f32 %v2262_v23, %v2019_v57  ;;  %v1674_v58 = vadd.f32 %v4778_v14, %v5165_v11  ;;  %v5166_v4 = vld [vmem:[#allocation20_spill] sm:$0xff]  ;;  %v5170_v30 = vld [vmem:[#allocation26_spill] sm:$0xff]  ;;  %v5177_v11 = vld [vmem:[#allocation13_spill] sm:$0xff] }
 0x17c   : > { %v4050_v43 = vpop.f32.mrf.mxu1  ;;  %v4086_v57 = vpop.f32.mrf.mxu0  ;;  %v4889_v2 = vadd.f32 %v5166_v4, %v1666_v44  ;;  %v4900_v14 = vadd.f32 %v5170_v30, %v1672_v42  ;;  %v5175_v42 = vld [vmem:[#allocation35_spill] sm:$0xff] }
 0x17d   : > { %v3707_v37 = vpack.c.bf16 %v2761_v46, %v2761_v46  ;;  %v2759_v13 = vadd.f32 %v2632_v29, %v2389_v1  ;;  %v2392_v21 = vadd.f32 %v4050_v43, %v2022_v61  ;;  %v5171_v29 = vld [vmem:[#allocation28_spill] sm:$0xff]  ;;  %v4908_v1 = vadd.f32 %v5172_v8, %v1675_v35 }
 0x17e   : > { %v2265_v18 = vpop.f32.mrf.mxu1  ;;  %v2635_v23 = vpop.f32.mrf.mxu0  ;;  %v4903_v63 = vadd.f32 %v5171_v29, %v1670_v27  ;;  %v4911_v61 = vadd.f32 %v5173_v41, %v1673_v40  ;;  %v4917_v27 = vadd.f32 %v5175_v42, %v1674_v58  ;;  %v4923_v43 = vadd.f32 %v4786_v32, %v1679_v28  ;;  %v5176_v40 = vld [vmem:[#allocation12_spill] sm:$0xff] }
 0x17f   : > { %2922 = vst.msk [vmem:[%s4882_s10 + $0x8] sm:$0xf] %vm2919_vm3, %v3707_v37  ;;  %v3705_v44 = vpack.c.bf16 %v2759_v13, %v2759_v13  ;;  %v2762_v31 = vadd.f32 %v4086_v57, %v2392_v21  ;;  %v2390_v45 = vadd.f32 %v2265_v18, %v2020_v19  ;;  %v3023_v16 = vmul.f32 %v2759_v13, %v2759_v13 }
 0x180   : > { %v4053_v53 = vpop.f32.mrf.mxu1  ;;  %v4089_v36 = vpop.f32.mrf.mxu0  ;;  %v1677_v19 = vadd.f32 %v4792_v3, %v5176_v40  ;;  %v4929_v37 = vadd.f32 %v4804_v20, %v5177_v11  ;;  %v3025_v58 = vmul.f32 %v2761_v46, %v2761_v46  ;;  %v2956_v18 = vsel %vm2952_vm4, %v2761_v46, 0.0 }
 0x181   : > { %2920 = vst.msk [vmem:[%s4882_s10] sm:$0xf] %vm2919_vm3, %v3705_v44  ;;  %v2395_v35 = vadd.f32 %v4053_v53, %v4813_v9  ;;  %v3708_v57 = vpack.c.bf16 %v2762_v31, %v2762_v31  ;;  %v2760_v47 = vadd.f32 %v2635_v23, %v2390_v45  ;;  %v2953_v9 = vsel %vm2952_vm4, %v2759_v13, 0.0 }
 0x182   : > { %v2278_v17 = vpop.f32.mrf.mxu1  ;;  %v2648_v52 = vpop.f32.mrf.mxu0  ;;  %v3055_v20 = vsel %vm2952_vm4, %v3023_v16, 0.0  ;;  %v3026_v30 = vmul.f32 %v2762_v31, %v2762_v31  ;;  %v3058_v41 = vsel %vm2952_vm4, %v3025_v58, 0.0 }
 0x183   : > { %v2765_v4 = vadd.f32 %v4089_v36, %v2395_v35  ;;  %v2393_v7 = vadd.f32 %v2278_v17, %v4816_v51  ;;  %2923 = vst.msk [vmem:[%s4882_s10 + $0xc] sm:$0xf] %vm2919_vm3, %v3708_v57  ;;  %v3706_v32 = vpack.c.bf16 %v2760_v47, %v2760_v47  ;;  %v2954_v3 = vsel %vm2952_vm4, %v2760_v47, 0.0 }
 0x184   : > { %v3024_v12 = vmul.f32 %v2760_v47, %v2760_v47  ;;  %v4054_v28 = vpop.f32.mrf.mxu1  ;;  %v4090_v21 = vpop.f32.mrf.mxu0  ;;  %v2955_v23 = vadd.f32 %v2954_v3, %v2953_v9  ;;  %v2958_v36 = vsel %vm2952_vm4, %v2762_v31, 0.0 }
 0x185   : > { %v3711_v38 = vpack.c.bf16 %v2765_v4, %v2765_v4  ;;  %2921 = vst.msk [vmem:[%s4882_s10 + $0x4] sm:$0xf] %vm2919_vm3, %v3706_v32  ;;  %v2763_v13 = vadd.f32 %v2648_v52, %v2393_v7  ;;  %v2396_v29 = vadd.f32 %v4054_v28, %v4819_v55  ;;  %v3060_v52 = vsel %vm2952_vm4, %v3026_v30, 0.0 }
 0x186   : > { %v3056_v51 = vsel %vm2952_vm4, %v3024_v12, 0.0  ;;  %v2281_v44 = vpop.f32.mrf.mxu1  ;;  %v2651_v8 = vpop.f32.mrf.mxu0  ;;  %v2957_v45 = vadd.f32 %v2956_v18, %v2955_v23  ;;  %v3029_v11 = vmul.f32 %v2765_v4, %v2765_v4 }
 0x187   : > { %v3057_v53 = vadd.f32 %v3056_v51, %v3055_v20  ;;  %2926 = vst.msk [vmem:[%s4882_s10 + $0x18] sm:$0xf] %vm2919_vm3, %v3711_v38  ;;  %v2394_v46 = vadd.f32 %v2281_v44, %v4827_v59  ;;  %v3709_v54 = vpack.c.bf16 %v2763_v13, %v2763_v13  ;;  %v3027_v42 = vmul.f32 %v2763_v13, %v2763_v13 }
 0x188   : > { %v2766_v16 = vadd.f32 %v4090_v21, %v2396_v29  ;;  %v4057_v35 = vpop.f32.mrf.mxu1  ;;  %v4093_v40 = vpop.f32.mrf.mxu0  ;;  %v2959_v55 = vadd.f32 %v2958_v36, %v2957_v45  ;;  %v2960_v59 = vsel %vm2952_vm4, %v2763_v13, 0.0  ;;  %v4958_v38 = vadd.f32 %v4794_v48, %v1677_v19 }
 0x189   : > { %v3059_v57 = vadd.f32 %v3058_v41, %v3057_v53  ;;  %v2764_v47 = vadd.f32 %v2651_v8, %v2394_v46  ;;  %v2399_v17 = vadd.f32 %v4057_v35, %v4830_v0  ;;  %2924 = vst.msk [vmem:[%s4882_s10 + $0x10] sm:$0xf] %vm2919_vm3, %v3709_v54  ;;  %v3062_v28 = vsel %vm2952_vm4, %v3027_v42, 0.0 }
 0x18a   : > { %v3712_v58 = vpack.c.bf16 %v2766_v16, %v2766_v16  ;;  %v2294_v31 = vpop.f32.mrf.mxu1  ;;  %v2664_v7 = vpop.f32.mrf.mxu0  ;;  %v2961_v9 = vadd.f32 %v2960_v59, %v2959_v55  ;;  %v2964_v29 = vsel %vm2952_vm4, %v2765_v4, 0.0  ;;  %v3030_v44 = vmul.f32 %v2766_v16, %v2766_v16 }
 0x18b   : > { %v3061_v32 = vadd.f32 %v3060_v52, %v3059_v57  ;;  %v3710_v3 = vpack.c.bf16 %v2764_v47, %v2764_v47  ;;  %v2962_v12 = vsel %vm2952_vm4, %v2764_v47, 0.0  ;;  %v3028_v0 = vmul.f32 %v2764_v47, %v2764_v47 }
 0x18c   : > { %2927 = vst.msk [vmem:[%s4882_s10 + $0x1c] sm:$0xf] %vm2919_vm3, %v3712_v58  ;;  %v2769_v21 = vadd.f32 %v4093_v40, %v2399_v17  ;;  %v2397_v18 = vadd.f32 %v2294_v31, %v4833_v6  ;;  %v4058_v20 = vpop.f32.mrf.mxu1  ;;  %v4094_v23 = vpop.f32.mrf.mxu0  ;;  %v2963_v51 = vadd.f32 %v2962_v12, %v2961_v9  ;;  %v4967_v19 = vadd.f32 %v4806_v33, %v4929_v37  ;;  %v5178_v40 = vld [vmem:[#allocation14_spill] sm:$0xff] }
 0x18d   : > { %v3063_v30 = vadd.f32 %v3062_v28, %v3061_v32  ;;  %2925 = vst.msk [vmem:[%s4882_s10 + $0x14] sm:$0xf] %vm2919_vm3, %v3710_v3  ;;  %v2400_v13 = vadd.f32 %v4058_v20, %v4836_v22  ;;  %v3064_v8 = vsel %vm2952_vm4, %v3028_v0, 0.0  ;;  %v3066_v54 = vsel %vm2952_vm4, %v3029_v11, 0.0 }
 0x18e   : > { %v3715_v41 = vpack.c.bf16 %v2769_v21, %v2769_v21  ;;  %v2297_v45 = vpop.f32.mrf.mxu1  ;;  %v2667_v6 = vpop.f32.mrf.mxu0  ;;  %v2965_v53 = vadd.f32 %v2964_v29, %v2963_v51  ;;  %v2767_v36 = vadd.f32 %v2664_v7, %v2397_v18  ;;  %v2966_v22 = vsel %vm2952_vm4, %v2766_v16, 0.0 }
 0x18f   : > { %v3065_v46 = vadd.f32 %v3064_v8, %v3063_v30  ;;  %v2770_v48 = vadd.f32 %v4094_v23, %v2400_v13  ;;  %v2398_v4 = vadd.f32 %v2297_v45, %v4839_v24  ;;  %v1678_v57 = vadd.f32 %v4822_v56, %v5178_v40 }
 0x190   : > { %2930 = vst.msk [vmem:[%s4882_s10 + $0x28] sm:$0xf] %vm2919_vm3, %v3715_v41  ;;  %v4061_v42 = vpop.f32.mrf.mxu1  ;;  %v4097_v35 = vpop.f32.mrf.mxu0  ;;  %v3713_v47 = vpack.c.bf16 %v2767_v36, %v2767_v36  ;;  %v2967_v17 = vadd.f32 %v2966_v22, %v2965_v53  ;;  %v3068_v33 = vsel %vm2952_vm4, %v3030_v44, 0.0  ;;  %v2968_v37 = vsel %vm2952_vm4, %v2767_v36, 0.0 }
 0x191   : > { %v3067_v55 = vadd.f32 %v3066_v54, %v3065_v46  ;;  %v3031_v52 = vmul.f32 %v2767_v36, %v2767_v36  ;;  %v3716_v11 = vpack.c.bf16 %v2770_v48, %v2770_v48  ;;  %v2768_v31 = vadd.f32 %v2667_v6, %v2398_v4 }
 0x192   : > { %v2310_v16 = vpop.f32.mrf.mxu1  ;;  %v2680_v59 = vpop.f32.mrf.mxu0  ;;  %2928 = vst.msk [vmem:[%s4882_s10 + $0x20] sm:$0xf] %vm2919_vm3, %v3713_v47  ;;  %v2969_v24 = vadd.f32 %v2968_v37, %v2967_v17  ;;  %v2403_v7 = vadd.f32 %v4061_v42, %v4842_v34  ;;  %v3033_v56 = vmul.f32 %v2769_v21, %v2769_v21  ;;  %v3034_v32 = vmul.f32 %v2770_v48, %v2770_v48 }
 0x193   : > { %v3069_v58 = vadd.f32 %v3068_v33, %v3067_v55  ;;  %v3070_v9 = vsel %vm2952_vm4, %v3031_v52, 0.0  ;;  %2931 = vst.msk [vmem:[%s4882_s10 + $0x2c] sm:$0xf] %vm2919_vm3, %v3716_v11  ;;  %v2401_v3 = vadd.f32 %v2310_v16, %v4847_v60  ;;  %v3714_v18 = vpack.c.bf16 %v2768_v31, %v2768_v31 }
 0x194   : > { %v4062_v12 = vpop.f32.mrf.mxu1  ;;  %v4098_v28 = vpop.f32.mrf.mxu0  ;;  %v2970_v20 = vsel %vm2952_vm4, %v2768_v31, 0.0  ;;  %v3032_v23 = vmul.f32 %v2768_v31, %v2768_v31  ;;  %v2773_v51 = vadd.f32 %v4097_v35, %v2403_v7  ;;  %v4988_v8 = vadd.f32 %v4824_v26, %v1678_v57 }
 0x195   : > { %v3071_v0 = vadd.f32 %v3070_v9, %v3069_v58  ;;  %v2971_v30 = vadd.f32 %v2970_v20, %v2969_v24  ;;  %v2771_v13 = vadd.f32 %v2680_v59, %v2401_v3  ;;  %v2404_v34 = vadd.f32 %v4062_v12, %v4850_v62  ;;  %2929 = vst.msk [vmem:[%s4882_s10 + $0x24] sm:$0xf] %vm2919_vm3, %v3714_v18 }
 0x196   : > { %v2313_v29 = vpop.f32.mrf.mxu1  ;;  %v2683_v44 = vpop.f32.mrf.mxu0  ;;  %v2972_v60 = vsel %vm2952_vm4, %v2769_v21, 0.0  ;;  %v3072_v41 = vsel %vm2952_vm4, %v3032_v23, 0.0  ;;  %v3074_v6 = vsel %vm2952_vm4, %v3033_v56, 0.0  ;;  %v3719_v62 = vpack.c.bf16 %v2773_v51, %v2773_v51 }
 0x197   : > { %v2402_v45 = vadd.f32 %v2313_v29, %v4853_v39  ;;  %v2973_v53 = vadd.f32 %v2972_v60, %v2971_v30  ;;  %v3073_v46 = vadd.f32 %v3072_v41, %v3071_v0  ;;  %v2974_v26 = vsel %vm2952_vm4, %v2770_v48, 0.0 }
 0x198   : > { %v4065_v36 = vpop.f32.mrf.mxu1  ;;  %v4101_v54 = vpop.f32.mrf.mxu0  ;;  %v3076_v22 = vsel %vm2952_vm4, %v3034_v32, 0.0  ;;  %v3717_v4 = vpack.c.bf16 %v2771_v13, %v2771_v13  ;;  %v3035_v21 = vmul.f32 %v2771_v13, %v2771_v13  ;;  %2934 = vst.msk [vmem:[%s4882_s10 + $0x38] sm:$0xf] %vm2919_vm3, %v3719_v62  ;;  %v2774_v40 = vadd.f32 %v4098_v28, %v2404_v34 }
 0x199   : > { %v3075_v42 = vadd.f32 %v3074_v6, %v3073_v46  ;;  %v2975_v35 = vadd.f32 %v2974_v26, %v2973_v53  ;;  %v2772_v39 = vadd.f32 %v2683_v44, %v2402_v45  ;;  %v3037_v47 = vmul.f32 %v2773_v51, %v2773_v51 }
 0x19a   : > { %v2326_v57 = vpop.f32.mrf.mxu1  ;;  %v2696_v55 = vpop.f32.mrf.mxu0  ;;  %2932 = vst.msk [vmem:[%s4882_s10 + $0x30] sm:$0xf] %vm2919_vm3, %v3717_v4  ;;  %v2976_v17 = vsel %vm2952_vm4, %v2771_v13, 0.0  ;;  %v2407_v48 = vadd.f32 %v4065_v36, %v4857_v15  ;;  %v3078_v11 = vsel %vm2952_vm4, %v3035_v21, 0.0  ;;  %v3720_v16 = vpack.c.bf16 %v2774_v40, %v2774_v40 }
 0x19b   : > { %v2405_v33 = vadd.f32 %v2326_v57, %v4870_v50  ;;  %v2977_v37 = vadd.f32 %v2976_v17, %v2975_v35  ;;  %v3077_v52 = vadd.f32 %v3076_v22, %v3075_v42  ;;  %v3038_v58 = vmul.f32 %v2774_v40, %v2774_v40 }
 0x19c   : > { %v4066_v59 = vpop.f32.mrf.mxu1  ;;  %v4102_v24 = vpop.f32.mrf.mxu0  ;;  %v3718_v31 = vpack.c.bf16 %v2772_v39, %v2772_v39  ;;  %v2978_v7 = vsel %vm2952_vm4, %v2772_v39, 0.0  ;;  %v3036_v56 = vmul.f32 %v2772_v39, %v2772_v39  ;;  %2935 = vst.msk [vmem:[%s4882_s10 + $0x3c] sm:$0xf] %vm2919_vm3, %v3720_v16  ;;  %v2777_v15 = vadd.f32 %v4101_v54, %v2407_v48 }
 0x19d   : > { %v3079_v9 = vadd.f32 %v3078_v11, %v3077_v52  ;;  %v2979_v32 = vadd.f32 %v2978_v7, %v2977_v37  ;;  %v2775_v3 = vadd.f32 %v2696_v55, %v2405_v33  ;;  %v2980_v28 = vsel %vm2952_vm4, %v2773_v51, 0.0 }
 0x19e   : > { %v2329_v50 = vpop.f32.mrf.mxu1  ;;  %v2699_v12 = vpop.f32.mrf.mxu0  ;;  %2933 = vst.msk [vmem:[%s4882_s10 + $0x34] sm:$0xf] %vm2919_vm3, %v3718_v31  ;;  %v3080_v0 = vsel %vm2952_vm4, %v3036_v56, 0.0  ;;  %v2408_v18 = vadd.f32 %v4066_v59, %v4873_v49  ;;  %v3082_v23 = vsel %vm2952_vm4, %v3037_v47, 0.0  ;;  %v3723_v34 = vpack.c.bf16 %v2777_v15, %v2777_v15 }
 0x19f   : > { %v2406_v20 = vadd.f32 %v2329_v50, %v4889_v2  ;;  %v2981_v30 = vadd.f32 %v2980_v28, %v2979_v32  ;;  %v3081_v13 = vadd.f32 %v3080_v0, %v3079_v9  ;;  %v2982_v60 = vsel %vm2952_vm4, %v2774_v40, 0.0 }
 0x1a0   : > { %v4069_v29 = vpop.f32.mrf.mxu1  ;;  %v4105_v44 = vpop.f32.mrf.mxu0  ;;  %v3084_v51 = vsel %vm2952_vm4, %v3038_v58, 0.0  ;;  %v3721_v41 = vpack.c.bf16 %v2775_v3, %v2775_v3  ;;  %v3039_v45 = vmul.f32 %v2775_v3, %v2775_v3  ;;  %2938 = vst.msk [vmem:[%s4882_s10 + $0x48] sm:$0xf] %vm2919_vm3, %v3723_v34  ;;  %v2778_v53 = vadd.f32 %v4102_v24, %v2408_v18 }
 0x1a1   : > { %v3083_v6 = vadd.f32 %v3082_v23, %v3081_v13  ;;  %v2983_v49 = vadd.f32 %v2982_v60, %v2981_v30  ;;  %v2776_v2 = vadd.f32 %v2699_v12, %v2406_v20  ;;  %v3041_v36 = vmul.f32 %v2777_v15, %v2777_v15 }
 0x1a2   : > { %v2342_v46 = vpop.f32.mrf.mxu1  ;;  %v2712_v62 = vpop.f32.mrf.mxu0  ;;  %2936 = vst.msk [vmem:[%s4882_s10 + $0x40] sm:$0xf] %vm2919_vm3, %v3721_v41  ;;  %v2984_v54 = vsel %vm2952_vm4, %v2775_v3, 0.0  ;;  %v2411_v26 = vadd.f32 %v4069_v29, %v4892_v10  ;;  %v3086_v42 = vsel %vm2952_vm4, %v3039_v45, 0.0  ;;  %v3724_v35 = vpack.c.bf16 %v2778_v53, %v2778_v53 }
 0x1a3   : > { %v2409_v22 = vadd.f32 %v2342_v46, %v4897_v25  ;;  %v2985_v4 = vadd.f32 %v2984_v54, %v2983_v49  ;;  %v3085_v21 = vadd.f32 %v3084_v51, %v3083_v6  ;;  %v3042_v57 = vmul.f32 %v2778_v53, %v2778_v53 }
 0x1a4   : > { %v4070_v40 = vpop.f32.mrf.mxu1  ;;  %v4106_v39 = vpop.f32.mrf.mxu0  ;;  %v3722_v55 = vpack.c.bf16 %v2776_v2, %v2776_v2  ;;  %v2986_v47 = vsel %vm2952_vm4, %v2776_v2, 0.0  ;;  %v3040_v17 = vmul.f32 %v2776_v2, %v2776_v2  ;;  %2939 = vst.msk [vmem:[%s4882_s10 + $0x4c] sm:$0xf] %vm2919_vm3, %v3724_v35  ;;  %v2781_v10 = vadd.f32 %v4105_v44, %v2411_v26 }
 0x1a5   : > { %v3087_v48 = vadd.f32 %v3086_v42, %v3085_v21  ;;  %v2987_v33 = vadd.f32 %v2986_v47, %v2985_v4  ;;  %v2779_v37 = vadd.f32 %v2712_v62, %v2409_v22  ;;  %v2988_v11 = vsel %vm2952_vm4, %v2777_v15, 0.0 }
 0x1a6   : > { %v2345_v25 = vpop.f32.mrf.mxu1  ;;  %v2715_v52 = vpop.f32.mrf.mxu0  ;;  %2937 = vst.msk [vmem:[%s4882_s10 + $0x44] sm:$0xf] %vm2919_vm3, %v3722_v55  ;;  %v3088_v16 = vsel %vm2952_vm4, %v3040_v17, 0.0  ;;  %v2412_v59 = vadd.f32 %v4070_v40, %v4900_v14  ;;  %v3090_v58 = vsel %vm2952_vm4, %v3041_v36, 0.0  ;;  %v3727_v56 = vpack.c.bf16 %v2781_v10, %v2781_v10 }
 0x1a7   : > { %v2410_v24 = vadd.f32 %v2345_v25, %v4903_v63  ;;  %v2989_v31 = vadd.f32 %v2988_v11, %v2987_v33  ;;  %v3089_v7 = vadd.f32 %v3088_v16, %v3087_v48  ;;  %v2990_v3 = vsel %vm2952_vm4, %v2778_v53, 0.0 }
 0x1a8   : > { %v4073_v9 = vpop.f32.mrf.mxu1  ;;  %v4109_v32 = vpop.f32.mrf.mxu0  ;;  %v3092_v15 = vsel %vm2952_vm4, %v3042_v57, 0.0  ;;  %v3725_v50 = vpack.c.bf16 %v2779_v37, %v2779_v37  ;;  %v3043_v12 = vmul.f32 %v2779_v37, %v2779_v37  ;;  %2942 = vst.msk [vmem:[%s4882_s10 + $0x58] sm:$0xf] %vm2919_vm3, %v3727_v56  ;;  %v2782_v0 = vadd.f32 %v4106_v39, %v2412_v59 }
 0x1a9   : > { %v3091_v28 = vadd.f32 %v3090_v58, %v3089_v7  ;;  %v2991_v14 = vadd.f32 %v2990_v3, %v2989_v31  ;;  %v2780_v63 = vadd.f32 %v2715_v52, %v2410_v24  ;;  %v3045_v23 = vmul.f32 %v2781_v10, %v2781_v10 }
 0x1aa   : > { %v2358_v18 = vpop.f32.mrf.mxu1  ;;  %v2728_v20 = vpop.f32.mrf.mxu0  ;;  %2940 = vst.msk [vmem:[%s4882_s10 + $0x50] sm:$0xf] %vm2919_vm3, %v3725_v50  ;;  %v2992_v30 = vsel %vm2952_vm4, %v2779_v37, 0.0  ;;  %v2415_v13 = vadd.f32 %v4073_v9, %v4908_v1  ;;  %v3094_v60 = vsel %vm2952_vm4, %v3043_v12, 0.0  ;;  %v3728_v51 = vpack.c.bf16 %v2782_v0, %v2782_v0 }
 0x1ab   : > { %v2413_v34 = vadd.f32 %v2358_v18, %v4911_v61  ;;  %v2993_v29 = vadd.f32 %v2992_v30, %v2991_v14  ;;  %v3093_v44 = vadd.f32 %v3092_v15, %v3091_v28  ;;  %v3046_v6 = vmul.f32 %v2782_v0, %v2782_v0 }
 0x1ac   : > { %v4074_v41 = vpop.f32.mrf.mxu1  ;;  %v4110_v45 = vpop.f32.mrf.mxu0  ;;  %v3726_v49 = vpack.c.bf16 %v2780_v63, %v2780_v63  ;;  %v2994_v53 = vsel %vm2952_vm4, %v2780_v63, 0.0  ;;  %v3044_v2 = vmul.f32 %v2780_v63, %v2780_v63  ;;  %2943 = vst.msk [vmem:[%s4882_s10 + $0x5c] sm:$0xf] %vm2919_vm3, %v3728_v51  ;;  %v2785_v1 = vadd.f32 %v4109_v32, %v2415_v13 }
 0x1ad   : > { %v3095_v46 = vadd.f32 %v3094_v60, %v3093_v44  ;;  %v2995_v62 = vadd.f32 %v2994_v53, %v2993_v29  ;;  %v2783_v36 = vadd.f32 %v2728_v20, %v2413_v34  ;;  %v2996_v26 = vsel %vm2952_vm4, %v2781_v10, 0.0 }
 0x1ae   : > { %v2361_v61 = vpop.f32.mrf.mxu1  ;;  %v2731_v54 = vpop.f32.mrf.mxu0  ;;  %2941 = vst.msk [vmem:[%s4882_s10 + $0x54] sm:$0xf] %vm2919_vm3, %v3726_v49  ;;  %v3096_v22 = vsel %vm2952_vm4, %v3044_v2, 0.0  ;;  %v2416_v4 = vadd.f32 %v4074_v41, %v4914_v5  ;;  %v3098_v42 = vsel %vm2952_vm4, %v3045_v23, 0.0  ;;  %v3731_v39 = vpack.c.bf16 %v2785_v1, %v2785_v1 }
 0x1af   : > { %v2414_v21 = vadd.f32 %v2361_v61, %v4917_v27  ;;  %v2997_v35 = vadd.f32 %v2996_v26, %v2995_v62  ;;  %v3097_v40 = vadd.f32 %v3096_v22, %v3095_v46  ;;  %v2998_v47 = vsel %vm2952_vm4, %v2782_v0, 0.0 }
 0x1b0   : > { %v4077_v57 = vpop.f32.mrf.mxu1  ;;  %v4113_v55 = vpop.f32.mrf.mxu0  ;;  %v3100_v17 = vsel %vm2952_vm4, %v3046_v6, 0.0  ;;  %v3729_v48 = vpack.c.bf16 %v2783_v36, %v2783_v36  ;;  %v3047_v33 = vmul.f32 %v2783_v36, %v2783_v36  ;;  %2946 = vst.msk [vmem:[%s4882_s10 + $0x68] sm:$0xf] %vm2919_vm3, %v3731_v39  ;;  %v2786_v37 = vadd.f32 %v4110_v45, %v2416_v4 }
 0x1b1   : > { %v3099_v10 = vadd.f32 %v3098_v42, %v3097_v40  ;;  %v2999_v5 = vadd.f32 %v2998_v47, %v2997_v35  ;;  %v2784_v27 = vadd.f32 %v2731_v54, %v2414_v21  ;;  %v3004_v11 = vsel %vm2952_vm4, %v2785_v1, 0.0 }
 0x1b2   : > { %v2374_v25 = vpop.f32.mrf.mxu1  ;;  %v2744_v52 = vpop.f32.mrf.mxu0  ;;  %2944 = vst.msk [vmem:[%s4882_s10 + $0x60] sm:$0xf] %vm2919_vm3, %v3729_v48  ;;  %v3000_v16 = vsel %vm2952_vm4, %v2783_v36, 0.0  ;;  %v2419_v59 = vadd.f32 %v4077_v57, %v4923_v43  ;;  %v3049_v58 = vmul.f32 %v2785_v1, %v2785_v1  ;;  %v3732_v56 = vpack.c.bf16 %v2786_v37, %v2786_v37 }
 0x1b3   : > { %v2417_v24 = vadd.f32 %v2374_v25, %v4958_v38  ;;  %v3001_v31 = vadd.f32 %v3000_v16, %v2999_v5  ;;  %v3101_v7 = vadd.f32 %v3100_v17, %v3099_v10  ;;  %v3102_v32 = vsel %vm2952_vm4, %v3047_v33, 0.0 }
 0x1b4   : > { %v4078_v9 = vpop.f32.mrf.mxu1  ;;  %v3730_v3 = vpack.c.bf16 %v2784_v27, %v2784_v27  ;;  %v3002_v15 = vsel %vm2952_vm4, %v2784_v27, 0.0  ;;  %v3048_v50 = vmul.f32 %v2784_v27, %v2784_v27  ;;  %v4114_v12 = vpop.f32.mrf.mxu0  ;;  %2947 = vst.msk [vmem:[%s4882_s10 + $0x6c] sm:$0xf] %vm2919_vm3, %v3732_v56  ;;  %v2789_v43 = vadd.f32 %v4113_v55, %v2419_v59 }
 0x1b5   : > { %v3103_v28 = vadd.f32 %v3102_v32, %v3101_v7  ;;  %v3003_v14 = vadd.f32 %v3002_v15, %v3001_v31  ;;  %v2787_v0 = vadd.f32 %v2744_v52, %v2417_v24  ;;  %v3050_v63 = vmul.f32 %v2786_v37, %v2786_v37 }
 0x1b6   : > { %v2377_v38 = vpop.f32.mrf.mxu1  ;;  %2945 = vst.msk [vmem:[%s4882_s10 + $0x64] sm:$0xf] %vm2919_vm3, %v3730_v3  ;;  %v3104_v18 = vsel %vm2952_vm4, %v3048_v50, 0.0  ;;  %v2420_v20 = vadd.f32 %v4078_v9, %v4967_v19  ;;  %v3735_v34 = vpack.c.bf16 %v2789_v43, %v2789_v43  ;;  %v3106_v29 = vsel %vm2952_vm4, %v3049_v58, 0.0  ;;  %v2747_v41 = vpop.f32.mrf.mxu0 }
 0x1b7   : > { %v2418_v23 = vadd.f32 %v2377_v38, %v4988_v8  ;;  %v3005_v30 = vadd.f32 %v3004_v11, %v3003_v14  ;;  %v3105_v13 = vadd.f32 %v3104_v18, %v3103_v28  ;;  %v3006_v44 = vsel %vm2952_vm4, %v2786_v37, 0.0 }
 0x1b8   : > { %v3733_v60 = vpack.c.bf16 %v2787_v0, %v2787_v0  ;;  %v3051_v51 = vmul.f32 %v2787_v0, %v2787_v0  ;;  %2950 = vst.msk [vmem:[%s4882_s10 + $0x78] sm:$0xf] %vm2919_vm3, %v3735_v34  ;;  %v2790_v49 = vadd.f32 %v4114_v12, %v2420_v20  ;;  %v3108_v53 = vsel %vm2952_vm4, %v3050_v63, 0.0 }
 0x1b9   : > { %v3107_v45 = vadd.f32 %v3106_v29, %v3105_v13  ;;  %v3007_v6 = vadd.f32 %v3006_v44, %v3005_v30  ;;  %v2788_v19 = vadd.f32 %v2747_v41, %v2418_v23  ;;  %v3008_v8 = vsel %vm2952_vm4, %v2787_v0, 0.0 }
 0x1ba   : > { %2948 = vst.msk [vmem:[%s4882_s10 + $0x70] sm:$0xf] %vm2919_vm3, %v3733_v60  ;;  %v3053_v2 = vmul.f32 %v2789_v43, %v2789_v43  ;;  %v3736_v1 = vpack.c.bf16 %v2790_v49, %v2790_v49  ;;  %v3110_v36 = vsel %vm2952_vm4, %v3051_v51, 0.0  ;;  %v3012_v21 = vsel %vm2952_vm4, %v2789_v43, 0.0 }
 0x1bb   : > { %v3009_v46 = vadd.f32 %v3008_v8, %v3007_v6  ;;  %v3109_v62 = vadd.f32 %v3108_v53, %v3107_v45  ;;  %v3734_v61 = vpack.c.bf16 %v2788_v19, %v2788_v19  ;;  %v3010_v54 = vsel %vm2952_vm4, %v2788_v19, 0.0 }
 0x1bc   : > { %v3052_v26 = vmul.f32 %v2788_v19, %v2788_v19  ;;  %2951 = vst.msk [vmem:[%s4882_s10 + $0x7c] sm:$0xf] %vm2919_vm3, %v3736_v1  ;;  %v3054_v42 = vmul.f32 %v2790_v49, %v2790_v49  ;;  %v3114_v57 = vsel %vm2952_vm4, %v3053_v2, 0.0  ;;  %v3014_v55 = vsel %vm2952_vm4, %v2790_v49, 0.0 }
 0x1bd   : > { %v3111_v22 = vadd.f32 %v3110_v36, %v3109_v62  ;;  %v3011_v4 = vadd.f32 %v3010_v54, %v3009_v46  ;;  %2949 = vst.msk [vmem:[%s4882_s10 + $0x74] sm:$0xf] %vm2919_vm3, %v3734_v61 }
 0x1be   : > { %v3112_v35 = vsel %vm2952_vm4, %v3052_v26, 0.0  ;;  %v3116_v48 = vsel %vm2952_vm4, %v3054_v42, 0.0 }
 0x1bf   : > { %v3013_v40 = vadd.f32 %v3012_v21, %v3011_v4  ;;  %v3113_v39 = vadd.f32 %v3112_v35, %v3111_v22 }
 0x1c1   : > { %v3015_v47 = vadd.f32 %v3014_v55, %v3013_v40  ;;  %v3115_v17 = vadd.f32 %v3114_v57, %v3113_v39 }
 0x1c3   : > { %v3016_v33 = vrot.slane %v3015_v47, 4  ;;  %v3117_v10 = vadd.f32 %v3116_v48, %v3115_v17 }
 0x1c5   : > { %v3017_v5 = vadd.f32 %v3016_v33, %v3015_v47  ;;  %v3118_v37 = vrot.slane %v3117_v10, 4 }
 0x1c7   : > { %v3018_v27 = vrot.slane %v3017_v5, 2  ;;  %v3119_v25 = vadd.f32 %v3118_v37, %v3117_v10 }
 0x1c9   : > { %v3019_v52 = vadd.f32 %v3018_v27, %v3017_v5  ;;  %v3120_v11 = vrot.slane %v3119_v25, 2 }
 0x1cb   : > { %v3020_v16 = vrot.slane %v3019_v52, 1  ;;  %v3121_v59 = vadd.f32 %v3120_v11, %v3119_v25 }
 0x1cd   : > { %v3021_v24 = vadd.f32 %v3020_v16, %v3019_v52  ;;  %v3122_v58 = vrot.slane %v3121_v59, 1 }
 0x1cf   : > { %v3123_v31 = vadd.f32 %v3122_v58, %v3121_v59  ;;  %3126 = vst.msk [vmem:[%s258_s13] sm:$0x1] %vm3125_vm5, %v3021_v24 }
 0x1d1   : > { %3127 = vst.msk [vmem:[%s261_s16] sm:$0x1] %vm3125_vm5, %v3123_v31 }
 0x1d2 PF: > { %s16_s18 = sadd.s32 1, %s4261_s18  }
 0x1d3   : > { %p13_p4 = scmp.ge.s32.totalorder %s16_s18, 4  }
 0x1d5   :  { %15 = sbr.rel (!%p13_p4) target bundleno = 1 (0x1), region = 100 }

// kernel: forward.9
= control target key start
LH: loop header
LB: loop body
LE: loop exit
PB: predicated region body
PF: predicated region fallthrough
CT: control target
= control target key end

     0   :  { %s2373_s15 = smov 0   ;;  %s2929_s0 = inlined_call_operand.vmem [shape: bf16[2,8,8,64], index: 0, kind: input, shape index: {}]   ;;  %s2930_s1 = inlined_call_operand.vmem [shape: bf16[576,64], index: 1, kind: input, shape index: {}]   ;;  %s2931_s2 = inlined_call_operand.vmem [shape: bf16[2,8,8,64], index: 2, kind: output, shape index: {0}]   ;;  %s2932_s3 = inlined_call_operand.vmem [shape: f32[2,1,64], index: 3, kind: output, shape index: {1}]   ;;  %s2933_s4 = inlined_call_operand.vmem [shape: f32[2,1,64], index: 4, kind: output, shape index: {2}]  }
   0x1 LB: > { %s2060_s16 = sadd.s32 4294967295, %s2344_s15   ;;  %p2064_p0 = scmp.ge.s32.totalorder %s2344_s15, 1  ;;  %s2344_s15 = sphi %s2373_s15, %s15_s15  }
   0x2   : > { %p167_p1 = scmp.lt.s32.totalorder %s2344_s15, 3 }
   0x4   : > { %p168_p2 = pnand %p2064_p0, %p167_p1 }
   0x5   : > { %p2383_p3 = scmp.lt.s32.totalorder (!%p168_p2), %s2060_s16, 1  ;;  %s2347_s28 = smov (!%p168_p2), 64  }
   0x6   : > { %171 = sbr.rel (%p168_p2) target bundleno = 451 (0x1c3), region = 28 }
   0xb   : > { %vm216_vm0 = vcmask 519168   ;;  %v2346_v0 = vmov 0   ;;  %s2940_s16 = smov (!%p2383_p3, %s2060_s16), 1  ;;  %v2279_v1 = vld [vmem:[%s2930_s1 + $0x78] sm:$0xff]   ;;  %v2281_v3 = vld [vmem:[%s2930_s1 + $0x70] sm:$0xff]   ;;  %v2283_v25 = vld [vmem:[%s2930_s1 + $0x68] sm:$0xff]  }
   0xc   : > { %219 = vst.msk [vmem:[#allocation2 + $0x8] sm:$0xf] %vm216_vm0, %v2346_v0  ;;  %218 = vst.msk [vmem:[#allocation2 + $0x4] sm:$0xf] %vm216_vm0, %v2346_v0  ;;  %s2155_s20 = sshll.u32 %s2940_s16, 5  ;;  %v2280_v2 = vld [vmem:[%s2930_s1 + $0x38] sm:$0xff]   ;;  %2157 = vmatprep.subr.bf16.mxu0 %v2279_v1  ;;  %s211_s6 = scalar_lea.vmem %s2932_s3, %s2940_s16 }
   0xd   : > { %220 = vst.msk [vmem:[#allocation2 + $0xc] sm:$0xf] %vm216_vm0, %v2346_v0  ;;  %222 = vst.msk [vmem:[#allocation2 + $0x14] sm:$0xf] %vm216_vm0, %v2346_v0  ;;  %s2435_s25 = scalar_lea.vmem %s2929_s0, %s2155_s20  ;;  %2158 = vmatpush3.bf16.msra.mxu0 %v2280_v2  ;;  %v2282_v23 = vld [vmem:[%s2930_s1 + $0x30] sm:$0xff]   ;;  %vm453_vm7 = vcmask 1043968   ;;  %s2882_s30 = scalar_lea.vmem %s2931_s2, %s2155_s20 }
   0xe   : > { %223 = vst.msk [vmem:[#allocation2 + $0x18] sm:$0xf] %vm216_vm0, %v2346_v0  ;;  %224 = vst.msk [vmem:[#allocation2 + $0x1c] sm:$0xf] %vm216_vm0, %v2346_v0  ;;  %v259_v4 = vld [vmem:[%s2435_s25 + $0x8] sm:$0xf]  ;;  %2159 = vmatprep.subr.bf16.mxu0 %v2281_v3  ;;  %s214_s9 = scalar_lea.vmem %s2933_s4, %s2940_s16 }
   0xf   : > { %226 = vst.msk [vmem:[#allocation2 + $0x24] sm:$0xf] %vm216_vm0, %v2346_v0  ;;  %227 = vst.msk [vmem:[#allocation2 + $0x28] sm:$0xf] %vm216_vm0, %v2346_v0  ;;  %v257_v5 = vld [vmem:[%s2435_s25] sm:$0xf] }
  0x10   : > { %228 = vst.msk [vmem:[#allocation2 + $0x2c] sm:$0xf] %vm216_vm0, %v2346_v0  ;;  %230 = vst.msk [vmem:[#allocation2 + $0x34] sm:$0xf] %vm216_vm0, %v2346_v0  ;;  %v258_v6 = vld [vmem:[%s2435_s25 + $0x4] sm:$0xf] }
  0x11   : > { %231 = vst.msk [vmem:[#allocation2 + $0x38] sm:$0xf] %vm216_vm0, %v2346_v0  ;;  %232 = vst.msk [vmem:[#allocation2 + $0x3c] sm:$0xf] %vm216_vm0, %v2346_v0  ;;  %v261_v7 = vld [vmem:[%s2435_s25 + $0x10] sm:$0xf]  ;;  %2160 = vmatpush3.bf16.msra.mxu0 %v2282_v23 }
  0x12   : > { %234 = vst.msk [vmem:[#allocation2 + $0x44] sm:$0xf] %vm216_vm0, %v2346_v0  ;;  %235 = vst.msk [vmem:[#allocation2 + $0x48] sm:$0xf] %vm216_vm0, %v2346_v0  ;;  %v260_v8 = vld [vmem:[%s2435_s25 + $0xc] sm:$0xf]  ;;  %2161 = vmatprep.subr.bf16.mxu0 %v2283_v25 }
  0x13   : > { %236 = vst.msk [vmem:[#allocation2 + $0x4c] sm:$0xf] %vm216_vm0, %v2346_v0  ;;  %238 = vst.msk [vmem:[#allocation2 + $0x54] sm:$0xf] %vm216_vm0, %v2346_v0  ;;  %v262_v9 = vld [vmem:[%s2435_s25 + $0x14] sm:$0xf] }
  0x14   : > { %239 = vst.msk [vmem:[#allocation2 + $0x58] sm:$0xf] %vm216_vm0, %v2346_v0  ;;  %240 = vst.msk [vmem:[#allocation2 + $0x5c] sm:$0xf] %vm216_vm0, %v2346_v0  ;;  %v413_v10 = vld [vmem:[#allocation2 + $0x8] sm:$0xf] }
  0x15   : > { %242 = vst.msk [vmem:[#allocation2 + $0x64] sm:$0xf] %vm216_vm0, %v2346_v0  ;;  %243 = vst.msk [vmem:[#allocation2 + $0x68] sm:$0xf] %vm216_vm0, %v2346_v0  ;;  %v609_v11 = vld [vmem:[#allocation2 + $0x14] sm:$0x8]  ;;  %429 = vrot.lane.b32.xlu0 %v413_v10, %s2347_s28 }
  0x16   : > { %244 = vst.msk [vmem:[#allocation2 + $0x6c] sm:$0xf] %vm216_vm0, %v2346_v0  ;;  %246 = vst.msk [vmem:[#allocation2 + $0x74] sm:$0xf] %vm216_vm0, %v2346_v0  ;;  %v611_v12 = vld [vmem:[#allocation2 + $0x24] sm:$0x8] }
  0x17   : > { %247 = vst.msk [vmem:[#allocation2 + $0x78] sm:$0xf] %vm216_vm0, %v2346_v0  ;;  %248 = vst.msk [vmem:[#allocation2 + $0x7c] sm:$0xf] %vm216_vm0, %v2346_v0  ;;  %v626_v13 = vshrl.u32 %v609_v11, 16  ;;  %v639_v16 = vshrl.u32 %v611_v12, 16 }
  0x18   : > { %250 = vst.msk [vmem:[#allocation2 + $0x84] sm:$0xf] %vm216_vm0, %v2346_v0  ;;  %251 = vst.msk [vmem:[#allocation2 + $0x88] sm:$0xf] %vm216_vm0, %v2346_v0  ;;  %v613_v14 = vld [vmem:[#allocation2 + $0x34] sm:$0x8] }
  0x19   : > { %252 = vst.msk [vmem:[#allocation2 + $0x8c] sm:$0xf] %vm216_vm0, %v2346_v0  ;;  %254 = vst.msk [vmem:[#allocation2 + $0x94] sm:$0xf] %vm216_vm0, %v2346_v0  ;;  %v615_v15 = vld [vmem:[#allocation2 + $0x44] sm:$0x8] }
  0x1a   : > { %255 = vst.msk [vmem:[#allocation2 + $0x98] sm:$0xf] %vm216_vm0, %v2346_v0  ;;  %256 = vst.msk [vmem:[#allocation2 + $0x9c] sm:$0xf] %vm216_vm0, %v2346_v0  ;;  %v778_v17 = vld [vmem:[#allocation2 + $0x1c] sm:$0x1] }
  0x1b   : > { %268 = vst.msk [vmem:[#allocation2 + $0x38] sm:$0xf] %vm216_vm0, %v259_v4  ;;  %266 = vst.msk [vmem:[#allocation2 + $0x18] sm:$0xf] %vm216_vm0, %v257_v5  ;;  %v652_v18 = vshrl.u32 %v613_v14, 16  ;;  %v665_v19 = vshrl.u32 %v615_v15, 16 }
  0x1c   : > { %267 = vst.msk [vmem:[#allocation2 + $0x28] sm:$0xf] %vm216_vm0, %v258_v6  ;;  %270 = vst.msk [vmem:[#allocation2 + $0x58] sm:$0xf] %vm216_vm0, %v261_v7  ;;  %v803_v20 = vshll.u32 %v778_v17, 16  ;;  %v2460_v24 = vrot.slane %v626_v13, 11 }
  0x1d   : > { %269 = vst.msk [vmem:[#allocation2 + $0x48] sm:$0xf] %vm216_vm0, %v260_v8  ;;  %271 = vst.msk [vmem:[#allocation2 + $0x68] sm:$0xf] %vm216_vm0, %v262_v9  ;;  %v2453_v21 = vld [vmem:[#allocation2 + $0x2c] sm:$0x1] }
  0x1e   : > { %v2455_v22 = vld [vmem:[#allocation2 + $0x54] sm:$0x8]  ;;  %vm290_vm1 = vsmask.f32 256  ;;  %vm291_vm2 = vsmask.f32 4368 }
  0x1f   : > { %v2465_v28 = vrot.slane %v639_v16, 11  ;;  %v817_v29 = vshll.u32 %v2453_v21, 16  ;;  %v2470_v31 = vrot.slane %v652_v18, 11  ;;  %v2472_v32 = vrot.slane %v665_v19, 11  ;;  %v619_v43 = vld [vmem:[#allocation2 + $0x64] sm:$0x8]  ;;  %vm2481_vm5 = vmor %vm290_vm1, %vm291_vm2 }
  0x20   : > { %v2474_v33 = vrot.slane %v803_v20, 5  ;;  %v678_v34 = vshrl.u32 %v2455_v22, 16  ;;  %vm478_vm3 = vsmask.f32 3328  ;;  %vm479_vm4 = vsmask.f32 7440 }
  0x21   : > { %v691_v4 = vshrl.u32 %v619_v43, 16  ;;  %v2284_v5 = vld [vmem:[%s2930_s1 + $0xf8] sm:$0xff]   ;;  %v2285_v10 = vld [vmem:[%s2930_s1 + $0x28] sm:$0xff]   ;;  %v2505_v19 = vrot.slane %v817_v29, 5  ;;  %vm2517_vm6 = vmor %vm478_vm3, %vm479_vm4  ;;  %vm1678_vm8 = vcmask 523264   ;;  %vm1923_vm9 = vcmask 516096  }
  0x22   : > { %v416_v26 = vld [vmem:[#allocation2 + $0x38] sm:$0xf]  ;;  %v782_v9 = vld [vmem:[#allocation2 + $0x3c] sm:$0x1]  ;;  %2197 = vmatprep.subr.bf16.mxu1 %v2284_v5  ;;  %2162 = vmatpush3.bf16.msra.mxu0 %v2285_v10  ;;  %v2508_v25 = vrot.slane %v678_v34, 11 }
  0x23   : > { %v414_v27 = vld [vmem:[#allocation2 + $0x18] sm:$0xf]  ;;  %435 = vrot.lane.b32.xlu1 %v416_v26, %s2347_s28  ;;  %v415_v35 = vld [vmem:[#allocation2 + $0x28] sm:$0xf] }
  0x24   : > { %431 = vrot.lane.b32.xlu0 %v414_v27, %s2347_s28  ;;  %v1075_v30 = vld [vmem:[#allocation2 + $0x38] sm:$0xf]  ;;  %v612_v37 = vld [vmem:[#allocation2 + $0x28] sm:$0xf] }
  0x25   : > { %v610_v36 = vld [vmem:[#allocation2 + $0x18] sm:$0xf]  ;;  %v644_v40 = vshrl.u32 %v612_v37, 16  ;;  %v647_v41 = vshll.u32 %v612_v37, 16  ;;  %v616_v47 = vld [vmem:[#allocation2 + $0x48] sm:$0xf] }
  0x26   : > { %v631_v38 = vshrl.u32 %v610_v36, 16  ;;  %v634_v39 = vshll.u32 %v610_v36, 16  ;;  %v614_v42 = vld [vmem:[#allocation2 + $0x38] sm:$0xf]  ;;  %v670_v51 = vshrl.u32 %v616_v47, 16  ;;  %v673_v52 = vshll.u32 %v616_v47, 16 }
  0x27   : > { %v418_v44 = vld [vmem:[#allocation2 + $0x58] sm:$0xf]  ;;  %v657_v45 = vshrl.u32 %v614_v42, 16  ;;  %v660_v46 = vshll.u32 %v614_v42, 16  ;;  %1092 = vrot.lane.b32.xlu1 %v1075_v30, %s2347_s28  ;;  %v646_v50 = vrot.slane %v644_v40, 7 }
  0x28   : > { %v777_v48 = vld [vmem:[#allocation2 + $0x18] sm:$0xf]  ;;  %433 = vrot.lane.b32.xlu0 %v415_v35, %s2347_s28  ;;  %v633_v49 = vrot.slane %v631_v38, 7  ;;  %v779_v53 = vld [vmem:[#allocation2 + $0x28] sm:$0xf]  ;;  %v672_v62 = vrot.slane %v670_v51, 7 }
  0x29   : > { %v1074_v54 = vld [vmem:[#allocation2 + $0x28] sm:$0xf]  ;;  %v659_v55 = vrot.slane %v657_v45, 7  ;;  %v794_v56 = vshrl.u32 %v777_v48, 16  ;;  %v797_v57 = vshll.u32 %v777_v48, 16  ;;  %v808_v58 = vshrl.u32 %v779_v53, 16 }
  0x2a   : > { %v636_v60 = vor.u32 %v634_v39, %v633_v49  ;;  %v649_v61 = vor.u32 %v647_v41, %v646_v50  ;;  %v811_v63 = vshll.u32 %v779_v53, 16  ;;  %v618_v0 = vld [vmem:[#allocation2 + $0x58] sm:$0xf]  ;;  %v2490_v8 = vld [vmem:[#allocation2 + $0x68] sm:$0xf]  ;;  %v2498_v13 = vor.u32 %v673_v52, %v672_v62 }
  0x2b   : > { %v796_v1 = vrot.slane %v794_v56, 4  ;;  %v799_v2 = vrot.slane %v797_v57, 5  ;;  %v810_v3 = vrot.slane %v808_v58, 4  ;;  %439 = vrot.lane.b32.xlu1 %v418_v44, %s2347_s28  ;;  %v662_v6 = vor.u32 %v660_v46, %v659_v55  ;;  %v417_v12 = vld [vmem:[#allocation2 + $0x48] sm:$0xf]  ;;  %v2286_v48 = vld [vmem:[%s2930_s1 + $0xb8] sm:$0xff]  }
  0x2c   : > { %1090 = vrot.lane.b32.xlu0 %v1074_v54, %s2347_s28  ;;  %v813_v7 = vrot.slane %v811_v63, 5  ;;  %v637_v11 = vsel %vm2481_vm5, %v2460_v24, %v636_v60  ;;  %v683_v15 = vshrl.u32 %v618_v0, 16  ;;  %v781_v16 = vld [vmem:[#allocation2 + $0x38] sm:$0xf]  ;;  %v650_v17 = vsel %vm2481_vm5, %v2465_v28, %v649_v61  ;;  %v783_v22 = vld [vmem:[#allocation2 + $0x48] sm:$0xf]  ;;  %2198 = vmatpush3.bf16.msra.mxu1 %v2286_v48 }
  0x2d   : > { %v800_v14 = vor.u32 %v799_v2, %v796_v1  ;;  %v686_v20 = vshll.u32 %v618_v0, 16  ;;  %v263_v23 = vld [vmem:[%s2435_s25 + $0x18] sm:$0xf]  ;;  %v696_v27 = vshrl.u32 %v2490_v8, 16  ;;  %v264_v30 = vld [vmem:[%s2435_s25 + $0x1c] sm:$0xf]  ;;  %v663_v37 = vsel %vm2481_vm5, %v2470_v31, %v662_v6 }
  0x2e   : > { %v814_v18 = vor.u32 %v813_v7, %v810_v3  ;;  %v685_v26 = vrot.slane %v683_v15, 7  ;;  %272 = vst.msk [vmem:[#allocation2 + $0x78] sm:$0xf] %vm216_vm0, %v263_v23  ;;  %v2521_v28 = vrot.slane %v691_v4, 11  ;;  %v822_v29 = vshrl.u32 %v781_v16, 16  ;;  %v2287_v55 = vld [vmem:[%s2930_s1 + $0x60] sm:$0xff]  }
  0x2f   : > { %v801_v24 = vrot.slane %v800_v14, 4  ;;  %729 = vrot.lane.b32.xlu1 %v637_v11, %s2347_s28  ;;  %v825_v34 = vshll.u32 %v781_v16, 16  ;;  %v831_v35 = vshll.u32 %v782_v9, 16  ;;  %v784_v36 = vld [vmem:[#allocation2 + $0x4c] sm:$0x1]  ;;  %v676_v38 = vsel %vm2481_vm5, %v2472_v32, %v2498_v13  ;;  %v2288_v61 = vld [vmem:[%s2930_s1 + $0xf0] sm:$0xff]   ;;  %2163 = vmatprep.subr.bf16.mxu0 %v2287_v55 }
  0x30   : > { %437 = vrot.lane.b32.xlu0 %v417_v12, %s2347_s28  ;;  %273 = vst.msk [vmem:[#allocation2 + $0x88] sm:$0xf] %vm216_vm0, %v264_v30  ;;  %v699_v39 = vshll.u32 %v2490_v8, 16  ;;  %v836_v40 = vshrl.u32 %v783_v22, 16  ;;  %v621_v41 = vld [vmem:[#allocation2 + $0x74] sm:$0x8]  ;;  %v688_v44 = vor.u32 %v686_v20, %v685_v26  ;;  %2199 = vmatprep.subr.bf16.mxu1 %v2288_v61 }
  0x31   : > { %v623_v42 = vld [vmem:[#allocation2 + $0x84] sm:$0x8]  ;;  %v815_v43 = vrot.slane %v814_v18, 4  ;;  %v824_v45 = vrot.slane %v822_v29, 4  ;;  %v827_v46 = vrot.slane %v825_v34, 5  ;;  %v806_v31 = vsel %vm2517_vm6, %v801_v24, %v2474_v33  ;;  %v2290_v13 = vld [vmem:[%s2930_s1 + $0xb0] sm:$0xff]  }
  0x32   : > { %v785_v47 = vld [vmem:[#allocation2 + $0x58] sm:$0xf]  ;;  %v698_v49 = vrot.slane %v696_v27, 7  ;;  %v838_v32 = vrot.slane %v836_v40, 4  ;;  %v839_v50 = vshll.u32 %v783_v22, 16  ;;  %v2540_v52 = vrot.slane %v831_v35, 5  ;;  %2200 = vmatpush3.bf16.msra.mxu1 %v2290_v13 }
  0x33   : > { %731 = vrot.lane.b32.xlu1 %v650_v17, %s2347_s28  ;;  %v828_v51 = vor.u32 %v827_v46, %v824_v45  ;;  %v845_v53 = vshll.u32 %v784_v36, 16  ;;  %v704_v54 = vshrl.u32 %v621_v41, 16  ;;  %v717_v57 = vshrl.u32 %v623_v42, 16  ;;  %v786_v58 = vld [vmem:[#allocation2 + $0x5c] sm:$0x1]  ;;  %v2289_v8 = vld [vmem:[%s2930_s1 + $0x20] sm:$0xff]  }
  0x34   : > { %733 = vrot.lane.b32.xlu0 %v663_v37, %s2347_s28  ;;  %v841_v56 = vrot.slane %v839_v50, 5  ;;  %v850_v33 = vshrl.u32 %v785_v47, 16  ;;  %v853_v60 = vshll.u32 %v785_v47, 16  ;;  %v820_v62 = vsel %vm2517_vm6, %v815_v43, %v2505_v19  ;;  %v787_v1 = vld [vmem:[#allocation2 + $0x68] sm:$0xf]  ;;  %2164 = vmatpush3.bf16.msra.mxu0 %v2289_v8  ;;  %v2291_v34 = vld [vmem:[%s2930_s1 + $0x58] sm:$0xff]  }
  0x35   : > { %v689_v63 = vsel %vm2481_vm5, %v2508_v25, %v688_v44  ;;  %v2554_v0 = vld [vmem:[#allocation2 + $0x78] sm:$0xf]  ;;  %v788_v2 = vld [vmem:[#allocation2 + $0x6c] sm:$0x1]  ;;  %v701_v3 = vor.u32 %v699_v39, %v698_v49  ;;  %v829_v4 = vrot.slane %v828_v51, 4  ;;  %v2564_v9 = vrot.slane %v845_v53, 5  ;;  %2165 = vmatprep.subr.bf16.mxu0 %v2291_v34 }
  0x36   : > { %v842_v5 = vor.u32 %v841_v56, %v838_v32  ;;  %v709_v6 = vshrl.u32 %v2554_v0, 16  ;;  %v2566_v10 = vrot.slane %v704_v54, 11  ;;  %v712_v11 = vshll.u32 %v2554_v0, 16  ;;  %v790_v18 = vld [vmem:[#allocation2 + $0x7c] sm:$0x1]  ;;  %v2292_v40 = vld [vmem:[%s2930_s1 + $0xe8] sm:$0xff]  }
  0x37   : > { %v2557_v7 = vld [vmem:[#allocation2 + $0x88] sm:$0xf]  ;;  %735 = vrot.lane.b32.xlu1 %v676_v38, %s2347_s28  ;;  %v2573_v14 = vrot.slane %v717_v57, 11  ;;  %v852_v16 = vrot.slane %v850_v33, 4  ;;  %v855_v17 = vrot.slane %v853_v60, 5  ;;  %v859_v20 = vshll.u32 %v786_v58, 16  ;;  %2201 = vmatprep.subr.bf16.mxu1 %v2292_v40 }
  0x38   : > { %905 = vrot.lane.b32.xlu0 %v806_v31, %s2347_s28  ;;  %v722_v12 = vshrl.u32 %v2557_v7, 16  ;;  %v725_v15 = vshll.u32 %v2557_v7, 16  ;;  %v2576_v19 = vrot.slane %v842_v5, 4  ;;  %v864_v22 = vshrl.u32 %v787_v1, 16  ;;  %v789_v24 = vld [vmem:[#allocation2 + $0x78] sm:$0xf] }
  0x39   : > { %v867_v23 = vshll.u32 %v787_v1, 16  ;;  %v711_v25 = vrot.slane %v709_v6, 7  ;;  %v856_v27 = vor.u32 %v855_v17, %v852_v16  ;;  %v873_v30 = vshll.u32 %v788_v2, 16  ;;  %v792_v29 = vld [vmem:[#allocation2 + $0x8c] sm:$0x1] }
  0x3a   : > { %v2578_v26 = vrot.slane %v722_v12, 7  ;;  %v702_v35 = vsel %vm2481_vm5, %v2521_v28, %v701_v3  ;;  %v2588_v36 = vrot.slane %v859_v20, 5  ;;  %v866_v37 = vrot.slane %v864_v22, 4  ;;  %v791_v39 = vld [vmem:[#allocation2 + $0x88] sm:$0xf]  ;;  %v2293_v28 = vld [vmem:[%s2930_s1 + $0x18] sm:$0xff]  }
  0x3b   : > { %907 = vrot.lane.b32.xlu1 %v820_v62, %s2347_s28  ;;  %v869_v38 = vrot.slane %v867_v23, 5  ;;  %v834_v41 = vsel %vm2517_vm6, %v829_v4, %v2540_v52  ;;  %v2596_v42 = vrot.slane %v856_v27, 4  ;;  %v2598_v43 = vrot.slane %v873_v30, 5  ;;  %v274_v45 = vld [vmem:[#allocation2 + $0x4] sm:$0x8]  ;;  %2166 = vmatpush3.bf16.msra.mxu0 %v2293_v28  ;;  %v2294_v56 = vld [vmem:[%s2930_s1 + $0xa8] sm:$0xff]  }
  0x3c   : > { %737 = vrot.lane.b32.xlu0 %v689_v63, %s2347_s28  ;;  %v878_v44 = vshrl.u32 %v789_v24, 16  ;;  %v881_v47 = vshll.u32 %v789_v24, 16  ;;  %v887_v48 = vshll.u32 %v790_v18, 16  ;;  %v275_v31 = vld [vmem:[#allocation2 + $0x8] sm:$0xf]  ;;  %v848_v32 = vsel %vm2517_vm6, %v2576_v19, %v2564_v9  ;;  %2202 = vmatpush3.bf16.msra.mxu1 %v2294_v56  ;;  %v2295_v18 = vld [vmem:[%s2930_s1 + $0x50] sm:$0xff]  }
  0x3d   : > { %v870_v46 = vor.u32 %v869_v38, %v866_v37  ;;  %v280_v49 = vld [vmem:[#allocation2 + $0x34] sm:$0x8]  ;;  %v1076_v50 = vld [vmem:[#allocation2 + $0x48] sm:$0xf]  ;;  %v892_v52 = vshrl.u32 %v791_v39, 16  ;;  %v895_v53 = vshll.u32 %v791_v39, 16  ;;  %v714_v3 = vor.u32 %v712_v11, %v711_v25  ;;  %2167 = vmatprep.subr.bf16.mxu0 %v2295_v18 }
  0x3e   : > { %v880_v51 = vrot.slane %v878_v44, 4  ;;  %v281_v54 = vld [vmem:[#allocation2 + $0x38] sm:$0xf]  ;;  %v276_v55 = vld [vmem:[#allocation2 + $0x14] sm:$0x8]  ;;  %v883_v58 = vrot.slane %v881_v47, 5 }
  0x3f   : > { %739 = vrot.lane.b32.xlu1 %v702_v35, %s2347_s28  ;;  %v2612_v57 = vrot.slane %v870_v46, 4  ;;  %v2614_v33 = vrot.slane %v887_v48, 5  ;;  %v901_v60 = vshll.u32 %v792_v29, 16  ;;  %v277_v61 = vld [vmem:[#allocation2 + $0x18] sm:$0xf]  ;;  %v894_v62 = vrot.slane %v892_v52, 4 }
  0x40   : > { %909 = vrot.lane.b32.xlu0 %v834_v41, %s2347_s28  ;;  %v897_v63 = vrot.slane %v895_v53, 5  ;;  %v294_v1 = vshrl.u32 %v274_v45, 16  ;;  %v299_v2 = vshrl.u32 %v275_v31, 16  ;;  %v884_v4 = vor.u32 %v883_v58, %v880_v51  ;;  %v1077_v8 = vld [vmem:[#allocation2 + $0x58] sm:$0xf]  ;;  %v2296_v30 = vld [vmem:[%s2930_s1 + $0xe0] sm:$0xff]  }
  0x41   : > { %v2618_v5 = vrot.slane %v901_v60, 5  ;;  %v302_v6 = vshll.u32 %v275_v31, 16  ;;  %v419_v9 = vld [vmem:[#allocation2 + $0x68] sm:$0xf]  ;;  %v333_v17 = vshrl.u32 %v280_v49, 16  ;;  %v338_v11 = vshrl.u32 %v281_v54, 16  ;;  %2203 = vmatprep.subr.bf16.mxu1 %v2296_v30 }
  0x42   : > { %v898_v12 = vor.u32 %v897_v63, %v894_v62  ;;  %v2069_v13 = vrot.slane %v294_v1, 11  ;;  %v301_v16 = vrot.slane %v299_v2, 7  ;;  %v2625_v0 = vrot.slane %v884_v4, 4  ;;  %v940_v27 = vld [vmem:[#allocation2 + $0x34] sm:$0x8]  ;;  %v2299_v51 = vld [vmem:[%s2930_s1 + $0x48] sm:$0xff]  }
  0x43   : > { %911 = vrot.lane.b32.xlu1 %v848_v32, %s2347_s28  ;;  %v341_v19 = vshll.u32 %v281_v54, 16  ;;  %v307_v20 = vshrl.u32 %v276_v55, 16  ;;  %v2072_v24 = vrot.slane %v333_v17, 11  ;;  %v312_v25 = vshrl.u32 %v277_v61, 16  ;;  %v941_v38 = vld [vmem:[#allocation2 + $0x38] sm:$0xf] }
  0x44   : > { %1094 = vrot.lane.b32.xlu0 %v1076_v50, %s2347_s28  ;;  %v2627_v22 = vrot.slane %v898_v12, 4  ;;  %v304_v23 = vor.u32 %v302_v6, %v301_v16  ;;  %v2635_v29 = vor.u32 %v725_v15, %v2578_v26  ;;  %v340_v34 = vrot.slane %v338_v11, 7  ;;  %v2297_v39 = vld [vmem:[%s2930_s1 + $0x10] sm:$0xff]   ;;  %v420_v40 = vld [vmem:[#allocation2 + $0x78] sm:$0xf]  ;;  %v2301_v6 = vld [vmem:[%s2930_s1 + $0x8] sm:$0xff]  }
  0x45   : > { %v2070_v35 = vrot.slane %v307_v20, 11  ;;  %v315_v37 = vshll.u32 %v277_v61, 16  ;;  %v715_v41 = vsel %vm2481_vm5, %v2566_v10, %v714_v3  ;;  %v314_v45 = vrot.slane %v312_v25, 7  ;;  %v278_v15 = vld [vmem:[#allocation2 + $0x24] sm:$0x8]  ;;  %2168 = vmatpush3.bf16.msra.mxu0 %v2297_v39  ;;  %v2300_v58 = vld [vmem:[%s2930_s1 + $0xd8] sm:$0xff]  }
  0x46   : > { %v305_v44 = vsel %vm2481_vm5, %v2069_v13, %v304_v23  ;;  %v968_v7 = vshrl.u32 %v940_v27, 16  ;;  %v279_v26 = vld [vmem:[#allocation2 + $0x28] sm:$0xf]  ;;  %v343_v28 = vor.u32 %v341_v19, %v340_v34  ;;  %v973_v46 = vshrl.u32 %v941_v38, 16  ;;  %v2298_v10 = vld [vmem:[%s2930_s1 + $0xa0] sm:$0xff]   ;;  %2169 = vmatprep.subr.bf16.mxu0 %v2299_v51  ;;  %v2304_v27 = vld [vmem:[%s2930_s1 + $0xd0] sm:$0xff]  }
  0x47   : > { %1096 = vrot.lane.b32.xlu1 %v1077_v8, %s2347_s28  ;;  %405 = vst.msk [vmem:[#allocation3] sm:$0xf] %vm216_vm0, %v305_v44  ;;  %v976_v47 = vshll.u32 %v941_v38, 16  ;;  %v320_v48 = vshrl.u32 %v278_v15, 16  ;;  %v317_v31 = vor.u32 %v315_v37, %v314_v45  ;;  %v325_v32 = vshrl.u32 %v279_v26, 16  ;;  %2204 = vmatpush3.bf16.msra.mxu1 %v2298_v10  ;;  %v2303_v19 = vld [vmem:[%s2930_s1 + $0x40] sm:$0xff]  }
  0x48   : > { %441 = vrot.lane.b32.xlu0 %v419_v9, %s2347_s28  ;;  %v2086_v49 = vrot.slane %v968_v7, 11  ;;  %v328_v50 = vshll.u32 %v279_v26, 16  ;;  %v344_v52 = vsel %vm2481_vm5, %v2072_v24, %v343_v28  ;;  %v975_v53 = vrot.slane %v973_v46, 7  ;;  %v284_v61 = vld [vmem:[#allocation2 + $0x54] sm:$0x8]  ;;  %2205 = vmatprep.subr.bf16.mxu1 %v2300_v58 }
  0x49   : > { %v2071_v54 = vrot.slane %v320_v48, 11  ;;  %408 = vst.msk [vmem:[#allocation3 + $0x3c] sm:$0xf] %vm216_vm0, %v344_v52  ;;  %v318_v55 = vsel %vm2481_vm5, %v2070_v35, %v317_v31  ;;  %v327_v56 = vrot.slane %v325_v32, 7  ;;  %v728_v62 = vsel %vm2481_vm5, %v2573_v14, %v2635_v29  ;;  %v285_v2 = vld [vmem:[#allocation2 + $0x58] sm:$0xf]  ;;  %2170 = vmatpush3.bf16.msra.mxu0 %v2301_v6 }
  0x4a   : > { %406 = vst.msk [vmem:[#allocation3 + $0x14] sm:$0xf] %vm216_vm0, %v318_v55  ;;  %v978_v60 = vor.u32 %v976_v47, %v975_v53  ;;  %v862_v63 = vsel %vm2517_vm6, %v2596_v42, %v2588_v36  ;;  %v359_v3 = vshrl.u32 %v284_v61, 16  ;;  %v938_v4 = vld [vmem:[#allocation2 + $0x24] sm:$0x8]  ;;  %v364_v9 = vshrl.u32 %v285_v2, 16  ;;  %2171 = vmatprep.subr.bf16.mxu0 %v2303_v19 }
  0x4b   : > { %443 = vrot.lane.b32.xlu1 %v420_v40, %s2347_s28  ;;  %v330_v1 = vor.u32 %v328_v50, %v327_v56  ;;  %v367_v12 = vshll.u32 %v285_v2, 16  ;;  %v939_v14 = vld [vmem:[#allocation2 + $0x28] sm:$0xf]  ;;  %v955_v13 = vshrl.u32 %v938_v4, 16  ;;  %v2302_v36 = vld [vmem:[%s2930_s1 + $0x98] sm:$0xff]   ;;  %v876_v24 = vsel %vm2517_vm6, %v2612_v57, %v2598_v43  ;;  %v2306_v26 = vld [vmem:[%s2930_s1 + $0x90] sm:$0xff]  }
  0x4c   : > { %741 = vrot.lane.b32.xlu0 %v715_v41, %s2347_s28  ;;  %v979_v8 = vsel %vm2481_vm5, %v2086_v49, %v978_v60  ;;  %v1078_v42 = vld [vmem:[#allocation2 + $0x68] sm:$0xf]  ;;  %v2074_v17 = vrot.slane %v359_v3, 11  ;;  %v960_v18 = vshrl.u32 %v939_v14, 16  ;;  %v963_v11 = vshll.u32 %v939_v14, 16  ;;  %2206 = vmatpush3.bf16.msra.mxu1 %v2302_v36  ;;  %v2314_v60 = vld [vmem:[%s2930_s1 + $0xc0] sm:$0xff]  }
  0x4d   : > { %1067 = vst.msk [vmem:[#allocation3 + $0x20] sm:$0xf] %vm216_vm0, %v979_v8  ;;  %v331_v16 = vsel %vm2481_vm5, %v2071_v54, %v330_v1  ;;  %v366_v20 = vrot.slane %v364_v9, 7  ;;  %v2085_v23 = vrot.slane %v955_v13, 11  ;;  %v1079_v29 = vld [vmem:[#allocation2 + $0x78] sm:$0xf]  ;;  %v890_v34 = vsel %vm2517_vm6, %v2625_v0, %v2614_v33  ;;  %2207 = vmatprep.subr.bf16.mxu1 %v2304_v27 }
  0x4e   : > { %407 = vst.msk [vmem:[#allocation3 + $0x28] sm:$0xf] %vm216_vm0, %v331_v16  ;;  %v962_v25 = vrot.slane %v960_v18, 7  ;;  %v462_v37 = vld [vmem:[#allocation2 + $0x8] sm:$0xf]  ;;  %v2305_v33 = vld [vmem:[%s2930_s1] sm:$0xff]   ;;  %v904_v51 = vsel %vm2517_vm6, %v2627_v22, %v2618_v5 }
  0x4f   : > { %743 = vrot.lane.b32.xlu1 %v728_v62, %s2347_s28  ;;  %v369_v30 = vor.u32 %v367_v12, %v366_v20  ;;  %v463_v38 = vld [vmem:[#allocation2 + $0xc] sm:$0x1]  ;;  %v282_v39 = vld [vmem:[#allocation2 + $0x44] sm:$0x8]  ;;  %v482_v57 = vshrl.u32 %v462_v37, 16  ;;  %v485_v40 = vshll.u32 %v462_v37, 16  ;;  %2172 = vmatpush3.bf16.msra.mxu0 %v2305_v33 }
  0x50   : > { %913 = vrot.lane.b32.xlu0 %v862_v63, %s2347_s28  ;;  %v965_v35 = vor.u32 %v963_v11, %v962_v25  ;;  %v491_v41 = vshll.u32 %v463_v38, 16  ;;  %v283_v44 = vld [vmem:[#allocation2 + $0x48] sm:$0xf]  ;;  %v346_v45 = vshrl.u32 %v282_v39, 16  ;;  %2208 = vmatpush3.bf16.msra.mxu1 %v2306_v26  ;;  %v465_v50 = vld [vmem:[#allocation2 + $0x1c] sm:$0x1] }
  0x51   : > { %v370_v43 = vsel %vm2481_vm5, %v2074_v17, %v369_v30  ;;  %v351_v7 = vshrl.u32 %v283_v44, 16  ;;  %v354_v15 = vshll.u32 %v283_v44, 16  ;;  %v484_v28 = vrot.slane %v482_v57, 4  ;;  %v2310_v48 = vld [vmem:[%s2930_s1 + $0xc8] sm:$0xff]   ;;  %v464_v56 = vld [vmem:[#allocation2 + $0x18] sm:$0xf] }
  0x52   : > { %410 = vst.msk [vmem:[#allocation3 + $0x64] sm:$0xf] %vm216_vm0, %v370_v43  ;;  %v966_v0 = vsel %vm2481_vm5, %v2085_v23, %v965_v35  ;;  %v487_v46 = vrot.slane %v485_v40, 5  ;;  %v493_v47 = vrot.slane %v491_v41, 5  ;;  %v1080_v10 = vld [vmem:[#allocation2 + $0x88] sm:$0xf]  ;;  %2209 = vmatprep.subr.bf16.mxu1 %v2310_v48 }
  0x53   : > { %915 = vrot.lane.b32.xlu1 %v876_v24, %s2347_s28  ;;  %1066 = vst.msk [vmem:[#allocation3 + $0xc] sm:$0xf] %vm216_vm0, %v966_v0  ;;  %v2073_v31 = vrot.slane %v346_v45, 11  ;;  %v353_v49 = vrot.slane %v351_v7, 7  ;;  %v505_v53 = vshll.u32 %v465_v50, 16  ;;  %v2311_v54 = vld [vmem:[%s2930_s1 + $0x88] sm:$0xff]  }
  0x54   : > { %1098 = vrot.lane.b32.xlu0 %v1078_v42, %s2347_s28  ;;  %v488_v32 = vor.u32 %v487_v46, %v484_v28  ;;  %v466_v58 = vld [vmem:[#allocation2 + $0x28] sm:$0xf]  ;;  %v1081_v61 = vld [vmem:[#allocation2 + $0x98] sm:$0xf]  ;;  %v496_v63 = vshrl.u32 %v464_v56, 16  ;;  %v499_v5 = vshll.u32 %v464_v56, 16  ;;  %2210 = vmatpush3.bf16.msra.mxu1 %v2311_v54 }
  0x55   : > { %v356_v52 = vor.u32 %v354_v15, %v353_v49  ;;  %v467_v22 = vld [vmem:[#allocation2 + $0x2c] sm:$0x1]  ;;  %v2315_v1 = vld [vmem:[%s2930_s1 + $0x80] sm:$0xff]   ;;  %v510_v3 = vshrl.u32 %v466_v58, 16  ;;  %v513_v4 = vshll.u32 %v466_v58, 16  ;;  %v2743_v8 = vld [vmem:[%s2930_s1 + $0x118] sm:$0xff]   ;;  %2211 = vmatprep.subr.bf16.mxu1 %v2314_v60 }
  0x56   : > { %v489_v55 = vrot.slane %v488_v32, 4  ;;  %v519_v6 = vshll.u32 %v467_v22, 16  ;;  %v498_v9 = vrot.slane %v496_v63, 4  ;;  %v501_v12 = vrot.slane %v499_v5, 5  ;;  %2245 = vmatprep.subr.bf16.mxu0 %v2743_v8  ;;  %v468_v18 = vld [vmem:[#allocation2 + $0x38] sm:$0xf] }
  0x57   : > { %1100 = vrot.lane.b32.xlu1 %v1079_v29, %s2347_s28  ;;  %v357_v62 = vsel %vm2481_vm5, %v2073_v31, %v356_v52  ;;  %v507_v14 = vrot.slane %v505_v53, 5  ;;  %v512_v13 = vrot.slane %v510_v3, 4  ;;  %v515_v36 = vrot.slane %v513_v4, 5  ;;  %v469_v11 = vld [vmem:[#allocation2 + $0x3c] sm:$0x1] }
  0x58   : > { %917 = vrot.lane.b32.xlu0 %v890_v34, %s2347_s28  ;;  %v494_v2 = vsel %vm2517_vm6, %v489_v55, %v493_v47  ;;  %409 = vst.msk [vmem:[#allocation3 + $0x50] sm:$0xf] %vm216_vm0, %v357_v62  ;;  %v521_v42 = vrot.slane %v519_v6, 5  ;;  %v502_v16 = vor.u32 %v501_v12, %v498_v9  ;;  %2212 = vmatpush3.bf16.msra.mxu1 %v2315_v1  ;;  %v524_v20 = vshrl.u32 %v468_v18, 16  ;;  %v761_v25 = vld [vmem:[#allocation2 + $0x18] sm:$0xf] }
  0x59   : > { %601 = vst.msk [vmem:[#allocation3 + $0x4] sm:$0xf] %vm216_vm0, %v494_v2  ;;  %v516_v17 = vor.u32 %v515_v36, %v512_v13  ;;  %2261 = vmatprep.subr.bf16.mxu1 %v2743_v8  ;;  %v527_v23 = vshll.u32 %v468_v18, 16  ;;  %v533_v24 = vshll.u32 %v469_v11, 16  ;;  %769 = vst.msk [vmem:[#allocation3 + $0x8] sm:$0xf] %vm216_vm0, %v761_v25 }
  0x5a   : > { %v503_v19 = vrot.slane %v502_v16, 4  ;;  %v526_v29 = vrot.slane %v524_v20, 4  ;;  %v762_v39 = vld [vmem:[#allocation2 + $0x28] sm:$0xf]  ;;  %v471_v57 = vld [vmem:[#allocation2 + $0x4c] sm:$0x1] }
  0x5b   : > { %919 = vrot.lane.b32.xlu1 %v904_v51, %s2347_s28  ;;  %v517_v27 = vrot.slane %v516_v17, 4  ;;  %v529_v34 = vrot.slane %v527_v23, 5  ;;  %v535_v35 = vrot.slane %v533_v24, 5  ;;  %770 = vst.msk [vmem:[#allocation3 + $0x1c] sm:$0xf] %vm216_vm0, %v762_v39  ;;  %v547_v33 = vshll.u32 %v471_v57, 16 }
  0x5c   : > { %1102 = vrot.lane.b32.xlu0 %v1080_v10, %s2347_s28  ;;  %v508_v30 = vsel %vm2517_vm6, %v503_v19, %v507_v14  ;;  %v470_v43 = vld [vmem:[#allocation2 + $0x48] sm:$0xf]  ;;  %v472_v26 = vld [vmem:[#allocation2 + $0x58] sm:$0xf]  ;;  %v473_v28 = vld [vmem:[#allocation2 + $0x5c] sm:$0x1] }
  0x5d   : > { %602 = vst.msk [vmem:[#allocation3 + $0x18] sm:$0xf] %vm216_vm0, %v508_v30  ;;  %v522_v37 = vsel %vm2517_vm6, %v517_v27, %v521_v42  ;;  %v530_v38 = vor.u32 %v529_v34, %v526_v29  ;;  %v538_v41 = vshrl.u32 %v470_v43, 16  ;;  %v541_v44 = vshll.u32 %v470_v43, 16  ;;  %v763_v46 = vld [vmem:[#allocation2 + $0x38] sm:$0xf] }
  0x5e   : > { %603 = vst.msk [vmem:[#allocation3 + $0x2c] sm:$0xf] %vm216_vm0, %v522_v37  ;;  %v549_v15 = vrot.slane %v547_v33, 5  ;;  %v552_v48 = vshrl.u32 %v472_v26, 16  ;;  %v555_v10 = vshll.u32 %v472_v26, 16  ;;  %v561_v31 = vshll.u32 %v473_v28, 16 }
  0x5f   : > { %1104 = vrot.lane.b32.xlu1 %v1081_v61, %s2347_s28  ;;  %v531_v40 = vrot.slane %v530_v38, 4  ;;  %v540_v45 = vrot.slane %v538_v41, 4  ;;  %v543_v7 = vrot.slane %v541_v44, 5  ;;  %771 = vst.msk [vmem:[#allocation3 + $0x30] sm:$0xf] %vm216_vm0, %v763_v46 }
  0x60   : > { %v554_v32 = vrot.slane %v552_v48, 4  ;;  %v557_v50 = vrot.slane %v555_v10, 5  ;;  %v563_v51 = vrot.slane %v561_v31, 5  ;;  %v764_v52 = vld [vmem:[#allocation2 + $0x48] sm:$0xf] }
  0x61   : > { %v536_v0 = vsel %vm2517_vm6, %v531_v40, %v535_v35  ;;  %v544_v47 = vor.u32 %v543_v7, %v540_v45  ;;  %772 = vst.msk [vmem:[#allocation3 + $0x44] sm:$0xf] %vm216_vm0, %v764_v52  ;;  %v942_v53 = vld [vmem:[#allocation2 + $0x44] sm:$0x8]  ;;  %v943_v54 = vld [vmem:[#allocation2 + $0x48] sm:$0xf] }
  0x62   : > { %604 = vst.msk [vmem:[#allocation3 + $0x40] sm:$0xf] %vm216_vm0, %v536_v0  ;;  %v558_v56 = vor.u32 %v557_v50, %v554_v32  ;;  %v981_v58 = vshrl.u32 %v942_v53, 16  ;;  %v986_v60 = vshrl.u32 %v943_v54, 16  ;;  %v944_v61 = vld [vmem:[#allocation2 + $0x54] sm:$0x8] }
  0x63   : > { %v545_v49 = vrot.slane %v544_v47, 4  ;;  %v989_v62 = vshll.u32 %v943_v54, 16  ;;  %v945_v63 = vld [vmem:[#allocation2 + $0x58] sm:$0xf]  ;;  %v994_v5 = vshrl.u32 %v944_v61, 16 }
  0x64   : > { %v286_v22 = vld [vmem:[#allocation2 + $0x64] sm:$0x8]  ;;  %v559_v1 = vrot.slane %v558_v56, 4  ;;  %v2087_v2 = vrot.slane %v981_v58, 11  ;;  %v988_v3 = vrot.slane %v986_v60, 7  ;;  %v999_v4 = vshrl.u32 %v945_v63, 16 }
  0x65   : > { %v550_v55 = vsel %vm2517_vm6, %v545_v49, %v549_v15  ;;  %v287_v6 = vld [vmem:[#allocation2 + $0x68] sm:$0xf]  ;;  %v2088_v9 = vrot.slane %v994_v5, 11  ;;  %v1002_v12 = vshll.u32 %v945_v63, 16  ;;  %v372_v14 = vshrl.u32 %v286_v22, 16 }
  0x66   : > { %605 = vst.msk [vmem:[#allocation3 + $0x54] sm:$0xf] %vm216_vm0, %v550_v55  ;;  %v377_v13 = vshrl.u32 %v287_v6, 16  ;;  %v564_v36 = vsel %vm2517_vm6, %v559_v1, %v563_v51  ;;  %v991_v42 = vor.u32 %v989_v62, %v988_v3  ;;  %v1001_v16 = vrot.slane %v999_v4, 7  ;;  %v288_v18 = vld [vmem:[#allocation2 + $0x74] sm:$0x8] }
  0x67   : > { %v380_v17 = vshll.u32 %v287_v6, 16  ;;  %606 = vst.msk [vmem:[#allocation3 + $0x68] sm:$0xf] %vm216_vm0, %v564_v36  ;;  %v2075_v11 = vrot.slane %v372_v14, 11  ;;  %v289_v20 = vld [vmem:[#allocation2 + $0x78] sm:$0xf] }
  0x68   : > { %v379_v19 = vrot.slane %v377_v13, 7  ;;  %v385_v23 = vshrl.u32 %v288_v18, 16  ;;  %v992_v24 = vsel %vm2481_vm5, %v2087_v2, %v991_v42  ;;  %v1004_v25 = vor.u32 %v1002_v12, %v1001_v16  ;;  %v474_v29 = vld [vmem:[#allocation2 + $0x68] sm:$0xf]  ;;  %v475_v34 = vld [vmem:[#allocation2 + $0x6c] sm:$0x1] }
  0x69   : > { %v390_v27 = vshrl.u32 %v289_v20, 16  ;;  %v393_v30 = vshll.u32 %v289_v20, 16  ;;  %1068 = vst.msk [vmem:[#allocation3 + $0x34] sm:$0xf] %vm216_vm0, %v992_v24  ;;  %v566_v38 = vshrl.u32 %v474_v29, 16  ;;  %v569_v39 = vshll.u32 %v474_v29, 16 }
  0x6a   : > { %v382_v35 = vor.u32 %v380_v17, %v379_v19  ;;  %v2076_v37 = vrot.slane %v385_v23, 11  ;;  %v476_v43 = vld [vmem:[#allocation2 + $0x78] sm:$0xf]  ;;  %v1005_v57 = vsel %vm2481_vm5, %v2088_v9, %v1004_v25  ;;  %v575_v41 = vshll.u32 %v475_v34, 16  ;;  %v477_v44 = vld [vmem:[#allocation2 + $0x7c] sm:$0x1] }
  0x6b   : > { %v392_v40 = vrot.slane %v390_v27, 7  ;;  %v580_v33 = vshrl.u32 %v476_v43, 16  ;;  %1069 = vst.msk [vmem:[#allocation3 + $0x48] sm:$0xf] %vm216_vm0, %v1005_v57  ;;  %v568_v45 = vrot.slane %v566_v38, 4  ;;  %v571_v7 = vrot.slane %v569_v39, 5 }
  0x6c   : > { %v383_v0 = vsel %vm2481_vm5, %v2075_v11, %v382_v35  ;;  %v583_v15 = vshll.u32 %v476_v43, 16  ;;  %v765_v26 = vld [vmem:[#allocation2 + $0x58] sm:$0xf]  ;;  %v589_v47 = vshll.u32 %v477_v44, 16  ;;  %v577_v10 = vrot.slane %v575_v41, 5 }
  0x6d   : > { %411 = vst.msk [vmem:[#allocation3 + $0x78] sm:$0xf] %vm216_vm0, %v383_v0  ;;  %v395_v28 = vor.u32 %v393_v30, %v392_v40  ;;  %v582_v46 = vrot.slane %v580_v33, 4  ;;  %773 = vst.msk [vmem:[#allocation3 + $0x58] sm:$0xf] %vm216_vm0, %v765_v26  ;;  %v572_v48 = vor.u32 %v571_v7, %v568_v45 }
  0x6e   : > { %v585_v31 = vrot.slane %v583_v15, 5  ;;  %v766_v49 = vld [vmem:[#allocation2 + $0x68] sm:$0xf]  ;;  %v591_v50 = vrot.slane %v589_v47, 5  ;;  %v946_v51 = vld [vmem:[#allocation2 + $0x64] sm:$0x8] }
  0x6f   : > { %v396_v32 = vsel %vm2481_vm5, %v2076_v37, %v395_v28  ;;  %774 = vst.msk [vmem:[#allocation3 + $0x6c] sm:$0xf] %vm216_vm0, %v766_v49  ;;  %v947_v52 = vld [vmem:[#allocation2 + $0x68] sm:$0xf]  ;;  %v573_v53 = vrot.slane %v572_v48, 4  ;;  %v1007_v55 = vshrl.u32 %v946_v51, 16 }
  0x70   : > { %412 = vst.msk [vmem:[#allocation3 + $0x8c] sm:$0xf] %vm216_vm0, %v396_v32  ;;  %v586_v54 = vor.u32 %v585_v31, %v582_v46  ;;  %v1012_v56 = vshrl.u32 %v947_v52, 16  ;;  %v948_v58 = vld [vmem:[#allocation2 + $0x74] sm:$0x8]  ;;  %v1015_v60 = vshll.u32 %v947_v52, 16 }
  0x71   : > { %v949_v61 = vld [vmem:[#allocation2 + $0x78] sm:$0xf]  ;;  %v1020_v62 = vshrl.u32 %v948_v58, 16  ;;  %v578_v5 = vsel %vm2517_vm6, %v573_v53, %v577_v10  ;;  %v2089_v1 = vrot.slane %v1007_v55, 11  ;;  %v768_v14 = vld [vmem:[#allocation2 + $0x88] sm:$0xf] }
  0x72   : > { %v767_v63 = vld [vmem:[#allocation2 + $0x78] sm:$0xf]  ;;  %v587_v22 = vrot.slane %v586_v54, 4  ;;  %v1014_v2 = vrot.slane %v1012_v56, 7  ;;  %607 = vst.msk [vmem:[#allocation3 + $0x7c] sm:$0xf] %vm216_vm0, %v578_v5 }
  0x73   : > { %775 = vst.msk [vmem:[#allocation3 + $0x80] sm:$0xf] %vm216_vm0, %v767_v63  ;;  %v2090_v3 = vrot.slane %v1020_v62, 11  ;;  %v1025_v4 = vshrl.u32 %v949_v61, 16  ;;  %v1028_v6 = vshll.u32 %v949_v61, 16 }
  0x74   : > { %v592_v9 = vsel %vm2517_vm6, %v587_v22, %v591_v50  ;;  %v1017_v12 = vor.u32 %v1015_v60, %v1014_v2  ;;  %v950_v13 = vld [vmem:[#allocation2 + $0x84] sm:$0x8]  ;;  %v951_v36 = vld [vmem:[#allocation2 + $0x88] sm:$0xf]  ;;  %776 = vst.msk [vmem:[#allocation3 + $0x94] sm:$0xf] %vm216_vm0, %v768_v14 }
  0x75   : > { %608 = vst.msk [vmem:[#allocation3 + $0x90] sm:$0xf] %vm216_vm0, %v592_v9  ;;  %v1027_v42 = vrot.slane %v1025_v4, 7  ;;  %v1033_v16 = vshrl.u32 %v950_v13, 16  ;;  %v1038_v17 = vshrl.u32 %v951_v36, 16  ;;  %v1041_v18 = vshll.u32 %v951_v36, 16 }
  0x76   : > { %v952_v11 = vld [vmem:[#allocation2 + $0x94] sm:$0x8]  ;;  %v1018_v19 = vsel %vm2481_vm5, %v2089_v1, %v1017_v12  ;;  %v953_v20 = vld [vmem:[#allocation2 + $0x98] sm:$0xf]  ;;  %v1122_v35 = vld [vmem:[#allocation2 + $0x28] sm:$0xf] }
  0x77   : > { %v1046_v23 = vshrl.u32 %v952_v11, 16  ;;  %1070 = vst.msk [vmem:[#allocation3 + $0x5c] sm:$0xf] %vm216_vm0, %v1018_v19  ;;  %v1030_v24 = vor.u32 %v1028_v6, %v1027_v42  ;;  %v2091_v25 = vrot.slane %v1033_v16, 11  ;;  %v1040_v27 = vrot.slane %v1038_v17, 7 }
  0x78   : > { %v1051_v30 = vshrl.u32 %v953_v20, 16  ;;  %v1054_v34 = vshll.u32 %v953_v20, 16  ;;  %v1123_v37 = vld [vmem:[#allocation2 + $0x2c] sm:$0x1]  ;;  %v1124_v57 = vld [vmem:[#allocation2 + $0x38] sm:$0xf] }
  0x79   : > { %v2092_v29 = vrot.slane %v1046_v23, 11  ;;  %v1031_v38 = vsel %vm2481_vm5, %v2090_v3, %v1030_v24  ;;  %v1043_v39 = vor.u32 %v1041_v18, %v1040_v27  ;;  %v1125_v40 = vld [vmem:[#allocation2 + $0x3c] sm:$0x1]  ;;  %v1139_v41 = vshrl.u32 %v1122_v35, 16  ;;  %v1126_v7 = vld [vmem:[#allocation2 + $0x48] sm:$0xf] }
  0x7a   : > { %v1053_v43 = vrot.slane %v1051_v30, 7  ;;  %1071 = vst.msk [vmem:[#allocation3 + $0x70] sm:$0xf] %vm216_vm0, %v1031_v38  ;;  %v1142_v44 = vshll.u32 %v1122_v35, 16  ;;  %v1148_v33 = vshll.u32 %v1123_v37, 16  ;;  %v1153_v0 = vshrl.u32 %v1124_v57, 16 }
  0x7b   : > { %v1156_v45 = vshll.u32 %v1124_v57, 16  ;;  %v1044_v15 = vsel %vm2481_vm5, %v2091_v25, %v1043_v39  ;;  %v1141_v28 = vrot.slane %v1139_v41, 4  ;;  %v1162_v46 = vshll.u32 %v1125_v40, 16  ;;  %v1127_v47 = vld [vmem:[#allocation2 + $0x4c] sm:$0x1] }
  0x7c   : > { %v1056_v26 = vor.u32 %v1054_v34, %v1053_v43  ;;  %v1128_v48 = vld [vmem:[#allocation2 + $0x58] sm:$0xf]  ;;  %1072 = vst.msk [vmem:[#allocation3 + $0x84] sm:$0xf] %vm216_vm0, %v1044_v15  ;;  %v1144_v10 = vrot.slane %v1142_v44, 5  ;;  %v1150_v31 = vrot.slane %v1148_v33, 5 }
  0x7d   : > { %v1155_v49 = vrot.slane %v1153_v0, 4  ;;  %v1158_v32 = vrot.slane %v1156_v45, 5  ;;  %v1129_v50 = vld [vmem:[#allocation2 + $0x5c] sm:$0x1]  ;;  %v1164_v52 = vrot.slane %v1162_v46, 5  ;;  %v1167_v53 = vshrl.u32 %v1126_v7, 16 }
  0x7e   : > { %v1057_v51 = vsel %vm2481_vm5, %v2092_v29, %v1056_v26  ;;  %v1170_v54 = vshll.u32 %v1126_v7, 16  ;;  %v1145_v55 = vor.u32 %v1144_v10, %v1141_v28  ;;  %v1176_v58 = vshll.u32 %v1127_v47, 16  ;;  %v1130_v61 = vld [vmem:[#allocation2 + $0x68] sm:$0xf]  ;;  %v1131_v1 = vld [vmem:[#allocation2 + $0x6c] sm:$0x1] }
  0x7f   : > { %1073 = vst.msk [vmem:[#allocation3 + $0x98] sm:$0xf] %vm216_vm0, %v1057_v51  ;;  %v1159_v56 = vor.u32 %v1158_v32, %v1155_v49  ;;  %v1181_v60 = vshrl.u32 %v1128_v48, 16  ;;  %v1169_v62 = vrot.slane %v1167_v53, 4  ;;  %v1184_v5 = vshll.u32 %v1128_v48, 16 }
  0x80   : > { %v1172_v63 = vrot.slane %v1170_v54, 5  ;;  %v1190_v22 = vshll.u32 %v1129_v50, 16  ;;  %v1146_v2 = vrot.slane %v1145_v55, 4  ;;  %v1178_v4 = vrot.slane %v1176_v58, 5  ;;  %v1132_v6 = vld [vmem:[#allocation2 + $0x78] sm:$0xf] }
  0x81   : > { %v1160_v3 = vrot.slane %v1159_v56, 4  ;;  %v1183_v59 = vrot.slane %v1181_v60, 4  ;;  %v1186_v12 = vrot.slane %v1184_v5, 5  ;;  %v1133_v13 = vld [vmem:[#allocation2 + $0x7c] sm:$0x1]  ;;  %v1195_v36 = vshrl.u32 %v1130_v61, 16 }
  0x82   : > { %v1173_v9 = vor.u32 %v1172_v63, %v1169_v62  ;;  %v1192_v14 = vrot.slane %v1190_v22, 5  ;;  %v1151_v42 = vsel %vm2517_vm6, %v1146_v2, %v1150_v31  ;;  %v1198_v17 = vshll.u32 %v1130_v61, 16  ;;  %v1134_v11 = vld [vmem:[#allocation2 + $0x88] sm:$0xf]  ;;  %v1135_v25 = vld [vmem:[#allocation2 + $0x8c] sm:$0x1] }
  0x83   : > { %v1165_v16 = vsel %vm2517_vm6, %v1160_v3, %v1164_v52  ;;  %v1204_v18 = vshll.u32 %v1131_v1, 16  ;;  %1258 = vst.msk [vmem:[#allocation3 + $0x10] sm:$0xf] %vm216_vm0, %v1151_v42  ;;  %v1187_v20 = vor.u32 %v1186_v12, %v1183_v59  ;;  %v1197_v23 = vrot.slane %v1195_v36, 4  ;;  %v1136_v35 = vld [vmem:[#allocation2 + $0x98] sm:$0xf] }
  0x84   : > { %1259 = vst.msk [vmem:[#allocation3 + $0x24] sm:$0xf] %vm216_vm0, %v1165_v16  ;;  %v1174_v19 = vrot.slane %v1173_v9, 4  ;;  %v1209_v24 = vshrl.u32 %v1132_v6, 16  ;;  %v1200_v30 = vrot.slane %v1198_v17, 5  ;;  %v1212_v29 = vshll.u32 %v1132_v6, 16 }
  0x85   : > { %v1218_v34 = vshll.u32 %v1133_v13, 16  ;;  %v1188_v38 = vrot.slane %v1187_v20, 4  ;;  %v1223_v43 = vshrl.u32 %v1134_v11, 16  ;;  %v1206_v40 = vrot.slane %v1204_v18, 5  ;;  %v1137_v44 = vld [vmem:[#allocation2 + $0x9c] sm:$0x1] }
  0x86   : > { %v1179_v37 = vsel %vm2517_vm6, %v1174_v19, %v1178_v4  ;;  %v1211_v39 = vrot.slane %v1209_v24, 4  ;;  %v1201_v57 = vor.u32 %v1200_v30, %v1197_v23  ;;  %v1214_v41 = vrot.slane %v1212_v29, 5  ;;  %v2324_v42 = vld [vmem:[%s2930_s1 + $0x110] sm:$0xff]   ;;  %v2328_v29 = vld [vmem:[%s2930_s1 + $0x100] sm:$0xff]  }
  0x87   : > { %v430_v27 = vpop.permute.xlu0 %429  ;;  %1260 = vst.msk [vmem:[#allocation3 + $0x38] sm:$0xf] %vm216_vm0, %v1179_v37  ;;  %v1226_v33 = vshll.u32 %v1134_v11, 16  ;;  %v1193_v0 = vsel %vm2517_vm6, %v1188_v38, %v1192_v14  ;;  %v1225_v45 = vrot.slane %v1223_v43, 4  ;;  %v1232_v7 = vshll.u32 %v1135_v25, 16  ;;  %v2327_v11 = vld [vmem:[%s2930_s1 + $0x108] sm:$0xff]  }
  0x88   : > { %454 = vst.msk [vmem:[#allocation3] sm:$0xf] %vm453_vm7, %v430_v27  ;;  %v1237_v15 = vshrl.u32 %v1136_v35, 16  ;;  %v1202_v26 = vrot.slane %v1201_v57, 4  ;;  %v1215_v28 = vor.u32 %v1214_v41, %v1211_v39  ;;  %v1240_v47 = vshll.u32 %v1136_v35, 16 }
  0x89   : > { %1261 = vst.msk [vmem:[#allocation3 + $0x4c] sm:$0xf] %vm216_vm0, %v1193_v0  ;;  %v1228_v46 = vrot.slane %v1226_v33, 5  ;;  %v1220_v48 = vrot.slane %v1218_v34, 5  ;;  %v1246_v31 = vshll.u32 %v1137_v44, 16  ;;  %v1234_v52 = vrot.slane %v1232_v7, 5 }
  0x8a   : > { %v1239_v10 = vrot.slane %v1237_v15, 4  ;;  %v1207_v50 = vsel %vm2517_vm6, %v1202_v26, %v1206_v40  ;;  %v1216_v53 = vrot.slane %v1215_v28, 4  ;;  %v1242_v54 = vrot.slane %v1240_v47, 5 }
  0x8b   : > { %v1229_v51 = vor.u32 %v1228_v46, %v1225_v45  ;;  %1262 = vst.msk [vmem:[#allocation3 + $0x60] sm:$0xf] %vm216_vm0, %v1207_v50  ;;  %v1248_v60 = vrot.slane %v1246_v31, 5  ;;  %v2331_v26 = vld [vmem:[#allocation3 + $0x10] ss:$20 sps:$4 sm:$0xff]  }
  0x8c   : > { %v1221_v56 = vsel %vm2517_vm6, %v1216_v53, %v1220_v48  ;;  %v1243_v58 = vor.u32 %v1242_v54, %v1239_v10 }
  0x8d   : > { %v1230_v55 = vrot.slane %v1229_v51, 4  ;;  %1263 = vst.msk [vmem:[#allocation3 + $0x74] sm:$0xf] %vm216_vm0, %v1221_v56 }
  0x8e   : > { %v1244_v5 = vrot.slane %v1243_v58, 4 }
  0x8f   : > { %v1235_v63 = vsel %vm2517_vm6, %v1230_v55, %v1234_v52 }
  0x90   : > { %1264 = vst.msk [vmem:[#allocation3 + $0x88] sm:$0xf] %vm216_vm0, %v1235_v63  ;;  %v1249_v22 = vsel %vm2517_vm6, %v1244_v5, %v1248_v60  ;;  %v2332_v50 = vld [vmem:[#allocation3 + $0x38] ss:$20 sps:$4 sm:$0xff]  }
  0x91   : > { %1265 = vst.msk [vmem:[#allocation3 + $0x9c] sm:$0xf] %vm216_vm0, %v1249_v22 }
  0x94   : > { %v2336_v56 = vld [vmem:[#allocation3 + $0x60] ss:$20 sps:$4 sm:$0xff]  }
  0x95   : > { %v436_v49 = vpop.permute.xlu1 %435 }
  0x96   : > { %v432_v32 = vpop.permute.xlu0 %431  ;;  %457 = vst.msk [vmem:[#allocation3 + $0x3c] sm:$0xf] %vm453_vm7, %v436_v49 }
  0x97   : > { %455 = vst.msk [vmem:[#allocation3 + $0x14] sm:$0xf] %vm453_vm7, %v432_v32 }
  0x99   : > { %v1093_v61 = vpop.permute.xlu1 %1092 }
  0x9a   : > { %v434_v62 = vpop.permute.xlu0 %433  ;;  %1115 = vst.msk [vmem:[#allocation3 + $0x20] sm:$0xf] %vm453_vm7, %v1093_v61  ;;  %v2337_v61 = vld [vmem:[#allocation3 + $0x88] ss:$20 sps:$4 sm:$0xff]  }
  0x9b   : > { %456 = vst.msk [vmem:[#allocation3 + $0x28] sm:$0xf] %vm453_vm7, %v434_v62 }
  0x9d   : > { %v440_v1 = vpop.permute.xlu1 %439 }
  0x9e   : > { %v1091_v2 = vpop.permute.xlu0 %1090  ;;  %459 = vst.msk [vmem:[#allocation3 + $0x64] sm:$0xf] %vm453_vm7, %v440_v1  ;;  %v2307_v13 = vld [vmem:[#allocation3] ss:$20 sps:$4 sm:$0xff]  }
  0x9f   : > { %1114 = vst.msk [vmem:[#allocation3 + $0xc] sm:$0xf] %vm453_vm7, %v1091_v2 }
  0xa1   : > { %v730_v3 = vpop.permute.xlu1 %729 }
  0xa2   : > { %v438_v4 = vpop.permute.xlu0 %437  ;;  %753 = vst.msk [vmem:[#allocation3 + $0x4] sm:$0xf] %vm453_vm7, %v730_v3 }
  0xa3   : > { %458 = vst.msk [vmem:[#allocation3 + $0x50] sm:$0xf] %vm453_vm7, %v438_v4 }
  0xa5   : > { %v732_v59 = vpop.permute.xlu1 %731 }
  0xa6   : > { %v734_v6 = vpop.permute.xlu0 %733  ;;  %754 = vst.msk [vmem:[#allocation3 + $0x18] sm:$0xf] %vm453_vm7, %v732_v59  ;;  %v2318_v27 = vld [vmem:[#allocation3 + $0xc] ss:$20 sps:$4 sm:$0xff]  }
  0xa7   : > { %755 = vst.msk [vmem:[#allocation3 + $0x2c] sm:$0xf] %vm453_vm7, %v734_v6  ;;  %1788 = vmatprep.mubr.bf16.mxu1 %v2318_v27 }
  0xa9   : > { %v736_v21 = vpop.permute.xlu1 %735 }
  0xaa   : > { %v906_v9 = vpop.permute.xlu0 %905  ;;  %756 = vst.msk [vmem:[#allocation3 + $0x40] sm:$0xf] %vm453_vm7, %v736_v21 }
  0xab   : > { %929 = vst.msk [vmem:[#allocation3 + $0x8] sm:$0xf] %vm453_vm7, %v906_v9 }
  0xad   : > { %v908_v12 = vpop.permute.xlu1 %907  ;;  %v2309_v36 = vld [vmem:[#allocation3 + $0x4] ss:$20 sps:$4 sm:$0xff]  }
  0xae   : > { %v738_v14 = vpop.permute.xlu0 %737  ;;  %930 = vst.msk [vmem:[#allocation3 + $0x1c] sm:$0xf] %vm453_vm7, %v908_v12  ;;  %1723 = vmatprep.mubr.bf16.mxu0 %v2309_v36  ;;  %v1272_v20 = vld [vmem:[#allocation3 + $0x28] sm:$0xff] }
  0xaf   : > { %757 = vst.msk [vmem:[#allocation3 + $0x54] sm:$0xf] %vm453_vm7, %v738_v14  ;;  %1724 = vmatmul.mubr.bf16.vlgmr.msra.gmra.mxu0 %v2307_v13 }
  0xb0   : > { %2246 = vmatpush3.bf16.msra.mxu0 %v2743_v8 }
  0xb1   : > { %v740_v16 = vpop.permute.xlu1 %739  ;;  %v2312_v18 = vld [vmem:[#allocation3 + $0x2c] ss:$20 sps:$4 sm:$0xff]   ;;  %2247 = vmatprep.subr.bf16.mxu0 %v2324_v42 }
  0xb2   : > { %v910_v17 = vpop.permute.xlu0 %909  ;;  %758 = vst.msk [vmem:[#allocation3 + $0x68] sm:$0xf] %vm453_vm7, %v740_v16  ;;  %v1275_v19 = vld [vmem:[#allocation3 + $0x3c] sm:$0xff]  ;;  %1731 = vmatprep.mubr.bf16.mxu0 %v2312_v18 }
  0xb3   : > { %931 = vst.msk [vmem:[#allocation3 + $0x30] sm:$0xf] %vm453_vm7, %v910_v17  ;;  %v2098_v30 = vcombine.low %v1272_v20, %v1275_v19 }
  0xb4   : > { %2248 = vmatpush3.bf16.msra.mxu0 %v2324_v42 }
  0xb5   : > { %v912_v23 = vpop.permute.xlu1 %911  ;;  %v2316_v25 = vld [vmem:[#allocation3 + $0x8] ss:$20 sps:$4 sm:$0xff]   ;;  %2249 = vmatprep.subr.bf16.mxu0 %v2327_v11 }
  0xb6   : > { %v1095_v24 = vpop.permute.xlu0 %1094  ;;  %932 = vst.msk [vmem:[#allocation3 + $0x44] sm:$0xf] %vm453_vm7, %v912_v23  ;;  %1789 = vmatmul.mubr.bf16.vlgmr.msra.gmra.mxu1 %v2316_v25  ;;  %v1278_v39 = vld [vmem:[#allocation3 + $0x50] sm:$0xff] }
  0xb7   : > { %1116 = vst.msk [vmem:[#allocation3 + $0x34] sm:$0xf] %vm453_vm7, %v1095_v24  ;;  %1732 = vmatmul.mubr.bf16.gmra.mxu0 %v2098_v30  ;;  %2265 = vmatpush3.bf16.msra.mxu1 %v2743_v8 }
  0xb8   : > { %2250 = vmatpush3.bf16.msra.mxu0 %v2327_v11  ;;  %2262 = vmatprep.subr.bf16.mxu1 %v2324_v42 }
  0xb9   : > { %v1097_v34 = vpop.permute.xlu1 %1096  ;;  %v2319_v37 = vld [vmem:[#allocation3 + $0x54] ss:$20 sps:$4 sm:$0xff]   ;;  %2251 = vmatprep.subr.bf16.mxu0 %v2328_v29 }
  0xba   : > { %v442_v35 = vpop.permute.xlu0 %441  ;;  %1117 = vst.msk [vmem:[#allocation3 + $0x48] sm:$0xf] %vm453_vm7, %v1097_v34  ;;  %v1281_v38 = vld [vmem:[#allocation3 + $0x64] sm:$0xff]  ;;  %1739 = vmatprep.mubr.bf16.mxu0 %v2319_v37 }
  0xbb   : > { %460 = vst.msk [vmem:[#allocation3 + $0x78] sm:$0xf] %vm453_vm7, %v442_v35  ;;  %2266 = vmatpush3.bf16.msra.mxu1 %v2324_v42  ;;  %v2103_v40 = vcombine.low %v1278_v39, %v1281_v38 }
  0xbc   : > { %2252 = vmatpush3.bf16.msra.mxu0 %v2328_v29  ;;  %2263 = vmatprep.subr.bf16.mxu1 %v2327_v11 }
  0xbd   : > { %v444_v43 = vpop.permute.xlu1 %443 }
  0xbe   : > { %v742_v57 = vpop.permute.xlu0 %741  ;;  %461 = vst.msk [vmem:[#allocation3 + $0x8c] sm:$0xf] %vm453_vm7, %v444_v43  ;;  %v1273_v44 = vld [vmem:[#allocation3 + $0x30] sm:$0xff] }
  0xbf   : > { %759 = vst.msk [vmem:[#allocation3 + $0x7c] sm:$0xf] %vm453_vm7, %v742_v57  ;;  %1740 = vmatmul.mubr.bf16.gmra.mxu0 %v2103_v40  ;;  %2267 = vmatpush3.bf16.msra.mxu1 %v2327_v11 }
  0xc0   : > { %2264 = vmatprep.subr.bf16.mxu1 %v2328_v29 }
  0xc1   : > { %v744_v8 = vpop.permute.xlu1 %743  ;;  %v1276_v33 = vld [vmem:[#allocation3 + $0x44] sm:$0xff] }
  0xc2   : > { %v914_v41 = vpop.permute.xlu0 %913  ;;  %v2322_v0 = vld [vmem:[#allocation3 + $0x34] ss:$20 sps:$4 sm:$0xff]   ;;  %760 = vst.msk [vmem:[#allocation3 + $0x90] sm:$0xf] %vm453_vm7, %v744_v8  ;;  %v2100_v45 = vcombine.low %v1273_v44, %v1276_v33 }
  0xc3   : > { %933 = vst.msk [vmem:[#allocation3 + $0x58] sm:$0xf] %vm453_vm7, %v914_v41  ;;  %1796 = vmatprep.mubr.bf16.mxu1 %v2322_v0  ;;  %2268 = vmatpush3.bf16.msra.mxu1 %v2328_v29 }
  0xc4   : > { %1797 = vmatmul.mubr.bf16.gmra.mxu1 %v2100_v45 }
  0xc5   : > { %v916_v7 = vpop.permute.xlu1 %915 }
  0xc6   : > { %v1099_v15 = vpop.permute.xlu0 %1098  ;;  %934 = vst.msk [vmem:[#allocation3 + $0x6c] sm:$0xf] %vm453_vm7, %v916_v7  ;;  %v1284_v47 = vld [vmem:[#allocation3 + $0x78] sm:$0xff] }
  0xc7   : > { %1118 = vst.msk [vmem:[#allocation3 + $0x5c] sm:$0xf] %vm453_vm7, %v1099_v15 }
  0xc9   : > { %v1101_v28 = vpop.permute.xlu1 %1100  ;;  %v1287_v48 = vld [vmem:[#allocation3 + $0x8c] sm:$0xff] }
  0xca   : > { %v918_v46 = vpop.permute.xlu0 %917  ;;  %v2325_v10 = vld [vmem:[#allocation3 + $0x7c] ss:$20 sps:$4 sm:$0xff]   ;;  %1119 = vst.msk [vmem:[#allocation3 + $0x70] sm:$0xf] %vm453_vm7, %v1101_v28  ;;  %v2108_v31 = vcombine.low %v1284_v47, %v1287_v48 }
  0xcb   : > { %935 = vst.msk [vmem:[#allocation3 + $0x80] sm:$0xf] %vm453_vm7, %v918_v46  ;;  %1747 = vmatprep.mubr.bf16.mxu0 %v2325_v10 }
  0xcc   : > { %1748 = vmatmul.mubr.bf16.gmra.mxu0 %v2108_v31 }
  0xcd   : > { %v920_v49 = vpop.permute.xlu1 %919  ;;  %2253 = vmatprep.mubr.msk.bf16.mxu0 %vm1678_vm8, %v2331_v26 }
  0xce   : > { %v1103_v32 = vpop.permute.xlu0 %1102  ;;  %936 = vst.msk [vmem:[#allocation3 + $0x94] sm:$0xf] %vm453_vm7, %v920_v49  ;;  %v1279_v52 = vld [vmem:[#allocation3 + $0x58] sm:$0xff] }
  0xcf   : > { %1120 = vst.msk [vmem:[#allocation3 + $0x84] sm:$0xf] %vm453_vm7, %v1103_v32 }
  0xd1   : > { %v1105_v51 = vpop.permute.xlu1 %1104  ;;  %v1282_v53 = vld [vmem:[#allocation3 + $0x6c] sm:$0xff] }
  0xd2   : > { %v2329_v54 = vld [vmem:[#allocation3 + $0x5c] ss:$20 sps:$4 sm:$0xff]   ;;  %1121 = vst.msk [vmem:[#allocation3 + $0x98] sm:$0xf] %vm453_vm7, %v1105_v51  ;;  %v2105_v55 = vcombine.low %v1279_v52, %v1282_v53 }
  0xd3   : > { %1804 = vmatprep.mubr.bf16.mxu1 %v2329_v54 }
  0xd4   : > { %1805 = vmatmul.mubr.bf16.gmra.mxu1 %v2105_v55  ;;  %2254 = vmatmul.mubr.msk.bf16.vlgmr.msra.gmra.mxu0 %vm1678_vm8, %v2332_v50 }
  0xd5   : > { %v2335_v60 = vld [vmem:[#allocation3 + $0x80] ss:$20 sps:$4 sm:$0xff]  }
  0xd9   : > { %v2333_v58 = vld [vmem:[#allocation3 + $0x84] ss:$20 sps:$4 sm:$0xff]  }
  0xda   : > { %1812 = vmatprep.mubr.bf16.mxu1 %v2333_v58 }
  0xdc   : > { %1813 = vmatmul.mubr.bf16.gmra.mxu1 %v2335_v60 }
  0xdd   : > { %2257 = vmatprep.mubr.msk.bf16.mxu1 %vm1678_vm8, %v2336_v56 }
  0xe4   : > { %2258 = vmatmul.mubr.msk.bf16.vlgmr.msra.gmra.mxu1 %vm1678_vm8, %v2337_v61 }
 0x16f   : > { %v2173_v62 = vpop.f32.mrf.mxu0 }
 0x171   : > { %v2174_v63 = vpop.f32.mrf.mxu0 }
 0x172   : > { %v2175_v34 = vadd.f32 %v2174_v63, %v2173_v62 }
 0x173   : > { %v2176_v5 = vpop.f32.mrf.mxu0 }
 0x175   : > { %v2177_v22 = vpop.f32.mrf.mxu0 }
 0x176   : > { %v2213_v2 = vpop.f32.mrf.mxu1  ;;  %v2178_v33 = vadd.f32 %v2177_v22, %v2176_v5 }
 0x177   : > { %v2179_v1 = vpop.f32.mrf.mxu0 }
 0x178   : > { %v2214_v4 = vpop.f32.mrf.mxu1 }
 0x179   : > { %v2180_v3 = vpop.f32.mrf.mxu0  ;;  %v2215_v25 = vadd.f32 %v2214_v4, %v2213_v2 }
 0x17a   : > { %v2216_v6 = vpop.f32.mrf.mxu1  ;;  %v2181_v24 = vadd.f32 %v2180_v3, %v2179_v1 }
 0x17b   : > { %v2182_v59 = vpop.f32.mrf.mxu0  ;;  %v1791_v40 = vadd.f32 %v2215_v25, %v2175_v34 }
 0x17c   : > { %v2217_v12 = vpop.f32.mrf.mxu1 }
 0x17d   : > { %v2183_v21 = vpop.f32.mrf.mxu0  ;;  %v2218_v43 = vadd.f32 %v2217_v12, %v2216_v6 }
 0x17e   : > { %v2184_v38 = vadd.f32 %v2183_v21, %v2182_v59 }
 0x17f   : > { %v2185_v9 = vpop.f32.mrf.mxu0  ;;  %v1794_v46 = vadd.f32 %v2218_v43, %v2178_v33 }
 0x181   : > { %v2186_v14 = vpop.f32.mrf.mxu0 }
 0x182   : > { %v2187_v63 = vadd.f32 %v2186_v14, %v2185_v9 }
 0x183   : > { %v2873_v36 = vpop.f32.mrf.mxu0 }
 0x184   : > { %v2219_v13 = vpop.f32.mrf.mxu1 }
 0x185   : > { %v2875_v16 = vpop.f32.mrf.mxu0 }
 0x186   : > { %v2220_v42 = vpop.f32.mrf.mxu1 }
 0x187   : > { %v2221_v19 = vadd.f32 %v2220_v42, %v2219_v13  ;;  %v2190_v13 = vadd.f32 %v2875_v16, %v2873_v36 }
 0x188   : > { %v2222_v17 = vpop.f32.mrf.mxu1 }
 0x189   : > { %v1799_v29 = vadd.f32 %v2221_v19, %v2181_v24 }
 0x18a   : > { %v2223_v20 = vpop.f32.mrf.mxu1 }
 0x18b   : > { %v2224_v30 = vadd.f32 %v2223_v20, %v2222_v17 }
 0x18c   : > { %v2191_v18 = vpop.f32.mrf.mxu0 }
 0x18d   : > { %v1802_v44 = vadd.f32 %v2224_v30, %v2184_v38 }
 0x18e   : > { %v2192_v11 = vpop.f32.mrf.mxu0 }
 0x18f   : > { %v2193_v55 = vadd.f32 %v2192_v11, %v2191_v18 }
 0x190   : > { %v2194_v23 = vpop.f32.mrf.mxu0 }
 0x192   : > { %v2195_v27 = vpop.f32.mrf.mxu0 }
 0x193   : > { %v2196_v42 = vadd.f32 %v2195_v27, %v2194_v23 }
 0x194   : > { %v2225_v35 = vpop.f32.mrf.mxu1  ;;  %v2255_v37 = vpop.f32.mrf.mxu0 }
 0x195   : > { %v1864_v39 = vadd.f32 %v2255_v37, %v1799_v29 }
 0x196   : > { %v2226_v57 = vpop.f32.mrf.mxu1  ;;  %v1855_v8 = vpop.f32.mrf.mxu0 }
 0x197   : > { %v1888_v41 = vpack.c.bf16 %v1864_v39, %v1864_v39  ;;  %v1856_v0 = vadd.f32 %v1855_v8, %v1791_v40  ;;  %v2227_v56 = vadd.f32 %v2226_v57, %v2225_v35  ;;  %v1927_v5 = vmul.f32 %v1864_v39, %v1864_v39 }
 0x198   : > { %v2228_v45 = vpop.f32.mrf.mxu1  ;;  %v2256_v7 = vpop.f32.mrf.mxu0  ;;  %v1905_v59 = vsel %vm1678_vm8, %v1864_v39, 0.0 }
 0x199   : > { %1896 = vst.msk [vmem:[%s2882_s30 + $0x8] sm:$0xf] %vm216_vm0, %v1888_v41  ;;  %v1867_v15 = vadd.f32 %v2256_v7, %v1802_v44  ;;  %v1886_v26 = vpack.c.bf16 %v1856_v0, %v1856_v0  ;;  %v1925_v51 = vmul.f32 %v1856_v0, %v1856_v0  ;;  %v1902_v58 = vsel %vm1678_vm8, %v1856_v0, 0.0 }
 0x19a   : > { %v2229_v28 = vpop.f32.mrf.mxu1  ;;  %v1858_v47 = vpop.f32.mrf.mxu0  ;;  %v1807_v12 = vadd.f32 %v2227_v56, %v2187_v63  ;;  %v1936_v9 = vsel %vm1678_vm8, %v1927_v5, 0.0 }
 0x19b   : > { %v1889_v48 = vpack.c.bf16 %v1867_v15, %v1867_v15  ;;  %1894 = vst.msk [vmem:[%s2882_s30] sm:$0xf] %vm216_vm0, %v1886_v26  ;;  %v1859_v10 = vadd.f32 %v1858_v47, %v1794_v46  ;;  %v1933_v22 = vsel %vm1678_vm8, %v1925_v51, 0.0  ;;  %v2230_v6 = vadd.f32 %v2229_v28, %v2228_v45 }
 0x19c   : > { %v2231_v31 = vpop.f32.mrf.mxu1  ;;  %v1928_v14 = vmul.f32 %v1867_v15, %v1867_v15  ;;  %v1907_v20 = vsel %vm1678_vm8, %v1867_v15, 0.0 }
 0x19d   : > { %1897 = vst.msk [vmem:[%s2882_s30 + $0xc] sm:$0xf] %vm216_vm0, %v1889_v48  ;;  %v1887_v49 = vpack.c.bf16 %v1859_v10, %v1859_v10  ;;  %v1926_v32 = vmul.f32 %v1859_v10, %v1859_v10  ;;  %v1903_v52 = vsel %vm1678_vm8, %v1859_v10, 0.0  ;;  %v1810_v16 = vadd.f32 %v2230_v6, %v2190_v13 }
 0x19e   : > { %v2232_v50 = vpop.f32.mrf.mxu1  ;;  %v1904_v61 = vadd.f32 %v1903_v52, %v1902_v58  ;;  %v1938_v37 = vsel %vm1678_vm8, %v1928_v14, 0.0 }
 0x19f   : > { %v2233_v53 = vadd.f32 %v2232_v50, %v2231_v31  ;;  %1895 = vst.msk [vmem:[%s2882_s30 + $0x4] sm:$0xf] %vm216_vm0, %v1887_v49  ;;  %v1934_v60 = vsel %vm1678_vm8, %v1926_v32, 0.0 }
 0x1a0   : > { %v2234_v54 = vpop.f32.mrf.mxu1  ;;  %v1935_v2 = vadd.f32 %v1934_v60, %v1933_v22  ;;  %v1906_v17 = vadd.f32 %v1905_v59, %v1904_v61 }
 0x1a1   : > { %v1815_v1 = vadd.f32 %v2233_v53, %v2193_v55 }
 0x1a2   : > { %v2235_v62 = vpop.f32.mrf.mxu1  ;;  %v1937_v24 = vadd.f32 %v1936_v9, %v1935_v2  ;;  %v1908_v23 = vadd.f32 %v1907_v20, %v1906_v17 }
 0x1a3   : > { %v2236_v3 = vadd.f32 %v2235_v62, %v2234_v54 }
 0x1a4   : > { %v2259_v4 = vpop.f32.mrf.mxu1  ;;  %v1939_v57 = vadd.f32 %v1938_v37, %v1937_v24 }
 0x1a5   : > { %v1880_v21 = vadd.f32 %v2259_v4, %v1815_v1  ;;  %v1818_v25 = vadd.f32 %v2236_v3, %v2196_v42 }
 0x1a6   : > { %v1871_v18 = vpop.f32.mrf.mxu1 }
 0x1a7   : > { %v1892_v11 = vpack.c.bf16 %v1880_v21, %v1880_v21  ;;  %v1872_v19 = vadd.f32 %v1871_v18, %v1807_v12  ;;  %v1931_v8 = vmul.f32 %v1880_v21, %v1880_v21  ;;  %v1913_v7 = vsel %vm1678_vm8, %v1880_v21, 0.0 }
 0x1a8   : > { %v2260_v30 = vpop.f32.mrf.mxu1 }
 0x1a9   : > { %1900 = vst.msk [vmem:[%s2882_s30 + $0x18] sm:$0xf] %vm216_vm0, %v1892_v11  ;;  %v1890_v29 = vpack.c.bf16 %v1872_v19, %v1872_v19  ;;  %v1909_v34 = vsel %vm1678_vm8, %v1872_v19, 0.0  ;;  %v1929_v36 = vmul.f32 %v1872_v19, %v1872_v19  ;;  %v1883_v27 = vadd.f32 %v2260_v30, %v1818_v25 }
 0x1aa   : > { %v1874_v35 = vpop.f32.mrf.mxu1  ;;  %v1910_v43 = vadd.f32 %v1909_v34, %v1908_v23  ;;  %v1944_v47 = vsel %vm1678_vm8, %v1931_v8, 0.0 }
 0x1ab   : > { %1898 = vst.msk [vmem:[%s2882_s30 + $0x10] sm:$0xf] %vm216_vm0, %v1890_v29  ;;  %v1940_v38 = vsel %vm1678_vm8, %v1929_v36, 0.0  ;;  %v1875_v39 = vadd.f32 %v1874_v35, %v1810_v16  ;;  %v1893_v40 = vpack.c.bf16 %v1883_v27, %v1883_v27  ;;  %v1932_v15 = vmul.f32 %v1883_v27, %v1883_v27 }
 0x1ac   : > { %v1941_v0 = vadd.f32 %v1940_v38, %v1939_v57  ;;  %v1915_v48 = vsel %vm1678_vm8, %v1883_v27, 0.0 }
 0x1ad   : > { %v1891_v41 = vpack.c.bf16 %v1875_v39, %v1875_v39  ;;  %v1911_v44 = vsel %vm1678_vm8, %v1875_v39, 0.0  ;;  %v1930_v33 = vmul.f32 %v1875_v39, %v1875_v39  ;;  %1901 = vst.msk [vmem:[%s2882_s30 + $0x1c] sm:$0xf] %vm216_vm0, %v1893_v40  ;;  %v1946_v49 = vsel %vm1678_vm8, %v1932_v15, 0.0 }
 0x1ae   : > { %v1912_v45 = vadd.f32 %v1911_v44, %v1910_v43 }
 0x1af   : > { %1899 = vst.msk [vmem:[%s2882_s30 + $0x14] sm:$0xf] %vm216_vm0, %v1891_v41  ;;  %v1942_v26 = vsel %vm1678_vm8, %v1930_v33, 0.0 }
 0x1b0   : > { %v1914_v28 = vadd.f32 %v1913_v7, %v1912_v45  ;;  %v1943_v46 = vadd.f32 %v1942_v26, %v1941_v0 }
 0x1b2   : > { %v1916_v10 = vadd.f32 %v1915_v48, %v1914_v28  ;;  %v1945_v31 = vadd.f32 %v1944_v47, %v1943_v46 }
 0x1b4   : > { %v1917_v32 = vrot.slane %v1916_v10, 4  ;;  %v1947_v50 = vadd.f32 %v1946_v49, %v1945_v31 }
 0x1b6   : > { %v1918_v51 = vadd.f32 %v1917_v32, %v1916_v10  ;;  %v1948_v52 = vrot.slane %v1947_v50, 4 }
 0x1b8   : > { %v1919_v53 = vrot.slane %v1918_v51, 2  ;;  %v1949_v54 = vadd.f32 %v1948_v52, %v1947_v50 }
 0x1ba   : > { %v1920_v55 = vadd.f32 %v1919_v53, %v1918_v51  ;;  %v1950_v56 = vrot.slane %v1949_v54, 2 }
 0x1bc   : > { %v1921_v58 = vrot.slane %v1920_v55, 1  ;;  %v1951_v60 = vadd.f32 %v1950_v56, %v1949_v54 }
 0x1be   : > { %v1922_v61 = vadd.f32 %v1921_v58, %v1920_v55  ;;  %v1952_v62 = vrot.slane %v1951_v60, 1 }
 0x1c0   : > { %1924 = vst.msk [vmem:[%s211_s6] sm:$0x1] %vm1923_vm9, %v1922_v61  ;;  %v1953_v63 = vadd.f32 %v1952_v62, %v1951_v60 }
 0x1c2   : > { %1954 = vst.msk [vmem:[%s214_s9] sm:$0x1] %vm1923_vm9, %v1953_v63 }
 0x1c3 PF: > { %s15_s15 = sadd.s32 1, %s2344_s15  }
 0x1c4   : > { %p12_p4 = scmp.ge.s32.totalorder %s15_s15, 4  }
 0x1c6   :  { %14 = sbr.rel (!%p12_p4) target bundleno = 1 (0x1), region = 84 }

// kernel: forward.10
= control target key start
LH: loop header
LB: loop body
LE: loop exit
PB: predicated region body
PF: predicated region fallthrough
CT: control target
= control target key end

     0   :  { %s2512_s21 = smov 0   ;;  %s3107_s0 = inlined_call_operand.vmem [shape: bf16[2,8,8,64], index: 0, kind: input, shape index: {}]   ;;  %s3108_s1 = inlined_call_operand.vmem [shape: f32[1,64], index: 1, kind: input, shape index: {}]   ;;  %s3109_s2 = inlined_call_operand.vmem [shape: f32[1,64], index: 2, kind: input, shape index: {}]   ;;  %s3110_s3 = inlined_call_operand.vmem [shape: bf16[576,64], index: 3, kind: input, shape index: {}]   ;;  %s3111_s4 = inlined_call_operand.vmem [shape: bf16[2,8,8,64], index: 4, kind: output, shape index: {0}]   ;;  %s3112_s5 = inlined_call_operand.vmem [shape: f32[2,1,64], index: 5, kind: output, shape index: {1}]   ;;  %s3113_s6 = inlined_call_operand.vmem [shape: f32[2,1,64], index: 6, kind: output, shape index: {2}]  }
   0x1 LB: > { %s2168_s22 = sadd.s32 4294967295, %s2473_s21   ;;  %p2172_p0 = scmp.ge.s32.totalorder %s2473_s21, 1  ;;  %s2473_s21 = sphi %s2512_s21, %s17_s21  }
   0x2   : > { %p217_p1 = scmp.lt.s32.totalorder %s2473_s21, 3 }
   0x4   : > { %p218_p2 = pnand %p2172_p0, %p217_p1 }
   0x5   : > { %p2522_p3 = scmp.lt.s32.totalorder (!%p218_p2), %s2168_s22, 1  ;;  %s2476_s14 = smov (!%p218_p2), 64  }
   0x6   : > { %221 = sbr.rel (%p218_p2) target bundleno = 455 (0x1c7), region = 36 }
   0xb   : > { %vm270_vm0 = vcmask 519168   ;;  %v2475_v0 = vmov 0   ;;  %s3120_s22 = smov (!%p2522_p3, %s2168_s22), 1  ;;  %v2408_v1 = vld [vmem:[%s3110_s3 + $0x78] sm:$0xff]   ;;  %v2569_v2 = vld [vmem:[%s3108_s1] ss:$0 sm:$0xff] }
   0xc   : > { %273 = vst.msk [vmem:[#allocation2 + $0x8] sm:$0xf] %vm270_vm0, %v2475_v0  ;;  %272 = vst.msk [vmem:[#allocation2 + $0x4] sm:$0xf] %vm270_vm0, %v2475_v0  ;;  %s2265_s26 = sshll.u32 %s3120_s22, 5  ;;  %2286 = vmatprep.subr.bf16.mxu0 %v2408_v1  ;;  %v2409_v3 = vld [vmem:[%s3110_s3 + $0x38] sm:$0xff]   ;;  %s265_s27 = scalar_lea.vmem %s3112_s5, %s3120_s22 }
   0xd   : > { %274 = vst.msk [vmem:[#allocation2 + $0xc] sm:$0xf] %vm270_vm0, %v2475_v0  ;;  %276 = vst.msk [vmem:[#allocation2 + $0x14] sm:$0xf] %vm270_vm0, %v2475_v0  ;;  %s257_s9 = scalar_lea.vmem %s3107_s0, %s2265_s26  ;;  %v2410_v4 = vld [vmem:[%s3110_s3 + $0x70] sm:$0xff]   ;;  %2287 = vmatpush3.bf16.msra.mxu0 %v2409_v3  ;;  %vm561_vm7 = vcmask 1043968   ;;  %s3060_s24 = scalar_lea.vmem %s3111_s4, %s2265_s26 }
   0xe   : > { %277 = vst.msk [vmem:[#allocation2 + $0x18] sm:$0xf] %vm270_vm0, %v2475_v0  ;;  %278 = vst.msk [vmem:[#allocation2 + $0x1c] sm:$0xf] %vm270_vm0, %v2475_v0  ;;  %v2283_v5 = vld [vmem:[%s257_s9 + $0x8] sm:$0xff]   ;;  %v2268_v6 = vld [vmem:[%s257_s9] sm:$0xff]   ;;  %2288 = vmatprep.subr.bf16.mxu0 %v2410_v4  ;;  %s268_s30 = scalar_lea.vmem %s3113_s6, %s3120_s22 }
   0xf   : > { %280 = vst.msk [vmem:[#allocation2 + $0x24] sm:$0xf] %vm270_vm0, %v2475_v0  ;;  %281 = vst.msk [vmem:[#allocation2 + $0x28] sm:$0xf] %vm270_vm0, %v2475_v0  ;;  %v2284_v7 = vld [vmem:[%s257_s9 + $0x10] sm:$0xff]   ;;  %v2273_v8 = vunpack.c.l.bf16 %v2283_v5  ;;  %v2269_v9 = vunpack.c.l.bf16 %v2268_v6  ;;  %v2270_v10 = vunpack.c.h.bf16 %v2268_v6  ;;  %v2274_v15 = vunpack.c.h.bf16 %v2283_v5  ;;  %v2285_v27 = vld [vmem:[%s257_s9 + $0x18] sm:$0xff]  }
  0x10   : > { %282 = vst.msk [vmem:[#allocation2 + $0x2c] sm:$0xf] %vm270_vm0, %v2475_v0  ;;  %284 = vst.msk [vmem:[#allocation2 + $0x34] sm:$0xf] %vm270_vm0, %v2475_v0  ;;  %v2277_v11 = vunpack.c.l.bf16 %v2284_v7  ;;  %v2585_v13 = vld [vmem:[%s3109_s2] ss:$0 sm:$0xff]  ;;  %v2278_v14 = vunpack.c.h.bf16 %v2284_v7  ;;  %v2281_v43 = vunpack.c.l.bf16 %v2285_v27  ;;  %v2282_v44 = vunpack.c.h.bf16 %v2285_v27 }
  0x11   : > { %285 = vst.msk [vmem:[#allocation2 + $0x38] sm:$0xf] %vm270_vm0, %v2475_v0  ;;  %286 = vst.msk [vmem:[#allocation2 + $0x3c] sm:$0xf] %vm270_vm0, %v2475_v0  ;;  %v336_v16 = vmul.f32 %v2273_v8, %v2569_v2  ;;  %v334_v17 = vmul.f32 %v2269_v9, %v2569_v2  ;;  %v335_v18 = vmul.f32 %v2270_v10, %v2569_v2  ;;  %v2411_v33 = vld [vmem:[%s3110_s3 + $0x30] sm:$0xff]   ;;  %vm1786_vm8 = vcmask 523264  }
  0x12   : > { %288 = vst.msk [vmem:[#allocation2 + $0x44] sm:$0xf] %vm270_vm0, %v2475_v0  ;;  %289 = vst.msk [vmem:[#allocation2 + $0x48] sm:$0xf] %vm270_vm0, %v2475_v0  ;;  %v338_v19 = vmul.f32 %v2277_v11, %v2569_v2  ;;  %v337_v21 = vmul.f32 %v2274_v15, %v2569_v2  ;;  %v339_v28 = vmul.f32 %v2278_v14, %v2569_v2  ;;  %2289 = vmatpush3.bf16.msra.mxu0 %v2411_v33  ;;  %vm398_vm1 = vsmask.f32 256 }
  0x13   : > { %290 = vst.msk [vmem:[#allocation2 + $0x4c] sm:$0xf] %vm270_vm0, %v2475_v0  ;;  %292 = vst.msk [vmem:[#allocation2 + $0x54] sm:$0xf] %vm270_vm0, %v2475_v0  ;;  %v521_v12 = vld [vmem:[#allocation2 + $0x8] sm:$0xf]  ;;  %v351_v22 = vadd.f32 %v2585_v13, %v336_v16  ;;  %v349_v23 = vadd.f32 %v2585_v13, %v334_v17  ;;  %v350_v24 = vadd.f32 %v2585_v13, %v335_v18 }
  0x14   : > { %293 = vst.msk [vmem:[#allocation2 + $0x58] sm:$0xf] %vm270_vm0, %v2475_v0  ;;  %294 = vst.msk [vmem:[#allocation2 + $0x5c] sm:$0xf] %vm270_vm0, %v2475_v0  ;;  %537 = vrot.lane.b32.xlu0 %v521_v12, %s2476_s14  ;;  %v717_v20 = vld [vmem:[#allocation2 + $0x14] sm:$0x8]  ;;  %v353_v25 = vadd.f32 %v2585_v13, %v338_v19  ;;  %v352_v30 = vadd.f32 %v2585_v13, %v337_v21  ;;  %v354_v53 = vadd.f32 %v2585_v13, %v339_v28 }
  0x15   : > { %296 = vst.msk [vmem:[#allocation2 + $0x64] sm:$0xf] %vm270_vm0, %v2475_v0  ;;  %297 = vst.msk [vmem:[#allocation2 + $0x68] sm:$0xf] %vm270_vm0, %v2475_v0  ;;  %v734_v29 = vshrl.u32 %v717_v20, 16  ;;  %v359_v34 = vmax.f32 %v351_v22, 0.0  ;;  %v340_v62 = vmul.f32 %v2281_v43, %v2569_v2  ;;  %v341_v63 = vmul.f32 %v2282_v44, %v2569_v2 }
  0x16   : > { %298 = vst.msk [vmem:[#allocation2 + $0x6c] sm:$0xf] %vm270_vm0, %v2475_v0  ;;  %300 = vst.msk [vmem:[#allocation2 + $0x74] sm:$0xf] %vm270_vm0, %v2475_v0  ;;  %v719_v26 = vld [vmem:[#allocation2 + $0x24] sm:$0x8] }
  0x17   : > { %301 = vst.msk [vmem:[#allocation2 + $0x78] sm:$0xf] %vm270_vm0, %v2475_v0  ;;  %302 = vst.msk [vmem:[#allocation2 + $0x7c] sm:$0xf] %vm270_vm0, %v2475_v0  ;;  %v721_v31 = vld [vmem:[#allocation2 + $0x34] sm:$0x8]  ;;  %v367_v45 = vpack.c.bf16 %v359_v34, %v359_v34  ;;  %v355_v10 = vadd.f32 %v2585_v13, %v340_v62  ;;  %v356_v16 = vadd.f32 %v2585_v13, %v341_v63 }
  0x18   : > { %304 = vst.msk [vmem:[#allocation2 + $0x84] sm:$0xf] %vm270_vm0, %v2475_v0  ;;  %305 = vst.msk [vmem:[#allocation2 + $0x88] sm:$0xf] %vm270_vm0, %v2475_v0  ;;  %v357_v35 = vmax.f32 %v349_v23, 0.0  ;;  %v358_v36 = vmax.f32 %v350_v24, 0.0 }
  0x19   : > { %306 = vst.msk [vmem:[#allocation2 + $0x8c] sm:$0xf] %vm270_vm0, %v2475_v0  ;;  %308 = vst.msk [vmem:[#allocation2 + $0x94] sm:$0xf] %vm270_vm0, %v2475_v0  ;;  %v723_v32 = vld [vmem:[#allocation2 + $0x44] sm:$0x8] }
  0x1a   : > { %309 = vst.msk [vmem:[#allocation2 + $0x98] sm:$0xf] %vm270_vm0, %v2475_v0  ;;  %310 = vst.msk [vmem:[#allocation2 + $0x9c] sm:$0xf] %vm270_vm0, %v2475_v0  ;;  %v361_v37 = vmax.f32 %v353_v25, 0.0  ;;  %v360_v39 = vmax.f32 %v352_v30, 0.0  ;;  %v365_v46 = vpack.c.bf16 %v357_v35, %v357_v35  ;;  %v366_v47 = vpack.c.bf16 %v358_v36, %v358_v36 }
  0x1b   : > { %v725_v38 = vld [vmem:[#allocation2 + $0x54] sm:$0x8]  ;;  %v747_v40 = vshrl.u32 %v719_v26, 16  ;;  %v886_v42 = vld [vmem:[#allocation2 + $0x1c] sm:$0x1]  ;;  %v2602_v50 = vrot.slane %v734_v29, 11 }
  0x1c   : > { %v727_v41 = vld [vmem:[#allocation2 + $0x64] sm:$0x8]  ;;  %v369_v48 = vpack.c.bf16 %v361_v37, %v361_v37  ;;  %v888_v49 = vld [vmem:[#allocation2 + $0x2c] sm:$0x1]  ;;  %v368_v51 = vpack.c.bf16 %v360_v39, %v360_v39  ;;  %v760_v52 = vshrl.u32 %v721_v31, 16  ;;  %v773_v56 = vshrl.u32 %v723_v32, 16 }
  0x1d   : > { %v890_v54 = vld [vmem:[#allocation2 + $0x3c] sm:$0x1]  ;;  %v892_v55 = vld [vmem:[#allocation2 + $0x4c] sm:$0x1]  ;;  %376 = vst.msk [vmem:[#allocation2 + $0x38] sm:$0xf] %vm270_vm0, %v367_v45 }
  0x1e   : > { %374 = vst.msk [vmem:[#allocation2 + $0x18] sm:$0xf] %vm270_vm0, %v365_v46  ;;  %375 = vst.msk [vmem:[#allocation2 + $0x28] sm:$0xf] %vm270_vm0, %v366_v47  ;;  %v786_v57 = vshrl.u32 %v725_v38, 16  ;;  %v799_v58 = vshrl.u32 %v727_v41, 16 }
  0x1f   : > { %378 = vst.msk [vmem:[#allocation2 + $0x58] sm:$0xf] %vm270_vm0, %v369_v48  ;;  %v911_v59 = vshll.u32 %v886_v42, 16  ;;  %377 = vst.msk [vmem:[#allocation2 + $0x48] sm:$0xf] %vm270_vm0, %v368_v51  ;;  %v362_v60 = vmax.f32 %v354_v53, 0.0 }
  0x20   : > { %v925_v61 = vshll.u32 %v888_v49, 16  ;;  %v729_v0 = vld [vmem:[#allocation2 + $0x74] sm:$0x8]  ;;  %v2612_v1 = vld [vmem:[#allocation2 + $0x84] sm:$0x8]  ;;  %v939_v3 = vshll.u32 %v890_v54, 16 }
  0x21   : > { %v953_v4 = vshll.u32 %v892_v55, 16  ;;  %v2614_v5 = vld [vmem:[#allocation2 + $0x5c] sm:$0x1]  ;;  %v2616_v6 = vld [vmem:[#allocation2 + $0x6c] sm:$0x1]  ;;  %v2618_v7 = vrot.slane %v747_v40, 11  ;;  %v370_v9 = vpack.c.bf16 %v362_v60, %v362_v60 }
  0x22   : > { %vm399_vm2 = vsmask.f32 4368  ;;  %v2620_v8 = vrot.slane %v760_v52, 11  ;;  %v2412_v2 = vld [vmem:[%s3110_s3 + $0x68] sm:$0xff]   ;;  %v2629_v12 = vrot.slane %v773_v56, 11  ;;  %v2631_v14 = vrot.slane %v786_v57, 11 }
  0x23   : > { %v2413_v11 = vld [vmem:[%s3110_s3 + $0x28] sm:$0xff]   ;;  %v812_v15 = vshrl.u32 %v729_v0, 16  ;;  %v2634_v17 = vld [vmem:[#allocation2 + $0x7c] sm:$0x1]  ;;  %v2414_v18 = vld [vmem:[%s3110_s3 + $0x60] sm:$0xff]   ;;  %v2640_v19 = vrot.slane %v799_v58, 11  ;;  %2290 = vmatprep.subr.bf16.mxu0 %v2412_v2 }
  0x24   : > { %379 = vst.msk [vmem:[#allocation2 + $0x68] sm:$0xf] %vm270_vm0, %v370_v9  ;;  %v2642_v20 = vrot.slane %v911_v59, 5  ;;  %v2644_v21 = vrot.slane %v925_v61, 5  ;;  %v363_v22 = vmax.f32 %v355_v10, 0.0  ;;  %v2648_v24 = vrot.slane %v939_v3, 5  ;;  %2291 = vmatpush3.bf16.msra.mxu0 %v2413_v11  ;;  %vm2667_vm5 = vmor %vm398_vm1, %vm399_vm2 }
  0x25   : > { %v2646_v23 = vld [vmem:[#allocation2 + $0x8c] sm:$0x1]  ;;  %v2650_v13 = vrot.slane %v953_v4, 5  ;;  %v364_v25 = vmax.f32 %v356_v16, 0.0  ;;  %v825_v26 = vshrl.u32 %v2612_v1, 16  ;;  %v967_v30 = vshll.u32 %v2614_v5, 16  ;;  %2292 = vmatprep.subr.bf16.mxu0 %v2414_v18 }
  0x26   : > { %v524_v27 = vld [vmem:[#allocation2 + $0x38] sm:$0xf]  ;;  %v371_v29 = vpack.c.bf16 %v363_v22, %v363_v22  ;;  %v981_v31 = vshll.u32 %v2616_v6, 16  ;;  %v2657_v33 = vrot.slane %v812_v15, 11  ;;  %v995_v35 = vshll.u32 %v2634_v17, 16  ;;  %v2426_v17 = vld [vmem:[%s3110_s3 + $0x48] sm:$0xff]  }
  0x27   : > { %v522_v28 = vld [vmem:[#allocation2 + $0x18] sm:$0xf]  ;;  %543 = vrot.lane.b32.xlu1 %v524_v27, %s2476_s14  ;;  %v372_v34 = vpack.c.bf16 %v364_v25, %v364_v25  ;;  %v1009_v36 = vshll.u32 %v2646_v23, 16  ;;  %v523_v37 = vld [vmem:[#allocation2 + $0x28] sm:$0xf]  ;;  %v2676_v18 = vrot.slane %v825_v26, 11 }
  0x28   : > { %539 = vrot.lane.b32.xlu0 %v522_v28, %s2476_s14  ;;  %v1183_v32 = vld [vmem:[#allocation2 + $0x38] sm:$0xf]  ;;  %v720_v39 = vld [vmem:[#allocation2 + $0x28] sm:$0xf]  ;;  %380 = vst.msk [vmem:[#allocation2 + $0x78] sm:$0xf] %vm270_vm0, %v371_v29 }
  0x29   : > { %v718_v38 = vld [vmem:[#allocation2 + $0x18] sm:$0xf]  ;;  %v752_v42 = vshrl.u32 %v720_v39, 16  ;;  %v755_v43 = vshll.u32 %v720_v39, 16  ;;  %381 = vst.msk [vmem:[#allocation2 + $0x88] sm:$0xf] %vm270_vm0, %v372_v34 }
  0x2a   : > { %v739_v40 = vshrl.u32 %v718_v38, 16  ;;  %v742_v41 = vshll.u32 %v718_v38, 16  ;;  %v722_v44 = vld [vmem:[#allocation2 + $0x38] sm:$0xf]  ;;  %v1182_v46 = vld [vmem:[#allocation2 + $0x28] sm:$0xf] }
  0x2b   : > { %v526_v45 = vld [vmem:[#allocation2 + $0x58] sm:$0xf]  ;;  %v765_v47 = vshrl.u32 %v722_v44, 16  ;;  %v768_v48 = vshll.u32 %v722_v44, 16  ;;  %v724_v49 = vld [vmem:[#allocation2 + $0x48] sm:$0xf]  ;;  %1200 = vrot.lane.b32.xlu1 %v1183_v32, %s2476_s14 }
  0x2c   : > { %v726_v51 = vld [vmem:[#allocation2 + $0x58] sm:$0xf]  ;;  %541 = vrot.lane.b32.xlu0 %v523_v37, %s2476_s14  ;;  %v741_v52 = vrot.slane %v739_v40, 7  ;;  %v754_v53 = vrot.slane %v752_v42, 7  ;;  %v778_v54 = vshrl.u32 %v724_v49, 16  ;;  %v781_v55 = vshll.u32 %v724_v49, 16 }
  0x2d   : > { %v728_v56 = vld [vmem:[#allocation2 + $0x68] sm:$0xf]  ;;  %v767_v57 = vrot.slane %v765_v47, 7  ;;  %v791_v58 = vshrl.u32 %v726_v51, 16  ;;  %v794_v59 = vshll.u32 %v726_v51, 16  ;;  %v2415_v11 = vld [vmem:[%s3110_s3 + $0xf8] sm:$0xff]  }
  0x2e   : > { %v804_v60 = vshrl.u32 %v728_v56, 16  ;;  %vm586_vm3 = vsmask.f32 3328  ;;  %vm587_vm4 = vsmask.f32 7440  ;;  %v744_v63 = vor.u32 %v742_v41, %v741_v52  ;;  %v2416_v25 = vld [vmem:[%s3110_s3 + $0x20] sm:$0xff]   ;;  %2326 = vmatprep.subr.bf16.mxu1 %v2415_v11 }
  0x2f   : > { %v885_v61 = vld [vmem:[#allocation2 + $0x18] sm:$0xf]  ;;  %v757_v0 = vor.u32 %v755_v43, %v754_v53  ;;  %v780_v1 = vrot.slane %v778_v54, 7  ;;  %v807_v3 = vshll.u32 %v728_v56, 16  ;;  %v770_v4 = vor.u32 %v768_v48, %v767_v57  ;;  %v887_v2 = vld [vmem:[#allocation2 + $0x28] sm:$0xf]  ;;  %547 = vrot.lane.b32.xlu1 %v526_v45, %s2476_s14  ;;  %2293 = vmatpush3.bf16.msra.mxu0 %v2416_v25  ;;  %vm2726_vm6 = vmor %vm586_vm3, %vm587_vm4 }
  0x30   : > { %v793_v5 = vrot.slane %v791_v58, 7  ;;  %v806_v9 = vrot.slane %v804_v60, 7  ;;  %v902_v10 = vshrl.u32 %v885_v61, 16  ;;  %1198 = vrot.lane.b32.xlu0 %v1182_v46, %s2476_s14  ;;  %v905_v15 = vshll.u32 %v885_v61, 16  ;;  %v889_v16 = vld [vmem:[#allocation2 + $0x38] sm:$0xf] }
  0x31   : > { %v2678_v22 = vrot.slane %v967_v30, 5  ;;  %v745_v27 = vsel %vm2667_vm5, %v2602_v50, %v744_v63  ;;  %v525_v28 = vld [vmem:[#allocation2 + $0x48] sm:$0xf]  ;;  %v758_v29 = vsel %vm2667_vm5, %v2618_v7, %v757_v0  ;;  %v2689_v32 = vor.u32 %v781_v55, %v780_v1  ;;  %v2417_v30 = vld [vmem:[%s3110_s3 + $0xb8] sm:$0xff]   ;;  %v2419_v49 = vld [vmem:[%s3110_s3 + $0xf0] sm:$0xff]  }
  0x32   : > { %v904_v34 = vrot.slane %v902_v10, 4  ;;  %v891_v26 = vld [vmem:[#allocation2 + $0x48] sm:$0xf]  ;;  %v771_v37 = vsel %vm2667_vm5, %v2620_v8, %v770_v4  ;;  %v907_v38 = vrot.slane %v905_v15, 5  ;;  %v916_v50 = vshrl.u32 %v887_v2, 16  ;;  %v2418_v7 = vld [vmem:[%s3110_s3 + $0x58] sm:$0xff]   ;;  %2327 = vmatpush3.bf16.msra.mxu1 %v2417_v30 }
  0x33   : > { %v919_v39 = vshll.u32 %v887_v2, 16  ;;  %v730_v40 = vld [vmem:[#allocation2 + $0x78] sm:$0xf]  ;;  %v796_v41 = vor.u32 %v794_v59, %v793_v5  ;;  %v2700_v42 = vor.u32 %v807_v3, %v806_v9  ;;  %v930_v43 = vshrl.u32 %v889_v16, 16  ;;  %837 = vrot.lane.b32.xlu1 %v745_v27, %s2476_s14  ;;  %v732_v48 = vld [vmem:[#allocation2 + $0x88] sm:$0xf]  ;;  %2294 = vmatprep.subr.bf16.mxu0 %v2418_v7 }
  0x34   : > { %v933_v44 = vshll.u32 %v889_v16, 16  ;;  %545 = vrot.lane.b32.xlu0 %v525_v28, %s2476_s14  ;;  %v908_v8 = vor.u32 %v907_v38, %v904_v34  ;;  %v918_v45 = vrot.slane %v916_v50, 4  ;;  %v944_v47 = vshrl.u32 %v891_v26, 16  ;;  %v893_v55 = vld [vmem:[#allocation2 + $0x58] sm:$0xf]  ;;  %2328 = vmatprep.subr.bf16.mxu1 %v2419_v49  ;;  %v2421_v4 = vld [vmem:[%s3110_s3 + $0xb0] sm:$0xff]  }
  0x35   : > { %v921_v46 = vrot.slane %v919_v39, 5  ;;  %v932_v51 = vrot.slane %v930_v43, 4  ;;  %v947_v53 = vshll.u32 %v891_v26, 16  ;;  %v817_v54 = vshrl.u32 %v730_v40, 16  ;;  %v2420_v60 = vld [vmem:[%s3110_s3 + $0x18] sm:$0xff]   ;;  %v2422_v15 = vld [vmem:[%s3110_s3 + $0x50] sm:$0xff]  }
  0x36   : > { %v935_v52 = vrot.slane %v933_v44, 5  ;;  %v2707_v56 = vrot.slane %v908_v8, 4  ;;  %v946_v58 = vrot.slane %v944_v47, 4  ;;  %v820_v59 = vshll.u32 %v730_v40, 16  ;;  %v895_v3 = vld [vmem:[#allocation2 + $0x68] sm:$0xf]  ;;  %2295 = vmatpush3.bf16.msra.mxu0 %v2420_v60  ;;  %2329 = vmatpush3.bf16.msra.mxu1 %v2421_v4 }
  0x37   : > { %v922_v57 = vor.u32 %v921_v46, %v918_v45  ;;  %v949_v63 = vrot.slane %v947_v53, 5  ;;  %v819_v0 = vrot.slane %v817_v54, 7  ;;  %v830_v1 = vshrl.u32 %v732_v48, 16  ;;  %839 = vrot.lane.b32.xlu1 %v758_v29, %s2476_s14  ;;  %v897_v28 = vld [vmem:[#allocation2 + $0x78] sm:$0xf]  ;;  %2296 = vmatprep.subr.bf16.mxu0 %v2422_v15  ;;  %v2423_v30 = vld [vmem:[%s3110_s3 + $0xe8] sm:$0xff]  }
  0x38   : > { %v936_v61 = vor.u32 %v935_v52, %v932_v51  ;;  %841 = vrot.lane.b32.xlu0 %v771_v37, %s2476_s14  ;;  %v784_v5 = vsel %vm2667_vm5, %v2629_v12, %v2689_v32  ;;  %v797_v9 = vsel %vm2667_vm5, %v2631_v14, %v796_v41  ;;  %v958_v11 = vshrl.u32 %v893_v55, 16  ;;  %v382_v26 = vld [vmem:[#allocation2 + $0x4] sm:$0x8]  ;;  %v899_v50 = vld [vmem:[#allocation2 + $0x88] sm:$0xf]  ;;  %v2424_v40 = vld [vmem:[%s3110_s3 + $0x10] sm:$0xff]   ;;  %2330 = vmatprep.subr.bf16.mxu1 %v2423_v30 }
  0x39   : > { %v2730_v2 = vrot.slane %v922_v57, 4  ;;  %v950_v12 = vor.u32 %v949_v63, %v946_v58  ;;  %v832_v25 = vrot.slane %v830_v1, 7  ;;  %v833_v27 = vshll.u32 %v732_v48, 16  ;;  %v383_v39 = vld [vmem:[#allocation2 + $0x8] sm:$0xf]  ;;  %v2427_v23 = vld [vmem:[%s3110_s3 + $0xe0] sm:$0xff]  }
  0x3a   : > { %v2735_v16 = vrot.slane %v936_v61, 4  ;;  %v960_v14 = vrot.slane %v958_v11, 4  ;;  %v961_v29 = vshll.u32 %v893_v55, 16  ;;  %v972_v32 = vshrl.u32 %v895_v3, 16  ;;  %v388_v8 = vld [vmem:[#allocation2 + $0x34] sm:$0x8]  ;;  %2297 = vmatpush3.bf16.msra.mxu0 %v2424_v40 }
  0x3b   : > { %v2739_v34 = vrot.slane %v981_v31, 5  ;;  %v810_v37 = vsel %vm2667_vm5, %v2640_v19, %v2700_v42  ;;  %v914_v38 = vsel %vm2726_vm6, %v2707_v56, %v2642_v20  ;;  %v928_v6 = vsel %vm2726_vm6, %v2730_v2, %v2644_v21  ;;  %843 = vrot.lane.b32.xlu1 %v784_v5, %s2476_s14  ;;  %v2425_v49 = vld [vmem:[%s3110_s3 + $0xa8] sm:$0xff]   ;;  %v384_v54 = vld [vmem:[#allocation2 + $0x14] sm:$0x8]  ;;  %2298 = vmatprep.subr.bf16.mxu0 %v2426_v17  ;;  %v393_v40 = vld [vmem:[#allocation2 + $0x58] sm:$0xf] }
  0x3c   : > { %v2756_v31 = vor.u32 %v820_v59, %v819_v0  ;;  %845 = vrot.lane.b32.xlu0 %v797_v9, %s2476_s14  ;;  %v963_v19 = vrot.slane %v961_v29, 5  ;;  %v974_v7 = vrot.slane %v972_v32, 4  ;;  %v975_v20 = vshll.u32 %v895_v3, 16  ;;  %v389_v59 = vld [vmem:[#allocation2 + $0x38] sm:$0xf]  ;;  %2331 = vmatpush3.bf16.msra.mxu1 %v2425_v49  ;;  %v2428_v2 = vld [vmem:[%s3110_s3 + $0x8] sm:$0xff]  }
  0x3d   : > { %v986_v41 = vshrl.u32 %v897_v28, 16  ;;  %v942_v21 = vsel %vm2726_vm6, %v2735_v16, %v2648_v24  ;;  %v2767_v42 = vrot.slane %v950_v12, 4  ;;  %v2769_v43 = vor.u32 %v833_v27, %v832_v25  ;;  %v385_v0 = vld [vmem:[#allocation2 + $0x18] sm:$0xf]  ;;  %v1048_v1 = vld [vmem:[#allocation2 + $0x34] sm:$0x8]  ;;  %2332 = vmatprep.subr.bf16.mxu1 %v2427_v23 }
  0x3e   : > { %v989_v44 = vshll.u32 %v897_v28, 16  ;;  %v964_v45 = vor.u32 %v963_v19, %v960_v14  ;;  %v977_v46 = vrot.slane %v975_v20, 5  ;;  %v1000_v48 = vshrl.u32 %v899_v50, 16  ;;  %v2794_v9 = vld [vmem:[#allocation2 + $0x38] sm:$0xf]  ;;  %v2429_v14 = vld [vmem:[%s3110_s3 + $0xa0] sm:$0xff]   ;;  %2299 = vmatpush3.bf16.msra.mxu0 %v2428_v2 }
  0x3f   : > { %v988_v47 = vrot.slane %v986_v41, 4  ;;  %v2776_v24 = vrot.slane %v995_v35, 5  ;;  %v1003_v52 = vshll.u32 %v899_v50, 16  ;;  %v402_v53 = vshrl.u32 %v382_v26, 16  ;;  %847 = vrot.lane.b32.xlu1 %v810_v37, %s2476_s14  ;;  %v1184_v11 = vld [vmem:[#allocation2 + $0x48] sm:$0xf] }
  0x40   : > { %v991_v51 = vrot.slane %v989_v44, 5  ;;  %1013 = vrot.lane.b32.xlu0 %v914_v38, %s2476_s14  ;;  %v978_v55 = vor.u32 %v977_v46, %v974_v7  ;;  %v1002_v56 = vrot.slane %v1000_v48, 4  ;;  %v2782_v57 = vrot.slane %v1009_v36, 5  ;;  %v386_v27 = vld [vmem:[#allocation2 + $0x24] sm:$0x8]  ;;  %2333 = vmatpush3.bf16.msra.mxu1 %v2429_v14 }
  0x41   : > { %v407_v58 = vshrl.u32 %v383_v39, 16  ;;  %v2787_v35 = vrot.slane %v964_v45, 4  ;;  %v1005_v61 = vrot.slane %v1003_v52, 5  ;;  %v410_v63 = vshll.u32 %v383_v39, 16  ;;  %v387_v28 = vld [vmem:[#allocation2 + $0x28] sm:$0xf] }
  0x42   : > { %v992_v60 = vor.u32 %v991_v51, %v988_v47  ;;  %v2792_v36 = vrot.slane %v978_v55, 4  ;;  %v2179_v3 = vrot.slane %v402_v53, 11  ;;  %v441_v5 = vshrl.u32 %v388_v8, 16  ;;  %v2430_v19 = vld [vmem:[%s3110_s3 + $0x40] sm:$0xff]   ;;  %v527_v8 = vld [vmem:[#allocation2 + $0x68] sm:$0xf] }
  0x43   : > { %v409_v4 = vrot.slane %v407_v58, 7  ;;  %v1006_v16 = vor.u32 %v1005_v61, %v1002_v56  ;;  %v446_v12 = vshrl.u32 %v389_v59, 16  ;;  %v449_v25 = vshll.u32 %v389_v59, 16  ;;  %1015 = vrot.lane.b32.xlu1 %v928_v6, %s2476_s14  ;;  %v392_v6 = vld [vmem:[#allocation2 + $0x54] sm:$0x8]  ;;  %2300 = vmatprep.subr.bf16.mxu0 %v2430_v19 }
  0x44   : > { %v2799_v15 = vrot.slane %v992_v60, 4  ;;  %1017 = vrot.lane.b32.xlu0 %v942_v21, %s2476_s14  ;;  %v823_v29 = vsel %vm2667_vm5, %v2657_v33, %v2756_v31  ;;  %v2182_v26 = vrot.slane %v441_v5, 11  ;;  %v415_v30 = vshrl.u32 %v384_v54, 16  ;;  %v1046_v44 = vld [vmem:[#allocation2 + $0x24] sm:$0x8]  ;;  %v2437_v33 = vld [vmem:[%s3110_s3 + $0xd0] sm:$0xff]  }
  0x45   : > { %v412_v32 = vor.u32 %v410_v63, %v409_v4  ;;  %v956_v37 = vsel %vm2726_vm6, %v2767_v42, %v2650_v13  ;;  %v2814_v38 = vrot.slane %v1006_v16, 4  ;;  %v448_v50 = vrot.slane %v446_v12, 7  ;;  %v2431_v13 = vld [vmem:[%s3110_s3 + $0xd8] sm:$0xff]   ;;  %v1047_v49 = vld [vmem:[#allocation2 + $0x28] sm:$0xf] }
  0x46   : > { %v420_v39 = vshrl.u32 %v385_v0, 16  ;;  %v2180_v20 = vrot.slane %v415_v30, 11  ;;  %v423_v41 = vshll.u32 %v385_v0, 16  ;;  %v1076_v21 = vshrl.u32 %v1048_v1, 16  ;;  %v1185_v42 = vld [vmem:[#allocation2 + $0x58] sm:$0xf]  ;;  %2334 = vmatprep.subr.bf16.mxu1 %v2431_v13 }
  0x47   : > { %v413_v7 = vsel %vm2667_vm5, %v2179_v3, %v412_v32  ;;  %v836_v45 = vsel %vm2667_vm5, %v2676_v18, %v2769_v43  ;;  %v451_v46 = vor.u32 %v449_v25, %v448_v50  ;;  %v1081_v48 = vshrl.u32 %v2794_v9, 16  ;;  %1019 = vrot.lane.b32.xlu1 %v956_v37, %s2476_s14  ;;  %v570_v17 = vld [vmem:[#allocation2 + $0x8] sm:$0xf]  ;;  %v571_v1 = vld [vmem:[#allocation2 + $0xc] sm:$0x1]  ;;  %v2433_v37 = vld [vmem:[%s3110_s3 + $0x98] sm:$0xff]  }
  0x48   : > { %513 = vst.msk [vmem:[#allocation3] sm:$0xf] %vm270_vm0, %v413_v7  ;;  %v422_v47 = vrot.slane %v420_v39, 7  ;;  %1202 = vrot.lane.b32.xlu0 %v1184_v11, %s2476_s14  ;;  %v2196_v51 = vrot.slane %v1076_v21, 11  ;;  %v1084_v52 = vshll.u32 %v2794_v9, 16  ;;  %v428_v53 = vshrl.u32 %v386_v27, 16  ;;  %2335 = vmatpush3.bf16.msra.mxu1 %v2433_v37 }
  0x49   : > { %v433_v54 = vshrl.u32 %v387_v28, 16  ;;  %v452_v55 = vsel %vm2667_vm5, %v2182_v26, %v451_v46  ;;  %v1083_v58 = vrot.slane %v1081_v48, 7  ;;  %v436_v59 = vshll.u32 %v387_v28, 16  ;;  %v528_v23 = vld [vmem:[#allocation2 + $0x78] sm:$0xf]  ;;  %v2432_v28 = vld [vmem:[%s3110_s3] sm:$0xff]   ;;  %2336 = vmatprep.subr.bf16.mxu1 %v2437_v33 }
  0x4a   : > { %v425_v56 = vor.u32 %v423_v41, %v422_v47  ;;  %516 = vst.msk [vmem:[#allocation3 + $0x3c] sm:$0xf] %vm270_vm0, %v452_v55  ;;  %v2181_v60 = vrot.slane %v428_v53, 11  ;;  %v467_v63 = vshrl.u32 %v392_v6, 16  ;;  %v472_v0 = vshrl.u32 %v393_v40, 16  ;;  %2301 = vmatpush3.bf16.msra.mxu0 %v2432_v28 }
  0x4b   : > { %v435_v61 = vrot.slane %v433_v54, 7  ;;  %v1086_v4 = vor.u32 %v1084_v52, %v1083_v58  ;;  %v475_v5 = vshll.u32 %v393_v40, 16  ;;  %v1063_v9 = vshrl.u32 %v1046_v44, 16  ;;  %v390_v2 = vld [vmem:[#allocation2 + $0x44] sm:$0x8]  ;;  %1204 = vrot.lane.b32.xlu1 %v1185_v42, %s2476_s14 }
  0x4c   : > { %v426_v3 = vsel %vm2667_vm5, %v2180_v20, %v425_v56  ;;  %v391_v11 = vld [vmem:[#allocation2 + $0x48] sm:$0xf]  ;;  %549 = vrot.lane.b32.xlu0 %v527_v8, %s2476_s14  ;;  %v2184_v12 = vrot.slane %v467_v63, 11  ;;  %v474_v25 = vrot.slane %v472_v0, 7  ;;  %v1068_v27 = vshrl.u32 %v1047_v49, 16 }
  0x4d   : > { %514 = vst.msk [vmem:[#allocation3 + $0x14] sm:$0xf] %vm270_vm0, %v426_v3  ;;  %v438_v16 = vor.u32 %v436_v59, %v435_v61  ;;  %v1087_v14 = vsel %vm2667_vm5, %v2196_v51, %v1086_v4  ;;  %v2195_v32 = vrot.slane %v1063_v9, 11  ;;  %v1071_v26 = vshll.u32 %v1047_v49, 16  ;;  %v573_v51 = vld [vmem:[#allocation2 + $0x1c] sm:$0x1] }
  0x4e   : > { %v590_v30 = vshrl.u32 %v570_v17, 16  ;;  %1175 = vst.msk [vmem:[#allocation3 + $0x20] sm:$0xf] %vm270_vm0, %v1087_v14  ;;  %v477_v39 = vor.u32 %v475_v5, %v474_v25  ;;  %v1070_v6 = vrot.slane %v1068_v27, 7  ;;  %v593_v40 = vshll.u32 %v570_v17, 16  ;;  %v2442_v4 = vld [vmem:[%s3110_s3 + $0x88] sm:$0xff]  }
  0x4f   : > { %v439_v50 = vsel %vm2667_vm5, %v2181_v60, %v438_v16  ;;  %v599_v7 = vshll.u32 %v571_v1, 16  ;;  %v454_v20 = vshrl.u32 %v390_v2, 16  ;;  %v459_v41 = vshrl.u32 %v391_v11, 16  ;;  %551 = vrot.lane.b32.xlu1 %v528_v23, %s2476_s14  ;;  %v1186_v52 = vld [vmem:[#allocation2 + $0x68] sm:$0xf]  ;;  %v2443_v14 = vld [vmem:[%s3110_s3 + $0xc0] sm:$0xff]  }
  0x50   : > { %515 = vst.msk [vmem:[#allocation3 + $0x28] sm:$0xf] %vm270_vm0, %v439_v50  ;;  %v592_v19 = vrot.slane %v590_v30, 4  ;;  %849 = vrot.lane.b32.xlu0 %v823_v29, %s2476_s14  ;;  %v478_v21 = vsel %vm2667_vm5, %v2184_v12, %v477_v39  ;;  %v1073_v44 = vor.u32 %v1071_v26, %v1070_v6  ;;  %v595_v13 = vrot.slane %v593_v40, 5  ;;  %v575_v58 = vld [vmem:[#allocation2 + $0x2c] sm:$0x1] }
  0x51   : > { %v462_v42 = vshll.u32 %v391_v11, 16  ;;  %v970_v8 = vsel %vm2726_vm6, %v2787_v35, %v2678_v22  ;;  %518 = vst.msk [vmem:[#allocation3 + $0x64] sm:$0xf] %vm270_vm0, %v478_v21  ;;  %v601_v46 = vrot.slane %v599_v7, 5  ;;  %v2183_v47 = vrot.slane %v454_v20, 11  ;;  %v2441_v23 = vld [vmem:[%s3110_s3 + $0xc8] sm:$0xff]  }
  0x52   : > { %v461_v48 = vrot.slane %v459_v41, 7  ;;  %v984_v31 = vsel %vm2726_vm6, %v2792_v36, %v2739_v34  ;;  %v1074_v29 = vsel %vm2667_vm5, %v2195_v32, %v1073_v44  ;;  %v596_v49 = vor.u32 %v595_v13, %v592_v19  ;;  %v572_v22 = vld [vmem:[#allocation2 + $0x18] sm:$0xf]  ;;  %v574_v35 = vld [vmem:[#allocation2 + $0x28] sm:$0xf]  ;;  %v2438_v34 = vld [vmem:[%s3110_s3 + $0x90] sm:$0xff]  }
  0x53   : > { %1174 = vst.msk [vmem:[#allocation3 + $0xc] sm:$0xf] %vm270_vm0, %v1074_v29  ;;  %v613_v54 = vshll.u32 %v573_v51, 16  ;;  %v604_v55 = vshrl.u32 %v572_v22, 16  ;;  %v607_v56 = vshll.u32 %v572_v22, 16  ;;  %851 = vrot.lane.b32.xlu1 %v836_v45, %s2476_s14  ;;  %v618_v59 = vshrl.u32 %v574_v35, 16  ;;  %2337 = vmatpush3.bf16.msra.mxu1 %v2438_v34 }
  0x54   : > { %v464_v53 = vor.u32 %v462_v42, %v461_v48  ;;  %1021 = vrot.lane.b32.xlu0 %v970_v8, %s2476_s14  ;;  %v597_v36 = vrot.slane %v596_v49, 4  ;;  %v621_v17 = vshll.u32 %v574_v35, 16  ;;  %v627_v60 = vshll.u32 %v575_v58, 16  ;;  %v1187_v5 = vld [vmem:[#allocation2 + $0x78] sm:$0xf]  ;;  %2338 = vmatprep.subr.bf16.mxu1 %v2441_v23 }
  0x55   : > { %v615_v63 = vrot.slane %v613_v54, 5  ;;  %v606_v0 = vrot.slane %v604_v55, 4  ;;  %v609_v1 = vrot.slane %v607_v56, 5  ;;  %v620_v43 = vrot.slane %v618_v59, 4  ;;  %v576_v11 = vld [vmem:[#allocation2 + $0x38] sm:$0xf] }
  0x56   : > { %v465_v61 = vsel %vm2667_vm5, %v2183_v47, %v464_v53  ;;  %v602_v18 = vsel %vm2726_vm6, %v597_v36, %v601_v46  ;;  %v623_v45 = vrot.slane %v621_v17, 5  ;;  %v629_v3 = vrot.slane %v627_v60, 5  ;;  %v577_v25 = vld [vmem:[#allocation2 + $0x3c] sm:$0x1]  ;;  %v578_v30 = vld [vmem:[#allocation2 + $0x48] sm:$0xf] }
  0x57   : > { %517 = vst.msk [vmem:[#allocation3 + $0x50] sm:$0xf] %vm270_vm0, %v465_v61  ;;  %709 = vst.msk [vmem:[#allocation3 + $0x4] sm:$0xf] %vm270_vm0, %v602_v18  ;;  %v610_v9 = vor.u32 %v609_v1, %v606_v0  ;;  %1023 = vrot.lane.b32.xlu1 %v984_v31, %s2476_s14  ;;  %v998_v16 = vsel %vm2726_vm6, %v2799_v15, %v2776_v24  ;;  %v632_v27 = vshrl.u32 %v576_v11, 16  ;;  %v635_v28 = vshll.u32 %v576_v11, 16 }
  0x58   : > { %1206 = vrot.lane.b32.xlu0 %v1186_v52, %s2476_s14  ;;  %v624_v2 = vor.u32 %v623_v45, %v620_v43  ;;  %2339 = vmatpush3.bf16.msra.mxu1 %v2442_v4  ;;  %v641_v26 = vshll.u32 %v577_v25, 16  ;;  %v579_v37 = vld [vmem:[#allocation2 + $0x4c] sm:$0x1]  ;;  %v1188_v50 = vld [vmem:[#allocation2 + $0x88] sm:$0xf]  ;;  %v646_v24 = vshrl.u32 %v578_v30, 16  ;;  %v1012_v21 = vsel %vm2726_vm6, %v2814_v38, %v2782_v57 }
  0x59   : > { %v611_v12 = vrot.slane %v610_v9, 4  ;;  %v634_v6 = vrot.slane %v632_v27, 4  ;;  %v637_v40 = vrot.slane %v635_v28, 5  ;;  %2340 = vmatprep.subr.bf16.mxu1 %v2443_v14  ;;  %v2446_v15 = vld [vmem:[%s3110_s3 + $0x80] sm:$0xff]   ;;  %v649_v7 = vshll.u32 %v578_v30, 16  ;;  %v2921_v41 = vld [vmem:[%s3110_s3 + $0x118] sm:$0xff]  }
  0x5a   : > { %v625_v32 = vrot.slane %v624_v2, 4  ;;  %v655_v20 = vshll.u32 %v579_v37, 16  ;;  %v643_v13 = vrot.slane %v641_v26, 5  ;;  %v648_v42 = vrot.slane %v646_v24, 4  ;;  %2374 = vmatprep.subr.bf16.mxu0 %v2921_v41  ;;  %v1189_v46 = vld [vmem:[#allocation2 + $0x98] sm:$0xf] }
  0x5b   : > { %v616_v39 = vsel %vm2726_vm6, %v611_v12, %v615_v63  ;;  %1208 = vrot.lane.b32.xlu1 %v1187_v5, %s2476_s14  ;;  %v638_v44 = vor.u32 %v637_v40, %v634_v6  ;;  %v651_v8 = vrot.slane %v649_v7, 5  ;;  %v580_v57 = vld [vmem:[#allocation2 + $0x58] sm:$0xf]  ;;  %v581_v38 = vld [vmem:[#allocation2 + $0x5c] sm:$0x1]  ;;  %vm2031_vm9 = vcmask 516096  }
  0x5c   : > { %1025 = vrot.lane.b32.xlu0 %v998_v16, %s2476_s14  ;;  %710 = vst.msk [vmem:[#allocation3 + $0x18] sm:$0xf] %vm270_vm0, %v616_v39  ;;  %v630_v19 = vsel %vm2726_vm6, %v625_v32, %v629_v3  ;;  %2341 = vmatpush3.bf16.msra.mxu1 %v2446_v15  ;;  %v657_v48 = vrot.slane %v655_v20, 5  ;;  %v869_v31 = vld [vmem:[#allocation2 + $0x18] sm:$0xf]  ;;  %v660_v49 = vshrl.u32 %v580_v57, 16 }
  0x5d   : > { %711 = vst.msk [vmem:[#allocation3 + $0x2c] sm:$0xf] %vm270_vm0, %v630_v19  ;;  %2390 = vmatprep.subr.bf16.mxu1 %v2921_v41  ;;  %v639_v47 = vrot.slane %v638_v44, 4  ;;  %v652_v33 = vor.u32 %v651_v8, %v648_v42  ;;  %v663_v51 = vshll.u32 %v580_v57, 16  ;;  %v669_v22 = vshll.u32 %v581_v38, 16 }
  0x5e   : > { %877 = vst.msk [vmem:[#allocation3 + $0x8] sm:$0xf] %vm270_vm0, %v869_v31  ;;  %v662_v52 = vrot.slane %v660_v49, 4  ;;  %v870_v56 = vld [vmem:[#allocation2 + $0x28] sm:$0xf] }
  0x5f   : > { %1027 = vrot.lane.b32.xlu1 %v1012_v21, %s2476_s14  ;;  %v644_v29 = vsel %vm2726_vm6, %v639_v47, %v643_v13  ;;  %v653_v35 = vrot.slane %v652_v33, 4  ;;  %v665_v53 = vrot.slane %v663_v51, 5  ;;  %v671_v54 = vrot.slane %v669_v22, 5  ;;  %878 = vst.msk [vmem:[#allocation3 + $0x1c] sm:$0xf] %vm270_vm0, %v870_v56 }
  0x60   : > { %1210 = vrot.lane.b32.xlu0 %v1188_v50, %s2476_s14  ;;  %712 = vst.msk [vmem:[#allocation3 + $0x40] sm:$0xf] %vm270_vm0, %v644_v29  ;;  %v871_v34 = vld [vmem:[#allocation2 + $0x38] sm:$0xf]  ;;  %v872_v36 = vld [vmem:[#allocation2 + $0x48] sm:$0xf] }
  0x61   : > { %v658_v55 = vsel %vm2726_vm6, %v653_v35, %v657_v48  ;;  %v666_v58 = vor.u32 %v665_v53, %v662_v52  ;;  %879 = vst.msk [vmem:[#allocation3 + $0x30] sm:$0xf] %vm270_vm0, %v871_v34  ;;  %880 = vst.msk [vmem:[#allocation3 + $0x44] sm:$0xf] %vm270_vm0, %v872_v36  ;;  %v1050_v17 = vld [vmem:[#allocation2 + $0x44] sm:$0x8] }
  0x62   : > { %713 = vst.msk [vmem:[#allocation3 + $0x54] sm:$0xf] %vm270_vm0, %v658_v55  ;;  %v1051_v60 = vld [vmem:[#allocation2 + $0x48] sm:$0xf]  ;;  %v1089_v61 = vshrl.u32 %v1050_v17, 16 }
  0x63   : > { %1212 = vrot.lane.b32.xlu1 %v1189_v46, %s2476_s14  ;;  %v667_v59 = vrot.slane %v666_v58, 4  ;;  %v1094_v63 = vshrl.u32 %v1051_v60, 16  ;;  %v1097_v0 = vshll.u32 %v1051_v60, 16  ;;  %v1052_v43 = vld [vmem:[#allocation2 + $0x54] sm:$0x8] }
  0x64   : > { %v2197_v23 = vrot.slane %v1089_v61, 11  ;;  %v1053_v45 = vld [vmem:[#allocation2 + $0x58] sm:$0xf]  ;;  %v1102_v3 = vshrl.u32 %v1052_v43, 16  ;;  %v394_v9 = vld [vmem:[#allocation2 + $0x64] sm:$0x8] }
  0x65   : > { %v672_v1 = vsel %vm2726_vm6, %v667_v59, %v671_v54  ;;  %v1096_v18 = vrot.slane %v1094_v63, 7  ;;  %v1107_v4 = vshrl.u32 %v1053_v45, 16  ;;  %v1110_v5 = vshll.u32 %v1053_v45, 16  ;;  %v395_v11 = vld [vmem:[#allocation2 + $0x68] sm:$0xf] }
  0x66   : > { %714 = vst.msk [vmem:[#allocation3 + $0x68] sm:$0xf] %vm270_vm0, %v672_v1  ;;  %v480_v16 = vshrl.u32 %v394_v9, 16  ;;  %v2198_v12 = vrot.slane %v1102_v3, 11  ;;  %v485_v27 = vshrl.u32 %v395_v11, 16  ;;  %v488_v28 = vshll.u32 %v395_v11, 16 }
  0x67   : > { %v1099_v2 = vor.u32 %v1097_v0, %v1096_v18  ;;  %v1109_v25 = vrot.slane %v1107_v4, 7  ;;  %v396_v37 = vld [vmem:[#allocation2 + $0x74] sm:$0x8]  ;;  %v397_v50 = vld [vmem:[#allocation2 + $0x78] sm:$0xf] }
  0x68   : > { %v2185_v26 = vrot.slane %v480_v16, 11  ;;  %v487_v30 = vrot.slane %v485_v27, 7  ;;  %v493_v39 = vshrl.u32 %v396_v37, 16  ;;  %v498_v6 = vshrl.u32 %v397_v50, 16  ;;  %v582_v24 = vld [vmem:[#allocation2 + $0x68] sm:$0xf] }
  0x69   : > { %v1100_v14 = vsel %vm2667_vm5, %v2197_v23, %v1099_v2  ;;  %v1112_v32 = vor.u32 %v1110_v5, %v1109_v25  ;;  %v501_v40 = vshll.u32 %v397_v50, 16  ;;  %v583_v7 = vld [vmem:[#allocation2 + $0x6c] sm:$0x1]  ;;  %v674_v20 = vshrl.u32 %v582_v24, 16  ;;  %v584_v44 = vld [vmem:[#allocation2 + $0x78] sm:$0xf] }
  0x6a   : > { %1176 = vst.msk [vmem:[#allocation3 + $0x34] sm:$0xf] %vm270_vm0, %v1100_v14  ;;  %v490_v19 = vor.u32 %v488_v28, %v487_v30  ;;  %v677_v21 = vshll.u32 %v582_v24, 16  ;;  %v2186_v13 = vrot.slane %v493_v39, 11  ;;  %v500_v42 = vrot.slane %v498_v6, 7 }
  0x6b   : > { %v1113_v15 = vsel %vm2667_vm5, %v2198_v12, %v1112_v32  ;;  %v683_v8 = vshll.u32 %v583_v7, 16  ;;  %v585_v46 = vld [vmem:[#allocation2 + $0x7c] sm:$0x1]  ;;  %v688_v47 = vshrl.u32 %v584_v44, 16  ;;  %v676_v33 = vrot.slane %v674_v20, 4 }
  0x6c   : > { %1177 = vst.msk [vmem:[#allocation3 + $0x48] sm:$0xf] %vm270_vm0, %v1113_v15  ;;  %v491_v48 = vsel %vm2667_vm5, %v2185_v26, %v490_v19  ;;  %v679_v57 = vrot.slane %v677_v21, 5  ;;  %v691_v38 = vshll.u32 %v584_v44, 16  ;;  %v873_v31 = vld [vmem:[#allocation2 + $0x58] sm:$0xf]  ;;  %v503_v29 = vor.u32 %v501_v40, %v500_v42 }
  0x6d   : > { %519 = vst.msk [vmem:[#allocation3 + $0x78] sm:$0xf] %vm270_vm0, %v491_v48  ;;  %v690_v49 = vrot.slane %v688_v47, 4  ;;  %v697_v51 = vshll.u32 %v585_v46, 16  ;;  %881 = vst.msk [vmem:[#allocation3 + $0x58] sm:$0xf] %vm270_vm0, %v873_v31 }
  0x6e   : > { %v680_v22 = vor.u32 %v679_v57, %v676_v33  ;;  %v685_v35 = vrot.slane %v683_v8, 5  ;;  %v693_v52 = vrot.slane %v691_v38, 5  ;;  %v874_v53 = vld [vmem:[#allocation2 + $0x68] sm:$0xf]  ;;  %v504_v54 = vsel %vm2667_vm5, %v2186_v13, %v503_v29  ;;  %v1054_v56 = vld [vmem:[#allocation2 + $0x64] sm:$0x8] }
  0x6f   : > { %v699_v55 = vrot.slane %v697_v51, 5  ;;  %882 = vst.msk [vmem:[#allocation3 + $0x6c] sm:$0xf] %vm270_vm0, %v874_v53  ;;  %v1055_v58 = vld [vmem:[#allocation2 + $0x68] sm:$0xf]  ;;  %v1115_v59 = vshrl.u32 %v1054_v56, 16 }
  0x70   : > { %520 = vst.msk [vmem:[#allocation3 + $0x8c] sm:$0xf] %vm270_vm0, %v504_v54  ;;  %v681_v34 = vrot.slane %v680_v22, 4  ;;  %v694_v36 = vor.u32 %v693_v52, %v690_v49  ;;  %v1120_v17 = vshrl.u32 %v1055_v58, 16  ;;  %v1056_v60 = vld [vmem:[#allocation2 + $0x74] sm:$0x8] }
  0x71   : > { %v1123_v61 = vshll.u32 %v1055_v58, 16  ;;  %v1057_v63 = vld [vmem:[#allocation2 + $0x78] sm:$0xf]  ;;  %v1128_v0 = vshrl.u32 %v1056_v60, 16  ;;  %v2199_v43 = vrot.slane %v1115_v59, 11 }
  0x72   : > { %v875_v1 = vld [vmem:[#allocation2 + $0x78] sm:$0xf]  ;;  %v686_v23 = vsel %vm2726_vm6, %v681_v34, %v685_v35  ;;  %v695_v18 = vrot.slane %v694_v36, 4  ;;  %v1122_v45 = vrot.slane %v1120_v17, 7  ;;  %v1133_v4 = vshrl.u32 %v1057_v63, 16 }
  0x73   : > { %883 = vst.msk [vmem:[#allocation3 + $0x80] sm:$0xf] %vm270_vm0, %v875_v1  ;;  %715 = vst.msk [vmem:[#allocation3 + $0x7c] sm:$0xf] %vm270_vm0, %v686_v23  ;;  %v2200_v3 = vrot.slane %v1128_v0, 11  ;;  %v1136_v5 = vshll.u32 %v1057_v63, 16 }
  0x74   : > { %v700_v9 = vsel %vm2726_vm6, %v695_v18, %v699_v55  ;;  %v1125_v2 = vor.u32 %v1123_v61, %v1122_v45  ;;  %v876_v11 = vld [vmem:[#allocation2 + $0x88] sm:$0xf]  ;;  %v1058_v16 = vld [vmem:[#allocation2 + $0x84] sm:$0x8]  ;;  %v1135_v25 = vrot.slane %v1133_v4, 7 }
  0x75   : > { %v1059_v12 = vld [vmem:[#allocation2 + $0x88] sm:$0xf]  ;;  %716 = vst.msk [vmem:[#allocation3 + $0x90] sm:$0xf] %vm270_vm0, %v700_v9  ;;  %884 = vst.msk [vmem:[#allocation3 + $0x94] sm:$0xf] %vm270_vm0, %v876_v11 }
  0x76   : > { %v1141_v27 = vshrl.u32 %v1058_v16, 16  ;;  %v1146_v28 = vshrl.u32 %v1059_v12, 16  ;;  %v1149_v14 = vshll.u32 %v1059_v12, 16  ;;  %v1060_v32 = vld [vmem:[#allocation2 + $0x94] sm:$0x8]  ;;  %v1126_v26 = vsel %vm2667_vm5, %v2199_v43, %v1125_v2 }
  0x77   : > { %v1061_v30 = vld [vmem:[#allocation2 + $0x98] sm:$0xf]  ;;  %v1154_v37 = vshrl.u32 %v1060_v32, 16  ;;  %1178 = vst.msk [vmem:[#allocation3 + $0x5c] sm:$0xf] %vm270_vm0, %v1126_v26  ;;  %v1138_v50 = vor.u32 %v1136_v5, %v1135_v25 }
  0x78   : > { %v2201_v39 = vrot.slane %v1141_v27, 11  ;;  %v1148_v6 = vrot.slane %v1146_v28, 7  ;;  %v1159_v40 = vshrl.u32 %v1061_v30, 16  ;;  %v1162_v15 = vshll.u32 %v1061_v30, 16  ;;  %v1230_v19 = vld [vmem:[#allocation2 + $0x28] sm:$0xf] }
  0x79   : > { %v2202_v24 = vrot.slane %v1154_v37, 11  ;;  %v1231_v7 = vld [vmem:[#allocation2 + $0x2c] sm:$0x1]  ;;  %v1139_v20 = vsel %vm2667_vm5, %v2200_v3, %v1138_v50  ;;  %v1232_v13 = vld [vmem:[#allocation2 + $0x38] sm:$0xf]  ;;  %v1247_v8 = vshrl.u32 %v1230_v19, 16 }
  0x7a   : > { %v1151_v21 = vor.u32 %v1149_v14, %v1148_v6  ;;  %v1161_v44 = vrot.slane %v1159_v40, 7  ;;  %v1233_v42 = vld [vmem:[#allocation2 + $0x3c] sm:$0x1]  ;;  %1179 = vst.msk [vmem:[#allocation3 + $0x70] sm:$0xf] %vm270_vm0, %v1139_v20  ;;  %v1250_v46 = vshll.u32 %v1230_v19, 16 }
  0x7b   : > { %v1256_v47 = vshll.u32 %v1231_v7, 16  ;;  %v1261_v48 = vshrl.u32 %v1232_v13, 16  ;;  %v1264_v33 = vshll.u32 %v1232_v13, 16  ;;  %v1234_v57 = vld [vmem:[#allocation2 + $0x48] sm:$0xf]  ;;  %v1249_v29 = vrot.slane %v1247_v8, 4 }
  0x7c   : > { %v1152_v38 = vsel %vm2667_vm5, %v2201_v39, %v1151_v21  ;;  %v1164_v31 = vor.u32 %v1162_v15, %v1161_v44  ;;  %v1270_v49 = vshll.u32 %v1233_v42, 16  ;;  %v1235_v51 = vld [vmem:[#allocation2 + $0x4c] sm:$0x1]  ;;  %v1236_v22 = vld [vmem:[#allocation2 + $0x58] sm:$0xf]  ;;  %v1252_v35 = vrot.slane %v1250_v46, 5 }
  0x7d   : > { %1180 = vst.msk [vmem:[#allocation3 + $0x84] sm:$0xf] %vm270_vm0, %v1152_v38  ;;  %v1258_v52 = vrot.slane %v1256_v47, 5  ;;  %v1263_v53 = vrot.slane %v1261_v48, 4  ;;  %v1266_v54 = vrot.slane %v1264_v33, 5  ;;  %v1275_v34 = vshrl.u32 %v1234_v57, 16 }
  0x7e   : > { %v1237_v55 = vld [vmem:[#allocation2 + $0x5c] sm:$0x1]  ;;  %v1165_v56 = vsel %vm2667_vm5, %v2202_v24, %v1164_v31  ;;  %v1272_v58 = vrot.slane %v1270_v49, 5  ;;  %v1278_v36 = vshll.u32 %v1234_v57, 16  ;;  %v1253_v59 = vor.u32 %v1252_v35, %v1249_v29  ;;  %v1238_v63 = vld [vmem:[#allocation2 + $0x68] sm:$0xf] }
  0x7f   : > { %1181 = vst.msk [vmem:[#allocation3 + $0x98] sm:$0xf] %vm270_vm0, %v1165_v56  ;;  %v1267_v17 = vor.u32 %v1266_v54, %v1263_v53  ;;  %v1284_v60 = vshll.u32 %v1235_v51, 16  ;;  %v1289_v61 = vshrl.u32 %v1236_v22, 16  ;;  %v1277_v0 = vrot.slane %v1275_v34, 4 }
  0x80   : > { %v1280_v1 = vrot.slane %v1278_v36, 5  ;;  %v1292_v23 = vshll.u32 %v1236_v22, 16  ;;  %v1298_v18 = vshll.u32 %v1237_v55, 16  ;;  %v1239_v43 = vld [vmem:[#allocation2 + $0x6c] sm:$0x1]  ;;  %v1254_v45 = vrot.slane %v1253_v59, 4 }
  0x81   : > { %v1268_v3 = vrot.slane %v1267_v17, 4  ;;  %v1286_v4 = vrot.slane %v1284_v60, 5  ;;  %v1291_v62 = vrot.slane %v1289_v61, 4  ;;  %v1240_v5 = vld [vmem:[#allocation2 + $0x78] sm:$0xf]  ;;  %v1303_v12 = vshrl.u32 %v1238_v63, 16 }
  0x82   : > { %v1281_v9 = vor.u32 %v1280_v1, %v1277_v0  ;;  %v1294_v2 = vrot.slane %v1292_v23, 5  ;;  %v1300_v11 = vrot.slane %v1298_v18, 5  ;;  %v1241_v16 = vld [vmem:[#allocation2 + $0x7c] sm:$0x1]  ;;  %v1259_v25 = vsel %vm2726_vm6, %v1254_v45, %v1258_v52  ;;  %v1242_v32 = vld [vmem:[#allocation2 + $0x88] sm:$0xf] }
  0x83   : > { %v1273_v27 = vsel %vm2726_vm6, %v1268_v3, %v1272_v58  ;;  %v1306_v28 = vshll.u32 %v1238_v63, 16  ;;  %v1312_v14 = vshll.u32 %v1239_v43, 16  ;;  %1366 = vst.msk [vmem:[#allocation3 + $0x10] sm:$0xf] %vm270_vm0, %v1259_v25  ;;  %v1305_v50 = vrot.slane %v1303_v12, 4  ;;  %v2453_v25 = vld [vmem:[%s3110_s3 + $0x110] sm:$0xff]  }
  0x84   : > { %1367 = vst.msk [vmem:[#allocation3 + $0x24] sm:$0xf] %vm270_vm0, %v1273_v27  ;;  %v1282_v30 = vrot.slane %v1281_v9, 4  ;;  %v1295_v37 = vor.u32 %v1294_v2, %v1291_v62  ;;  %v1317_v39 = vshrl.u32 %v1240_v5, 16  ;;  %v1243_v6 = vld [vmem:[#allocation2 + $0x8c] sm:$0x1] }
  0x85   : > { %v1308_v40 = vrot.slane %v1306_v28, 5  ;;  %v1320_v24 = vshll.u32 %v1240_v5, 16  ;;  %v1326_v15 = vshll.u32 %v1241_v16, 16  ;;  %v1244_v19 = vld [vmem:[#allocation2 + $0x98] sm:$0xf]  ;;  %v1331_v44 = vshrl.u32 %v1242_v32, 16 }
  0x86   : > { %v538_v26 = vpop.permute.xlu0 %537  ;;  %v1287_v7 = vsel %vm2726_vm6, %v1282_v30, %v1286_v4  ;;  %v1296_v20 = vrot.slane %v1295_v37, 4  ;;  %v1319_v21 = vrot.slane %v1317_v39, 4  ;;  %v1314_v42 = vrot.slane %v1312_v14, 5  ;;  %v1245_v46 = vld [vmem:[#allocation2 + $0x9c] sm:$0x1] }
  0x87   : > { %562 = vst.msk [vmem:[#allocation3] sm:$0xf] %vm561_vm7, %v538_v26  ;;  %v1309_v13 = vor.u32 %v1308_v40, %v1305_v50  ;;  %v1322_v8 = vrot.slane %v1320_v24, 5  ;;  %v1334_v47 = vshll.u32 %v1242_v32, 16  ;;  %v1333_v33 = vrot.slane %v1331_v44, 4  ;;  %v2456_v32 = vld [vmem:[%s3110_s3 + $0x108] sm:$0xff]  }
  0x88   : > { %1368 = vst.msk [vmem:[#allocation3 + $0x38] sm:$0xf] %vm270_vm0, %v1287_v7  ;;  %v1301_v48 = vsel %vm2726_vm6, %v1296_v20, %v1300_v11  ;;  %v1340_v57 = vshll.u32 %v1243_v6, 16  ;;  %v1345_v38 = vshrl.u32 %v1244_v19, 16  ;;  %v1348_v51 = vshll.u32 %v1244_v19, 16  ;;  %v2457_v6 = vld [vmem:[%s3110_s3 + $0x100] sm:$0xff]  }
  0x89   : > { %1369 = vst.msk [vmem:[#allocation3 + $0x4c] sm:$0xf] %vm270_vm0, %v1301_v48  ;;  %v1310_v31 = vrot.slane %v1309_v13, 4  ;;  %v1323_v29 = vor.u32 %v1322_v8, %v1319_v21  ;;  %v1336_v49 = vrot.slane %v1334_v47, 5  ;;  %v1328_v22 = vrot.slane %v1326_v15, 5 }
  0x8a   : > { %v1347_v35 = vrot.slane %v1345_v38, 4  ;;  %v1354_v52 = vshll.u32 %v1245_v46, 16  ;;  %v1342_v55 = vrot.slane %v1340_v57, 5  ;;  %v1350_v58 = vrot.slane %v1348_v51, 5 }
  0x8b   : > { %v1315_v53 = vsel %vm2726_vm6, %v1310_v31, %v1314_v42  ;;  %v1337_v54 = vor.u32 %v1336_v49, %v1333_v33  ;;  %v1324_v56 = vrot.slane %v1323_v29, 4  ;;  %v2460_v31 = vld [vmem:[#allocation3 + $0x10] ss:$20 sps:$4 sm:$0xff]  }
  0x8c   : > { %1370 = vst.msk [vmem:[#allocation3 + $0x60] sm:$0xf] %vm270_vm0, %v1315_v53  ;;  %v1351_v59 = vor.u32 %v1350_v58, %v1347_v35  ;;  %v1356_v17 = vrot.slane %v1354_v52, 5 }
  0x8d   : > { %v1338_v34 = vrot.slane %v1337_v54, 4  ;;  %v1329_v36 = vsel %vm2726_vm6, %v1324_v56, %v1328_v22 }
  0x8e   : > { %1371 = vst.msk [vmem:[#allocation3 + $0x74] sm:$0xf] %vm270_vm0, %v1329_v36  ;;  %v1352_v61 = vrot.slane %v1351_v59, 4 }
  0x8f   : > { %v1343_v60 = vsel %vm2726_vm6, %v1338_v34, %v1342_v55 }
  0x90   : > { %1372 = vst.msk [vmem:[#allocation3 + $0x88] sm:$0xf] %vm270_vm0, %v1343_v60  ;;  %v1357_v63 = vsel %vm2726_vm6, %v1352_v61, %v1356_v17  ;;  %v2461_v55 = vld [vmem:[#allocation3 + $0x38] ss:$20 sps:$4 sm:$0xff]  }
  0x91   : > { %1373 = vst.msk [vmem:[#allocation3 + $0x9c] sm:$0xf] %vm270_vm0, %v1357_v63 }
  0x95   : > { %v2465_v17 = vld [vmem:[#allocation3 + $0x60] ss:$20 sps:$4 sm:$0xff]  }
  0x98   : > { %v2466_v63 = vld [vmem:[#allocation3 + $0x88] ss:$20 sps:$4 sm:$0xff]  }
  0x99   : > { %v544_v0 = vpop.permute.xlu1 %543 }
  0x9a   : > { %v540_v1 = vpop.permute.xlu0 %539  ;;  %565 = vst.msk [vmem:[#allocation3 + $0x3c] sm:$0xf] %vm561_vm7, %v544_v0 }
  0x9b   : > { %563 = vst.msk [vmem:[#allocation3 + $0x14] sm:$0xf] %vm561_vm7, %v540_v1 }
  0x9d   : > { %v1201_v23 = vpop.permute.xlu1 %1200 }
  0x9e   : > { %v542_v18 = vpop.permute.xlu0 %541  ;;  %1223 = vst.msk [vmem:[#allocation3 + $0x20] sm:$0xf] %vm561_vm7, %v1201_v23 }
  0x9f   : > { %564 = vst.msk [vmem:[#allocation3 + $0x28] sm:$0xf] %vm561_vm7, %v542_v18 }
  0xa1   : > { %v548_v43 = vpop.permute.xlu1 %547 }
  0xa2   : > { %v1199_v45 = vpop.permute.xlu0 %1198  ;;  %567 = vst.msk [vmem:[#allocation3 + $0x64] sm:$0xf] %vm561_vm7, %v548_v43  ;;  %v2434_v16 = vld [vmem:[#allocation3] ss:$20 sps:$4 sm:$0xff]  }
  0xa3   : > { %1222 = vst.msk [vmem:[#allocation3 + $0xc] sm:$0xf] %vm561_vm7, %v1199_v45 }
  0xa5   : > { %v838_v10 = vpop.permute.xlu1 %837 }
  0xa6   : > { %v546_v3 = vpop.permute.xlu0 %545  ;;  %861 = vst.msk [vmem:[#allocation3 + $0x4] sm:$0xf] %vm561_vm7, %v838_v10 }
  0xa7   : > { %566 = vst.msk [vmem:[#allocation3 + $0x50] sm:$0xf] %vm561_vm7, %v546_v3 }
  0xa9   : > { %v840_v4 = vpop.permute.xlu1 %839 }
  0xaa   : > { %v842_v62 = vpop.permute.xlu0 %841  ;;  %862 = vst.msk [vmem:[#allocation3 + $0x18] sm:$0xf] %vm561_vm7, %v840_v4  ;;  %v2449_v7 = vld [vmem:[#allocation3 + $0xc] ss:$20 sps:$4 sm:$0xff]  }
  0xab   : > { %863 = vst.msk [vmem:[#allocation3 + $0x2c] sm:$0xf] %vm561_vm7, %v842_v62  ;;  %1896 = vmatprep.mubr.bf16.mxu1 %v2449_v7 }
  0xad   : > { %v844_v5 = vpop.permute.xlu1 %843 }
  0xae   : > { %v846_v9 = vpop.permute.xlu0 %845  ;;  %864 = vst.msk [vmem:[#allocation3 + $0x40] sm:$0xf] %vm561_vm7, %v844_v5 }
  0xaf   : > { %865 = vst.msk [vmem:[#allocation3 + $0x54] sm:$0xf] %vm561_vm7, %v846_v9 }
  0xb1   : > { %v848_v2 = vpop.permute.xlu1 %847  ;;  %v2436_v12 = vld [vmem:[#allocation3 + $0x4] ss:$20 sps:$4 sm:$0xff]  }
  0xb2   : > { %v1014_v11 = vpop.permute.xlu0 %1013  ;;  %866 = vst.msk [vmem:[#allocation3 + $0x68] sm:$0xf] %vm561_vm7, %v848_v2  ;;  %1831 = vmatprep.mubr.bf16.mxu0 %v2436_v12  ;;  %v1380_v30 = vld [vmem:[#allocation3 + $0x28] sm:$0xff] }
  0xb3   : > { %1037 = vst.msk [vmem:[#allocation3 + $0x8] sm:$0xf] %vm561_vm7, %v1014_v11  ;;  %1832 = vmatmul.mubr.bf16.vlgmr.msra.gmra.mxu0 %v2434_v16 }
  0xb4   : > { %2375 = vmatpush3.bf16.msra.mxu0 %v2921_v41 }
  0xb5   : > { %v1016_v27 = vpop.permute.xlu1 %1015  ;;  %v2439_v14 = vld [vmem:[#allocation3 + $0x2c] ss:$20 sps:$4 sm:$0xff]   ;;  %2376 = vmatprep.subr.bf16.mxu0 %v2453_v25 }
  0xb6   : > { %v1018_v28 = vpop.permute.xlu0 %1017  ;;  %1038 = vst.msk [vmem:[#allocation3 + $0x1c] sm:$0xf] %vm561_vm7, %v1016_v27  ;;  %v1383_v26 = vld [vmem:[#allocation3 + $0x3c] sm:$0xff]  ;;  %1839 = vmatprep.mubr.bf16.mxu0 %v2439_v14  ;;  %v1386_v21 = vld [vmem:[#allocation3 + $0x50] sm:$0xff] }
  0xb7   : > { %1039 = vst.msk [vmem:[#allocation3 + $0x30] sm:$0xf] %vm561_vm7, %v1018_v28  ;;  %v2208_v39 = vcombine.low %v1380_v30, %v1383_v26 }
  0xb8   : > { %2377 = vmatpush3.bf16.msra.mxu0 %v2453_v25 }
  0xb9   : > { %v1020_v37 = vpop.permute.xlu1 %1019  ;;  %2378 = vmatprep.subr.bf16.mxu0 %v2456_v32  ;;  %v2444_v40 = vld [vmem:[#allocation3 + $0x54] ss:$20 sps:$4 sm:$0xff]  }
  0xba   : > { %v1203_v50 = vpop.permute.xlu0 %1202  ;;  %1040 = vst.msk [vmem:[#allocation3 + $0x44] sm:$0xf] %vm561_vm7, %v1020_v37  ;;  %v1389_v20 = vld [vmem:[#allocation3 + $0x64] sm:$0xff] }
  0xbb   : > { %1224 = vst.msk [vmem:[#allocation3 + $0x34] sm:$0xf] %vm561_vm7, %v1203_v50  ;;  %1840 = vmatmul.mubr.bf16.gmra.mxu0 %v2208_v39  ;;  %v2213_v42 = vcombine.low %v1386_v21, %v1389_v20 }
  0xbc   : > { %1847 = vmatprep.mubr.bf16.mxu0 %v2444_v40  ;;  %2379 = vmatpush3.bf16.msra.mxu0 %v2456_v32 }
  0xbd   : > { %v1205_v24 = vpop.permute.xlu1 %1204  ;;  %v2447_v19 = vld [vmem:[#allocation3 + $0x8] ss:$20 sps:$4 sm:$0xff]   ;;  %2380 = vmatprep.subr.bf16.mxu0 %v2457_v6 }
  0xbe   : > { %v550_v15 = vpop.permute.xlu0 %549  ;;  %1225 = vst.msk [vmem:[#allocation3 + $0x48] sm:$0xf] %vm561_vm7, %v1205_v24  ;;  %1897 = vmatmul.mubr.bf16.vlgmr.msra.gmra.mxu1 %v2447_v19 }
  0xbf   : > { %568 = vst.msk [vmem:[#allocation3 + $0x78] sm:$0xf] %vm561_vm7, %v550_v15  ;;  %2394 = vmatpush3.bf16.msra.mxu1 %v2921_v41 }
  0xc0   : > { %2381 = vmatpush3.bf16.msra.mxu0 %v2457_v6  ;;  %2391 = vmatprep.subr.bf16.mxu1 %v2453_v25 }
  0xc1   : > { %v552_v44 = vpop.permute.xlu1 %551 }
  0xc2   : > { %v850_v13 = vpop.permute.xlu0 %849  ;;  %569 = vst.msk [vmem:[#allocation3 + $0x8c] sm:$0xf] %vm561_vm7, %v552_v44  ;;  %v1381_v47 = vld [vmem:[#allocation3 + $0x30] sm:$0xff] }
  0xc3   : > { %867 = vst.msk [vmem:[#allocation3 + $0x7c] sm:$0xf] %vm561_vm7, %v850_v13  ;;  %1848 = vmatmul.mubr.bf16.gmra.mxu0 %v2213_v42  ;;  %2395 = vmatpush3.bf16.msra.mxu1 %v2453_v25 }
  0xc4   : > { %2392 = vmatprep.subr.bf16.mxu1 %v2456_v32 }
  0xc5   : > { %v852_v8 = vpop.permute.xlu1 %851  ;;  %v1384_v48 = vld [vmem:[#allocation3 + $0x44] sm:$0xff] }
  0xc6   : > { %v1022_v46 = vpop.permute.xlu0 %1021  ;;  %v2451_v33 = vld [vmem:[#allocation3 + $0x34] ss:$20 sps:$4 sm:$0xff]   ;;  %868 = vst.msk [vmem:[#allocation3 + $0x90] sm:$0xf] %vm561_vm7, %v852_v8  ;;  %v2210_v57 = vcombine.low %v1381_v47, %v1384_v48 }
  0xc7   : > { %1041 = vst.msk [vmem:[#allocation3 + $0x58] sm:$0xf] %vm561_vm7, %v1022_v46  ;;  %1904 = vmatprep.mubr.bf16.mxu1 %v2451_v33  ;;  %2396 = vmatpush3.bf16.msra.mxu1 %v2456_v32 }
  0xc8   : > { %1905 = vmatmul.mubr.bf16.gmra.mxu1 %v2210_v57  ;;  %2393 = vmatprep.subr.bf16.mxu1 %v2457_v6 }
  0xc9   : > { %v1024_v41 = vpop.permute.xlu1 %1023 }
  0xca   : > { %v1207_v38 = vpop.permute.xlu0 %1206  ;;  %1042 = vst.msk [vmem:[#allocation3 + $0x6c] sm:$0xf] %vm561_vm7, %v1024_v41  ;;  %v1392_v51 = vld [vmem:[#allocation3 + $0x78] sm:$0xff] }
  0xcb   : > { %1226 = vst.msk [vmem:[#allocation3 + $0x5c] sm:$0xf] %vm561_vm7, %v1207_v38  ;;  %2397 = vmatpush3.bf16.msra.mxu1 %v2457_v6 }
  0xcd   : > { %v1209_v29 = vpop.permute.xlu1 %1208  ;;  %v1395_v22 = vld [vmem:[#allocation3 + $0x8c] sm:$0xff] }
  0xce   : > { %v1026_v49 = vpop.permute.xlu0 %1025  ;;  %v2454_v35 = vld [vmem:[#allocation3 + $0x7c] ss:$20 sps:$4 sm:$0xff]   ;;  %1227 = vst.msk [vmem:[#allocation3 + $0x70] sm:$0xf] %vm561_vm7, %v1209_v29  ;;  %v2218_v52 = vcombine.low %v1392_v51, %v1395_v22 }
  0xcf   : > { %1043 = vst.msk [vmem:[#allocation3 + $0x80] sm:$0xf] %vm561_vm7, %v1026_v49  ;;  %1855 = vmatprep.mubr.bf16.mxu0 %v2454_v35 }
  0xd0   : > { %1856 = vmatmul.mubr.bf16.gmra.mxu0 %v2218_v52 }
  0xd1   : > { %v1028_v53 = vpop.permute.xlu1 %1027  ;;  %2382 = vmatprep.mubr.msk.bf16.mxu0 %vm1786_vm8, %v2460_v31 }
  0xd2   : > { %v1211_v54 = vpop.permute.xlu0 %1210  ;;  %1044 = vst.msk [vmem:[#allocation3 + $0x94] sm:$0xf] %vm561_vm7, %v1028_v53  ;;  %v1387_v58 = vld [vmem:[#allocation3 + $0x58] sm:$0xff] }
  0xd3   : > { %1228 = vst.msk [vmem:[#allocation3 + $0x84] sm:$0xf] %vm561_vm7, %v1211_v54 }
  0xd5   : > { %v1213_v56 = vpop.permute.xlu1 %1212  ;;  %v1390_v34 = vld [vmem:[#allocation3 + $0x6c] sm:$0xff] }
  0xd6   : > { %v2458_v36 = vld [vmem:[#allocation3 + $0x5c] ss:$20 sps:$4 sm:$0xff]   ;;  %1229 = vst.msk [vmem:[#allocation3 + $0x98] sm:$0xf] %vm561_vm7, %v1213_v56  ;;  %v2215_v59 = vcombine.low %v1387_v58, %v1390_v34 }
  0xd7   : > { %1912 = vmatprep.mubr.bf16.mxu1 %v2458_v36 }
  0xd8   : > { %1913 = vmatmul.mubr.bf16.gmra.mxu1 %v2215_v59  ;;  %2383 = vmatmul.mubr.msk.bf16.vlgmr.msra.gmra.mxu0 %vm1786_vm8, %v2461_v55 }
  0xd9   : > { %v2464_v61 = vld [vmem:[#allocation3 + $0x80] ss:$20 sps:$4 sm:$0xff]  }
  0xdd   : > { %v2462_v60 = vld [vmem:[#allocation3 + $0x84] ss:$20 sps:$4 sm:$0xff]  }
  0xde   : > { %1920 = vmatprep.mubr.bf16.mxu1 %v2462_v60 }
  0xe0   : > { %1921 = vmatmul.mubr.bf16.gmra.mxu1 %v2464_v61 }
  0xe1   : > { %2386 = vmatprep.mubr.msk.bf16.mxu1 %vm1786_vm8, %v2465_v17 }
  0xe8   : > { %2387 = vmatmul.mubr.msk.bf16.vlgmr.msra.gmra.mxu1 %vm1786_vm8, %v2466_v63 }
 0x173   : > { %v2302_v0 = vpop.f32.mrf.mxu0 }
 0x175   : > { %v2303_v1 = vpop.f32.mrf.mxu0 }
 0x176   : > { %v2304_v15 = vadd.f32 %v2303_v1, %v2302_v0 }
 0x177   : > { %v2305_v23 = vpop.f32.mrf.mxu0 }
 0x179   : > { %v2306_v18 = vpop.f32.mrf.mxu0 }
 0x17a   : > { %v2307_v48 = vadd.f32 %v2306_v18, %v2305_v23 }
 0x17b   : > { %v2308_v43 = vpop.f32.mrf.mxu0 }
 0x17d   : > { %v2309_v45 = vpop.f32.mrf.mxu0 }
 0x17e   : > { %v2342_v3 = vpop.f32.mrf.mxu1  ;;  %v2310_v50 = vadd.f32 %v2309_v45, %v2308_v43 }
 0x17f   : > { %v2311_v10 = vpop.f32.mrf.mxu0 }
 0x180   : > { %v2343_v62 = vpop.f32.mrf.mxu1 }
 0x181   : > { %v2312_v4 = vpop.f32.mrf.mxu0  ;;  %v2344_v39 = vadd.f32 %v2343_v62, %v2342_v3 }
 0x182   : > { %v2345_v9 = vpop.f32.mrf.mxu1  ;;  %v2313_v20 = vadd.f32 %v2312_v4, %v2311_v10 }
 0x183   : > { %v2314_v5 = vpop.f32.mrf.mxu0  ;;  %v1899_v42 = vadd.f32 %v2344_v39, %v2304_v15 }
 0x184   : > { %v2346_v11 = vpop.f32.mrf.mxu1 }
 0x185   : > { %v2315_v2 = vpop.f32.mrf.mxu0  ;;  %v2347_v44 = vadd.f32 %v2346_v11, %v2345_v9 }
 0x186   : > { %v2316_v1 = vadd.f32 %v2315_v2, %v2314_v5 }
 0x187   : > { %v3051_v12 = vpop.f32.mrf.mxu0  ;;  %v1902_v49 = vadd.f32 %v2347_v44, %v2307_v48 }
 0x188   : > { %v2348_v16 = vpop.f32.mrf.mxu1 }
 0x189   : > { %v3053_v27 = vpop.f32.mrf.mxu0 }
 0x18a   : > { %v2349_v25 = vpop.f32.mrf.mxu1 }
 0x18b   : > { %v2350_v26 = vadd.f32 %v2349_v25, %v2348_v16  ;;  %v2319_v16 = vadd.f32 %v3053_v27, %v3051_v12 }
 0x18c   : > { %v2351_v28 = vpop.f32.mrf.mxu1 }
 0x18d   : > { %v1907_v24 = vadd.f32 %v2350_v26, %v2310_v50 }
 0x18e   : > { %v2352_v30 = vpop.f32.mrf.mxu1 }
 0x18f   : > { %v2353_v40 = vadd.f32 %v2352_v30, %v2351_v28 }
 0x190   : > { %v2320_v14 = vpop.f32.mrf.mxu0 }
 0x191   : > { %v1910_v47 = vadd.f32 %v2353_v40, %v2313_v20 }
 0x192   : > { %v2321_v32 = vpop.f32.mrf.mxu0 }
 0x193   : > { %v2322_v59 = vadd.f32 %v2321_v32, %v2320_v14 }
 0x194   : > { %v2323_v37 = vpop.f32.mrf.mxu0 }
 0x196   : > { %v2324_v6 = vpop.f32.mrf.mxu0 }
 0x197   : > { %v2325_v25 = vadd.f32 %v2324_v6, %v2323_v37 }
 0x198   : > { %v2354_v19 = vpop.f32.mrf.mxu1  ;;  %v2384_v7 = vpop.f32.mrf.mxu0 }
 0x199   : > { %v1972_v21 = vadd.f32 %v2384_v7, %v1907_v24 }
 0x19a   : > { %v2355_v13 = vpop.f32.mrf.mxu1  ;;  %v1963_v8 = vpop.f32.mrf.mxu0 }
 0x19b   : > { %v1996_v46 = vpack.c.bf16 %v1972_v21, %v1972_v21  ;;  %v1964_v33 = vadd.f32 %v1963_v8, %v1899_v42  ;;  %v2356_v17 = vadd.f32 %v2355_v13, %v2354_v19  ;;  %v2035_v23 = vmul.f32 %v1972_v21, %v1972_v21 }
 0x19c   : > { %v2357_v57 = vpop.f32.mrf.mxu1  ;;  %v2385_v41 = vpop.f32.mrf.mxu0  ;;  %v2013_v4 = vsel %vm1786_vm8, %v1972_v21, 0.0 }
 0x19d   : > { %2004 = vst.msk [vmem:[%s3060_s24 + $0x8] sm:$0xf] %vm270_vm0, %v1996_v46  ;;  %v1975_v38 = vadd.f32 %v2385_v41, %v1910_v47  ;;  %v1994_v31 = vpack.c.bf16 %v1964_v33, %v1964_v33  ;;  %v2033_v56 = vmul.f32 %v1964_v33, %v1964_v33  ;;  %v2010_v60 = vsel %vm1786_vm8, %v1964_v33, 0.0 }
 0x19e   : > { %v2358_v29 = vpop.f32.mrf.mxu1  ;;  %v1966_v51 = vpop.f32.mrf.mxu0  ;;  %v1915_v11 = vadd.f32 %v2356_v17, %v2316_v1  ;;  %v2044_v5 = vsel %vm1786_vm8, %v2035_v23, 0.0 }
 0x19f   : > { %v1997_v22 = vpack.c.bf16 %v1975_v38, %v1975_v38  ;;  %2002 = vst.msk [vmem:[%s3060_s24] sm:$0xf] %vm270_vm0, %v1994_v31  ;;  %v1967_v35 = vadd.f32 %v1966_v51, %v1902_v49  ;;  %v2041_v18 = vsel %vm1786_vm8, %v2033_v56, 0.0  ;;  %v2359_v62 = vadd.f32 %v2358_v29, %v2357_v57 }
 0x1a0   : > { %v2360_v52 = vpop.f32.mrf.mxu1  ;;  %v2036_v2 = vmul.f32 %v1975_v38, %v1975_v38  ;;  %v2015_v30 = vsel %vm1786_vm8, %v1975_v38, 0.0 }
 0x1a1   : > { %2005 = vst.msk [vmem:[%s3060_s24 + $0xc] sm:$0xf] %vm270_vm0, %v1997_v22  ;;  %v1995_v53 = vpack.c.bf16 %v1967_v35, %v1967_v35  ;;  %v2034_v54 = vmul.f32 %v1967_v35, %v1967_v35  ;;  %v2011_v58 = vsel %vm1786_vm8, %v1967_v35, 0.0  ;;  %v1918_v27 = vadd.f32 %v2359_v62, %v2319_v16 }
 0x1a2   : > { %v2361_v55 = vpop.f32.mrf.mxu1  ;;  %v2012_v63 = vadd.f32 %v2011_v58, %v2010_v60  ;;  %v2046_v7 = vsel %vm1786_vm8, %v2036_v2, 0.0 }
 0x1a3   : > { %v2362_v34 = vadd.f32 %v2361_v55, %v2360_v52  ;;  %2003 = vst.msk [vmem:[%s3060_s24 + $0x4] sm:$0xf] %vm270_vm0, %v1995_v53  ;;  %v2042_v61 = vsel %vm1786_vm8, %v2034_v54, 0.0 }
 0x1a4   : > { %v2363_v36 = vpop.f32.mrf.mxu1  ;;  %v2043_v45 = vadd.f32 %v2042_v61, %v2041_v18  ;;  %v2014_v28 = vadd.f32 %v2013_v4, %v2012_v63 }
 0x1a5   : > { %v1923_v43 = vadd.f32 %v2362_v34, %v2322_v59 }
 0x1a6   : > { %v2364_v0 = vpop.f32.mrf.mxu1  ;;  %v2045_v50 = vadd.f32 %v2044_v5, %v2043_v45  ;;  %v2016_v37 = vadd.f32 %v2015_v30, %v2014_v28 }
 0x1a7   : > { %v2365_v10 = vadd.f32 %v2364_v0, %v2363_v36 }
 0x1a8   : > { %v2388_v3 = vpop.f32.mrf.mxu1  ;;  %v2047_v13 = vadd.f32 %v2046_v7, %v2045_v50 }
 0x1a9   : > { %v1988_v9 = vadd.f32 %v2388_v3, %v1923_v43  ;;  %v1926_v39 = vadd.f32 %v2365_v10, %v2325_v25 }
 0x1aa   : > { %v1979_v14 = vpop.f32.mrf.mxu1 }
 0x1ab   : > { %v2000_v32 = vpack.c.bf16 %v1988_v9, %v1988_v9  ;;  %v1980_v26 = vadd.f32 %v1979_v14, %v1915_v11  ;;  %v2039_v8 = vmul.f32 %v1988_v9, %v1988_v9  ;;  %v2021_v41 = vsel %vm1786_vm8, %v1988_v9, 0.0 }
 0x1ac   : > { %v2389_v40 = vpop.f32.mrf.mxu1 }
 0x1ad   : > { %2008 = vst.msk [vmem:[%s3060_s24 + $0x18] sm:$0xf] %vm270_vm0, %v2000_v32  ;;  %v1998_v24 = vpack.c.bf16 %v1980_v26, %v1980_v26  ;;  %v2017_v15 = vsel %vm1786_vm8, %v1980_v26, 0.0  ;;  %v2037_v12 = vmul.f32 %v1980_v26, %v1980_v26  ;;  %v1991_v6 = vadd.f32 %v2389_v40, %v1926_v39 }
 0x1ae   : > { %v1982_v19 = vpop.f32.mrf.mxu1  ;;  %v2018_v44 = vadd.f32 %v2017_v15, %v2016_v37  ;;  %v2052_v51 = vsel %vm1786_vm8, %v2039_v8, 0.0 }
 0x1af   : > { %2006 = vst.msk [vmem:[%s3060_s24 + $0x10] sm:$0xf] %vm270_vm0, %v1998_v24  ;;  %v2048_v20 = vsel %vm1786_vm8, %v2037_v12, 0.0  ;;  %v1983_v21 = vadd.f32 %v1982_v19, %v1918_v27  ;;  %v2001_v42 = vpack.c.bf16 %v1991_v6, %v1991_v6  ;;  %v2040_v38 = vmul.f32 %v1991_v6, %v1991_v6 }
 0x1b0   : > { %v2049_v33 = vadd.f32 %v2048_v20, %v2047_v13  ;;  %v2023_v22 = vsel %vm1786_vm8, %v1991_v6, 0.0 }
 0x1b1   : > { %v1999_v46 = vpack.c.bf16 %v1983_v21, %v1983_v21  ;;  %v2019_v47 = vsel %vm1786_vm8, %v1983_v21, 0.0  ;;  %v2038_v48 = vmul.f32 %v1983_v21, %v1983_v21  ;;  %2009 = vst.msk [vmem:[%s3060_s24 + $0x1c] sm:$0xf] %vm270_vm0, %v2001_v42  ;;  %v2054_v53 = vsel %vm1786_vm8, %v2040_v38, 0.0 }
 0x1b2   : > { %v2020_v57 = vadd.f32 %v2019_v47, %v2018_v44 }
 0x1b3   : > { %2007 = vst.msk [vmem:[%s3060_s24 + $0x14] sm:$0xf] %vm270_vm0, %v1999_v46  ;;  %v2050_v31 = vsel %vm1786_vm8, %v2038_v48, 0.0 }
 0x1b4   : > { %v2022_v29 = vadd.f32 %v2021_v41, %v2020_v57  ;;  %v2051_v49 = vadd.f32 %v2050_v31, %v2049_v33 }
 0x1b6   : > { %v2024_v35 = vadd.f32 %v2023_v22, %v2022_v29  ;;  %v2053_v52 = vadd.f32 %v2052_v51, %v2051_v49 }
 0x1b8   : > { %v2025_v54 = vrot.slane %v2024_v35, 4  ;;  %v2055_v55 = vadd.f32 %v2054_v53, %v2053_v52 }
 0x1ba   : > { %v2026_v56 = vadd.f32 %v2025_v54, %v2024_v35  ;;  %v2056_v58 = vrot.slane %v2055_v55, 4 }
 0x1bc   : > { %v2027_v34 = vrot.slane %v2026_v56, 2  ;;  %v2057_v36 = vadd.f32 %v2056_v58, %v2055_v55 }
 0x1be   : > { %v2028_v59 = vadd.f32 %v2027_v34, %v2026_v56  ;;  %v2058_v17 = vrot.slane %v2057_v36, 2 }
 0x1c0   : > { %v2029_v60 = vrot.slane %v2028_v59, 1  ;;  %v2059_v61 = vadd.f32 %v2058_v17, %v2057_v36 }
 0x1c2   : > { %v2030_v63 = vadd.f32 %v2029_v60, %v2028_v59  ;;  %v2060_v0 = vrot.slane %v2059_v61, 1 }
 0x1c4   : > { %2032 = vst.msk [vmem:[%s265_s27] sm:$0x1] %vm2031_vm9, %v2030_v63  ;;  %v2061_v1 = vadd.f32 %v2060_v0, %v2059_v61 }
 0x1c6   : > { %2062 = vst.msk [vmem:[%s268_s30] sm:$0x1] %vm2031_vm9, %v2061_v1 }
 0x1c7 PF: > { %s17_s21 = sadd.s32 1, %s2473_s21  }
 0x1c8   : > { %p14_p4 = scmp.ge.s32.totalorder %s17_s21, 4  }
 0x1ca   :  { %16 = sbr.rel (!%p14_p4) target bundleno = 1 (0x1), region = 92 }

// kernel: forward.13
= control target key start
LH: loop header
LB: loop body
LE: loop exit
PB: predicated region body
PF: predicated region fallthrough
CT: control target
= control target key end

     0   :  { %s586_s18 = smov 0   ;;  %s627_s0 = inlined_call_operand.vmem [shape: bf16[2,8,8,64], index: 0, kind: input, shape index: {}]   ;;  %s628_s1 = inlined_call_operand.vmem [shape: bf16[2,8,8,64], index: 1, kind: input, shape index: {}]   ;;  %s629_s2 = inlined_call_operand.vmem [shape: f32[1,64], index: 2, kind: input, shape index: {}]   ;;  %s630_s3 = inlined_call_operand.vmem [shape: f32[1,64], index: 3, kind: input, shape index: {}]   ;;  %s631_s4 = inlined_call_operand.vmem [shape: f32[1,64], index: 4, kind: input, shape index: {}]   ;;  %s632_s5 = inlined_call_operand.vmem [shape: f32[2,8,8], index: 5, kind: output, shape index: {}]  }
   0x1 LB: > { %s485_s19 = sadd.s32 4294967295, %s554_s18   ;;  %p489_p0 = scmp.ge.s32.totalorder %s554_s18, 1  ;;  %s554_s18 = sphi %s586_s18, %s15_s18  }
   0x2   : > { %p197_p1 = scmp.lt.s32.totalorder %s554_s18, 3 }
   0x4   : > { %p198_p2 = pnand %p489_p0, %p197_p1 }
   0x5   : > { %p229_p3 = scmp.lt.s32.totalorder (!%p198_p2), %s485_s19, 1 }
   0x6   : > { %201 = sbr.rel (%p198_p2) target bundleno = 183 (0xb7), region = 40 }
   0xb   : > { %s634_s19 = smov (!%p229_p3, %s485_s19), 1  ;;  %v495_v0 = vld [vmem:[%s629_s2] ss:$0 sm:$0xff]  ;;  %vm336_vm0 = vcmask 523264   ;;  %vm403_vm1 = vcmask 1041409   ;;  %vm405_vm2 = vcmask 1042434  }
   0xc   : > { %s500_s20 = sshll.u32 %s634_s19, 5  ;;  %v496_v11 = vld [vmem:[%s630_s3] ss:$0 sm:$0xff]  ;;  %vm407_vm3 = vcmask 1043459   ;;  %vm409_vm4 = vcmask 1044484   ;;  %vm411_vm5 = vcmask 1045509  }
   0xd   : > { %s233_s23 = scalar_lea.vmem %s627_s0, %s500_s20  ;;  %s238_s26 = scalar_lea.vmem %s628_s1, %s500_s20  ;;  %v497_v38 = vld [vmem:[%s631_s4] ss:$0 sm:$0xff]  ;;  %vm413_vm6 = vcmask 1046534   ;;  %vm415_vm7 = vcmask 1047559   ;;  %vm418_vm8 = vcmask 64512  }
   0xe   : > { %v503_v1 = vld [vmem:[%s233_s23] sm:$0xff]   ;;  %v534_v3 = vld [vmem:[%s233_s23 + $0x8] sm:$0xff]   ;;  %v535_v9 = vld [vmem:[%s233_s23 + $0x10] sm:$0xff]   ;;  %s494_s8 = sshll.u32 %s634_s19, 3 }
   0xf   : > { %v519_v2 = vld [vmem:[%s238_s26] sm:$0xff]   ;;  %v504_v4 = vunpack.c.l.bf16 %v503_v1  ;;  %v508_v6 = vunpack.c.l.bf16 %v534_v3  ;;  %v537_v7 = vld [vmem:[%s238_s26 + $0x8] sm:$0xff]   ;;  %v505_v8 = vunpack.c.h.bf16 %v503_v1  ;;  %v538_v10 = vld [vmem:[%s238_s26 + $0x10] sm:$0xff]   ;;  %v509_v14 = vunpack.c.h.bf16 %v534_v3  ;;  %s242_s11 = scalar_lea.vmem %s632_s5, %s494_s8 }
  0x10   : > { %v520_v5 = vunpack.c.l.bf16 %v519_v2  ;;  %v524_v12 = vunpack.c.l.bf16 %v537_v7  ;;  %v521_v13 = vunpack.c.h.bf16 %v519_v2  ;;  %v525_v15 = vunpack.c.h.bf16 %v537_v7  ;;  %v536_v20 = vld [vmem:[%s233_s23 + $0x18] sm:$0xff]  }
  0x11   : > { %v266_v16 = vmul.f32 %v504_v4, %v495_v0  ;;  %v268_v17 = vmul.f32 %v508_v6, %v495_v0  ;;  %v267_v18 = vmul.f32 %v505_v8, %v495_v0  ;;  %v512_v19 = vunpack.c.l.bf16 %v535_v9  ;;  %v539_v21 = vld [vmem:[%s238_s26 + $0x18] sm:$0xff]  }
  0x12   : > { %v269_v22 = vmul.f32 %v509_v14, %v495_v0  ;;  %v528_v23 = vunpack.c.l.bf16 %v538_v10  ;;  %v513_v24 = vunpack.c.h.bf16 %v535_v9  ;;  %v529_v25 = vunpack.c.h.bf16 %v538_v10 }
  0x13   : > { %v281_v26 = vadd.f32 %v496_v11, %v266_v16  ;;  %v283_v27 = vadd.f32 %v496_v11, %v268_v17  ;;  %v282_v28 = vadd.f32 %v496_v11, %v267_v18  ;;  %v270_v29 = vmul.f32 %v512_v19, %v495_v0 }
  0x14   : > { %v284_v30 = vadd.f32 %v496_v11, %v269_v22  ;;  %v271_v31 = vmul.f32 %v513_v24, %v495_v0  ;;  %v516_v32 = vunpack.c.l.bf16 %v536_v20  ;;  %v532_v33 = vunpack.c.l.bf16 %v539_v21 }
  0x15   : > { %v305_v34 = vadd.f32 %v520_v5, %v281_v26  ;;  %v307_v35 = vadd.f32 %v524_v12, %v283_v27  ;;  %v306_v36 = vadd.f32 %v521_v13, %v282_v28  ;;  %v285_v37 = vadd.f32 %v496_v11, %v270_v29 }
  0x16   : > { %v308_v39 = vadd.f32 %v525_v15, %v284_v30  ;;  %v286_v40 = vadd.f32 %v496_v11, %v271_v31  ;;  %v272_v41 = vmul.f32 %v516_v32, %v495_v0  ;;  %v517_v42 = vunpack.c.h.bf16 %v536_v20 }
  0x17   : > { %v313_v43 = vmax.f32 %v305_v34, 0.0  ;;  %v315_v44 = vmax.f32 %v307_v35, 0.0  ;;  %v314_v45 = vmax.f32 %v306_v36, 0.0  ;;  %v309_v46 = vadd.f32 %v528_v23, %v285_v37 }
  0x18   : > { %v316_v47 = vmax.f32 %v308_v39, 0.0  ;;  %v310_v48 = vadd.f32 %v529_v25, %v286_v40  ;;  %v287_v49 = vadd.f32 %v496_v11, %v272_v41  ;;  %v273_v50 = vmul.f32 %v517_v42, %v495_v0 }
  0x19   : > { %v328_v51 = vmul.f32 %v497_v38, %v313_v43  ;;  %v330_v52 = vmul.f32 %v497_v38, %v315_v44  ;;  %v329_v53 = vmul.f32 %v497_v38, %v314_v45  ;;  %v317_v54 = vmax.f32 %v309_v46, 0.0 }
  0x1a   : > { %v331_v55 = vmul.f32 %v497_v38, %v316_v47  ;;  %v318_v56 = vmax.f32 %v310_v48, 0.0  ;;  %v311_v57 = vadd.f32 %v532_v33, %v287_v49  ;;  %v288_v58 = vadd.f32 %v496_v11, %v273_v50 }
  0x1b   : > { %v337_v59 = vsel %vm336_vm0, %v328_v51, 0.0  ;;  %v343_v60 = vsel %vm336_vm0, %v330_v52, 0.0  ;;  %v340_v61 = vsel %vm336_vm0, %v329_v53, 0.0  ;;  %v533_v62 = vunpack.c.h.bf16 %v539_v21 }
  0x1c   : > { %338 = vadd.xlane.f32.xlu0 %v337_v59  ;;  %344 = vadd.xlane.f32.xlu1 %v343_v60  ;;  %v346_v63 = vsel %vm336_vm0, %v331_v55, 0.0  ;;  %v332_v0 = vmul.f32 %v497_v38, %v317_v54  ;;  %v333_v1 = vmul.f32 %v497_v38, %v318_v56  ;;  %v319_v2 = vmax.f32 %v311_v57, 0.0 }
  0x1d   : > { %v312_v3 = vadd.f32 %v533_v62, %v288_v58  ;;  %v369_v11 = vlaneseq }
  0x1e   : > { %v349_v5 = vsel %vm336_vm0, %v332_v0, 0.0  ;;  %v352_v6 = vsel %vm336_vm0, %v333_v1, 0.0  ;;  %v334_v7 = vmul.f32 %v497_v38, %v319_v2 }
  0x1f   : > { %v320_v4 = vmax.f32 %v312_v3, 0.0  ;;  %v370_v12 = vand.u32 127, %v369_v11  ;;  %v372_v13 = vshrl.u32 %v369_v11, 7 }
  0x20   : > { %341 = vadd.xlane.f32.xlu0 %v340_v61  ;;  %347 = vadd.xlane.f32.xlu1 %v346_v63  ;;  %v355_v9 = vsel %vm336_vm0, %v334_v7, 0.0 }
  0x21   : > { %v335_v8 = vmul.f32 %v497_v38, %v320_v4  ;;  %v373_v16 = vsub.s32 %v370_v12, %v372_v13 }
  0x23   : > { %v358_v10 = vsel %vm336_vm0, %v335_v8, 0.0 }
  0x24   : > { %350 = vadd.xlane.f32.xlu0 %v349_v5  ;;  %353 = vadd.xlane.f32.xlu1 %v352_v6 }
  0x28   : > { %356 = vadd.xlane.f32.xlu0 %v355_v9  ;;  %359 = vadd.xlane.f32.xlu1 %v358_v10 }
  0xa5   : > { %v339_v14 = vpop.xlane.xlu0 %338  ;;  %v345_v15 = vpop.xlane.xlu1 %344 }
  0xa6   : > { %v374_v19 = vrot.slane %v339_v14, %v373_v16  ;;  %v382_v22 = vrot.slane %v345_v15, %v373_v16 }
  0xa9   : > { %v342_v17 = vpop.xlane.xlu0 %341  ;;  %v348_v18 = vpop.xlane.xlu1 %347 }
  0xaa   : > { %v378_v20 = vrot.slane %v342_v17, %v373_v16  ;;  %v386_v21 = vrot.slane %v348_v18, %v373_v16 }
  0xac   : > { %v404_v23 = vsel %vm403_vm1, %v378_v20, %v374_v19 }
  0xad   : > { %v406_v24 = vsel %vm405_vm2, %v382_v22, %v404_v23  ;;  %v351_v25 = vpop.xlane.xlu0 %350  ;;  %v354_v26 = vpop.xlane.xlu1 %353 }
  0xae   : > { %v408_v27 = vsel %vm407_vm3, %v386_v21, %v406_v24  ;;  %v390_v28 = vrot.slane %v351_v25, %v373_v16  ;;  %v394_v29 = vrot.slane %v354_v26, %v373_v16 }
  0xb0   : > { %v410_v30 = vsel %vm409_vm4, %v390_v28, %v408_v27 }
  0xb1   : > { %v357_v31 = vpop.xlane.xlu0 %356  ;;  %v360_v32 = vpop.xlane.xlu1 %359  ;;  %v412_v35 = vsel %vm411_vm5, %v394_v29, %v410_v30 }
  0xb2   : > { %v398_v33 = vrot.slane %v357_v31, %v373_v16  ;;  %v402_v34 = vrot.slane %v360_v32, %v373_v16 }
  0xb4   : > { %v414_v36 = vsel %vm413_vm6, %v398_v33, %v412_v35 }
  0xb5   : > { %v416_v37 = vsel %vm415_vm7, %v402_v34, %v414_v36 }
  0xb6   : > { %419 = vst.msk [vmem:[%s242_s11] sm:$0xff] %vm418_vm8, %v416_v37 }
  0xb7 PF: > { %s15_s18 = sadd.s32 1, %s554_s18  }
  0xb8   : > { %p12_p4 = scmp.ge.s32.totalorder %s15_s18, 4  }
  0xba   :  { %14 = sbr.rel (!%p12_p4) target bundleno = 1 (0x1), region = 73 }

// kernel: forward.11
= control target key start
LH: loop header
LB: loop body
LE: loop exit
PB: predicated region body
PF: predicated region fallthrough
CT: control target
= control target key end

     0   :  { %s2710_s27 = smov 0   ;;  %s3401_s0 = inlined_call_operand.vmem [shape: bf16[2,8,8,64], index: 0, kind: input, shape index: {}]   ;;  %s3402_s1 = inlined_call_operand.vmem [shape: bf16[2,8,8,64], index: 1, kind: input, shape index: {}]   ;;  %s3403_s2 = inlined_call_operand.vmem [shape: f32[1,64], index: 2, kind: input, shape index: {}]   ;;  %s3404_s3 = inlined_call_operand.vmem [shape: f32[1,64], index: 3, kind: input, shape index: {}]   ;;  %s3405_s4 = inlined_call_operand.vmem [shape: bf16[576,64], index: 4, kind: input, shape index: {}]   ;;  %s3406_s5 = inlined_call_operand.vmem [shape: bf16[2,8,8,64], index: 5, kind: output, shape index: {0}]   ;;  %s3407_s6 = inlined_call_operand.vmem [shape: bf16[2,8,8,64], index: 6, kind: output, shape index: {1}]   ;;  %s3408_s7 = inlined_call_operand.vmem [shape: f32[2,1,64], index: 7, kind: output, shape index: {2}]   ;;  %s3409_s8 = inlined_call_operand.vmem [shape: f32[2,1,64], index: 8, kind: output, shape index: {3}]  }
   0x1 LB: > { %s2331_s28 = sadd.s32 4294967295, %s2661_s27   ;;  %p2335_p0 = scmp.ge.s32.totalorder %s2661_s27, 1  ;;  %s2661_s27 = sphi %s2710_s27, %s19_s27  }
   0x2   : > { %p279_p1 = scmp.lt.s32.totalorder %s2661_s27, 3 }
   0x4   : > { %p280_p2 = pnand %p2335_p0, %p279_p1 }
   0x5   : > { %p2720_p3 = scmp.lt.s32.totalorder (!%p280_p2), %s2331_s28, 1  ;;  %s2664_s21 = smov (!%p280_p2), 64  }
   0x6   : > { %283 = sbr.rel (%p280_p2) target bundleno = 457 (0x1c9), region = 40 }
   0xb   : > { %vm356_vm0 = vcmask 519168   ;;  %v2663_v0 = vmov 0   ;;  %s3416_s28 = smov (!%p2720_p3, %s2331_s28), 1  ;;  %v2766_v1 = vld [vmem:[%s3403_s2] ss:$0 sm:$0xff]  ;;  %v2596_v2 = vld [vmem:[%s3405_s4 + $0x78] sm:$0xff]  }
   0xc   : > { %359 = vst.msk [vmem:[#allocation2 + $0x8] sm:$0xf] %vm356_vm0, %v2663_v0  ;;  %358 = vst.msk [vmem:[#allocation2 + $0x4] sm:$0xf] %vm356_vm0, %v2663_v0  ;;  %s2761_s30 = sshll.u32 %s3416_s28, 5  ;;  %2474 = vmatprep.subr.bf16.mxu0 %v2596_v2  ;;  %v2597_v37 = vld [vmem:[%s3405_s4 + $0x38] sm:$0xff]   ;;  %s351_s26 = scalar_lea.vmem %s3408_s7, %s3416_s28 }
   0xd   : > { %360 = vst.msk [vmem:[#allocation2 + $0xc] sm:$0xf] %vm356_vm0, %v2663_v0  ;;  %362 = vst.msk [vmem:[#allocation2 + $0x14] sm:$0xf] %vm356_vm0, %v2663_v0  ;;  %s2775_s15 = scalar_lea.vmem %s3401_s0, %s2761_s30  ;;  %s2781_s18 = scalar_lea.vmem %s3402_s1, %s2761_s30  ;;  %v2792_v14 = vld [vmem:[%s3404_s3] ss:$0 sm:$0xff]  ;;  %2475 = vmatpush3.bf16.msra.mxu0 %v2597_v37 }
   0xe   : > { %363 = vst.msk [vmem:[#allocation2 + $0x18] sm:$0xf] %vm356_vm0, %v2663_v0  ;;  %364 = vst.msk [vmem:[#allocation2 + $0x1c] sm:$0xf] %vm356_vm0, %v2663_v0  ;;  %v2468_v3 = vld [vmem:[%s2775_s15 + $0x8] sm:$0xff]   ;;  %v2437_v5 = vld [vmem:[%s2775_s15] sm:$0xff]   ;;  %s2817_s9 = scalar_lea.vmem %s3407_s6, %s2761_s30  ;;  %s3354_s24 = scalar_lea.vmem %s3406_s5, %s2761_s30 }
   0xf   : > { %366 = vst.msk [vmem:[#allocation2 + $0x24] sm:$0xf] %vm356_vm0, %v2663_v0  ;;  %367 = vst.msk [vmem:[#allocation2 + $0x28] sm:$0xf] %vm356_vm0, %v2663_v0  ;;  %v2471_v4 = vld [vmem:[%s2781_s18 + $0x8] sm:$0xff]   ;;  %v2442_v6 = vunpack.c.l.bf16 %v2468_v3  ;;  %v2438_v8 = vunpack.c.l.bf16 %v2437_v5  ;;  %v2453_v9 = vld [vmem:[%s2781_s18] sm:$0xff]   ;;  %v2439_v10 = vunpack.c.h.bf16 %v2437_v5  ;;  %v2443_v26 = vunpack.c.h.bf16 %v2468_v3  ;;  %s354_s11 = scalar_lea.vmem %s3409_s8, %s3416_s28 }
  0x10   : > { %368 = vst.msk [vmem:[#allocation2 + $0x2c] sm:$0xf] %vm356_vm0, %v2663_v0  ;;  %370 = vst.msk [vmem:[#allocation2 + $0x34] sm:$0xf] %vm356_vm0, %v2663_v0  ;;  %v2458_v7 = vunpack.c.l.bf16 %v2471_v4  ;;  %v2469_v11 = vld [vmem:[%s2775_s15 + $0x10] sm:$0xff]   ;;  %v2454_v15 = vunpack.c.l.bf16 %v2453_v9  ;;  %v2455_v16 = vunpack.c.h.bf16 %v2453_v9  ;;  %v2459_v33 = vunpack.c.h.bf16 %v2471_v4 }
  0x11   : > { %371 = vst.msk [vmem:[#allocation2 + $0x38] sm:$0xf] %vm356_vm0, %v2663_v0  ;;  %372 = vst.msk [vmem:[#allocation2 + $0x3c] sm:$0xf] %vm356_vm0, %v2663_v0  ;;  %v2472_v12 = vld [vmem:[%s2781_s18 + $0x10] sm:$0xff]   ;;  %v2446_v17 = vunpack.c.l.bf16 %v2469_v11  ;;  %v2447_v18 = vunpack.c.h.bf16 %v2469_v11  ;;  %v422_v19 = vmul.f32 %v2442_v6, %v2766_v1  ;;  %v420_v20 = vmul.f32 %v2438_v8, %v2766_v1  ;;  %v2470_v6 = vld [vmem:[%s2775_s15 + $0x18] sm:$0xff]  }
  0x12   : > { %374 = vst.msk [vmem:[#allocation2 + $0x44] sm:$0xf] %vm356_vm0, %v2663_v0  ;;  %375 = vst.msk [vmem:[#allocation2 + $0x48] sm:$0xf] %vm356_vm0, %v2663_v0  ;;  %v421_v21 = vmul.f32 %v2439_v10, %v2766_v1  ;;  %v2462_v22 = vunpack.c.l.bf16 %v2472_v12  ;;  %v2463_v25 = vunpack.c.h.bf16 %v2472_v12  ;;  %v423_v32 = vmul.f32 %v2443_v26, %v2766_v1  ;;  %v2598_v44 = vld [vmem:[%s3405_s4 + $0x70] sm:$0xff]  }
  0x13   : > { %376 = vst.msk [vmem:[#allocation2 + $0x4c] sm:$0xf] %vm356_vm0, %v2663_v0  ;;  %378 = vst.msk [vmem:[#allocation2 + $0x54] sm:$0xf] %vm356_vm0, %v2663_v0  ;;  %v639_v13 = vld [vmem:[#allocation2 + $0x8] sm:$0xf]  ;;  %v424_v23 = vmul.f32 %v2446_v17, %v2766_v1  ;;  %v425_v24 = vmul.f32 %v2447_v18, %v2766_v1  ;;  %v437_v27 = vadd.f32 %v2792_v14, %v422_v19  ;;  %2476 = vmatprep.subr.bf16.mxu0 %v2598_v44 }
  0x14   : > { %379 = vst.msk [vmem:[#allocation2 + $0x58] sm:$0xf] %vm356_vm0, %v2663_v0  ;;  %380 = vst.msk [vmem:[#allocation2 + $0x5c] sm:$0xf] %vm356_vm0, %v2663_v0  ;;  %655 = vrot.lane.b32.xlu0 %v639_v13, %s2664_s21  ;;  %v435_v28 = vadd.f32 %v2792_v14, %v420_v20  ;;  %v436_v29 = vadd.f32 %v2792_v14, %v421_v21  ;;  %v438_v40 = vadd.f32 %v2792_v14, %v423_v32  ;;  %v835_v41 = vld [vmem:[#allocation2 + $0x14] sm:$0x8] }
  0x15   : > { %382 = vst.msk [vmem:[#allocation2 + $0x64] sm:$0xf] %vm356_vm0, %v2663_v0  ;;  %383 = vst.msk [vmem:[#allocation2 + $0x68] sm:$0xf] %vm356_vm0, %v2663_v0  ;;  %v439_v30 = vadd.f32 %v2792_v14, %v424_v23  ;;  %v440_v31 = vadd.f32 %v2792_v14, %v425_v24  ;;  %v461_v34 = vadd.f32 %v2458_v7, %v437_v27  ;;  %v2599_v53 = vld [vmem:[%s3405_s4 + $0x30] sm:$0xff]   ;;  %v852_v2 = vshrl.u32 %v835_v41, 16 }
  0x16   : > { %384 = vst.msk [vmem:[#allocation2 + $0x6c] sm:$0xf] %vm356_vm0, %v2663_v0  ;;  %386 = vst.msk [vmem:[#allocation2 + $0x74] sm:$0xf] %vm356_vm0, %v2663_v0  ;;  %v459_v35 = vadd.f32 %v2454_v15, %v435_v28  ;;  %v460_v36 = vadd.f32 %v2455_v16, %v436_v29  ;;  %v837_v42 = vld [vmem:[#allocation2 + $0x24] sm:$0x8]  ;;  %v462_v51 = vadd.f32 %v2459_v33, %v438_v40  ;;  %2477 = vmatpush3.bf16.msra.mxu0 %v2599_v53 }
  0x17   : > { %387 = vst.msk [vmem:[#allocation2 + $0x78] sm:$0xf] %vm356_vm0, %v2663_v0  ;;  %388 = vst.msk [vmem:[#allocation2 + $0x7c] sm:$0xf] %vm356_vm0, %v2663_v0  ;;  %v463_v38 = vadd.f32 %v2462_v22, %v439_v30  ;;  %v464_v39 = vadd.f32 %v2463_v25, %v440_v31  ;;  %v839_v43 = vld [vmem:[#allocation2 + $0x34] sm:$0x8]  ;;  %v2450_v18 = vunpack.c.l.bf16 %v2470_v6  ;;  %v2451_v24 = vunpack.c.h.bf16 %v2470_v6 }
  0x18   : > { %390 = vst.msk [vmem:[#allocation2 + $0x84] sm:$0xf] %vm356_vm0, %v2663_v0  ;;  %391 = vst.msk [vmem:[#allocation2 + $0x88] sm:$0xf] %vm356_vm0, %v2663_v0  ;;  %v469_v45 = vmax.f32 %v461_v34, 0.0  ;;  %v467_v46 = vmax.f32 %v459_v35, 0.0 }
  0x19   : > { %392 = vst.msk [vmem:[#allocation2 + $0x8c] sm:$0xf] %vm356_vm0, %v2663_v0  ;;  %394 = vst.msk [vmem:[#allocation2 + $0x94] sm:$0xf] %vm356_vm0, %v2663_v0  ;;  %v468_v47 = vmax.f32 %v460_v36, 0.0  ;;  %v471_v49 = vmax.f32 %v463_v38, 0.0  ;;  %v426_v40 = vmul.f32 %v2450_v18, %v2766_v1 }
  0x1a   : > { %395 = vst.msk [vmem:[#allocation2 + $0x98] sm:$0xf] %vm356_vm0, %v2663_v0  ;;  %396 = vst.msk [vmem:[#allocation2 + $0x9c] sm:$0xf] %vm356_vm0, %v2663_v0  ;;  %v841_v48 = vld [vmem:[#allocation2 + $0x44] sm:$0x8]  ;;  %v477_v54 = vpack.c.bf16 %v469_v45, %v469_v45  ;;  %v475_v55 = vpack.c.bf16 %v467_v46, %v467_v46 }
  0x1b   : > { %v472_v50 = vmax.f32 %v464_v39, 0.0  ;;  %v843_v52 = vld [vmem:[#allocation2 + $0x54] sm:$0x8]  ;;  %v476_v56 = vpack.c.bf16 %v468_v47, %v468_v47  ;;  %v1004_v58 = vld [vmem:[#allocation2 + $0x1c] sm:$0x1]  ;;  %v479_v60 = vpack.c.bf16 %v471_v49, %v471_v49  ;;  %v470_v61 = vmax.f32 %v462_v51, 0.0 }
  0x1c   : > { %v845_v57 = vld [vmem:[#allocation2 + $0x64] sm:$0x8]  ;;  %v1006_v59 = vld [vmem:[#allocation2 + $0x2c] sm:$0x1]  ;;  %v1008_v62 = vld [vmem:[#allocation2 + $0x3c] sm:$0x1] }
  0x1d   : > { %v1010_v63 = vld [vmem:[#allocation2 + $0x4c] sm:$0x1]  ;;  %494 = vst.msk [vmem:[#allocation2 + $0x38] sm:$0xf] %vm356_vm0, %v477_v54  ;;  %485 = vst.msk [vmem:[%s2817_s9 + $0x8] sm:$0xf] %vm356_vm0, %v477_v54  ;;  %v480_v5 = vpack.c.bf16 %v472_v50, %v472_v50  ;;  %v478_v8 = vpack.c.bf16 %v470_v61, %v470_v61 }
  0x1e   : > { %v2600_v0 = vld [vmem:[%s3405_s4 + $0x68] sm:$0xff]   ;;  %492 = vst.msk [vmem:[#allocation2 + $0x18] sm:$0xf] %vm356_vm0, %v475_v55  ;;  %483 = vst.msk [vmem:[%s2817_s9] sm:$0xf] %vm356_vm0, %v475_v55  ;;  %v865_v3 = vshrl.u32 %v837_v42, 16  ;;  %v427_v42 = vmul.f32 %v2451_v24, %v2766_v1 }
  0x1f   : > { %484 = vst.msk [vmem:[%s2817_s9 + $0x4] sm:$0xf] %vm356_vm0, %v476_v56  ;;  %493 = vst.msk [vmem:[#allocation2 + $0x28] sm:$0xf] %vm356_vm0, %v476_v56  ;;  %v878_v4 = vshrl.u32 %v839_v43, 16  ;;  %v2601_v7 = vld [vmem:[%s3405_s4 + $0x28] sm:$0xff]   ;;  %2478 = vmatprep.subr.bf16.mxu0 %v2600_v0 }
  0x20   : > { %487 = vst.msk [vmem:[%s2817_s9 + $0x10] sm:$0xf] %vm356_vm0, %v479_v60  ;;  %496 = vst.msk [vmem:[#allocation2 + $0x58] sm:$0xf] %vm356_vm0, %v479_v60  ;;  %v891_v9 = vshrl.u32 %v841_v48, 16  ;;  %v904_v10 = vshrl.u32 %v843_v52, 16  ;;  %2479 = vmatpush3.bf16.msra.mxu0 %v2601_v7 }
  0x21   : > { %v917_v11 = vshrl.u32 %v845_v57, 16  ;;  %488 = vst.msk [vmem:[%s2817_s9 + $0x14] sm:$0xf] %vm356_vm0, %v480_v5  ;;  %497 = vst.msk [vmem:[#allocation2 + $0x68] sm:$0xf] %vm356_vm0, %v480_v5  ;;  %v1029_v12 = vshll.u32 %v1004_v58, 16 }
  0x22   : > { %v1043_v13 = vshll.u32 %v1006_v59, 16  ;;  %v847_v15 = vld [vmem:[#allocation2 + $0x74] sm:$0x8]  ;;  %486 = vst.msk [vmem:[%s2817_s9 + $0xc] sm:$0xf] %vm356_vm0, %v478_v8  ;;  %v1057_v16 = vshll.u32 %v1008_v62, 16  ;;  %v441_v59 = vadd.f32 %v2792_v14, %v426_v40 }
  0x23   : > { %495 = vst.msk [vmem:[#allocation2 + $0x48] sm:$0xf] %vm356_vm0, %v478_v8  ;;  %vm516_vm1 = vsmask.f32 256  ;;  %vm517_vm2 = vsmask.f32 4368 }
  0x24   : > { %v1071_v17 = vshll.u32 %v1010_v63, 16  ;;  %v2847_v19 = vld [vmem:[#allocation2 + $0x84] sm:$0x8]  ;;  %v2849_v20 = vld [vmem:[#allocation2 + $0x5c] sm:$0x1]  ;;  %v2851_v21 = vrot.slane %v852_v2, 11  ;;  %vm2904_vm5 = vmor %vm516_vm1, %vm517_vm2 }
  0x25   : > { %v2853_v22 = vrot.slane %v865_v3, 11  ;;  %v2855_v23 = vrot.slane %v878_v4, 11  ;;  %v2858_v25 = vld [vmem:[%s2781_s18 + $0x18] sm:$0xff]   ;;  %v2860_v26 = vld [vmem:[#allocation2 + $0x6c] sm:$0x1]  ;;  %v2862_v27 = vrot.slane %v891_v9, 11  ;;  %v442_v3 = vadd.f32 %v2792_v14, %v427_v42 }
  0x26   : > { %v2864_v28 = vrot.slane %v904_v10, 11  ;;  %v2866_v29 = vrot.slane %v917_v11, 11  ;;  %v2868_v30 = vld [vmem:[#allocation2 + $0x7c] sm:$0x1]  ;;  %v2602_v31 = vld [vmem:[%s3405_s4 + $0x60] sm:$0xff]   ;;  %v2873_v32 = vrot.slane %v1029_v12, 5  ;;  %v2466_v49 = vunpack.c.l.bf16 %v2858_v25 }
  0x27   : > { %v2875_v33 = vrot.slane %v1043_v13, 5  ;;  %v930_v34 = vshrl.u32 %v847_v15, 16  ;;  %v2603_v35 = vld [vmem:[%s3405_s4 + $0xf8] sm:$0xff]   ;;  %v2880_v38 = vrot.slane %v1057_v16, 5  ;;  %v2882_v39 = vrot.slane %v1071_v17, 5  ;;  %2480 = vmatprep.subr.bf16.mxu0 %v2602_v31  ;;  %v2604_v14 = vld [vmem:[%s3405_s4 + $0x20] sm:$0xff]  }
  0x28   : > { %v642_v36 = vld [vmem:[#allocation2 + $0x38] sm:$0xf]  ;;  %v943_v43 = vshrl.u32 %v2847_v19, 16  ;;  %v1085_v44 = vshll.u32 %v2849_v20, 16  ;;  %v1099_v45 = vshll.u32 %v2860_v26, 16  ;;  %2514 = vmatprep.subr.bf16.mxu1 %v2603_v35  ;;  %v1113_v53 = vshll.u32 %v2868_v30, 16  ;;  %2481 = vmatpush3.bf16.msra.mxu0 %v2604_v14 }
  0x29   : > { %v640_v37 = vld [vmem:[#allocation2 + $0x18] sm:$0xf]  ;;  %661 = vrot.lane.b32.xlu1 %v642_v36, %s2664_s21  ;;  %v641_v46 = vld [vmem:[#allocation2 + $0x28] sm:$0xf]  ;;  %v2892_v52 = vrot.slane %v930_v34, 11  ;;  %v2467_v60 = vunpack.c.h.bf16 %v2858_v25  ;;  %v465_v40 = vadd.f32 %v2466_v49, %v441_v59  ;;  %v2615_v26 = vld [vmem:[%s3405_s4 + $0xe0] sm:$0xff]  }
  0x2a   : > { %657 = vrot.lane.b32.xlu0 %v640_v37, %s2664_s21  ;;  %v1301_v41 = vld [vmem:[#allocation2 + $0x38] sm:$0xf]  ;;  %v838_v48 = vld [vmem:[#allocation2 + $0x28] sm:$0xf]  ;;  %v2897_v61 = vld [vmem:[#allocation2 + $0x8c] sm:$0x1] }
  0x2b   : > { %v836_v47 = vld [vmem:[#allocation2 + $0x18] sm:$0xf]  ;;  %v1300_v1 = vld [vmem:[#allocation2 + $0x28] sm:$0xf]  ;;  %v870_v55 = vshrl.u32 %v838_v48, 16  ;;  %v873_v56 = vshll.u32 %v838_v48, 16 }
  0x2c   : > { %v857_v50 = vshrl.u32 %v836_v47, 16  ;;  %v860_v51 = vshll.u32 %v836_v47, 16  ;;  %v644_v54 = vld [vmem:[#allocation2 + $0x58] sm:$0xf]  ;;  %v842_v58 = vld [vmem:[#allocation2 + $0x48] sm:$0xf] }
  0x2d   : > { %v840_v57 = vld [vmem:[#allocation2 + $0x38] sm:$0xf]  ;;  %1318 = vrot.lane.b32.xlu1 %v1301_v41, %s2664_s21  ;;  %v896_v0 = vshrl.u32 %v842_v58, 16  ;;  %v872_v4 = vrot.slane %v870_v55, 7  ;;  %v899_v6 = vshll.u32 %v842_v58, 16  ;;  %v1127_v41 = vshll.u32 %v2897_v61, 16 }
  0x2e   : > { %659 = vrot.lane.b32.xlu0 %v641_v46, %s2664_s21  ;;  %v859_v62 = vrot.slane %v857_v50, 7  ;;  %v883_v63 = vshrl.u32 %v840_v57, 16  ;;  %v844_v2 = vld [vmem:[#allocation2 + $0x58] sm:$0xf]  ;;  %v886_v5 = vshll.u32 %v840_v57, 16  ;;  %v473_v14 = vmax.f32 %v465_v40, 0.0 }
  0x2f   : > { %v909_v7 = vshrl.u32 %v844_v2, 16  ;;  %v846_v8 = vld [vmem:[#allocation2 + $0x68] sm:$0xf]  ;;  %vm704_vm3 = vsmask.f32 3328  ;;  %v898_v12 = vrot.slane %v896_v0, 7  ;;  %v2913_v17 = vor.u32 %v873_v56, %v872_v4 }
  0x30   : > { %vm705_vm4 = vsmask.f32 7440  ;;  %v2908_v10 = vor.u32 %v860_v51, %v859_v62  ;;  %v885_v11 = vrot.slane %v883_v63, 7  ;;  %v922_v13 = vshrl.u32 %v846_v8, 16  ;;  %v1003_v15 = vld [vmem:[#allocation2 + $0x18] sm:$0xf] }
  0x31   : > { %v1303_v16 = vld [vmem:[#allocation2 + $0x58] sm:$0xf]  ;;  %v911_v18 = vrot.slane %v909_v7, 7  ;;  %v912_v24 = vshll.u32 %v844_v2, 16  ;;  %v1020_v25 = vshrl.u32 %v1003_v15, 16  ;;  %665 = vrot.lane.b32.xlu1 %v644_v54, %s2664_s21  ;;  %v925_v36 = vshll.u32 %v846_v8, 16  ;;  %vm2967_vm6 = vmor %vm704_vm3, %vm705_vm4 }
  0x32   : > { %v1005_v31 = vld [vmem:[#allocation2 + $0x28] sm:$0xf]  ;;  %v2605_v34 = vld [vmem:[%s3405_s4 + $0xb8] sm:$0xff]   ;;  %1316 = vrot.lane.b32.xlu0 %v1300_v1, %s2664_s21  ;;  %v924_v35 = vrot.slane %v922_v13, 7  ;;  %v863_v47 = vsel %vm2904_vm5, %v2851_v21, %v2908_v10  ;;  %v1023_v50 = vshll.u32 %v1003_v15, 16  ;;  %v466_v54 = vadd.f32 %v2467_v60, %v442_v3  ;;  %v2607_v21 = vld [vmem:[%s3405_s4 + $0xf0] sm:$0xff]  }
  0x33   : > { %v1007_v37 = vld [vmem:[#allocation2 + $0x38] sm:$0xf]  ;;  %v643_v46 = vld [vmem:[#allocation2 + $0x48] sm:$0xf]  ;;  %v1022_v48 = vrot.slane %v1020_v25, 4  ;;  %2515 = vmatpush3.bf16.msra.mxu1 %v2605_v34  ;;  %v876_v49 = vsel %vm2904_vm5, %v2853_v22, %v2913_v17  ;;  %v2932_v1 = vor.u32 %v886_v5, %v885_v11  ;;  %v2934_v55 = vor.u32 %v899_v6, %v898_v12  ;;  %v2609_v5 = vld [vmem:[%s3405_s4 + $0xb0] sm:$0xff]  }
  0x34   : > { %v2606_v42 = vld [vmem:[%s3405_s4 + $0x58] sm:$0xff]   ;;  %v1009_v51 = vld [vmem:[#allocation2 + $0x48] sm:$0xf]  ;;  %v1034_v56 = vshrl.u32 %v1005_v31, 16  ;;  %v2939_v57 = vor.u32 %v912_v24, %v911_v18  ;;  %v1025_v58 = vrot.slane %v1023_v50, 5  ;;  %v1037_v59 = vshll.u32 %v1005_v31, 16  ;;  %2516 = vmatprep.subr.bf16.mxu1 %v2607_v21 }
  0x35   : > { %2482 = vmatprep.subr.bf16.mxu0 %v2606_v42  ;;  %v1048_v60 = vshrl.u32 %v1007_v37, 16  ;;  %v2608_v62 = vld [vmem:[%s3405_s4 + $0x18] sm:$0xff]   ;;  %1322 = vrot.lane.b32.xlu1 %v1303_v16, %s2664_s21  ;;  %v1302_v63 = vld [vmem:[#allocation2 + $0x48] sm:$0xf]  ;;  %v2946_v0 = vor.u32 %v925_v36, %v924_v35  ;;  %v1051_v3 = vshll.u32 %v1007_v37, 16  ;;  %v1062_v4 = vshrl.u32 %v1009_v51, 16 }
  0x36   : > { %663 = vrot.lane.b32.xlu0 %v643_v46, %s2664_s21  ;;  %v1036_v2 = vrot.slane %v1034_v56, 4  ;;  %v1026_v6 = vor.u32 %v1025_v58, %v1022_v48  ;;  %v1039_v7 = vrot.slane %v1037_v59, 5  ;;  %v1065_v10 = vshll.u32 %v1009_v51, 16  ;;  %v1011_v11 = vld [vmem:[#allocation2 + $0x58] sm:$0xf]  ;;  %2483 = vmatpush3.bf16.msra.mxu0 %v2608_v62  ;;  %v2610_v12 = vld [vmem:[%s3405_s4 + $0x50] sm:$0xff]  }
  0x37   : > { %v1050_v8 = vrot.slane %v1048_v60, 4  ;;  %v1053_v13 = vrot.slane %v1051_v3, 5  ;;  %v1064_v15 = vrot.slane %v1062_v4, 4  ;;  %v474_v16 = vmax.f32 %v466_v54, 0.0  ;;  %2517 = vmatpush3.bf16.msra.mxu1 %v2609_v5  ;;  %v1013_v34 = vld [vmem:[#allocation2 + $0x68] sm:$0xf]  ;;  %2484 = vmatprep.subr.bf16.mxu0 %v2610_v12 }
  0x38   : > { %v889_v18 = vsel %vm2904_vm5, %v2855_v23, %v2932_v1  ;;  %v2958_v24 = vrot.slane %v1026_v6, 4  ;;  %v1040_v25 = vor.u32 %v1039_v7, %v1036_v2  ;;  %v1067_v31 = vrot.slane %v1065_v10, 5  ;;  %v2611_v35 = vld [vmem:[%s3405_s4 + $0xe8] sm:$0xff]   ;;  %v2612_v46 = vld [vmem:[%s3405_s4 + $0x10] sm:$0xff]   ;;  %v500_v54 = vld [vmem:[#allocation2 + $0x4] sm:$0x8] }
  0x39   : > { %955 = vrot.lane.b32.xlu1 %v863_v47, %s2664_s21  ;;  %v1054_v23 = vor.u32 %v1053_v13, %v1050_v8  ;;  %v481_v37 = vpack.c.bf16 %v473_v14, %v473_v14  ;;  %v482_v40 = vpack.c.bf16 %v474_v16, %v474_v16  ;;  %v1076_v42 = vshrl.u32 %v1011_v11, 16  ;;  %2518 = vmatprep.subr.bf16.mxu1 %v2611_v35  ;;  %v501_v21 = vld [vmem:[#allocation2 + $0x8] sm:$0xf]  ;;  %v506_v59 = vld [vmem:[#allocation2 + $0x34] sm:$0x8] }
  0x3a   : > { %1320 = vrot.lane.b32.xlu0 %v1302_v63, %s2664_s21  ;;  %v902_v47 = vsel %vm2904_vm5, %v2862_v27, %v2934_v55  ;;  %v2978_v48 = vrot.slane %v1040_v25, 4  ;;  %v1068_v50 = vor.u32 %v1067_v31, %v1064_v15  ;;  %v1079_v51 = vshll.u32 %v1011_v11, 16  ;;  %2485 = vmatpush3.bf16.msra.mxu0 %v2612_v46  ;;  %v2613_v60 = vld [vmem:[%s3405_s4 + $0xa8] sm:$0xff]   ;;  %v3022_v63 = vld [vmem:[#allocation2 + $0x38] sm:$0xf] }
  0x3b   : > { %v915_v1 = vsel %vm2904_vm5, %v2864_v28, %v2939_v57  ;;  %v928_v56 = vsel %vm2904_vm5, %v2866_v29, %v2946_v0  ;;  %489 = vst.msk [vmem:[%s2817_s9 + $0x18] sm:$0xf] %vm356_vm0, %v481_v37  ;;  %498 = vst.msk [vmem:[#allocation2 + $0x78] sm:$0xf] %vm356_vm0, %v481_v37  ;;  %v1078_v27 = vrot.slane %v1076_v42, 4  ;;  %v1090_v55 = vshrl.u32 %v1013_v34, 16  ;;  %2519 = vmatpush3.bf16.msra.mxu1 %v2613_v60 }
  0x3c   : > { %490 = vst.msk [vmem:[%s2817_s9 + $0x1c] sm:$0xf] %vm356_vm0, %v482_v40  ;;  %499 = vst.msk [vmem:[#allocation2 + $0x88] sm:$0xf] %vm356_vm0, %v482_v40  ;;  %v1032_v28 = vsel %vm2967_vm6, %v2958_v24, %v2873_v32  ;;  %v3000_v29 = vrot.slane %v943_v43, 11  ;;  %v1081_v57 = vrot.slane %v1079_v51, 5  ;;  %v1046_v19 = vsel %vm2967_vm6, %v2978_v48, %v2875_v33  ;;  %2520 = vmatprep.subr.bf16.mxu1 %v2615_v26 }
  0x3d   : > { %v1093_v58 = vshll.u32 %v1013_v34, 16  ;;  %957 = vrot.lane.b32.xlu1 %v876_v49, %s2664_s21  ;;  %v3016_v32 = vrot.slane %v1054_v23, 4  ;;  %v3020_v43 = vrot.slane %v1085_v44, 5  ;;  %v1092_v62 = vrot.slane %v1090_v55, 4  ;;  %v2614_v22 = vld [vmem:[%s3405_s4 + $0x48] sm:$0xff]   ;;  %v2617_v33 = vld [vmem:[%s3405_s4 + $0xa0] sm:$0xff]  }
  0x3e   : > { %959 = vrot.lane.b32.xlu0 %v889_v18, %s2664_s21  ;;  %v3027_v17 = vrot.slane %v1068_v50, 4  ;;  %v1082_v49 = vor.u32 %v1081_v57, %v1078_v27  ;;  %v3031_v2 = vrot.slane %v1099_v45, 5  ;;  %v502_v3 = vld [vmem:[#allocation2 + $0x14] sm:$0x8]  ;;  %v3035_v20 = vrot.slane %v1113_v53, 5  ;;  %2486 = vmatprep.subr.bf16.mxu0 %v2614_v22  ;;  %v2616_v22 = vld [vmem:[%s3405_s4 + $0x8] sm:$0xff]  }
  0x3f   : > { %v1095_v0 = vrot.slane %v1093_v58, 5  ;;  %v520_v44 = vshrl.u32 %v500_v54, 16  ;;  %v525_v4 = vshrl.u32 %v501_v21, 16  ;;  %v559_v5 = vshrl.u32 %v506_v59, 16  ;;  %v503_v50 = vld [vmem:[#allocation2 + $0x18] sm:$0xf]  ;;  %2487 = vmatpush3.bf16.msra.mxu0 %v2616_v22  ;;  %2521 = vmatpush3.bf16.msra.mxu1 %v2617_v33 }
  0x40   : > { %v3037_v6 = vrot.slane %v1082_v49, 4  ;;  %v528_v8 = vshll.u32 %v501_v21, 16  ;;  %v564_v10 = vshrl.u32 %v3022_v63, 16  ;;  %v3047_v30 = vrot.slane %v1127_v41, 5  ;;  %v1166_v51 = vld [vmem:[#allocation2 + $0x34] sm:$0x8] }
  0x41   : > { %v1096_v7 = vor.u32 %v1095_v0, %v1092_v62  ;;  %961 = vrot.lane.b32.xlu1 %v902_v47, %s2664_s21  ;;  %v2346_v45 = vrot.slane %v520_v44, 11  ;;  %v527_v53 = vrot.slane %v525_v4, 7  ;;  %v567_v11 = vshll.u32 %v3022_v63, 16  ;;  %v1167_v21 = vld [vmem:[#allocation2 + $0x38] sm:$0xf] }
  0x42   : > { %963 = vrot.lane.b32.xlu0 %v915_v1, %s2664_s21  ;;  %v1060_v12 = vsel %vm2967_vm6, %v3016_v32, %v2880_v38  ;;  %v1074_v13 = vsel %vm2967_vm6, %v3027_v17, %v2882_v39  ;;  %v848_v15 = vld [vmem:[#allocation2 + $0x78] sm:$0xf]  ;;  %v2349_v16 = vrot.slane %v559_v5, 11  ;;  %v533_v61 = vshrl.u32 %v502_v3, 16  ;;  %v504_v59 = vld [vmem:[#allocation2 + $0x24] sm:$0x8] }
  0x43   : > { %v850_v14 = vld [vmem:[#allocation2 + $0x88] sm:$0xf]  ;;  %v935_v41 = vshrl.u32 %v848_v15, 16  ;;  %v938_v18 = vshll.u32 %v848_v15, 16  ;;  %v1088_v31 = vsel %vm2967_vm6, %v3037_v6, %v3020_v43  ;;  %v3062_v38 = vrot.slane %v1096_v7, 4 }
  0x44   : > { %v948_v24 = vshrl.u32 %v850_v14, 16  ;;  %v951_v25 = vshll.u32 %v850_v14, 16  ;;  %v1015_v34 = vld [vmem:[#allocation2 + $0x78] sm:$0xf]  ;;  %v1017_v35 = vld [vmem:[#allocation2 + $0x88] sm:$0xf]  ;;  %v530_v23 = vor.u32 %v528_v8, %v527_v53 }
  0x45   : > { %v566_v37 = vrot.slane %v564_v10, 7  ;;  %965 = vrot.lane.b32.xlu1 %v928_v56, %s2664_s21  ;;  %v937_v40 = vrot.slane %v935_v41, 7  ;;  %v1104_v46 = vshrl.u32 %v1015_v34, 16  ;;  %v1107_v47 = vshll.u32 %v1015_v34, 16  ;;  %v505_v4 = vld [vmem:[#allocation2 + $0x28] sm:$0xf] }
  0x46   : > { %1131 = vrot.lane.b32.xlu0 %v1032_v28, %s2664_s21  ;;  %v950_v42 = vrot.slane %v948_v24, 7  ;;  %v1102_v54 = vsel %vm2967_vm6, %v3062_v38, %v3031_v2  ;;  %v1118_v1 = vshrl.u32 %v1017_v35, 16  ;;  %v1121_v27 = vshll.u32 %v1017_v35, 16  ;;  %v510_v5 = vld [vmem:[#allocation2 + $0x54] sm:$0x8]  ;;  %v3196_v2 = vld [vmem:[%s3405_s4 + $0x118] sm:$0xff]  }
  0x47   : > { %v531_v55 = vsel %vm2904_vm5, %v2346_v45, %v530_v23  ;;  %v3072_v56 = vor.u32 %v938_v18, %v937_v40  ;;  %v1106_v57 = vrot.slane %v1104_v46, 4  ;;  %v1109_v58 = vrot.slane %v1107_v47, 5  ;;  %v645_v48 = vld [vmem:[#allocation2 + $0x68] sm:$0xf]  ;;  %v511_v10 = vld [vmem:[#allocation2 + $0x58] sm:$0xf] }
  0x48   : > { %v3074_v28 = vor.u32 %v951_v25, %v950_v42  ;;  %631 = vst.msk [vmem:[#allocation3] sm:$0xf] %vm356_vm0, %v531_v55  ;;  %v1120_v60 = vrot.slane %v1118_v1, 4  ;;  %v1123_v32 = vrot.slane %v1121_v27, 5  ;;  %v569_v62 = vor.u32 %v567_v11, %v566_v37  ;;  %v1165_v15 = vld [vmem:[#allocation2 + $0x28] sm:$0xf] }
  0x49   : > { %v2347_v63 = vrot.slane %v533_v61, 11  ;;  %1133 = vrot.lane.b32.xlu1 %v1046_v19, %s2664_s21  ;;  %v941_v49 = vsel %vm2904_vm5, %v2892_v52, %v3072_v56  ;;  %v1110_v3 = vor.u32 %v1109_v58, %v1106_v57  ;;  %v538_v44 = vshrl.u32 %v503_v50, 16  ;;  %v646_v14 = vld [vmem:[#allocation2 + $0x78] sm:$0xf]  ;;  %v1170_v24 = vld [vmem:[#allocation2 + $0x54] sm:$0x8] }
  0x4a   : > { %1135 = vrot.lane.b32.xlu0 %v1060_v12, %s2664_s21  ;;  %v954_v0 = vsel %vm2904_vm5, %v3000_v29, %v3074_v28  ;;  %v1124_v19 = vor.u32 %v1123_v32, %v1120_v60  ;;  %v570_v7 = vsel %vm2904_vm5, %v2349_v16, %v569_v62  ;;  %v541_v8 = vshll.u32 %v503_v50, 16  ;;  %v1164_v12 = vld [vmem:[#allocation2 + $0x24] sm:$0x8]  ;;  %v3116_v37 = vld [vmem:[#allocation2 + $0x58] sm:$0xf]  ;;  %v2629_v29 = vld [vmem:[%s3405_s4 + $0xc8] sm:$0xff]  }
  0x4b   : > { %v1194_v52 = vshrl.u32 %v1166_v51, 16  ;;  %v3100_v26 = vrot.slane %v1110_v3, 4  ;;  %634 = vst.msk [vmem:[#allocation3 + $0x3c] sm:$0xf] %vm356_vm0, %v570_v7  ;;  %v540_v45 = vrot.slane %v538_v44, 7  ;;  %v1199_v53 = vshrl.u32 %v1167_v21, 16 }
  0x4c   : > { %v1202_v11 = vshll.u32 %v1167_v21, 16  ;;  %v3103_v61 = vrot.slane %v1124_v19, 4  ;;  %v546_v18 = vshrl.u32 %v504_v59, 16  ;;  %v551_v16 = vshrl.u32 %v505_v4, 16  ;;  %v2618_v46 = vld [vmem:[%s3405_s4 + $0x40] sm:$0xff]   ;;  %v2619_v59 = vld [vmem:[%s3405_s4 + $0xd8] sm:$0xff]  }
  0x4d   : > { %v2363_v41 = vrot.slane %v1194_v52, 11  ;;  %1137 = vrot.lane.b32.xlu1 %v1074_v13, %s2664_s21  ;;  %v1116_v25 = vsel %vm2967_vm6, %v3100_v26, %v3035_v20  ;;  %v543_v34 = vor.u32 %v541_v8, %v540_v45  ;;  %v1201_v35 = vrot.slane %v1199_v53, 7  ;;  %v508_v13 = vld [vmem:[#allocation2 + $0x44] sm:$0x8]  ;;  %v3127_v27 = vld [vmem:[#allocation2 + $0x48] sm:$0xf]  ;;  %2488 = vmatprep.subr.bf16.mxu0 %v2618_v46 }
  0x4e   : > { %667 = vrot.lane.b32.xlu0 %v645_v48, %s2664_s21  ;;  %v554_v23 = vshll.u32 %v505_v4, 16  ;;  %v1130_v40 = vsel %vm2967_vm6, %v3103_v61, %v3047_v30  ;;  %v2348_v42 = vrot.slane %v546_v18, 11  ;;  %v553_v39 = vrot.slane %v551_v16, 7  ;;  %v688_v58 = vld [vmem:[#allocation2 + $0x8] sm:$0xf]  ;;  %v2620_v3 = vld [vmem:[%s3405_s4] sm:$0xff]   ;;  %2522 = vmatprep.subr.bf16.mxu1 %v2619_v59 }
  0x4f   : > { %v585_v17 = vshrl.u32 %v510_v5, 16  ;;  %v544_v47 = vsel %vm2904_vm5, %v2347_v63, %v543_v34  ;;  %v1204_v50 = vor.u32 %v1202_v11, %v1201_v35  ;;  %v590_v51 = vshrl.u32 %v511_v10, 16  ;;  %v689_v22 = vld [vmem:[#allocation2 + $0xc] sm:$0x1]  ;;  %v1168_v33 = vld [vmem:[#allocation2 + $0x44] sm:$0x8]  ;;  %2489 = vmatpush3.bf16.msra.mxu0 %v2620_v3 }
  0x50   : > { %v593_v1 = vshll.u32 %v511_v10, 16  ;;  %632 = vst.msk [vmem:[#allocation3 + $0x14] sm:$0xf] %vm356_vm0, %v544_v47  ;;  %v556_v55 = vor.u32 %v554_v23, %v553_v39  ;;  %v1181_v56 = vshrl.u32 %v1164_v12, 16  ;;  %v1186_v57 = vshrl.u32 %v1165_v15, 16  ;;  %v2621_v48 = vld [vmem:[%s3405_s4 + $0x98] sm:$0xff]   ;;  %2562 = vmatprep.subr.bf16.mxu0 %v3196_v2 }
  0x51   : > { %v2351_v21 = vrot.slane %v585_v17, 11  ;;  %669 = vrot.lane.b32.xlu1 %v646_v14, %s2664_s21  ;;  %v1205_v60 = vsel %vm2904_vm5, %v2363_v41, %v1204_v50  ;;  %v592_v32 = vrot.slane %v590_v51, 7  ;;  %v1189_v62 = vshll.u32 %v1165_v15, 16  ;;  %v1169_v10 = vld [vmem:[#allocation2 + $0x48] sm:$0xf]  ;;  %v2625_v45 = vld [vmem:[%s3405_s4 + $0xd0] sm:$0xff]   ;;  %2523 = vmatpush3.bf16.msra.mxu1 %v2621_v48 }
  0x52   : > { %967 = vrot.lane.b32.xlu0 %v941_v49, %s2664_s21  ;;  %v1220_v63 = vshrl.u32 %v1170_v24, 16  ;;  %1293 = vst.msk [vmem:[#allocation3 + $0x20] sm:$0xf] %vm356_vm0, %v1205_v60  ;;  %v557_v44 = vsel %vm2904_vm5, %v2348_v42, %v556_v55  ;;  %v2362_v4 = vrot.slane %v1181_v56, 11  ;;  %v1188_v5 = vrot.slane %v1186_v57, 7  ;;  %v2626_v18 = vld [vmem:[%s3405_s4 + $0x90] sm:$0xff]   ;;  %2524 = vmatprep.subr.bf16.mxu1 %v2625_v45 }
  0x53   : > { %v1225_v49 = vshrl.u32 %v3116_v37, 16  ;;  %633 = vst.msk [vmem:[#allocation3 + $0x28] sm:$0xf] %vm356_vm0, %v557_v44  ;;  %v595_v19 = vor.u32 %v593_v1, %v592_v32  ;;  %v1228_v8 = vshll.u32 %v3116_v37, 16  ;;  %v572_v52 = vshrl.u32 %v508_v13, 16  ;;  %v2630_v57 = vld [vmem:[%s3405_s4 + $0x88] sm:$0xff]  }
  0x54   : > { %v2365_v7 = vrot.slane %v1220_v63, 11  ;;  %v1304_v53 = vld [vmem:[#allocation2 + $0x68] sm:$0xf]  ;;  %v1191_v11 = vor.u32 %v1189_v62, %v1188_v5  ;;  %v577_v15 = vshrl.u32 %v3127_v27, 16  ;;  %v580_v14 = vshll.u32 %v3127_v27, 16  ;;  %v2632_v3 = vld [vmem:[%s3405_s4 + $0xc0] sm:$0xff]  }
  0x55   : > { %v1227_v12 = vrot.slane %v1225_v49, 7  ;;  %v691_v41 = vld [vmem:[#allocation2 + $0x1c] sm:$0x1]  ;;  %969 = vrot.lane.b32.xlu1 %v954_v0, %s2664_s21  ;;  %v596_v16 = vsel %vm2904_vm5, %v2351_v21, %v595_v19  ;;  %v2350_v24 = vrot.slane %v572_v52, 11  ;;  %v708_v34 = vshrl.u32 %v688_v58, 16  ;;  %2525 = vmatpush3.bf16.msra.mxu1 %v2626_v18  ;;  %v2635_v20 = vld [vmem:[%s3405_s4 + $0x80] sm:$0xff]  }
  0x56   : > { %1139 = vrot.lane.b32.xlu0 %v1088_v31, %s2664_s21  ;;  %v711_v35 = vshll.u32 %v688_v58, 16  ;;  %v690_v23 = vld [vmem:[#allocation2 + $0x18] sm:$0xf]  ;;  %v692_v37 = vld [vmem:[#allocation2 + $0x28] sm:$0xf]  ;;  %v1192_v28 = vsel %vm2904_vm5, %v2362_v4, %v1191_v11  ;;  %v579_v43 = vrot.slane %v577_v15, 7  ;;  %2526 = vmatprep.subr.bf16.mxu1 %v2629_v29 }
  0x57   : > { %636 = vst.msk [vmem:[#allocation3 + $0x64] sm:$0xf] %vm356_vm0, %v596_v16  ;;  %v1230_v0 = vor.u32 %v1228_v8, %v1227_v12  ;;  %v717_v6 = vshll.u32 %v689_v22, 16  ;;  %1292 = vst.msk [vmem:[#allocation3 + $0xc] sm:$0xf] %vm356_vm0, %v1192_v28  ;;  %v710_v31 = vrot.slane %v708_v34, 4 }
  0x58   : > { %v713_v42 = vrot.slane %v711_v35, 5  ;;  %v1207_v39 = vshrl.u32 %v1168_v33, 16  ;;  %v1212_v17 = vshrl.u32 %v1169_v10, 16  ;;  %v693_v13 = vld [vmem:[#allocation2 + $0x2c] sm:$0x1]  ;;  %v582_v50 = vor.u32 %v580_v14, %v579_v43 }
  0x59   : > { %v1305_v46 = vld [vmem:[#allocation2 + $0x78] sm:$0xf]  ;;  %v1231_v47 = vsel %vm2904_vm5, %v2365_v7, %v1230_v0  ;;  %v719_v51 = vrot.slane %v717_v6, 5  ;;  %v1215_v1 = vshll.u32 %v1169_v10, 16  ;;  %1141 = vrot.lane.b32.xlu1 %v1102_v54, %s2664_s21  ;;  %v731_v56 = vshll.u32 %v691_v41, 16  ;;  %2527 = vmatpush3.bf16.msra.mxu1 %v2630_v57 }
  0x5a   : > { %1324 = vrot.lane.b32.xlu0 %v1304_v53, %s2664_s21  ;;  %1295 = vst.msk [vmem:[#allocation3 + $0x48] sm:$0xf] %vm356_vm0, %v1231_v47  ;;  %v714_v27 = vor.u32 %v713_v42, %v710_v31  ;;  %v2364_v55 = vrot.slane %v1207_v39, 11  ;;  %v1214_v21 = vrot.slane %v1212_v17, 7  ;;  %v583_v58 = vsel %vm2904_vm5, %v2350_v24, %v582_v50  ;;  %v694_v22 = vld [vmem:[#allocation2 + $0x38] sm:$0xf]  ;;  %2528 = vmatprep.subr.bf16.mxu1 %v2632_v3 }
  0x5b   : > { %v722_v59 = vshrl.u32 %v690_v23, 16  ;;  %v725_v60 = vshll.u32 %v690_v23, 16  ;;  %v736_v32 = vshrl.u32 %v692_v37, 16  ;;  %635 = vst.msk [vmem:[#allocation3 + $0x50] sm:$0xf] %vm356_vm0, %v583_v58  ;;  %v733_v62 = vrot.slane %v731_v56, 5 }
  0x5c   : > { %v715_v38 = vrot.slane %v714_v27, 4  ;;  %v1217_v54 = vor.u32 %v1215_v1, %v1214_v21  ;;  %v739_v63 = vshll.u32 %v692_v37, 16  ;;  %v1306_v44 = vld [vmem:[#allocation2 + $0x88] sm:$0xf]  ;;  %v745_v33 = vshll.u32 %v693_v13, 16 }
  0x5d   : > { %v724_v4 = vrot.slane %v722_v59, 4  ;;  %v727_v5 = vrot.slane %v725_v60, 5  ;;  %v738_v49 = vrot.slane %v736_v32, 4  ;;  %v695_v48 = vld [vmem:[#allocation2 + $0x3c] sm:$0x1]  ;;  %1326 = vrot.lane.b32.xlu1 %v1305_v46, %s2664_s21  ;;  %v750_v52 = vshrl.u32 %v694_v22, 16  ;;  %2529 = vmatpush3.bf16.msra.mxu1 %v2635_v20 }
  0x5e   : > { %1143 = vrot.lane.b32.xlu0 %v1116_v25, %s2664_s21  ;;  %v720_v19 = vsel %vm2967_vm6, %v715_v38, %v719_v51  ;;  %v1218_v7 = vsel %vm2904_vm5, %v2364_v55, %v1217_v54  ;;  %v741_v8 = vrot.slane %v739_v63, 5  ;;  %v696_v10 = vld [vmem:[#allocation2 + $0x48] sm:$0xf]  ;;  %v697_v45 = vld [vmem:[#allocation2 + $0x4c] sm:$0x1]  ;;  %v747_v11 = vrot.slane %v745_v33, 5  ;;  %2578 = vmatprep.subr.bf16.mxu1 %v3196_v2 }
  0x5f   : > { %827 = vst.msk [vmem:[#allocation3 + $0x4] sm:$0xf] %vm356_vm0, %v720_v19  ;;  %1294 = vst.msk [vmem:[#allocation3 + $0x34] sm:$0xf] %vm356_vm0, %v1218_v7  ;;  %v728_v53 = vor.u32 %v727_v5, %v724_v4  ;;  %v753_v12 = vshll.u32 %v694_v22, 16  ;;  %v759_v15 = vshll.u32 %v695_v48, 16 }
  0x60   : > { %v742_v26 = vor.u32 %v741_v8, %v738_v49  ;;  %v752_v25 = vrot.slane %v750_v52, 4  ;;  %v764_v14 = vshrl.u32 %v696_v10, 16  ;;  %v767_v41 = vshll.u32 %v696_v10, 16  ;;  %v1307_v18 = vld [vmem:[#allocation2 + $0x98] sm:$0xf] }
  0x61   : > { %v729_v16 = vrot.slane %v728_v53, 4  ;;  %v755_v24 = vrot.slane %v753_v12, 5  ;;  %v773_v34 = vshll.u32 %v697_v45, 16  ;;  %1145 = vrot.lane.b32.xlu1 %v1130_v40, %s2664_s21  ;;  %v761_v0 = vrot.slane %v759_v15, 5  ;;  %v698_v61 = vld [vmem:[#allocation2 + $0x58] sm:$0xf] }
  0x62   : > { %1328 = vrot.lane.b32.xlu0 %v1306_v44, %s2664_s21  ;;  %v743_v35 = vrot.slane %v742_v26, 4  ;;  %v766_v23 = vrot.slane %v764_v14, 4  ;;  %v769_v37 = vrot.slane %v767_v41, 5  ;;  %v699_v31 = vld [vmem:[#allocation2 + $0x5c] sm:$0x1]  ;;  %v778_v42 = vshrl.u32 %v698_v61, 16 }
  0x63   : > { %v734_v29 = vsel %vm2967_vm6, %v729_v16, %v733_v62  ;;  %v756_v28 = vor.u32 %v755_v24, %v752_v25  ;;  %v775_v43 = vrot.slane %v773_v34, 5  ;;  %v781_v39 = vshll.u32 %v698_v61, 16  ;;  %v987_v46 = vld [vmem:[#allocation2 + $0x18] sm:$0xf]  ;;  %v988_v21 = vld [vmem:[#allocation2 + $0x28] sm:$0xf] }
  0x64   : > { %828 = vst.msk [vmem:[#allocation3 + $0x18] sm:$0xf] %vm356_vm0, %v734_v29  ;;  %v748_v6 = vsel %vm2967_vm6, %v743_v35, %v747_v11  ;;  %v770_v30 = vor.u32 %v769_v37, %v766_v23  ;;  %v787_v13 = vshll.u32 %v699_v31, 16  ;;  %v780_v50 = vrot.slane %v778_v42, 4  ;;  %995 = vst.msk [vmem:[#allocation3 + $0x8] sm:$0xf] %vm356_vm0, %v987_v46 }
  0x65   : > { %829 = vst.msk [vmem:[#allocation3 + $0x2c] sm:$0xf] %vm356_vm0, %v748_v6  ;;  %v757_v40 = vrot.slane %v756_v28, 4  ;;  %1330 = vrot.lane.b32.xlu1 %v1307_v18, %s2664_s21  ;;  %v783_v51 = vrot.slane %v781_v39, 5  ;;  %v989_v56 = vld [vmem:[#allocation2 + $0x38] sm:$0xf] }
  0x66   : > { %v771_v17 = vrot.slane %v770_v30, 4  ;;  %v789_v27 = vrot.slane %v787_v13, 5  ;;  %996 = vst.msk [vmem:[#allocation3 + $0x1c] sm:$0xf] %vm356_vm0, %v988_v21  ;;  %997 = vst.msk [vmem:[#allocation3 + $0x30] sm:$0xf] %vm356_vm0, %v989_v56 }
  0x67   : > { %v762_v47 = vsel %vm2967_vm6, %v757_v40, %v761_v0  ;;  %v784_v55 = vor.u32 %v783_v51, %v780_v50  ;;  %v990_v58 = vld [vmem:[#allocation2 + $0x48] sm:$0xf]  ;;  %v512_v59 = vld [vmem:[#allocation2 + $0x64] sm:$0x8]  ;;  %v514_v3 = vld [vmem:[#allocation2 + $0x74] sm:$0x8] }
  0x68   : > { %830 = vst.msk [vmem:[#allocation3 + $0x40] sm:$0xf] %vm356_vm0, %v762_v47  ;;  %v776_v1 = vsel %vm2967_vm6, %v771_v17, %v775_v43  ;;  %998 = vst.msk [vmem:[#allocation3 + $0x44] sm:$0xf] %vm356_vm0, %v990_v58  ;;  %v513_v60 = vld [vmem:[#allocation2 + $0x68] sm:$0xf] }
  0x69   : > { %831 = vst.msk [vmem:[#allocation3 + $0x54] sm:$0xf] %vm356_vm0, %v776_v1  ;;  %v785_v57 = vrot.slane %v784_v55, 4  ;;  %v598_v38 = vshrl.u32 %v512_v59, 16  ;;  %v603_v54 = vshrl.u32 %v513_v60, 16  ;;  %v606_v62 = vshll.u32 %v513_v60, 16 }
  0x6a   : > { %v515_v44 = vld [vmem:[#allocation2 + $0x78] sm:$0xf]  ;;  %v611_v4 = vshrl.u32 %v514_v3, 16  ;;  %v700_v5 = vld [vmem:[#allocation2 + $0x68] sm:$0xf]  ;;  %vm679_vm7 = vcmask 1043968  }
  0x6b   : > { %v790_v32 = vsel %vm2967_vm6, %v785_v57, %v789_v27  ;;  %v2352_v63 = vrot.slane %v598_v38, 11  ;;  %v605_v22 = vrot.slane %v603_v54, 7  ;;  %v616_v33 = vshrl.u32 %v515_v44, 16  ;;  %v701_v19 = vld [vmem:[#allocation2 + $0x6c] sm:$0x1] }
  0x6c   : > { %832 = vst.msk [vmem:[#allocation3 + $0x68] sm:$0xf] %vm356_vm0, %v790_v32  ;;  %v619_v48 = vshll.u32 %v515_v44, 16  ;;  %v792_v7 = vshrl.u32 %v700_v5, 16  ;;  %v2353_v8 = vrot.slane %v611_v4, 11  ;;  %v795_v52 = vshll.u32 %v700_v5, 16 }
  0x6d   : > { %v608_v49 = vor.u32 %v606_v62, %v605_v22  ;;  %v801_v10 = vshll.u32 %v701_v19, 16  ;;  %v618_v53 = vrot.slane %v616_v33, 7  ;;  %v702_v12 = vld [vmem:[#allocation2 + $0x78] sm:$0xf]  ;;  %v703_v20 = vld [vmem:[#allocation2 + $0x7c] sm:$0x1] }
  0x6e   : > { %v794_v11 = vrot.slane %v792_v7, 4  ;;  %v797_v15 = vrot.slane %v795_v52, 5  ;;  %v806_v26 = vshrl.u32 %v702_v12, 16  ;;  %v809_v25 = vshll.u32 %v702_v12, 16  ;;  %v991_v16 = vld [vmem:[#allocation2 + $0x58] sm:$0xf] }
  0x6f   : > { %v609_v45 = vsel %vm2904_vm5, %v2352_v63, %v608_v49  ;;  %v621_v14 = vor.u32 %v619_v48, %v618_v53  ;;  %v803_v41 = vrot.slane %v801_v10, 5  ;;  %v815_v18 = vshll.u32 %v703_v20, 16  ;;  %999 = vst.msk [vmem:[#allocation3 + $0x58] sm:$0xf] %vm356_vm0, %v991_v16  ;;  %v992_v23 = vld [vmem:[#allocation2 + $0x68] sm:$0xf] }
  0x70   : > { %637 = vst.msk [vmem:[#allocation3 + $0x78] sm:$0xf] %vm356_vm0, %v609_v45  ;;  %v798_v24 = vor.u32 %v797_v15, %v794_v11  ;;  %v808_v34 = vrot.slane %v806_v26, 4  ;;  %v811_v35 = vrot.slane %v809_v25, 5  ;;  %1000 = vst.msk [vmem:[#allocation3 + $0x6c] sm:$0xf] %vm356_vm0, %v992_v23 }
  0x71   : > { %v622_v37 = vsel %vm2904_vm5, %v2353_v8, %v621_v14  ;;  %v817_v29 = vrot.slane %v815_v18, 5  ;;  %v1172_v28 = vld [vmem:[#allocation2 + $0x64] sm:$0x8]  ;;  %v1173_v0 = vld [vmem:[#allocation2 + $0x68] sm:$0xf]  ;;  %vm1904_vm8 = vcmask 523264  }
  0x72   : > { %638 = vst.msk [vmem:[#allocation3 + $0x8c] sm:$0xf] %vm356_vm0, %v622_v37  ;;  %v799_v43 = vrot.slane %v798_v24, 4  ;;  %v812_v6 = vor.u32 %v811_v35, %v808_v34  ;;  %v1233_v30 = vshrl.u32 %v1172_v28, 16  ;;  %v1238_v61 = vshrl.u32 %v1173_v0, 16 }
  0x73   : > { %v1174_v40 = vld [vmem:[#allocation2 + $0x74] sm:$0x8]  ;;  %v1241_v31 = vshll.u32 %v1173_v0, 16  ;;  %v1175_v42 = vld [vmem:[#allocation2 + $0x78] sm:$0xf]  ;;  %vm2149_vm9 = vcmask 516096  }
  0x74   : > { %v1246_v39 = vshrl.u32 %v1174_v40, 16  ;;  %v993_v17 = vld [vmem:[#allocation2 + $0x78] sm:$0xf]  ;;  %v804_v13 = vsel %vm2967_vm6, %v799_v43, %v803_v41  ;;  %v813_v46 = vrot.slane %v812_v6, 4  ;;  %v2366_v47 = vrot.slane %v1233_v30, 11 }
  0x75   : > { %v1240_v50 = vrot.slane %v1238_v61, 7  ;;  %1001 = vst.msk [vmem:[#allocation3 + $0x80] sm:$0xf] %vm356_vm0, %v993_v17  ;;  %833 = vst.msk [vmem:[#allocation3 + $0x7c] sm:$0xf] %vm356_vm0, %v804_v13  ;;  %v1251_v1 = vshrl.u32 %v1175_v42, 16 }
  0x76   : > { %v2367_v51 = vrot.slane %v1246_v39, 11  ;;  %v1254_v27 = vshll.u32 %v1175_v42, 16  ;;  %v818_v55 = vsel %vm2967_vm6, %v813_v46, %v817_v29  ;;  %v994_v56 = vld [vmem:[#allocation2 + $0x88] sm:$0xf]  ;;  %v1176_v57 = vld [vmem:[#allocation2 + $0x84] sm:$0x8] }
  0x77   : > { %v1243_v21 = vor.u32 %v1241_v31, %v1240_v50  ;;  %v1177_v58 = vld [vmem:[#allocation2 + $0x88] sm:$0xf]  ;;  %834 = vst.msk [vmem:[#allocation3 + $0x90] sm:$0xf] %vm356_vm0, %v818_v55  ;;  %v1253_v59 = vrot.slane %v1251_v1, 7  ;;  %v1259_v60 = vshrl.u32 %v1176_v57, 16 }
  0x78   : > { %1002 = vst.msk [vmem:[#allocation3 + $0x94] sm:$0xf] %vm356_vm0, %v994_v56  ;;  %v1264_v32 = vshrl.u32 %v1177_v58, 16  ;;  %v1267_v38 = vshll.u32 %v1177_v58, 16  ;;  %v1178_v54 = vld [vmem:[#allocation2 + $0x94] sm:$0x8] }
  0x79   : > { %v1244_v62 = vsel %vm2904_vm5, %v2366_v47, %v1243_v21  ;;  %v1179_v63 = vld [vmem:[#allocation2 + $0x98] sm:$0xf]  ;;  %v1272_v22 = vshrl.u32 %v1178_v54, 16  ;;  %v1256_v3 = vor.u32 %v1254_v27, %v1253_v59  ;;  %v2368_v44 = vrot.slane %v1259_v60, 11  ;;  %v1348_v48 = vld [vmem:[#allocation2 + $0x28] sm:$0xf] }
  0x7a   : > { %1296 = vst.msk [vmem:[#allocation3 + $0x5c] sm:$0xf] %vm356_vm0, %v1244_v62  ;;  %v1266_v4 = vrot.slane %v1264_v32, 7  ;;  %v1277_v5 = vshrl.u32 %v1179_v63, 16  ;;  %v1280_v33 = vshll.u32 %v1179_v63, 16  ;;  %v1365_v53 = vshrl.u32 %v1348_v48, 16 }
  0x7b   : > { %v2369_v49 = vrot.slane %v1272_v22, 11  ;;  %v1349_v19 = vld [vmem:[#allocation2 + $0x2c] sm:$0x1]  ;;  %v1257_v7 = vsel %vm2904_vm5, %v2367_v51, %v1256_v3  ;;  %v1350_v10 = vld [vmem:[#allocation2 + $0x38] sm:$0xf]  ;;  %v1368_v11 = vshll.u32 %v1348_v48, 16 }
  0x7c   : > { %v1269_v8 = vor.u32 %v1267_v38, %v1266_v4  ;;  %v1279_v52 = vrot.slane %v1277_v5, 7  ;;  %v1351_v45 = vld [vmem:[#allocation2 + $0x3c] sm:$0x1]  ;;  %1297 = vst.msk [vmem:[#allocation3 + $0x70] sm:$0xf] %vm356_vm0, %v1257_v7  ;;  %v1374_v12 = vshll.u32 %v1349_v19, 16 }
  0x7d   : > { %v1379_v15 = vshrl.u32 %v1350_v10, 16  ;;  %v1382_v20 = vshll.u32 %v1350_v10, 16  ;;  %v1352_v26 = vld [vmem:[#allocation2 + $0x48] sm:$0xf]  ;;  %v1367_v41 = vrot.slane %v1365_v53, 4  ;;  %v1388_v18 = vshll.u32 %v1351_v45, 16 }
  0x7e   : > { %v1270_v25 = vsel %vm2904_vm5, %v2368_v44, %v1269_v8  ;;  %v1282_v14 = vor.u32 %v1280_v33, %v1279_v52  ;;  %v1353_v16 = vld [vmem:[#allocation2 + $0x4c] sm:$0x1]  ;;  %v1354_v24 = vld [vmem:[#allocation2 + $0x58] sm:$0xf]  ;;  %v1370_v34 = vrot.slane %v1368_v11, 5  ;;  %v1376_v35 = vrot.slane %v1374_v12, 5 }
  0x7f   : > { %1298 = vst.msk [vmem:[#allocation3 + $0x84] sm:$0xf] %vm356_vm0, %v1270_v25  ;;  %v1381_v23 = vrot.slane %v1379_v15, 4  ;;  %v1384_v37 = vrot.slane %v1382_v20, 5  ;;  %v1355_v29 = vld [vmem:[#allocation2 + $0x5c] sm:$0x1] }
  0x80   : > { %v1283_v28 = vsel %vm2904_vm5, %v2369_v49, %v1282_v14  ;;  %v1390_v0 = vrot.slane %v1388_v18, 5  ;;  %v1393_v43 = vshrl.u32 %v1352_v26, 16  ;;  %v1396_v6 = vshll.u32 %v1352_v26, 16  ;;  %v1356_v42 = vld [vmem:[#allocation2 + $0x68] sm:$0xf] }
  0x81   : > { %1299 = vst.msk [vmem:[#allocation3 + $0x98] sm:$0xf] %vm356_vm0, %v1283_v28  ;;  %v1371_v30 = vor.u32 %v1370_v34, %v1367_v41  ;;  %v1385_v61 = vor.u32 %v1384_v37, %v1381_v23  ;;  %v1402_v40 = vshll.u32 %v1353_v16, 16  ;;  %v1407_v31 = vshrl.u32 %v1354_v24, 16  ;;  %v1357_v47 = vld [vmem:[#allocation2 + $0x6c] sm:$0x1] }
  0x82   : > { %v1395_v39 = vrot.slane %v1393_v43, 4  ;;  %v1398_v17 = vrot.slane %v1396_v6, 5  ;;  %v1410_v13 = vshll.u32 %v1354_v24, 16  ;;  %v1416_v46 = vshll.u32 %v1355_v29, 16  ;;  %v1358_v27 = vld [vmem:[#allocation2 + $0x78] sm:$0xf] }
  0x83   : > { %v1372_v50 = vrot.slane %v1371_v30, 4  ;;  %v1386_v51 = vrot.slane %v1385_v61, 4  ;;  %v1404_v1 = vrot.slane %v1402_v40, 5  ;;  %v1409_v9 = vrot.slane %v1407_v31, 4  ;;  %v1359_v57 = vld [vmem:[#allocation2 + $0x7c] sm:$0x1] }
  0x84   : > { %v1399_v55 = vor.u32 %v1398_v17, %v1395_v39  ;;  %v1412_v21 = vrot.slane %v1410_v13, 5  ;;  %v1418_v56 = vrot.slane %v1416_v46, 5  ;;  %v1421_v58 = vshrl.u32 %v1356_v42, 16  ;;  %v1360_v62 = vld [vmem:[#allocation2 + $0x88] sm:$0xf] }
  0x85   : > { %v1377_v60 = vsel %vm2967_vm6, %v1372_v50, %v1376_v35  ;;  %v1391_v32 = vsel %vm2967_vm6, %v1386_v51, %v1390_v0  ;;  %v1424_v38 = vshll.u32 %v1356_v42, 16  ;;  %v1430_v54 = vshll.u32 %v1357_v47, 16  ;;  %v1361_v4 = vld [vmem:[#allocation2 + $0x8c] sm:$0x1]  ;;  %v1362_v48 = vld [vmem:[#allocation2 + $0x98] sm:$0xf] }
  0x86   : > { %v656_v59 = vpop.permute.xlu0 %655  ;;  %1484 = vst.msk [vmem:[#allocation3 + $0x10] sm:$0xf] %vm356_vm0, %v1377_v60  ;;  %1485 = vst.msk [vmem:[#allocation3 + $0x24] sm:$0xf] %vm356_vm0, %v1391_v32  ;;  %v1400_v63 = vrot.slane %v1399_v55, 4  ;;  %v1413_v22 = vor.u32 %v1412_v21, %v1409_v9  ;;  %v1423_v3 = vrot.slane %v1421_v58, 4 }
  0x87   : > { %680 = vst.msk [vmem:[#allocation3] sm:$0xf] %vm679_vm7, %v656_v59  ;;  %v1435_v44 = vshrl.u32 %v1358_v27, 16  ;;  %v1426_v5 = vrot.slane %v1424_v38, 5  ;;  %v1438_v49 = vshll.u32 %v1358_v27, 16  ;;  %v1444_v33 = vshll.u32 %v1359_v57, 16 }
  0x88   : > { %v1405_v19 = vsel %vm2967_vm6, %v1400_v63, %v1404_v1  ;;  %v1414_v7 = vrot.slane %v1413_v22, 4  ;;  %v1449_v52 = vshrl.u32 %v1360_v62, 16  ;;  %v1432_v45 = vrot.slane %v1430_v54, 5  ;;  %v1363_v11 = vld [vmem:[#allocation2 + $0x9c] sm:$0x1]  ;;  %v2641_v32 = vld [vmem:[%s3405_s4 + $0x110] sm:$0xff]  }
  0x89   : > { %v1437_v8 = vrot.slane %v1435_v44, 4  ;;  %1486 = vst.msk [vmem:[#allocation3 + $0x38] sm:$0xf] %vm356_vm0, %v1405_v19  ;;  %v1427_v10 = vor.u32 %v1426_v5, %v1423_v3  ;;  %v1440_v53 = vrot.slane %v1438_v49, 5  ;;  %v1452_v12 = vshll.u32 %v1360_v62, 16  ;;  %v2644_v63 = vld [vmem:[%s3405_s4 + $0x108] sm:$0xff]  }
  0x8a   : > { %v1419_v15 = vsel %vm2967_vm6, %v1414_v7, %v1418_v56  ;;  %v1451_v20 = vrot.slane %v1449_v52, 4  ;;  %v1458_v26 = vshll.u32 %v1361_v4, 16  ;;  %v1463_v25 = vshrl.u32 %v1362_v48, 16  ;;  %v2645_v49 = vld [vmem:[%s3405_s4 + $0x100] sm:$0xff]  }
  0x8b   : > { %1487 = vst.msk [vmem:[#allocation3 + $0x4c] sm:$0xf] %vm356_vm0, %v1419_v15  ;;  %v1428_v14 = vrot.slane %v1427_v10, 4  ;;  %v1441_v41 = vor.u32 %v1440_v53, %v1437_v8  ;;  %v1454_v18 = vrot.slane %v1452_v12, 5  ;;  %v1466_v16 = vshll.u32 %v1362_v48, 16 }
  0x8c   : > { %v1446_v24 = vrot.slane %v1444_v33, 5  ;;  %v1465_v34 = vrot.slane %v1463_v25, 4  ;;  %v1472_v35 = vshll.u32 %v1363_v11, 16  ;;  %v1460_v29 = vrot.slane %v1458_v26, 5 }
  0x8d   : > { %v1433_v23 = vsel %vm2967_vm6, %v1428_v14, %v1432_v45  ;;  %v1455_v37 = vor.u32 %v1454_v18, %v1451_v20  ;;  %v1442_v28 = vrot.slane %v1441_v41, 4  ;;  %v1468_v0 = vrot.slane %v1466_v16, 5 }
  0x8e   : > { %1488 = vst.msk [vmem:[#allocation3 + $0x60] sm:$0xf] %vm356_vm0, %v1433_v23  ;;  %v1474_v61 = vrot.slane %v1472_v35, 5 }
  0x8f   : > { %v1456_v43 = vrot.slane %v1455_v37, 4  ;;  %v1447_v6 = vsel %vm2967_vm6, %v1442_v28, %v1446_v24  ;;  %v1469_v30 = vor.u32 %v1468_v0, %v1465_v34 }
  0x90   : > { %1489 = vst.msk [vmem:[#allocation3 + $0x74] sm:$0xf] %vm356_vm0, %v1447_v6 }
  0x91   : > { %v1461_v40 = vsel %vm2967_vm6, %v1456_v43, %v1460_v29  ;;  %v1470_v31 = vrot.slane %v1469_v30, 4 }
  0x92   : > { %1490 = vst.msk [vmem:[#allocation3 + $0x88] sm:$0xf] %vm356_vm0, %v1461_v40  ;;  %v2649_v29 = vld [vmem:[#allocation3 + $0x38] ss:$20 sps:$4 sm:$0xff]  }
  0x93   : > { %v1475_v42 = vsel %vm2967_vm6, %v1470_v31, %v1474_v61 }
  0x94   : > { %1491 = vst.msk [vmem:[#allocation3 + $0x9c] sm:$0xf] %vm356_vm0, %v1475_v42 }
  0x97   : > { %v2653_v61 = vld [vmem:[#allocation3 + $0x60] ss:$20 sps:$4 sm:$0xff]  }
  0x9b   : > { %v662_v39 = vpop.permute.xlu1 %661  ;;  %v2654_v42 = vld [vmem:[#allocation3 + $0x88] ss:$20 sps:$4 sm:$0xff]  }
  0x9c   : > { %v658_v17 = vpop.permute.xlu0 %657  ;;  %683 = vst.msk [vmem:[#allocation3 + $0x3c] sm:$0xf] %vm679_vm7, %v662_v39 }
  0x9d   : > { %681 = vst.msk [vmem:[#allocation3 + $0x14] sm:$0xf] %vm679_vm7, %v658_v17 }
  0x9f   : > { %v1319_v13 = vpop.permute.xlu1 %1318 }
  0xa0   : > { %v660_v46 = vpop.permute.xlu0 %659  ;;  %1341 = vst.msk [vmem:[#allocation3 + $0x20] sm:$0xf] %vm679_vm7, %v1319_v13 }
  0xa1   : > { %682 = vst.msk [vmem:[#allocation3 + $0x28] sm:$0xf] %vm679_vm7, %v660_v46 }
  0xa3   : > { %v666_v47 = vpop.permute.xlu1 %665 }
  0xa4   : > { %v1317_v50 = vpop.permute.xlu0 %1316  ;;  %685 = vst.msk [vmem:[#allocation3 + $0x64] sm:$0xf] %vm679_vm7, %v666_v47  ;;  %v2622_v59 = vld [vmem:[#allocation3] ss:$20 sps:$4 sm:$0xff]  }
  0xa5   : > { %1340 = vst.msk [vmem:[#allocation3 + $0xc] sm:$0xf] %vm679_vm7, %v1317_v50 }
  0xa7   : > { %v1323_v36 = vpop.permute.xlu1 %1322 }
  0xa8   : > { %v664_v51 = vpop.permute.xlu0 %663  ;;  %1343 = vst.msk [vmem:[#allocation3 + $0x48] sm:$0xf] %vm679_vm7, %v1323_v36 }
  0xa9   : > { %684 = vst.msk [vmem:[#allocation3 + $0x50] sm:$0xf] %vm679_vm7, %v664_v51 }
  0xab   : > { %v956_v1 = vpop.permute.xlu1 %955 }
  0xac   : > { %v1321_v9 = vpop.permute.xlu0 %1320  ;;  %979 = vst.msk [vmem:[#allocation3 + $0x4] sm:$0xf] %vm679_vm7, %v956_v1  ;;  %v2638_v8 = vld [vmem:[#allocation3 + $0xc] ss:$20 sps:$4 sm:$0xff]  }
  0xad   : > { %1342 = vst.msk [vmem:[#allocation3 + $0x34] sm:$0xf] %vm679_vm7, %v1321_v9  ;;  %2014 = vmatprep.mubr.bf16.mxu1 %v2638_v8 }
  0xaf   : > { %v958_v27 = vpop.permute.xlu1 %957 }
  0xb0   : > { %v960_v55 = vpop.permute.xlu0 %959  ;;  %980 = vst.msk [vmem:[#allocation3 + $0x18] sm:$0xf] %vm679_vm7, %v958_v27 }
  0xb1   : > { %981 = vst.msk [vmem:[#allocation3 + $0x2c] sm:$0xf] %vm679_vm7, %v960_v55 }
  0xb3   : > { %v962_v21 = vpop.permute.xlu1 %961 }
  0xb4   : > { %v964_v56 = vpop.permute.xlu0 %963  ;;  %982 = vst.msk [vmem:[#allocation3 + $0x40] sm:$0xf] %vm679_vm7, %v962_v21  ;;  %v2639_v11 = vld [vmem:[#allocation3 + $0x34] ss:$20 sps:$4 sm:$0xff]  }
  0xb5   : > { %983 = vst.msk [vmem:[#allocation3 + $0x54] sm:$0xf] %vm679_vm7, %v964_v56 }
  0xb7   : > { %v966_v57 = vpop.permute.xlu1 %965  ;;  %v2624_v60 = vld [vmem:[#allocation3 + $0x4] ss:$20 sps:$4 sm:$0xff]  }
  0xb8   : > { %v1132_v58 = vpop.permute.xlu0 %1131  ;;  %984 = vst.msk [vmem:[#allocation3 + $0x68] sm:$0xf] %vm679_vm7, %v966_v57  ;;  %1949 = vmatprep.mubr.bf16.mxu0 %v2624_v60  ;;  %v1498_v3 = vld [vmem:[#allocation3 + $0x28] sm:$0xff] }
  0xb9   : > { %1155 = vst.msk [vmem:[#allocation3 + $0x8] sm:$0xf] %vm679_vm7, %v1132_v58  ;;  %1950 = vmatmul.mubr.bf16.vlgmr.msra.gmra.mxu0 %v2622_v59 }
  0xba   : > { %2563 = vmatpush3.bf16.msra.mxu0 %v3196_v2 }
  0xbb   : > { %v1134_v38 = vpop.permute.xlu1 %1133  ;;  %v2627_v62 = vld [vmem:[#allocation3 + $0x2c] ss:$20 sps:$4 sm:$0xff]   ;;  %2564 = vmatprep.subr.bf16.mxu0 %v2641_v32 }
  0xbc   : > { %v1136_v54 = vpop.permute.xlu0 %1135  ;;  %1156 = vst.msk [vmem:[#allocation3 + $0x1c] sm:$0xf] %vm679_vm7, %v1134_v38  ;;  %v1501_v22 = vld [vmem:[#allocation3 + $0x3c] sm:$0xff]  ;;  %1957 = vmatprep.mubr.bf16.mxu0 %v2627_v62  ;;  %v1504_v10 = vld [vmem:[#allocation3 + $0x50] sm:$0xff] }
  0xbd   : > { %1157 = vst.msk [vmem:[#allocation3 + $0x30] sm:$0xf] %vm679_vm7, %v1136_v54  ;;  %v2375_v5 = vcombine.low %v1498_v3, %v1501_v22 }
  0xbe   : > { %2565 = vmatpush3.bf16.msra.mxu0 %v2641_v32 }
  0xbf   : > { %v1138_v44 = vpop.permute.xlu1 %1137  ;;  %2566 = vmatprep.subr.bf16.mxu0 %v2644_v63  ;;  %v2633_v33 = vld [vmem:[#allocation3 + $0x54] ss:$20 sps:$4 sm:$0xff]  }
  0xc0   : > { %v668_v4 = vpop.permute.xlu0 %667  ;;  %1158 = vst.msk [vmem:[#allocation3 + $0x44] sm:$0xf] %vm679_vm7, %v1138_v44  ;;  %v1507_v52 = vld [vmem:[#allocation3 + $0x64] sm:$0xff] }
  0xc1   : > { %686 = vst.msk [vmem:[#allocation3 + $0x78] sm:$0xf] %vm679_vm7, %v668_v4  ;;  %1958 = vmatmul.mubr.bf16.gmra.mxu0 %v2375_v5  ;;  %v2380_v12 = vcombine.low %v1504_v10, %v1507_v52 }
  0xc2   : > { %1965 = vmatprep.mubr.bf16.mxu0 %v2633_v33  ;;  %2567 = vmatpush3.bf16.msra.mxu0 %v2644_v63 }
  0xc3   : > { %v670_v48 = vpop.permute.xlu1 %669  ;;  %v2636_v7 = vld [vmem:[#allocation3 + $0x8] ss:$20 sps:$4 sm:$0xff]   ;;  %2568 = vmatprep.subr.bf16.mxu0 %v2645_v49 }
  0xc4   : > { %v968_v19 = vpop.permute.xlu0 %967  ;;  %687 = vst.msk [vmem:[#allocation3 + $0x8c] sm:$0xf] %vm679_vm7, %v670_v48  ;;  %2015 = vmatmul.mubr.bf16.vlgmr.msra.gmra.mxu1 %v2636_v7  ;;  %v1499_v20 = vld [vmem:[#allocation3 + $0x30] sm:$0xff] }
  0xc5   : > { %985 = vst.msk [vmem:[#allocation3 + $0x7c] sm:$0xf] %vm679_vm7, %v968_v19  ;;  %2582 = vmatpush3.bf16.msra.mxu1 %v3196_v2  ;;  %2022 = vmatprep.mubr.bf16.mxu1 %v2639_v11  ;;  %v2648_v2 = vld [vmem:[#allocation3 + $0x10] ss:$20 sps:$4 sm:$0xff]  }
  0xc6   : > { %2569 = vmatpush3.bf16.msra.mxu0 %v2645_v49  ;;  %2579 = vmatprep.subr.bf16.mxu1 %v2641_v32 }
  0xc7   : > { %v970_v45 = vpop.permute.xlu1 %969  ;;  %v1502_v15 = vld [vmem:[#allocation3 + $0x44] sm:$0xff] }
  0xc8   : > { %v1140_v53 = vpop.permute.xlu0 %1139  ;;  %986 = vst.msk [vmem:[#allocation3 + $0x90] sm:$0xf] %vm679_vm7, %v970_v45  ;;  %v2377_v14 = vcombine.low %v1499_v20, %v1502_v15 }
  0xc9   : > { %1159 = vst.msk [vmem:[#allocation3 + $0x58] sm:$0xf] %vm679_vm7, %v1140_v53  ;;  %1966 = vmatmul.mubr.bf16.gmra.mxu0 %v2380_v12  ;;  %2583 = vmatpush3.bf16.msra.mxu1 %v2641_v32 }
  0xca   : > { %2580 = vmatprep.subr.bf16.mxu1 %v2644_v63 }
  0xcb   : > { %v1142_v26 = vpop.permute.xlu1 %1141 }
  0xcc   : > { %v1325_v25 = vpop.permute.xlu0 %1324  ;;  %1160 = vst.msk [vmem:[#allocation3 + $0x6c] sm:$0xf] %vm679_vm7, %v1142_v26  ;;  %2023 = vmatmul.mubr.bf16.gmra.mxu1 %v2377_v14  ;;  %v1510_v16 = vld [vmem:[#allocation3 + $0x78] sm:$0xff] }
  0xcd   : > { %1344 = vst.msk [vmem:[#allocation3 + $0x5c] sm:$0xf] %vm679_vm7, %v1325_v25  ;;  %2584 = vmatpush3.bf16.msra.mxu1 %v2644_v63 }
  0xce   : > { %2581 = vmatprep.subr.bf16.mxu1 %v2645_v49 }
  0xcf   : > { %v1327_v41 = vpop.permute.xlu1 %1326  ;;  %v1513_v24 = vld [vmem:[#allocation3 + $0x8c] sm:$0xff] }
  0xd0   : > { %v1144_v18 = vpop.permute.xlu0 %1143  ;;  %v2642_v34 = vld [vmem:[#allocation3 + $0x7c] ss:$20 sps:$4 sm:$0xff]   ;;  %1345 = vst.msk [vmem:[#allocation3 + $0x70] sm:$0xf] %vm679_vm7, %v1327_v41  ;;  %v2385_v35 = vcombine.low %v1510_v16, %v1513_v24 }
  0xd1   : > { %1161 = vst.msk [vmem:[#allocation3 + $0x80] sm:$0xf] %vm679_vm7, %v1144_v18  ;;  %1973 = vmatprep.mubr.bf16.mxu0 %v2642_v34  ;;  %2585 = vmatpush3.bf16.msra.mxu1 %v2645_v49 }
  0xd2   : > { %1974 = vmatmul.mubr.bf16.gmra.mxu0 %v2385_v35 }
  0xd3   : > { %v1146_v23 = vpop.permute.xlu1 %1145  ;;  %2570 = vmatprep.mubr.msk.bf16.mxu0 %vm1904_vm8, %v2648_v2 }
  0xd4   : > { %v1329_v37 = vpop.permute.xlu0 %1328  ;;  %1162 = vst.msk [vmem:[#allocation3 + $0x94] sm:$0xf] %vm679_vm7, %v1146_v23  ;;  %v1505_v0 = vld [vmem:[#allocation3 + $0x58] sm:$0xff] }
  0xd5   : > { %1346 = vst.msk [vmem:[#allocation3 + $0x84] sm:$0xf] %vm679_vm7, %v1329_v37 }
  0xd7   : > { %v1331_v28 = vpop.permute.xlu1 %1330  ;;  %v1508_v43 = vld [vmem:[#allocation3 + $0x6c] sm:$0xff] }
  0xd8   : > { %v2646_v6 = vld [vmem:[#allocation3 + $0x5c] ss:$20 sps:$4 sm:$0xff]   ;;  %1347 = vst.msk [vmem:[#allocation3 + $0x98] sm:$0xf] %vm679_vm7, %v1331_v28  ;;  %v2382_v30 = vcombine.low %v1505_v0, %v1508_v43 }
  0xd9   : > { %2030 = vmatprep.mubr.bf16.mxu1 %v2646_v6 }
  0xda   : > { %2031 = vmatmul.mubr.bf16.gmra.mxu1 %v2382_v30  ;;  %2571 = vmatmul.mubr.msk.bf16.vlgmr.msra.gmra.mxu0 %vm1904_vm8, %v2649_v29 }
  0xdb   : > { %v2652_v31 = vld [vmem:[#allocation3 + $0x80] ss:$20 sps:$4 sm:$0xff]  }
  0xdf   : > { %v2650_v40 = vld [vmem:[#allocation3 + $0x84] ss:$20 sps:$4 sm:$0xff]  }
  0xe0   : > { %2038 = vmatprep.mubr.bf16.mxu1 %v2650_v40 }
  0xe2   : > { %2039 = vmatmul.mubr.bf16.gmra.mxu1 %v2652_v31 }
  0xe3   : > { %2574 = vmatprep.mubr.msk.bf16.mxu1 %vm1904_vm8, %v2653_v61 }
  0xea   : > { %2575 = vmatmul.mubr.msk.bf16.vlgmr.msra.gmra.mxu1 %vm1904_vm8, %v2654_v42 }
 0x179   : > { %v2490_v39 = vpop.f32.mrf.mxu0 }
 0x17b   : > { %v2491_v17 = vpop.f32.mrf.mxu0 }
 0x17c   : > { %v2492_v33 = vadd.f32 %v2491_v17, %v2490_v39 }
 0x17d   : > { %v2493_v13 = vpop.f32.mrf.mxu0 }
 0x17f   : > { %v2494_v46 = vpop.f32.mrf.mxu0 }
 0x180   : > { %v2495_v15 = vadd.f32 %v2494_v46, %v2493_v13 }
 0x181   : > { %v2496_v47 = vpop.f32.mrf.mxu0 }
 0x183   : > { %v2497_v50 = vpop.f32.mrf.mxu0 }
 0x184   : > { %v2530_v51 = vpop.f32.mrf.mxu1  ;;  %v2498_v3 = vadd.f32 %v2497_v50, %v2496_v47 }
 0x185   : > { %v2499_v36 = vpop.f32.mrf.mxu0 }
 0x186   : > { %v2531_v9 = vpop.f32.mrf.mxu1 }
 0x187   : > { %v2500_v1 = vpop.f32.mrf.mxu0  ;;  %v2532_v44 = vadd.f32 %v2531_v9, %v2530_v51 }
 0x188   : > { %v2533_v55 = vpop.f32.mrf.mxu1  ;;  %v2501_v7 = vadd.f32 %v2500_v1, %v2499_v36 }
 0x189   : > { %v2502_v27 = vpop.f32.mrf.mxu0  ;;  %v2017_v45 = vadd.f32 %v2532_v44, %v2492_v33 }
 0x18a   : > { %v2534_v56 = vpop.f32.mrf.mxu1 }
 0x18b   : > { %v2503_v21 = vpop.f32.mrf.mxu0  ;;  %v2535_v52 = vadd.f32 %v2534_v56, %v2533_v55 }
 0x18c   : > { %v2536_v58 = vpop.f32.mrf.mxu1  ;;  %v2504_v17 = vadd.f32 %v2503_v21, %v2502_v27 }
 0x18d   : > { %v3346_v57 = vpop.f32.mrf.mxu0  ;;  %v2020_v18 = vadd.f32 %v2535_v52, %v2495_v15 }
 0x18e   : > { %v2537_v60 = vpop.f32.mrf.mxu1 }
 0x18f   : > { %v3348_v59 = vpop.f32.mrf.mxu0  ;;  %v2538_v62 = vadd.f32 %v2537_v60, %v2536_v58 }
 0x190   : > { %v2539_v38 = vpop.f32.mrf.mxu1  ;;  %v2507_v58 = vadd.f32 %v3348_v59, %v3346_v57 }
 0x191   : > { %v2025_v49 = vadd.f32 %v2538_v62, %v2498_v3 }
 0x192   : > { %v2508_v32 = vpop.f32.mrf.mxu0  ;;  %v2540_v63 = vpop.f32.mrf.mxu1 }
 0x193   : > { %v2541_v5 = vadd.f32 %v2540_v63, %v2539_v38 }
 0x194   : > { %v2509_v54 = vpop.f32.mrf.mxu0 }
 0x195   : > { %v2028_v12 = vadd.f32 %v2541_v5, %v2501_v7  ;;  %v2510_v30 = vadd.f32 %v2509_v54, %v2508_v32 }
 0x196   : > { %v2511_v22 = vpop.f32.mrf.mxu0 }
 0x198   : > { %v2512_v4 = vpop.f32.mrf.mxu0 }
 0x199   : > { %v2513_v60 = vadd.f32 %v2512_v4, %v2511_v22 }
 0x19a   : > { %v2542_v48 = vpop.f32.mrf.mxu1  ;;  %v2572_v19 = vpop.f32.mrf.mxu0 }
 0x19b   : > { %v2090_v8 = vadd.f32 %v2572_v19, %v2025_v49 }
 0x19c   : > { %v2543_v10 = vpop.f32.mrf.mxu1  ;;  %v2081_v53 = vpop.f32.mrf.mxu0 }
 0x19d   : > { %v2114_v11 = vpack.c.bf16 %v2090_v8, %v2090_v8  ;;  %v2082_v20 = vadd.f32 %v2081_v53, %v2017_v45  ;;  %v2544_v61 = vadd.f32 %v2543_v10, %v2542_v48  ;;  %v2153_v13 = vmul.f32 %v2090_v8, %v2090_v8 }
 0x19e   : > { %v2545_v26 = vpop.f32.mrf.mxu1  ;;  %v2573_v25 = vpop.f32.mrf.mxu0  ;;  %v2131_v1 = vsel %vm1904_vm8, %v2090_v8, 0.0 }
 0x19f   : > { %2122 = vst.msk [vmem:[%s3354_s24 + $0x8] sm:$0xf] %vm356_vm0, %v2114_v11  ;;  %v2093_v14 = vadd.f32 %v2573_v25, %v2028_v12  ;;  %v2112_v2 = vpack.c.bf16 %v2082_v20, %v2082_v20  ;;  %v2151_v28 = vmul.f32 %v2082_v20, %v2082_v20  ;;  %v2128_v40 = vsel %vm1904_vm8, %v2082_v20, 0.0 }
 0x1a0   : > { %v2546_v41 = vpop.f32.mrf.mxu1  ;;  %v2084_v16 = vpop.f32.mrf.mxu0  ;;  %v2033_v56 = vadd.f32 %v2544_v61, %v2504_v17  ;;  %v2162_v27 = vsel %vm1904_vm8, %v2153_v13, 0.0 }
 0x1a1   : > { %v2115_v24 = vpack.c.bf16 %v2093_v14, %v2093_v14  ;;  %2120 = vst.msk [vmem:[%s3354_s24] sm:$0xf] %vm356_vm0, %v2112_v2  ;;  %v2085_v34 = vadd.f32 %v2084_v16, %v2020_v18  ;;  %v2159_v46 = vsel %vm1904_vm8, %v2151_v28, 0.0  ;;  %v2547_v9 = vadd.f32 %v2546_v41, %v2545_v26 }
 0x1a2   : > { %v2548_v35 = vpop.f32.mrf.mxu1  ;;  %v2154_v21 = vmul.f32 %v2093_v14, %v2093_v14  ;;  %v2133_v63 = vsel %vm1904_vm8, %v2093_v14, 0.0 }
 0x1a3   : > { %2123 = vst.msk [vmem:[%s3354_s24 + $0xc] sm:$0xf] %vm356_vm0, %v2115_v24  ;;  %v2113_v23 = vpack.c.bf16 %v2085_v34, %v2085_v34  ;;  %v2152_v37 = vmul.f32 %v2085_v34, %v2085_v34  ;;  %v2129_v0 = vsel %vm1904_vm8, %v2085_v34, 0.0  ;;  %v2036_v59 = vadd.f32 %v2547_v9, %v2507_v58 }
 0x1a4   : > { %v2549_v29 = vpop.f32.mrf.mxu1  ;;  %v2130_v42 = vadd.f32 %v2129_v0, %v2128_v40  ;;  %v2164_v19 = vsel %vm1904_vm8, %v2154_v21, 0.0 }
 0x1a5   : > { %v2550_v43 = vadd.f32 %v2549_v29, %v2548_v35  ;;  %2121 = vst.msk [vmem:[%s3354_s24 + $0x4] sm:$0xf] %vm356_vm0, %v2113_v23  ;;  %v2160_v31 = vsel %vm1904_vm8, %v2152_v37, 0.0 }
 0x1a6   : > { %v2551_v6 = vpop.f32.mrf.mxu1  ;;  %v2161_v50 = vadd.f32 %v2160_v31, %v2159_v46  ;;  %v2132_v32 = vadd.f32 %v2131_v1, %v2130_v42 }
 0x1a7   : > { %v2041_v47 = vadd.f32 %v2550_v43, %v2510_v30 }
 0x1a8   : > { %v2552_v39 = vpop.f32.mrf.mxu1  ;;  %v2163_v3 = vadd.f32 %v2162_v27, %v2161_v50  ;;  %v2134_v22 = vadd.f32 %v2133_v63, %v2132_v32 }
 0x1a9   : > { %v2553_v36 = vadd.f32 %v2552_v39, %v2551_v6 }
 0x1aa   : > { %v2576_v51 = vpop.f32.mrf.mxu1  ;;  %v2165_v10 = vadd.f32 %v2164_v19, %v2163_v3 }
 0x1ab   : > { %v2106_v55 = vadd.f32 %v2576_v51, %v2041_v47  ;;  %v2044_v44 = vadd.f32 %v2553_v36, %v2513_v60 }
 0x1ac   : > { %v2097_v38 = vpop.f32.mrf.mxu1 }
 0x1ad   : > { %v2118_v54 = vpack.c.bf16 %v2106_v55, %v2106_v55  ;;  %v2098_v62 = vadd.f32 %v2097_v38, %v2033_v56  ;;  %v2157_v53 = vmul.f32 %v2106_v55, %v2106_v55  ;;  %v2139_v25 = vsel %vm1904_vm8, %v2106_v55, 0.0 }
 0x1ae   : > { %v2577_v5 = vpop.f32.mrf.mxu1 }
 0x1af   : > { %2126 = vst.msk [vmem:[%s3354_s24 + $0x18] sm:$0xf] %vm356_vm0, %v2118_v54  ;;  %v2116_v49 = vpack.c.bf16 %v2098_v62, %v2098_v62  ;;  %v2135_v33 = vsel %vm1904_vm8, %v2098_v62, 0.0  ;;  %v2155_v57 = vmul.f32 %v2098_v62, %v2098_v62  ;;  %v2109_v4 = vadd.f32 %v2577_v5, %v2044_v44 }
 0x1b0   : > { %v2100_v48 = vpop.f32.mrf.mxu1  ;;  %v2136_v52 = vadd.f32 %v2135_v33, %v2134_v22  ;;  %v2170_v16 = vsel %vm1904_vm8, %v2157_v53, 0.0 }
 0x1b1   : > { %2124 = vst.msk [vmem:[%s3354_s24 + $0x10] sm:$0xf] %vm356_vm0, %v2116_v49  ;;  %v2166_v7 = vsel %vm1904_vm8, %v2155_v57, 0.0  ;;  %v2101_v8 = vadd.f32 %v2100_v48, %v2036_v59  ;;  %v2119_v45 = vpack.c.bf16 %v2109_v4, %v2109_v4  ;;  %v2158_v14 = vmul.f32 %v2109_v4, %v2109_v4 }
 0x1b2   : > { %v2167_v20 = vadd.f32 %v2166_v7, %v2165_v10  ;;  %v2141_v24 = vsel %vm1904_vm8, %v2109_v4, 0.0 }
 0x1b3   : > { %v2117_v11 = vpack.c.bf16 %v2101_v8, %v2101_v8  ;;  %v2137_v12 = vsel %vm1904_vm8, %v2101_v8, 0.0  ;;  %v2156_v15 = vmul.f32 %v2101_v8, %v2101_v8  ;;  %2127 = vst.msk [vmem:[%s3354_s24 + $0x1c] sm:$0xf] %vm356_vm0, %v2119_v45  ;;  %v2172_v23 = vsel %vm1904_vm8, %v2158_v14, 0.0 }
 0x1b4   : > { %v2138_v26 = vadd.f32 %v2137_v12, %v2136_v52 }
 0x1b5   : > { %2125 = vst.msk [vmem:[%s3354_s24 + $0x14] sm:$0xf] %vm356_vm0, %v2117_v11  ;;  %v2168_v2 = vsel %vm1904_vm8, %v2156_v15, 0.0 }
 0x1b6   : > { %v2140_v41 = vadd.f32 %v2139_v25, %v2138_v26  ;;  %v2169_v18 = vadd.f32 %v2168_v2, %v2167_v20 }
 0x1b8   : > { %v2142_v34 = vadd.f32 %v2141_v24, %v2140_v41  ;;  %v2171_v35 = vadd.f32 %v2170_v16, %v2169_v18 }
 0x1ba   : > { %v2143_v37 = vrot.slane %v2142_v34, 4  ;;  %v2173_v29 = vadd.f32 %v2172_v23, %v2171_v35 }
 0x1bc   : > { %v2144_v28 = vadd.f32 %v2143_v37, %v2142_v34  ;;  %v2174_v0 = vrot.slane %v2173_v29, 4 }
 0x1be   : > { %v2145_v43 = vrot.slane %v2144_v28, 2  ;;  %v2175_v6 = vadd.f32 %v2174_v0, %v2173_v29 }
 0x1c0   : > { %v2146_v30 = vadd.f32 %v2145_v43, %v2144_v28  ;;  %v2176_v61 = vrot.slane %v2175_v6, 2 }
 0x1c2   : > { %v2147_v40 = vrot.slane %v2146_v30, 1  ;;  %v2177_v31 = vadd.f32 %v2176_v61, %v2175_v6 }
 0x1c4   : > { %v2148_v42 = vadd.f32 %v2147_v40, %v2146_v30  ;;  %v2178_v39 = vrot.slane %v2177_v31, 1 }
 0x1c6   : > { %2150 = vst.msk [vmem:[%s351_s26] sm:$0x1] %vm2149_vm9, %v2148_v42  ;;  %v2179_v17 = vadd.f32 %v2178_v39, %v2177_v31 }
 0x1c8   : > { %2180 = vst.msk [vmem:[%s354_s11] sm:$0x1] %vm2149_vm9, %v2179_v17 }
 0x1c9 PF: > { %s19_s27 = sadd.s32 1, %s2661_s27  }
 0x1ca   : > { %p16_p4 = scmp.ge.s32.totalorder %s19_s27, 4  }
 0x1cc   :  { %18 = sbr.rel (!%p16_p4) target bundleno = 1 (0x1), region = 111 }

</bundles_post_ra>
